<compile_context>
chip_gen: v7x
topology: tpu7x:2x2x1
jax: 0.10.0
libtpu: 0.0.40
codegen_flags: <defaults>
</compile_context>

<pallas_src>
import jax
import jax.numpy as jnp
from jax.experimental import pallas as pl
from jax.experimental.pallas import tpu as pltpu


# -----------------------------------------------------------------------------
# Pallas kernel: one batch tile (Bb samples -> R = Bb*N rows) per grid step.
# -----------------------------------------------------------------------------
def astgcn_submodule_kernel(
    x_ref,                                      # (R, C*T) f32, rows (b, n), cols (c, t)
    u1_ref, u2_ref, u3f_ref, be_ref, ve_ref,    # temporal attention params
    w1_ref, w2r_ref, w3f_ref, bs_ref, vs_ref,   # spatial attention params
    cheb_ref, thk_ref,                          # (K,N,N) f32, (K*C*T, Fc*T) bf16 (K-fused)
    wt_ref, btb_ref,                            # folded time_conv  (Fc*T, Ft*T) bf16, (1, Ft*T)
    wr_ref, brb_ref,                            # folded residual   (C*T,  Ft*T) bf16, (1, Ft*T)
    lnavg_ref, gamb_ref, betb_ref,              # layernorm helpers (f32)
    wf_ref, bf_ref,                             # folded final_conv (P, Ft*T) bf16, (P, 1)
    out_ref,                                    # (1, P, R)  -- lane-dense store over R
    rhs_ref,                                    # VMEM scratch (R, K*C*T) f32
):
  f32 = jnp.float32
  bf16 = jnp.bfloat16

  K, N, _ = cheb_ref.shape
  T = be_ref.shape[0]
  x_all = x_ref[...]                            # (R, C*T) f32
  R, CT = x_all.shape
  C = CT // T
  Bb = R // N

  u1 = u1_ref[...]                              # (1, N)
  u2 = u2_ref[...]                              # (C, N)
  be = be_ref[...]
  ve = ve_ref[...]
  w1 = w1_ref[...]                              # (T, 1)
  w2r = w2r_ref[...]                            # (C*T, T): row (c,t) -> W2[c,:]
  bs = bs_ref[...]
  vs = vs_ref[...]

  dn_c0 = (((0,), (0,)), ((), ()))              # contract dim 0 with dim 0
  dn_c01 = (((0,), (1,)), ((), ()))             # contract lhs dim 0 with rhs dim 1
  dn_c1 = (((1,), (1,)), ((), ()))              # contract dim 1 with dim 1

  def softmax_axis0(logits):
    # softmax over axis 0 (torch dim=1); approximate reciprocal runs on the EUP slot.
    e = jnp.exp(logits - jnp.max(logits, axis=0, keepdims=True))
    return e * pl.reciprocal(jnp.sum(e, axis=0, keepdims=True), approx=True)

  # ---- sample-invariant hoists: one fat (R x CT) matmul each instead of Bb tiny ones ----
  rhs_t_all = jnp.dot(x_all, u3f_ref[...], preferred_element_type=f32)   # (R, T)
  xw3_all = jnp.dot(x_all, w3f_ref[...], preferred_element_type=f32)     # (R, T)

  # ---- per-sample attentions + attended Chebyshev gather (bounded static unroll) ----
  for b in range(Bb):
    r0 = b * N
    xb = x_all[r0:r0 + N, :]                                             # (N, C*T)

    # temporal attention: E_norm (T,T), softmax over axis 0 (torch dim=1)
    # tmp_col[c*T+t] = sum_n U1[n] * x[b,n,c,t]  -- column form, sublane slices, no .T
    tmp_col = jax.lax.dot_general(xb, u1, dn_c01, preferred_element_type=f32)  # (C*T, 1)
    lhs_t = jnp.zeros((T, N), f32)
    for c in range(C):
      lhs_t = lhs_t + tmp_col[c * T:(c + 1) * T, :] * u2[c:c + 1, :]     # (T,1)*(1,N)
    prod_t = jnp.dot(lhs_t, rhs_t_all[r0:r0 + N, :], preferred_element_type=f32)  # (T, T)
    t_at = softmax_axis0(
        jnp.dot(ve, jax.nn.sigmoid(prod_t + be), preferred_element_type=f32))

    # spatial attention on x_TAt (never materialized): S_norm (N,N), softmax over axis 0
    rhs_s = jnp.dot(xw3_all[r0:r0 + N, :], t_at, preferred_element_type=f32)   # (N, T)
    v_col = jnp.dot(t_at, w1, preferred_element_type=f32)                      # (T, 1)
    # kron(I_C, v_col) @ W2 folded into one (C*T, T) operand -> single matmul, no C-loop
    lhs_s = jnp.dot(xb, jnp.concatenate([v_col] * C, axis=0) * w2r,
                    preferred_element_type=f32)                                # (N, T)
    prod_s = jax.lax.dot_general(lhs_s, rhs_s, dn_c1, preferred_element_type=f32)  # (N, N)
    s_at = softmax_axis0(
        jnp.dot(vs, jax.nn.sigmoid(prod_s + bs), preferred_element_type=f32))

    # attended Chebyshev gather: (cheb_k * S_at)^T @ x via a dim-0 contraction (no vxpose),
    # written straight into the scratch slab at static offsets (no concatenate).
    for k in range(K):
      part = jax.lax.dot_general(cheb_ref[k] * s_at, xb, dn_c0,
                                 preferred_element_type=f32)             # (N, C*T)
      rhs_ref[r0:r0 + N, k * CT:(k + 1) * CT] = part

  # ---- fused K-order Chebyshev filter + ReLU (bf16 MXU, f32 accumulate) ----
  sg = jnp.maximum(
      jnp.dot(rhs_ref[...].astype(bf16), thk_ref[...], preferred_element_type=f32), 0.0)

  # ---- time conv (1x3, pad 1) + residual conv (1x1) as folded matmuls + ReLU ----
  t_out = jnp.dot(sg.astype(bf16), wt_ref[...], preferred_element_type=f32) + btb_ref[...]
  r_out = jnp.dot(x_all.astype(bf16), wr_ref[...], preferred_element_type=f32) + brb_ref[...]
  z = jnp.maximum(t_out + r_out, 0.0)                                    # (R, Ft*T)

  # ---- LayerNorm over each trailing length-T block (block-averaging matmuls) ----
  mu = jnp.dot(z, lnavg_ref[...], preferred_element_type=f32)
  zc = z - mu
  var = jnp.dot(zc * zc, lnavg_ref[...], preferred_element_type=f32)
  z_ln = zc * jax.lax.rsqrt(var + 1e-5) * gamb_ref[...] + betb_ref[...]

  # ---- final conv, emitted transposed (P, R) so the store is lane-dense over R ----
  out_t = jax.lax.dot_general(wf_ref[...], z_ln.astype(bf16), dn_c1,
                              preferred_element_type=f32) + bf_ref[...]  # (P, R)
  out_ref[0] = out_t.astype(out_ref.dtype)


# -----------------------------------------------------------------------------
# Parameter construction (deterministic, synthetic) and weight folding (glue).
# -----------------------------------------------------------------------------
def build_params(key, N, C, T, K, Fc, Ft, P):
  keys = jax.random.split(key, 20)
  att = 0.1  # keep attention logits in a non-saturated regime (synthetic init)
  p = {}
  p["U1"] = att * jax.random.normal(keys[0], (N,), jnp.float32)
  p["U2"] = att * jax.random.normal(keys[1], (C, N), jnp.float32)
  p["U3"] = att * jax.random.normal(keys[2], (C,), jnp.float32)
  p["be"] = att * jax.random.normal(keys[3], (T, T), jnp.float32)
  p["Ve"] = att * jax.random.normal(keys[4], (T, T), jnp.float32)
  p["W1"] = att * jax.random.normal(keys[5], (T,), jnp.float32)
  p["W2"] = att * jax.random.normal(keys[6], (C, T), jnp.float32)
  p["W3"] = att * jax.random.normal(keys[7], (C,), jnp.float32)
  p["bs"] = att * jax.random.normal(keys[8], (N, N), jnp.float32)
  p["Vs"] = att * jax.random.normal(keys[9], (N, N), jnp.float32)

  # Chebyshev polynomials of the scaled Laplacian of a random graph
  A = jax.random.uniform(keys[10], (N, N), jnp.float32)
  A = 0.5 * (A + A.T) * (1.0 - jnp.eye(N, dtype=jnp.float32))
  L = jnp.diag(jnp.sum(A, axis=1)) - A
  lam = jnp.max(jnp.sum(jnp.abs(L), axis=1))          # Gershgorin upper bound
  Lt = 2.0 * L / lam - jnp.eye(N, dtype=jnp.float32)
  chebs = [jnp.eye(N, dtype=jnp.float32), Lt]
  for _ in range(2, K):
    chebs.append(2.0 * Lt @ chebs[-1] - chebs[-2])
  p["cheb"] = jnp.stack(chebs[:K])

  def xavier(k, shape, fan_in, fan_out):
    a = (6.0 / (fan_in + fan_out)) ** 0.5
    return jax.random.uniform(k, shape, jnp.float32, -a, a)

  p["Theta"] = xavier(keys[11], (K, C, Fc), C, Fc)
  p["Wt"] = xavier(keys[12], (Ft, Fc, 3), Fc * 3, Ft * 3)   # time_conv (1,3)
  p["bt"] = jax.random.uniform(keys[13], (Ft,), jnp.float32)
  p["Wr"] = xavier(keys[14], (Ft, C), C, Ft)                # residual_conv (1,1)
  p["br"] = jax.random.uniform(keys[15], (Ft,), jnp.float32)
  p["gamma"] = jax.random.uniform(keys[16], (Ft,), jnp.float32)
  p["beta"] = jax.random.uniform(keys[17], (Ft,), jnp.float32)
  p["Wf"] = xavier(keys[18], (P, T, Ft), T * Ft, P * Ft)    # final_conv (1,Ft)
  p["bf"] = jax.random.uniform(keys[19], (P,), jnp.float32)
  return p


def fold_params(p, N, C, T, K, Fc, Ft, P):
  """Fold conv / Theta / LayerNorm / attention weights into 2-D matmul operands."""
  # Structural constraints of the torch module (also required by the gamma tiling below).
  assert Fc == T and Ft == T, "module requires num_of_chev_filters == num_of_time_filters == T"
  f32, bf16 = jnp.float32, jnp.bfloat16
  eyeT = jnp.eye(T, dtype=f32)
  # K-fused Chebyshev Theta: rows ordered (k, c, t), columns (f_cheb, t)
  theta_kron = jnp.stack([jnp.kron(p["Theta"][k], eyeT) for k in range(K)])
  thk_fused = theta_kron.reshape(K * C * T, Fc * T).astype(bf16)
  # time conv (1x3, pad 1) as a (Fc*T, Ft*T) matrix: t_in == t_out + d - 1
  wt4 = jnp.zeros((Fc, T, Ft, T), f32)
  for d in range(3):
    sel = jnp.eye(T, k=1 - d, dtype=f32)
    wt4 = wt4 + p["Wt"][:, :, d].T[:, None, :, None] * sel[None, :, None, :]
  wt_big = wt4.reshape(Fc * T, Ft * T).astype(bf16)
  bt_big = jnp.repeat(p["bt"], T)[None, :]
  wr_big = jnp.kron(p["Wr"].T, eyeT).astype(bf16)              # (C*T, Ft*T)
  br_big = jnp.repeat(p["br"], T)[None, :]
  lnavg = jnp.kron(jnp.eye(Ft, dtype=f32),
                   jnp.ones((T, T), f32) / T)                  # block averaging
  gam_big = jnp.tile(p["gamma"], Ft)[None, :]                  # gamma indexes the T axis (Ft == T)
  bet_big = jnp.tile(p["beta"], Ft)[None, :]
  wfT = jnp.transpose(p["Wf"], (0, 2, 1)).reshape(P, Ft * T).astype(bf16)
  bf_col = p["bf"][:, None]
  u3f = jnp.kron(p["U3"][:, None], eyeT)                       # (C*T, T)
  w3f = jnp.kron(p["W3"][:, None], eyeT)                       # (C*T, T)
  w2rep = jnp.repeat(p["W2"], T, axis=0)                       # (C*T, T): row (c,t) -> W2[c,:]
  return [
      p["U1"][None, :], p["U2"], u3f, p["be"], p["Ve"],
      p["W1"][:, None], w2rep, w3f, p["bs"], p["Vs"],
      p["cheb"], thk_fused, wt_big, bt_big, wr_big, br_big,
      lnavg, gam_big, bet_big, wfT, bf_col,
  ]


def _choose_batch_block(B, N, *, max_unroll=8, max_rows=1024):
  """Pick Bb (samples per grid step) and padded batch Bp.

  Priorities: bounded static unroll (Bb <= max_unroll); lane-dense output rows
  (Bb*N % 128 == 0) when reachable without more than ~2x zero-padding work;
  G = Bp/Bb >= 2 so the 'parallel' grid axis can shard across TensorCores (v7x);
  then the fattest tile.
  """
  cands = [d for d in range(1, max_unroll + 1) if d * N <= max_rows] or [1]
  lane = [d for d in cands
          if (d * N) % 128 == 0 and (-(-B // d)) * d <= 2 * B]
  pool = lane if lane else cands

  def key(d):
    Bp = -(-B // d) * d
    G = Bp // d
    return (Bp - B,                             # least host-side padding
            0 if (d * N) % 128 == 0 else 1,     # lane-dense output store
            0 if G >= 2 else 1,                 # keep >= 2 grid steps (megacore)
            -(d * N))                           # then the fattest tile

  Bb = min(pool, key=key)
  Bp = -(-B // Bb) * Bb
  return Bb, Bp


def astgcn_submodule(x, folded, P, K, *, batch_block=None):
  B, N, C, T = x.shape
  CT = C * T
  if batch_block is None:
    Bb, Bp = _choose_batch_block(B, N)
  else:
    Bb = batch_block
    Bp = -(-B // Bb) * Bb
  G = Bp // Bb
  R = Bb * N

  # host-side layout plumbing (free): rows (b, n), columns (c, t); zero-pad batch if needed
  x2d = x.reshape(B * N, CT)
  if Bp != B:
    x2d = jnp.concatenate(
        [x2d, jnp.zeros(((Bp - B) * N, CT), x2d.dtype)], axis=0)

  # explicit VMEM budget -> vmem_limit_bytes (v5e scoped default 16 MiB; v7x physical 64 MiB)
  weight_bytes = sum(int(a.size) * a.dtype.itemsize for a in folded)
  act_cols = max(int(a.shape[-1]) for a in folded)     # widest folded operand (Ft*T)
  est = (2 * R * CT * 4                                # double-buffered x tile
         + 2 * weight_bytes                            # worst case: weights double-buffered
         + R * K * CT * 4                              # rhs scratch
         + 6 * R * act_cols * 4                        # live f32 intermediates
         + 2 * P * R * 4)                              # double-buffered output tile
  vmem_limit = int(min(64 << 20, max(32 << 20, 2 * est)))

  x_spec = pl.BlockSpec((R, CT), lambda g: (g, 0))
  out_spec = pl.BlockSpec((1, P, R), lambda g: (g, 0, 0))
  out_shape = jax.ShapeDtypeStruct((G, P, R), jnp.float32)
  scratch = [pltpu.VMEM((R, K * CT), jnp.float32)]
  cparams = pltpu.CompilerParams(
      dimension_semantics=("parallel",),       # shards batch tiles across TCs on v7x
      vmem_limit_bytes=vmem_limit)

  def _weight_spec(arr, single_buffer):
    idx = (lambda nd: (lambda g: (0,) * nd))(arr.ndim)
    if single_buffer:
      # grid-invariant weights: one VMEM buffer is enough (halves weight footprint)
      return pl.BlockSpec(arr.shape, idx, pipeline_mode=pl.Buffered(buffer_count=1))
    return pl.BlockSpec(arr.shape, idx)

  def _run(single_buffer):
    out = pl.pallas_call(
        astgcn_submodule_kernel,
        grid=(G,),
        in_specs=[x_spec] + [_weight_spec(a, single_buffer) for a in folded],
        out_specs=out_spec,
        out_shape=out_shape,
        scratch_shapes=scratch,
        compiler_params=cparams,
    )(x2d, *folded)
    return jax.block_until_ready(out)

  if hasattr(pl, "Buffered"):
    try:
      out_t = _run(True)
    except Exception:          # pipeline_mode=Buffered(1) unsupported -> default buffering
      out_t = _run(False)
  else:
    out_t = _run(False)

  # (G, P, Bb*N) -> (B, N, P)  (wrapper-side transpose of the lane-dense output)
  out = out_t.reshape(G, P, Bb, N).transpose(0, 2, 3, 1).reshape(Bp, N, P)
  return out[:B]


# -----------------------------------------------------------------------------
# Plain-JAX reference mirroring the PyTorch forward (for a correctness check).
# TODO(synk): PyTorch's lazy in-forward Parameter creation and print() calls are
# host-side behaviour with no kernel equivalent; parameters are created up front.
# -----------------------------------------------------------------------------
def reference_forward(x, p):
  B, N, C, T = x.shape
  K = p["cheb"].shape[0]
  _lhs = jnp.einsum("bnct,n->btc", x, p["U1"])
  lhs = jnp.einsum("btc,cn->btn", _lhs, p["U2"])
  rhs = jnp.einsum("c,bnct->bnt", p["U3"], x)
  prod = jnp.einsum("btn,bnu->btu", lhs, rhs)
  E = jnp.einsum("ts,bsu->btu", p["Ve"], jax.nn.sigmoid(prod + p["be"][None]))
  TA = jax.nn.softmax(E, axis=1)
  x_tat = jnp.matmul(x.reshape(B, N * C, T), TA).reshape(B, N, C, T)
  lhs_s = jnp.einsum("bnct,t->bnc", x_tat, p["W1"])
  lhs_s = jnp.einsum("bnc,ct->bnt", lhs_s, p["W2"])
  rhs_s = jnp.einsum("c,bnct->bnt", p["W3"], x_tat)
  prod_s = jnp.einsum("bnt,bmt->bnm", lhs_s, rhs_s)
  S = jnp.einsum("nm,bmq->bnq", p["Vs"], jax.nn.sigmoid(prod_s + p["bs"][None]))
  SA = jax.nn.softmax(S, axis=1)
  out = jnp.zeros((B, N, p["Theta"].shape[2], T), jnp.float32)
  for k in range(K):
    Tk_at = p["cheb"][k][None] * SA
    rhs_k = jnp.einsum("bmn,bmct->bnct", Tk_at, x)
    out = out + jnp.einsum("bnct,cf->bnft", rhs_k, p["Theta"][k])
  sg = jax.nn.relu(out)
  sgp = jnp.pad(sg, ((0, 0), (0, 0), (0, 0), (1, 1)))
  tco = sum(jnp.einsum("bnct,fc->bnft", sgp[..., d:d + T], p["Wt"][:, :, d])
            for d in range(3)) + p["bt"][None, None, :, None]
  res = jnp.einsum("bnct,fc->bnft", x, p["Wr"]) + p["br"][None, None, :, None]
  z = jax.nn.relu(tco + res)
  mu = z.mean(-1, keepdims=True)
  var = ((z - mu) ** 2).mean(-1, keepdims=True)
  zl = (z - mu) / jnp.sqrt(var + 1e-5) * p["gamma"] + p["beta"]
  return jnp.einsum("bnft,ptf->bnp", zl, p["Wf"]) + p["bf"][None, None, :]


if __name__ == "__main__":
  B, N, C, T = 8, 32, 2, 8
  K = 3
  Fc = T   # num_of_chev_filters (must equal T for final_conv's in_channels)
  Ft = T   # num_of_time_filters (must equal T for LayerNorm over trailing dim)
  P = 4    # num_for_prediction

  key = jax.random.PRNGKey(0)
  kx, kp = jax.random.split(key)
  x = jax.random.normal(kx, (B, N, C, T), jnp.float32)

  params = build_params(kp, N, C, T, K, Fc, Ft, P)
  folded = [jax.device_put(a) for a in fold_params(params, N, C, T, K, Fc, Ft, P)]

  out = jax.block_until_ready(astgcn_submodule(x, folded, P, K))

  ref = jax.block_until_ready(reference_forward(x, params))
  if not jnp.allclose(out, ref, rtol=5e-2, atol=5e-2):
    raise AssertionError(
        f"kernel mismatch vs reference, max abs err = {float(jnp.max(jnp.abs(out - ref)))}")
  print("KERNEL_OK")
</pallas_src>

<mosaic_0001>
module attributes {stable_mosaic.version = 11 : i64} {
  func.func @astgcn_submodule_kernel(%arg0: i32, %arg1: memref<128x16xf32, #tpu.memory_space<vmem>>, %arg2: memref<1x32xf32, #tpu.memory_space<vmem>>, %arg3: memref<2x32xf32, #tpu.memory_space<vmem>>, %arg4: memref<16x8xf32, #tpu.memory_space<vmem>>, %arg5: memref<8x8xf32, #tpu.memory_space<vmem>>, %arg6: memref<8x8xf32, #tpu.memory_space<vmem>>, %arg7: memref<8x1xf32, #tpu.memory_space<vmem>>, %arg8: memref<16x8xf32, #tpu.memory_space<vmem>>, %arg9: memref<16x8xf32, #tpu.memory_space<vmem>>, %arg10: memref<32x32xf32, #tpu.memory_space<vmem>>, %arg11: memref<32x32xf32, #tpu.memory_space<vmem>>, %arg12: memref<3x32x32xf32, #tpu.memory_space<vmem>>, %arg13: memref<48x64xbf16, #tpu.memory_space<vmem>>, %arg14: memref<64x64xbf16, #tpu.memory_space<vmem>>, %arg15: memref<1x64xf32, #tpu.memory_space<vmem>>, %arg16: memref<16x64xbf16, #tpu.memory_space<vmem>>, %arg17: memref<1x64xf32, #tpu.memory_space<vmem>>, %arg18: memref<64x64xf32, #tpu.memory_space<vmem>>, %arg19: memref<1x64xf32, #tpu.memory_space<vmem>>, %arg20: memref<1x64xf32, #tpu.memory_space<vmem>>, %arg21: memref<4x64xbf16, #tpu.memory_space<vmem>>, %arg22: memref<4x1xf32, #tpu.memory_space<vmem>>, %arg23: memref<1x4x128xf32, #tpu.memory_space<vmem>>, %arg24: memref<128x48xf32, #tpu.memory_space<vmem>>) attributes {dimension_semantics = [#tpu.dimension_semantics<parallel>], iteration_bounds = array<i64: 2>, scalar_prefetch = 0 : i64, scratch_operands = 1 : i64, tpu.core_type = #tpu.core_type<tc>, window_params = [{transform_indices = @transform_0, window_bounds = array<i64: 128, 16>}, {pipeline_mode = #tpu.pipeline_mode<synchronous>, transform_indices = @transform_1, window_bounds = array<i64: 1, 32>}, {pipeline_mode = #tpu.pipeline_mode<synchronous>, transform_indices = @transform_2, window_bounds = array<i64: 2, 32>}, {pipeline_mode = #tpu.pipeline_mode<synchronous>, transform_indices = @transform_3, window_bounds = array<i64: 16, 8>}, {pipeline_mode = #tpu.pipeline_mode<synchronous>, transform_indices = @transform_4, window_bounds = array<i64: 8, 8>}, {pipeline_mode = #tpu.pipeline_mode<synchronous>, transform_indices = @transform_5, window_bounds = array<i64: 8, 8>}, {pipeline_mode = #tpu.pipeline_mode<synchronous>, transform_indices = @transform_6, window_bounds = array<i64: 8, 1>}, {pipeline_mode = #tpu.pipeline_mode<synchronous>, transform_indices = @transform_7, window_bounds = array<i64: 16, 8>}, {pipeline_mode = #tpu.pipeline_mode<synchronous>, transform_indices = @transform_8, window_bounds = array<i64: 16, 8>}, {pipeline_mode = #tpu.pipeline_mode<synchronous>, transform_indices = @transform_9, window_bounds = array<i64: 32, 32>}, {pipeline_mode = #tpu.pipeline_mode<synchronous>, transform_indices = @transform_10, window_bounds = array<i64: 32, 32>}, {pipeline_mode = #tpu.pipeline_mode<synchronous>, transform_indices = @transform_11, window_bounds = array<i64: 3, 32, 32>}, {pipeline_mode = #tpu.pipeline_mode<synchronous>, transform_indices = @transform_12, window_bounds = array<i64: 48, 64>}, {pipeline_mode = #tpu.pipeline_mode<synchronous>, transform_indices = @transform_13, window_bounds = array<i64: 64, 64>}, {pipeline_mode = #tpu.pipeline_mode<synchronous>, transform_indices = @transform_14, window_bounds = array<i64: 1, 64>}, {pipeline_mode = #tpu.pipeline_mode<synchronous>, transform_indices = @transform_15, window_bounds = array<i64: 16, 64>}, {pipeline_mode = #tpu.pipeline_mode<synchronous>, transform_indices = @transform_16, window_bounds = array<i64: 1, 64>}, {pipeline_mode = #tpu.pipeline_mode<synchronous>, transform_indices = @transform_17, window_bounds = array<i64: 64, 64>}, {pipeline_mode = #tpu.pipeline_mode<synchronous>, transform_indices = @transform_18, window_bounds = array<i64: 1, 64>}, {pipeline_mode = #tpu.pipeline_mode<synchronous>, transform_indices = @transform_19, window_bounds = array<i64: 1, 64>}, {pipeline_mode = #tpu.pipeline_mode<synchronous>, transform_indices = @transform_20, window_bounds = array<i64: 4, 64>}, {pipeline_mode = #tpu.pipeline_mode<synchronous>, transform_indices = @transform_21, window_bounds = array<i64: 4, 1>}, {transform_indices = @transform_22, window_bounds = array<i64: 1, 4, 128>}]} {
    %c0 = arith.constant 0 : index
    %c0_0 = arith.constant 0 : index
    %0 = vector.load %arg1[%c0, %c0_0] : memref<128x16xf32, #tpu.memory_space<vmem>>, vector<128x16xf32>
    %c0_1 = arith.constant 0 : index
    %c0_2 = arith.constant 0 : index
    %1 = vector.load %arg2[%c0_1, %c0_2] : memref<1x32xf32, #tpu.memory_space<vmem>>, vector<1x32xf32>
    %c0_3 = arith.constant 0 : index
    %c0_4 = arith.constant 0 : index
    %2 = vector.load %arg3[%c0_3, %c0_4] : memref<2x32xf32, #tpu.memory_space<vmem>>, vector<2x32xf32>
    %c0_5 = arith.constant 0 : index
    %c0_6 = arith.constant 0 : index
    %3 = vector.load %arg5[%c0_5, %c0_6] : memref<8x8xf32, #tpu.memory_space<vmem>>, vector<8x8xf32>
    %c0_7 = arith.constant 0 : index
    %c0_8 = arith.constant 0 : index
    %4 = vector.load %arg6[%c0_7, %c0_8] : memref<8x8xf32, #tpu.memory_space<vmem>>, vector<8x8xf32>
    %c0_9 = arith.constant 0 : index
    %c0_10 = arith.constant 0 : index
    %5 = vector.load %arg7[%c0_9, %c0_10] : memref<8x1xf32, #tpu.memory_space<vmem>>, vector<8x1xf32>
    %c0_11 = arith.constant 0 : index
    %c0_12 = arith.constant 0 : index
    %6 = vector.load %arg8[%c0_11, %c0_12] : memref<16x8xf32, #tpu.memory_space<vmem>>, vector<16x8xf32>
    %c0_13 = arith.constant 0 : index
    %c0_14 = arith.constant 0 : index
    %7 = vector.load %arg10[%c0_13, %c0_14] : memref<32x32xf32, #tpu.memory_space<vmem>>, vector<32x32xf32>
    %c0_15 = arith.constant 0 : index
    %c0_16 = arith.constant 0 : index
    %8 = vector.load %arg11[%c0_15, %c0_16] : memref<32x32xf32, #tpu.memory_space<vmem>>, vector<32x32xf32>
    %c0_17 = arith.constant 0 : index
    %c0_18 = arith.constant 0 : index
    %9 = vector.load %arg4[%c0_17, %c0_18] : memref<16x8xf32, #tpu.memory_space<vmem>>, vector<16x8xf32>
    %cst = arith.constant dense<0.000000e+00> : vector<128x8xf32>
    %10 = tpu.matmul %0, %9, %cst {dimension_numbers = #tpu.dot_dimension_numbers<[1], [0], [0], [1], [0, 0, 1, 1], [], []>} : vector<128x16xf32>, vector<16x8xf32>, vector<128x8xf32> -> vector<128x8xf32>
    %c0_19 = arith.constant 0 : index
    %c0_20 = arith.constant 0 : index
    %11 = vector.load %arg9[%c0_19, %c0_20] : memref<16x8xf32, #tpu.memory_space<vmem>>, vector<16x8xf32>
    %cst_21 = arith.constant dense<0.000000e+00> : vector<128x8xf32>
    %12 = tpu.matmul %0, %11, %cst_21 {dimension_numbers = #tpu.dot_dimension_numbers<[1], [0], [0], [1], [0, 0, 1, 1], [], []>} : vector<128x16xf32>, vector<16x8xf32>, vector<128x8xf32> -> vector<128x8xf32>
    %13 = vector.extract_strided_slice %0 {offsets = [0, 0], sizes = [32, 16], strides = [1, 1]} : vector<128x16xf32> to vector<32x16xf32>
    %cst_22 = arith.constant dense<0.000000e+00> : vector<16x1xf32>
    %14 = tpu.matmul %13, %1, %cst_22 {dimension_numbers = #tpu.dot_dimension_numbers<[0], [1], [1], [0], [0, 1, 1, 0], [], []>} : vector<32x16xf32>, vector<1x32xf32>, vector<16x1xf32> -> vector<16x1xf32>
    %cst_23 = arith.constant 0.000000e+00 : f32
    %15 = vector.broadcast %cst_23 : f32 to vector<8x32xf32>
    %16 = vector.extract_strided_slice %14 {offsets = [0, 0], sizes = [8, 1], strides = [1, 1]} : vector<16x1xf32> to vector<8x1xf32>
    %17 = vector.extract_strided_slice %2 {offsets = [0, 0], sizes = [1, 32], strides = [1, 1]} : vector<2x32xf32> to vector<1x32xf32>
    %18 = vector.broadcast %16 : vector<8x1xf32> to vector<8x32xf32>
    %19 = vector.broadcast %17 : vector<1x32xf32> to vector<8x32xf32>
    %20 = arith.mulf %18, %19 : vector<8x32xf32>
    %21 = arith.addf %15, %20 : vector<8x32xf32>
    %22 = vector.extract_strided_slice %14 {offsets = [8, 0], sizes = [8, 1], strides = [1, 1]} : vector<16x1xf32> to vector<8x1xf32>
    %23 = vector.extract_strided_slice %2 {offsets = [1, 0], sizes = [1, 32], strides = [1, 1]} : vector<2x32xf32> to vector<1x32xf32>
    %24 = vector.broadcast %22 : vector<8x1xf32> to vector<8x32xf32>
    %25 = vector.broadcast %23 : vector<1x32xf32> to vector<8x32xf32>
    %26 = arith.mulf %24, %25 : vector<8x32xf32>
    %27 = arith.addf %21, %26 : vector<8x32xf32>
    %28 = vector.extract_strided_slice %10 {offsets = [0, 0], sizes = [32, 8], strides = [1, 1]} : vector<128x8xf32> to vector<32x8xf32>
    %cst_24 = arith.constant dense<0.000000e+00> : vector<8x8xf32>
    %29 = tpu.matmul %27, %28, %cst_24 {dimension_numbers = #tpu.dot_dimension_numbers<[1], [0], [0], [1], [0, 0, 1, 1], [], []>} : vector<8x32xf32>, vector<32x8xf32>, vector<8x8xf32> -> vector<8x8xf32>
    %30 = arith.addf %29, %3 : vector<8x8xf32>
    %31 = arith.negf %30 : vector<8x8xf32>
    %32 = math.exp %31 : vector<8x8xf32>
    %cst_25 = arith.constant 1.000000e+00 : f32
    %33 = vector.broadcast %cst_25 : f32 to vector<8x8xf32>
    %34 = arith.addf %33, %32 : vector<8x8xf32>
    %35 = arith.divf %33, %34 : vector<8x8xf32>
    %cst_26 = arith.constant dense<0.000000e+00> : vector<8x8xf32>
    %36 = tpu.matmul %4, %35, %cst_26 {dimension_numbers = #tpu.dot_dimension_numbers<[1], [0], [0], [1], [0, 0, 1, 1], [], []>} : vector<8x8xf32>, vector<8x8xf32>, vector<8x8xf32> -> vector<8x8xf32>
    %cst_27 = arith.constant dense<0xFF800000> : vector<8xf32>
    %37 = vector.multi_reduction <maximumf>, %36, %cst_27 [0] : vector<8x8xf32> to vector<8xf32>
    %38 = vector.shape_cast %37 : vector<8xf32> to vector<1x8xf32>
    %39 = vector.broadcast %38 : vector<1x8xf32> to vector<8x8xf32>
    %40 = arith.subf %36, %39 : vector<8x8xf32>
    %41 = math.exp %40 : vector<8x8xf32>
    %cst_28 = arith.constant dense<0.000000e+00> : vector<8xf32>
    %42 = vector.multi_reduction <add>, %41, %cst_28 [0] : vector<8x8xf32> to vector<8xf32>
    %43 = vector.shape_cast %42 : vector<8xf32> to vector<1x8xf32>
    %44 = tpu.reciprocal %43 {approx = true} : vector<1x8xf32> -> vector<1x8xf32>
    %45 = vector.broadcast %44 : vector<1x8xf32> to vector<8x8xf32>
    %46 = arith.mulf %41, %45 : vector<8x8xf32>
    %47 = vector.extract_strided_slice %12 {offsets = [0, 0], sizes = [32, 8], strides = [1, 1]} : vector<128x8xf32> to vector<32x8xf32>
    %cst_29 = arith.constant dense<0.000000e+00> : vector<32x8xf32>
    %48 = tpu.matmul %47, %46, %cst_29 {dimension_numbers = #tpu.dot_dimension_numbers<[1], [0], [0], [1], [0, 0, 1, 1], [], []>} : vector<32x8xf32>, vector<8x8xf32>, vector<32x8xf32> -> vector<32x8xf32>
    %cst_30 = arith.constant dense<0.000000e+00> : vector<8x1xf32>
    %49 = tpu.matmul %46, %5, %cst_30 {dimension_numbers = #tpu.dot_dimension_numbers<[1], [0], [0], [1], [0, 0, 1, 1], [], []>} : vector<8x8xf32>, vector<8x1xf32>, vector<8x1xf32> -> vector<8x1xf32>
    %50 = tpu.concatenate %49, %49 in 0 : vector<8x1xf32>, vector<8x1xf32> -> vector<16x1xf32>
    %51 = vector.broadcast %50 : vector<16x1xf32> to vector<16x8xf32>
    %52 = arith.mulf %51, %6 : vector<16x8xf32>
    %cst_31 = arith.constant dense<0.000000e+00> : vector<32x8xf32>
    %53 = tpu.matmul %13, %52, %cst_31 {dimension_numbers = #tpu.dot_dimension_numbers<[1], [0], [0], [1], [0, 0, 1, 1], [], []>} : vector<32x16xf32>, vector<16x8xf32>, vector<32x8xf32> -> vector<32x8xf32>
    %cst_32 = arith.constant dense<0.000000e+00> : vector<32x32xf32>
    %54 = tpu.matmul %53, %48, %cst_32 {dimension_numbers = #tpu.dot_dimension_numbers<[1], [1], [0], [0], [0, 0, 1, 0], [], []>} : vector<32x8xf32>, vector<32x8xf32>, vector<32x32xf32> -> vector<32x32xf32>
    %55 = arith.addf %54, %7 : vector<32x32xf32>
    %56 = arith.negf %55 : vector<32x32xf32>
    %57 = math.exp %56 : vector<32x32xf32>
    %cst_33 = arith.constant 1.000000e+00 : f32
    %58 = vector.broadcast %cst_33 : f32 to vector<32x32xf32>
    %59 = arith.addf %58, %57 : vector<32x32xf32>
    %60 = arith.divf %58, %59 : vector<32x32xf32>
    %cst_34 = arith.constant dense<0.000000e+00> : vector<32x32xf32>
    %61 = tpu.matmul %8, %60, %cst_34 {dimension_numbers = #tpu.dot_dimension_numbers<[1], [0], [0], [1], [0, 0, 1, 1], [], []>} : vector<32x32xf32>, vector<32x32xf32>, vector<32x32xf32> -> vector<32x32xf32>
    %cst_35 = arith.constant dense<0xFF800000> : vector<32xf32>
    %62 = vector.multi_reduction <maximumf>, %61, %cst_35 [0] : vector<32x32xf32> to vector<32xf32>
    %63 = vector.shape_cast %62 : vector<32xf32> to vector<1x32xf32>
    %64 = vector.broadcast %63 : vector<1x32xf32> to vector<32x32xf32>
    %65 = arith.subf %61, %64 : vector<32x32xf32>
    %66 = math.exp %65 : vector<32x32xf32>
    %cst_36 = arith.constant dense<0.000000e+00> : vector<32xf32>
    %67 = vector.multi_reduction <add>, %66, %cst_36 [0] : vector<32x32xf32> to vector<32xf32>
    %68 = vector.shape_cast %67 : vector<32xf32> to vector<1x32xf32>
    %69 = tpu.reciprocal %68 {approx = true} : vector<1x32xf32> -> vector<1x32xf32>
    %70 = vector.broadcast %69 : vector<1x32xf32> to vector<32x32xf32>
    %71 = arith.mulf %66, %70 : vector<32x32xf32>
    %c0_37 = arith.constant 0 : index
    %c0_38 = arith.constant 0 : index
    %c0_39 = arith.constant 0 : index
    %72 = vector.load %arg12[%c0_37, %c0_38, %c0_39] : memref<3x32x32xf32, #tpu.memory_space<vmem>>, vector<1x32x32xf32>
    %73 = vector.shape_cast %72 : vector<1x32x32xf32> to vector<32x32xf32>
    %74 = arith.mulf %73, %71 : vector<32x32xf32>
    %cst_40 = arith.constant dense<0.000000e+00> : vector<32x16xf32>
    %75 = tpu.matmul %74, %13, %cst_40 {dimension_numbers = #tpu.dot_dimension_numbers<[0], [0], [1], [1], [0, 1, 1, 1], [], []>} : vector<32x32xf32>, vector<32x16xf32>, vector<32x16xf32> -> vector<32x16xf32>
    %c0_41 = arith.constant 0 : index
    %c0_42 = arith.constant 0 : index
    %76 = vector.load %arg24[%c0_41, %c0_42] : memref<128x48xf32, #tpu.memory_space<vmem>>, vector<32x16xf32>
    tpu.vector_store %arg24[%c0_41, %c0_42], %75 {strides = array<i32>} : memref<128x48xf32, #tpu.memory_space<vmem>>, vector<32x16xf32>,
    %c1 = arith.constant 1 : index
    %c0_43 = arith.constant 0 : index
    %c0_44 = arith.constant 0 : index
    %77 = vector.load %arg12[%c1, %c0_43, %c0_44] : memref<3x32x32xf32, #tpu.memory_space<vmem>>, vector<1x32x32xf32>
    %78 = vector.shape_cast %77 : vector<1x32x32xf32> to vector<32x32xf32>
    %79 = arith.mulf %78, %71 : vector<32x32xf32>
    %cst_45 = arith.constant dense<0.000000e+00> : vector<32x16xf32>
    %80 = tpu.matmul %79, %13, %cst_45 {dimension_numbers = #tpu.dot_dimension_numbers<[0], [0], [1], [1], [0, 1, 1, 1], [], []>} : vector<32x32xf32>, vector<32x16xf32>, vector<32x16xf32> -> vector<32x16xf32>
    %c0_46 = arith.constant 0 : index
    %c16 = arith.constant 16 : index
    %81 = vector.load %arg24[%c0_46, %c16] : memref<128x48xf32, #tpu.memory_space<vmem>>, vector<32x16xf32>
    tpu.vector_store %arg24[%c0_46, %c16], %80 {strides = array<i32>} : memref<128x48xf32, #tpu.memory_space<vmem>>, vector<32x16xf32>,
    %c2 = arith.constant 2 : index
    %c0_47 = arith.constant 0 : index
    %c0_48 = arith.constant 0 : index
    %82 = vector.load %arg12[%c2, %c0_47, %c0_48] : memref<3x32x32xf32, #tpu.memory_space<vmem>>, vector<1x32x32xf32>
    %83 = vector.shape_cast %82 : vector<1x32x32xf32> to vector<32x32xf32>
    %84 = arith.mulf %83, %71 : vector<32x32xf32>
    %cst_49 = arith.constant dense<0.000000e+00> : vector<32x16xf32>
    %85 = tpu.matmul %84, %13, %cst_49 {dimension_numbers = #tpu.dot_dimension_numbers<[0], [0], [1], [1], [0, 1, 1, 1], [], []>} : vector<32x32xf32>, vector<32x16xf32>, vector<32x16xf32> -> vector<32x16xf32>
    %c0_50 = arith.constant 0 : index
    %c32 = arith.constant 32 : index
    %86 = vector.load %arg24[%c0_50, %c32] : memref<128x48xf32, #tpu.memory_space<vmem>>, vector<32x16xf32>
    tpu.vector_store %arg24[%c0_50, %c32], %85 {strides = array<i32>} : memref<128x48xf32, #tpu.memory_space<vmem>>, vector<32x16xf32>,
    %87 = vector.extract_strided_slice %0 {offsets = [32, 0], sizes = [32, 16], strides = [1, 1]} : vector<128x16xf32> to vector<32x16xf32>
    %cst_51 = arith.constant dense<0.000000e+00> : vector<16x1xf32>
    %88 = tpu.matmul %87, %1, %cst_51 {dimension_numbers = #tpu.dot_dimension_numbers<[0], [1], [1], [0], [0, 1, 1, 0], [], []>} : vector<32x16xf32>, vector<1x32xf32>, vector<16x1xf32> -> vector<16x1xf32>
    %cst_52 = arith.constant 0.000000e+00 : f32
    %89 = vector.broadcast %cst_52 : f32 to vector<8x32xf32>
    %90 = vector.extract_strided_slice %88 {offsets = [0, 0], sizes = [8, 1], strides = [1, 1]} : vector<16x1xf32> to vector<8x1xf32>
    %91 = vector.extract_strided_slice %2 {offsets = [0, 0], sizes = [1, 32], strides = [1, 1]} : vector<2x32xf32> to vector<1x32xf32>
    %92 = vector.broadcast %90 : vector<8x1xf32> to vector<8x32xf32>
    %93 = vector.broadcast %91 : vector<1x32xf32> to vector<8x32xf32>
    %94 = arith.mulf %92, %93 : vector<8x32xf32>
    %95 = arith.addf %89, %94 : vector<8x32xf32>
    %96 = vector.extract_strided_slice %88 {offsets = [8, 0], sizes = [8, 1], strides = [1, 1]} : vector<16x1xf32> to vector<8x1xf32>
    %97 = vector.extract_strided_slice %2 {offsets = [1, 0], sizes = [1, 32], strides = [1, 1]} : vector<2x32xf32> to vector<1x32xf32>
    %98 = vector.broadcast %96 : vector<8x1xf32> to vector<8x32xf32>
    %99 = vector.broadcast %97 : vector<1x32xf32> to vector<8x32xf32>
    %100 = arith.mulf %98, %99 : vector<8x32xf32>
    %101 = arith.addf %95, %100 : vector<8x32xf32>
    %102 = vector.extract_strided_slice %10 {offsets = [32, 0], sizes = [32, 8], strides = [1, 1]} : vector<128x8xf32> to vector<32x8xf32>
    %cst_53 = arith.constant dense<0.000000e+00> : vector<8x8xf32>
    %103 = tpu.matmul %101, %102, %cst_53 {dimension_numbers = #tpu.dot_dimension_numbers<[1], [0], [0], [1], [0, 0, 1, 1], [], []>} : vector<8x32xf32>, vector<32x8xf32>, vector<8x8xf32> -> vector<8x8xf32>
    %104 = arith.addf %103, %3 : vector<8x8xf32>
    %105 = arith.negf %104 : vector<8x8xf32>
    %106 = math.exp %105 : vector<8x8xf32>
    %cst_54 = arith.constant 1.000000e+00 : f32
    %107 = vector.broadcast %cst_54 : f32 to vector<8x8xf32>
    %108 = arith.addf %107, %106 : vector<8x8xf32>
    %109 = arith.divf %107, %108 : vector<8x8xf32>
    %cst_55 = arith.constant dense<0.000000e+00> : vector<8x8xf32>
    %110 = tpu.matmul %4, %109, %cst_55 {dimension_numbers = #tpu.dot_dimension_numbers<[1], [0], [0], [1], [0, 0, 1, 1], [], []>} : vector<8x8xf32>, vector<8x8xf32>, vector<8x8xf32> -> vector<8x8xf32>
    %cst_56 = arith.constant dense<0xFF800000> : vector<8xf32>
    %111 = vector.multi_reduction <maximumf>, %110, %cst_56 [0] : vector<8x8xf32> to vector<8xf32>
    %112 = vector.shape_cast %111 : vector<8xf32> to vector<1x8xf32>
    %113 = vector.broadcast %112 : vector<1x8xf32> to vector<8x8xf32>
    %114 = arith.subf %110, %113 : vector<8x8xf32>
    %115 = math.exp %114 : vector<8x8xf32>
    %cst_57 = arith.constant dense<0.000000e+00> : vector<8xf32>
    %116 = vector.multi_reduction <add>, %115, %cst_57 [0] : vector<8x8xf32> to vector<8xf32>
    %117 = vector.shape_cast %116 : vector<8xf32> to vector<1x8xf32>
    %118 = tpu.reciprocal %117 {approx = true} : vector<1x8xf32> -> vector<1x8xf32>
    %119 = vector.broadcast %118 : vector<1x8xf32> to vector<8x8xf32>
    %120 = arith.mulf %115, %119 : vector<8x8xf32>
    %121 = vector.extract_strided_slice %12 {offsets = [32, 0], sizes = [32, 8], strides = [1, 1]} : vector<128x8xf32> to vector<32x8xf32>
    %cst_58 = arith.constant dense<0.000000e+00> : vector<32x8xf32>
    %122 = tpu.matmul %121, %120, %cst_58 {dimension_numbers = #tpu.dot_dimension_numbers<[1], [0], [0], [1], [0, 0, 1, 1], [], []>} : vector<32x8xf32>, vector<8x8xf32>, vector<32x8xf32> -> vector<32x8xf32>
    %cst_59 = arith.constant dense<0.000000e+00> : vector<8x1xf32>
    %123 = tpu.matmul %120, %5, %cst_59 {dimension_numbers = #tpu.dot_dimension_numbers<[1], [0], [0], [1], [0, 0, 1, 1], [], []>} : vector<8x8xf32>, vector<8x1xf32>, vector<8x1xf32> -> vector<8x1xf32>
    %124 = tpu.concatenate %123, %123 in 0 : vector<8x1xf32>, vector<8x1xf32> -> vector<16x1xf32>
    %125 = vector.broadcast %124 : vector<16x1xf32> to vector<16x8xf32>
    %126 = arith.mulf %125, %6 : vector<16x8xf32>
    %cst_60 = arith.constant dense<0.000000e+00> : vector<32x8xf32>
    %127 = tpu.matmul %87, %126, %cst_60 {dimension_numbers = #tpu.dot_dimension_numbers<[1], [0], [0], [1], [0, 0, 1, 1], [], []>} : vector<32x16xf32>, vector<16x8xf32>, vector<32x8xf32> -> vector<32x8xf32>
    %cst_61 = arith.constant dense<0.000000e+00> : vector<32x32xf32>
    %128 = tpu.matmul %127, %122, %cst_61 {dimension_numbers = #tpu.dot_dimension_numbers<[1], [1], [0], [0], [0, 0, 1, 0], [], []>} : vector<32x8xf32>, vector<32x8xf32>, vector<32x32xf32> -> vector<32x32xf32>
    %129 = arith.addf %128, %7 : vector<32x32xf32>
    %130 = arith.negf %129 : vector<32x32xf32>
    %131 = math.exp %130 : vector<32x32xf32>
    %cst_62 = arith.constant 1.000000e+00 : f32
    %132 = vector.broadcast %cst_62 : f32 to vector<32x32xf32>
    %133 = arith.addf %132, %131 : vector<32x32xf32>
    %134 = arith.divf %132, %133 : vector<32x32xf32>
    %cst_63 = arith.constant dense<0.000000e+00> : vector<32x32xf32>
    %135 = tpu.matmul %8, %134, %cst_63 {dimension_numbers = #tpu.dot_dimension_numbers<[1], [0], [0], [1], [0, 0, 1, 1], [], []>} : vector<32x32xf32>, vector<32x32xf32>, vector<32x32xf32> -> vector<32x32xf32>
    %cst_64 = arith.constant dense<0xFF800000> : vector<32xf32>
    %136 = vector.multi_reduction <maximumf>, %135, %cst_64 [0] : vector<32x32xf32> to vector<32xf32>
    %137 = vector.shape_cast %136 : vector<32xf32> to vector<1x32xf32>
    %138 = vector.broadcast %137 : vector<1x32xf32> to vector<32x32xf32>
    %139 = arith.subf %135, %138 : vector<32x32xf32>
    %140 = math.exp %139 : vector<32x32xf32>
    %cst_65 = arith.constant dense<0.000000e+00> : vector<32xf32>
    %141 = vector.multi_reduction <add>, %140, %cst_65 [0] : vector<32x32xf32> to vector<32xf32>
    %142 = vector.shape_cast %141 : vector<32xf32> to vector<1x32xf32>
    %143 = tpu.reciprocal %142 {approx = true} : vector<1x32xf32> -> vector<1x32xf32>
    %144 = vector.broadcast %143 : vector<1x32xf32> to vector<32x32xf32>
    %145 = arith.mulf %140, %144 : vector<32x32xf32>
    %c0_66 = arith.constant 0 : index
    %c0_67 = arith.constant 0 : index
    %c0_68 = arith.constant 0 : index
    %146 = vector.load %arg12[%c0_66, %c0_67, %c0_68] : memref<3x32x32xf32, #tpu.memory_space<vmem>>, vector<1x32x32xf32>
    %147 = vector.shape_cast %146 : vector<1x32x32xf32> to vector<32x32xf32>
    %148 = arith.mulf %147, %145 : vector<32x32xf32>
    %cst_69 = arith.constant dense<0.000000e+00> : vector<32x16xf32>
    %149 = tpu.matmul %148, %87, %cst_69 {dimension_numbers = #tpu.dot_dimension_numbers<[0], [0], [1], [1], [0, 1, 1, 1], [], []>} : vector<32x32xf32>, vector<32x16xf32>, vector<32x16xf32> -> vector<32x16xf32>
    %c32_70 = arith.constant 32 : index
    %c0_71 = arith.constant 0 : index
    %150 = vector.load %arg24[%c32_70, %c0_71] : memref<128x48xf32, #tpu.memory_space<vmem>>, vector<32x16xf32>
    tpu.vector_store %arg24[%c32_70, %c0_71], %149 {strides = array<i32>} : memref<128x48xf32, #tpu.memory_space<vmem>>, vector<32x16xf32>,
    %c1_72 = arith.constant 1 : index
    %c0_73 = arith.constant 0 : index
    %c0_74 = arith.constant 0 : index
    %151 = vector.load %arg12[%c1_72, %c0_73, %c0_74] : memref<3x32x32xf32, #tpu.memory_space<vmem>>, vector<1x32x32xf32>
    %152 = vector.shape_cast %151 : vector<1x32x32xf32> to vector<32x32xf32>
    %153 = arith.mulf %152, %145 : vector<32x32xf32>
    %cst_75 = arith.constant dense<0.000000e+00> : vector<32x16xf32>
    %154 = tpu.matmul %153, %87, %cst_75 {dimension_numbers = #tpu.dot_dimension_numbers<[0], [0], [1], [1], [0, 1, 1, 1], [], []>} : vector<32x32xf32>, vector<32x16xf32>, vector<32x16xf32> -> vector<32x16xf32>
    %c32_76 = arith.constant 32 : index
    %c16_77 = arith.constant 16 : index
    %155 = vector.load %arg24[%c32_76, %c16_77] : memref<128x48xf32, #tpu.memory_space<vmem>>, vector<32x16xf32>
    tpu.vector_store %arg24[%c32_76, %c16_77], %154 {strides = array<i32>} : memref<128x48xf32, #tpu.memory_space<vmem>>, vector<32x16xf32>,
    %c2_78 = arith.constant 2 : index
    %c0_79 = arith.constant 0 : index
    %c0_80 = arith.constant 0 : index
    %156 = vector.load %arg12[%c2_78, %c0_79, %c0_80] : memref<3x32x32xf32, #tpu.memory_space<vmem>>, vector<1x32x32xf32>
    %157 = vector.shape_cast %156 : vector<1x32x32xf32> to vector<32x32xf32>
    %158 = arith.mulf %157, %145 : vector<32x32xf32>
    %cst_81 = arith.constant dense<0.000000e+00> : vector<32x16xf32>
    %159 = tpu.matmul %158, %87, %cst_81 {dimension_numbers = #tpu.dot_dimension_numbers<[0], [0], [1], [1], [0, 1, 1, 1], [], []>} : vector<32x32xf32>, vector<32x16xf32>, vector<32x16xf32> -> vector<32x16xf32>
    %c32_82 = arith.constant 32 : index
    %c32_83 = arith.constant 32 : index
    %160 = vector.load %arg24[%c32_82, %c32_83] : memref<128x48xf32, #tpu.memory_space<vmem>>, vector<32x16xf32>
    tpu.vector_store %arg24[%c32_82, %c32_83], %159 {strides = array<i32>} : memref<128x48xf32, #tpu.memory_space<vmem>>, vector<32x16xf32>,
    %161 = vector.extract_strided_slice %0 {offsets = [64, 0], sizes = [32, 16], strides = [1, 1]} : vector<128x16xf32> to vector<32x16xf32>
    %cst_84 = arith.constant dense<0.000000e+00> : vector<16x1xf32>
    %162 = tpu.matmul %161, %1, %cst_84 {dimension_numbers = #tpu.dot_dimension_numbers<[0], [1], [1], [0], [0, 1, 1, 0], [], []>} : vector<32x16xf32>, vector<1x32xf32>, vector<16x1xf32> -> vector<16x1xf32>
    %cst_85 = arith.constant 0.000000e+00 : f32
    %163 = vector.broadcast %cst_85 : f32 to vector<8x32xf32>
    %164 = vector.extract_strided_slice %162 {offsets = [0, 0], sizes = [8, 1], strides = [1, 1]} : vector<16x1xf32> to vector<8x1xf32>
    %165 = vector.extract_strided_slice %2 {offsets = [0, 0], sizes = [1, 32], strides = [1, 1]} : vector<2x32xf32> to vector<1x32xf32>
    %166 = vector.broadcast %164 : vector<8x1xf32> to vector<8x32xf32>
    %167 = vector.broadcast %165 : vector<1x32xf32> to vector<8x32xf32>
    %168 = arith.mulf %166, %167 : vector<8x32xf32>
    %169 = arith.addf %163, %168 : vector<8x32xf32>
    %170 = vector.extract_strided_slice %162 {offsets = [8, 0], sizes = [8, 1], strides = [1, 1]} : vector<16x1xf32> to vector<8x1xf32>
    %171 = vector.extract_strided_slice %2 {offsets = [1, 0], sizes = [1, 32], strides = [1, 1]} : vector<2x32xf32> to vector<1x32xf32>
    %172 = vector.broadcast %170 : vector<8x1xf32> to vector<8x32xf32>
    %173 = vector.broadcast %171 : vector<1x32xf32> to vector<8x32xf32>
    %174 = arith.mulf %172, %173 : vector<8x32xf32>
    %175 = arith.addf %169, %174 : vector<8x32xf32>
    %176 = vector.extract_strided_slice %10 {offsets = [64, 0], sizes = [32, 8], strides = [1, 1]} : vector<128x8xf32> to vector<32x8xf32>
    %cst_86 = arith.constant dense<0.000000e+00> : vector<8x8xf32>
    %177 = tpu.matmul %175, %176, %cst_86 {dimension_numbers = #tpu.dot_dimension_numbers<[1], [0], [0], [1], [0, 0, 1, 1], [], []>} : vector<8x32xf32>, vector<32x8xf32>, vector<8x8xf32> -> vector<8x8xf32>
    %178 = arith.addf %177, %3 : vector<8x8xf32>
    %179 = arith.negf %178 : vector<8x8xf32>
    %180 = math.exp %179 : vector<8x8xf32>
    %cst_87 = arith.constant 1.000000e+00 : f32
    %181 = vector.broadcast %cst_87 : f32 to vector<8x8xf32>
    %182 = arith.addf %181, %180 : vector<8x8xf32>
    %183 = arith.divf %181, %182 : vector<8x8xf32>
    %cst_88 = arith.constant dense<0.000000e+00> : vector<8x8xf32>
    %184 = tpu.matmul %4, %183, %cst_88 {dimension_numbers = #tpu.dot_dimension_numbers<[1], [0], [0], [1], [0, 0, 1, 1], [], []>} : vector<8x8xf32>, vector<8x8xf32>, vector<8x8xf32> -> vector<8x8xf32>
    %cst_89 = arith.constant dense<0xFF800000> : vector<8xf32>
    %185 = vector.multi_reduction <maximumf>, %184, %cst_89 [0] : vector<8x8xf32> to vector<8xf32>
    %186 = vector.shape_cast %185 : vector<8xf32> to vector<1x8xf32>
    %187 = vector.broadcast %186 : vector<1x8xf32> to vector<8x8xf32>
    %188 = arith.subf %184, %187 : vector<8x8xf32>
    %189 = math.exp %188 : vector<8x8xf32>
    %cst_90 = arith.constant dense<0.000000e+00> : vector<8xf32>
    %190 = vector.multi_reduction <add>, %189, %cst_90 [0] : vector<8x8xf32> to vector<8xf32>
    %191 = vector.shape_cast %190 : vector<8xf32> to vector<1x8xf32>
    %192 = tpu.reciprocal %191 {approx = true} : vector<1x8xf32> -> vector<1x8xf32>
    %193 = vector.broadcast %192 : vector<1x8xf32> to vector<8x8xf32>
    %194 = arith.mulf %189, %193 : vector<8x8xf32>
    %195 = vector.extract_strided_slice %12 {offsets = [64, 0], sizes = [32, 8], strides = [1, 1]} : vector<128x8xf32> to vector<32x8xf32>
    %cst_91 = arith.constant dense<0.000000e+00> : vector<32x8xf32>
    %196 = tpu.matmul %195, %194, %cst_91 {dimension_numbers = #tpu.dot_dimension_numbers<[1], [0], [0], [1], [0, 0, 1, 1], [], []>} : vector<32x8xf32>, vector<8x8xf32>, vector<32x8xf32> -> vector<32x8xf32>
    %cst_92 = arith.constant dense<0.000000e+00> : vector<8x1xf32>
    %197 = tpu.matmul %194, %5, %cst_92 {dimension_numbers = #tpu.dot_dimension_numbers<[1], [0], [0], [1], [0, 0, 1, 1], [], []>} : vector<8x8xf32>, vector<8x1xf32>, vector<8x1xf32> -> vector<8x1xf32>
    %198 = tpu.concatenate %197, %197 in 0 : vector<8x1xf32>, vector<8x1xf32> -> vector<16x1xf32>
    %199 = vector.broadcast %198 : vector<16x1xf32> to vector<16x8xf32>
    %200 = arith.mulf %199, %6 : vector<16x8xf32>
    %cst_93 = arith.constant dense<0.000000e+00> : vector<32x8xf32>
    %201 = tpu.matmul %161, %200, %cst_93 {dimension_numbers = #tpu.dot_dimension_numbers<[1], [0], [0], [1], [0, 0, 1, 1], [], []>} : vector<32x16xf32>, vector<16x8xf32>, vector<32x8xf32> -> vector<32x8xf32>
    %cst_94 = arith.constant dense<0.000000e+00> : vector<32x32xf32>
    %202 = tpu.matmul %201, %196, %cst_94 {dimension_numbers = #tpu.dot_dimension_numbers<[1], [1], [0], [0], [0, 0, 1, 0], [], []>} : vector<32x8xf32>, vector<32x8xf32>, vector<32x32xf32> -> vector<32x32xf32>
    %203 = arith.addf %202, %7 : vector<32x32xf32>
    %204 = arith.negf %203 : vector<32x32xf32>
    %205 = math.exp %204 : vector<32x32xf32>
    %cst_95 = arith.constant 1.000000e+00 : f32
    %206 = vector.broadcast %cst_95 : f32 to vector<32x32xf32>
    %207 = arith.addf %206, %205 : vector<32x32xf32>
    %208 = arith.divf %206, %207 : vector<32x32xf32>
    %cst_96 = arith.constant dense<0.000000e+00> : vector<32x32xf32>
    %209 = tpu.matmul %8, %208, %cst_96 {dimension_numbers = #tpu.dot_dimension_numbers<[1], [0], [0], [1], [0, 0, 1, 1], [], []>} : vector<32x32xf32>, vector<32x32xf32>, vector<32x32xf32> -> vector<32x32xf32>
    %cst_97 = arith.constant dense<0xFF800000> : vector<32xf32>
    %210 = vector.multi_reduction <maximumf>, %209, %cst_97 [0] : vector<32x32xf32> to vector<32xf32>
    %211 = vector.shape_cast %210 : vector<32xf32> to vector<1x32xf32>
    %212 = vector.broadcast %211 : vector<1x32xf32> to vector<32x32xf32>
    %213 = arith.subf %209, %212 : vector<32x32xf32>
    %214 = math.exp %213 : vector<32x32xf32>
    %cst_98 = arith.constant dense<0.000000e+00> : vector<32xf32>
    %215 = vector.multi_reduction <add>, %214, %cst_98 [0] : vector<32x32xf32> to vector<32xf32>
    %216 = vector.shape_cast %215 : vector<32xf32> to vector<1x32xf32>
    %217 = tpu.reciprocal %216 {approx = true} : vector<1x32xf32> -> vector<1x32xf32>
    %218 = vector.broadcast %217 : vector<1x32xf32> to vector<32x32xf32>
    %219 = arith.mulf %214, %218 : vector<32x32xf32>
    %c0_99 = arith.constant 0 : index
    %c0_100 = arith.constant 0 : index
    %c0_101 = arith.constant 0 : index
    %220 = vector.load %arg12[%c0_99, %c0_100, %c0_101] : memref<3x32x32xf32, #tpu.memory_space<vmem>>, vector<1x32x32xf32>
    %221 = vector.shape_cast %220 : vector<1x32x32xf32> to vector<32x32xf32>
    %222 = arith.mulf %221, %219 : vector<32x32xf32>
    %cst_102 = arith.constant dense<0.000000e+00> : vector<32x16xf32>
    %223 = tpu.matmul %222, %161, %cst_102 {dimension_numbers = #tpu.dot_dimension_numbers<[0], [0], [1], [1], [0, 1, 1, 1], [], []>} : vector<32x32xf32>, vector<32x16xf32>, vector<32x16xf32> -> vector<32x16xf32>
    %c64 = arith.constant 64 : index
    %c0_103 = arith.constant 0 : index
    %224 = vector.load %arg24[%c64, %c0_103] : memref<128x48xf32, #tpu.memory_space<vmem>>, vector<32x16xf32>
    tpu.vector_store %arg24[%c64, %c0_103], %223 {strides = array<i32>} : memref<128x48xf32, #tpu.memory_space<vmem>>, vector<32x16xf32>,
    %c1_104 = arith.constant 1 : index
    %c0_105 = arith.constant 0 : index
    %c0_106 = arith.constant 0 : index
    %225 = vector.load %arg12[%c1_104, %c0_105, %c0_106] : memref<3x32x32xf32, #tpu.memory_space<vmem>>, vector<1x32x32xf32>
    %226 = vector.shape_cast %225 : vector<1x32x32xf32> to vector<32x32xf32>
    %227 = arith.mulf %226, %219 : vector<32x32xf32>
    %cst_107 = arith.constant dense<0.000000e+00> : vector<32x16xf32>
    %228 = tpu.matmul %227, %161, %cst_107 {dimension_numbers = #tpu.dot_dimension_numbers<[0], [0], [1], [1], [0, 1, 1, 1], [], []>} : vector<32x32xf32>, vector<32x16xf32>, vector<32x16xf32> -> vector<32x16xf32>
    %c64_108 = arith.constant 64 : index
    %c16_109 = arith.constant 16 : index
    %229 = vector.load %arg24[%c64_108, %c16_109] : memref<128x48xf32, #tpu.memory_space<vmem>>, vector<32x16xf32>
    tpu.vector_store %arg24[%c64_108, %c16_109], %228 {strides = array<i32>} : memref<128x48xf32, #tpu.memory_space<vmem>>, vector<32x16xf32>,
    %c2_110 = arith.constant 2 : index
    %c0_111 = arith.constant 0 : index
    %c0_112 = arith.constant 0 : index
    %230 = vector.load %arg12[%c2_110, %c0_111, %c0_112] : memref<3x32x32xf32, #tpu.memory_space<vmem>>, vector<1x32x32xf32>
    %231 = vector.shape_cast %230 : vector<1x32x32xf32> to vector<32x32xf32>
    %232 = arith.mulf %231, %219 : vector<32x32xf32>
    %cst_113 = arith.constant dense<0.000000e+00> : vector<32x16xf32>
    %233 = tpu.matmul %232, %161, %cst_113 {dimension_numbers = #tpu.dot_dimension_numbers<[0], [0], [1], [1], [0, 1, 1, 1], [], []>} : vector<32x32xf32>, vector<32x16xf32>, vector<32x16xf32> -> vector<32x16xf32>
    %c64_114 = arith.constant 64 : index
    %c32_115 = arith.constant 32 : index
    %234 = vector.load %arg24[%c64_114, %c32_115] : memref<128x48xf32, #tpu.memory_space<vmem>>, vector<32x16xf32>
    tpu.vector_store %arg24[%c64_114, %c32_115], %233 {strides = array<i32>} : memref<128x48xf32, #tpu.memory_space<vmem>>, vector<32x16xf32>,
    %235 = vector.extract_strided_slice %0 {offsets = [96, 0], sizes = [32, 16], strides = [1, 1]} : vector<128x16xf32> to vector<32x16xf32>
    %cst_116 = arith.constant dense<0.000000e+00> : vector<16x1xf32>
    %236 = tpu.matmul %235, %1, %cst_116 {dimension_numbers = #tpu.dot_dimension_numbers<[0], [1], [1], [0], [0, 1, 1, 0], [], []>} : vector<32x16xf32>, vector<1x32xf32>, vector<16x1xf32> -> vector<16x1xf32>
    %cst_117 = arith.constant 0.000000e+00 : f32
    %237 = vector.broadcast %cst_117 : f32 to vector<8x32xf32>
    %238 = vector.extract_strided_slice %236 {offsets = [0, 0], sizes = [8, 1], strides = [1, 1]} : vector<16x1xf32> to vector<8x1xf32>
    %239 = vector.extract_strided_slice %2 {offsets = [0, 0], sizes = [1, 32], strides = [1, 1]} : vector<2x32xf32> to vector<1x32xf32>
    %240 = vector.broadcast %238 : vector<8x1xf32> to vector<8x32xf32>
    %241 = vector.broadcast %239 : vector<1x32xf32> to vector<8x32xf32>
    %242 = arith.mulf %240, %241 : vector<8x32xf32>
    %243 = arith.addf %237, %242 : vector<8x32xf32>
    %244 = vector.extract_strided_slice %236 {offsets = [8, 0], sizes = [8, 1], strides = [1, 1]} : vector<16x1xf32> to vector<8x1xf32>
    %245 = vector.extract_strided_slice %2 {offsets = [1, 0], sizes = [1, 32], strides = [1, 1]} : vector<2x32xf32> to vector<1x32xf32>
    %246 = vector.broadcast %244 : vector<8x1xf32> to vector<8x32xf32>
    %247 = vector.broadcast %245 : vector<1x32xf32> to vector<8x32xf32>
    %248 = arith.mulf %246, %247 : vector<8x32xf32>
    %249 = arith.addf %243, %248 : vector<8x32xf32>
    %250 = vector.extract_strided_slice %10 {offsets = [96, 0], sizes = [32, 8], strides = [1, 1]} : vector<128x8xf32> to vector<32x8xf32>
    %cst_118 = arith.constant dense<0.000000e+00> : vector<8x8xf32>
    %251 = tpu.matmul %249, %250, %cst_118 {dimension_numbers = #tpu.dot_dimension_numbers<[1], [0], [0], [1], [0, 0, 1, 1], [], []>} : vector<8x32xf32>, vector<32x8xf32>, vector<8x8xf32> -> vector<8x8xf32>
    %252 = arith.addf %251, %3 : vector<8x8xf32>
    %253 = arith.negf %252 : vector<8x8xf32>
    %254 = math.exp %253 : vector<8x8xf32>
    %cst_119 = arith.constant 1.000000e+00 : f32
    %255 = vector.broadcast %cst_119 : f32 to vector<8x8xf32>
    %256 = arith.addf %255, %254 : vector<8x8xf32>
    %257 = arith.divf %255, %256 : vector<8x8xf32>
    %cst_120 = arith.constant dense<0.000000e+00> : vector<8x8xf32>
    %258 = tpu.matmul %4, %257, %cst_120 {dimension_numbers = #tpu.dot_dimension_numbers<[1], [0], [0], [1], [0, 0, 1, 1], [], []>} : vector<8x8xf32>, vector<8x8xf32>, vector<8x8xf32> -> vector<8x8xf32>
    %cst_121 = arith.constant dense<0xFF800000> : vector<8xf32>
    %259 = vector.multi_reduction <maximumf>, %258, %cst_121 [0] : vector<8x8xf32> to vector<8xf32>
    %260 = vector.shape_cast %259 : vector<8xf32> to vector<1x8xf32>
    %261 = vector.broadcast %260 : vector<1x8xf32> to vector<8x8xf32>
    %262 = arith.subf %258, %261 : vector<8x8xf32>
    %263 = math.exp %262 : vector<8x8xf32>
    %cst_122 = arith.constant dense<0.000000e+00> : vector<8xf32>
    %264 = vector.multi_reduction <add>, %263, %cst_122 [0] : vector<8x8xf32> to vector<8xf32>
    %265 = vector.shape_cast %264 : vector<8xf32> to vector<1x8xf32>
    %266 = tpu.reciprocal %265 {approx = true} : vector<1x8xf32> -> vector<1x8xf32>
    %267 = vector.broadcast %266 : vector<1x8xf32> to vector<8x8xf32>
    %268 = arith.mulf %263, %267 : vector<8x8xf32>
    %269 = vector.extract_strided_slice %12 {offsets = [96, 0], sizes = [32, 8], strides = [1, 1]} : vector<128x8xf32> to vector<32x8xf32>
    %cst_123 = arith.constant dense<0.000000e+00> : vector<32x8xf32>
    %270 = tpu.matmul %269, %268, %cst_123 {dimension_numbers = #tpu.dot_dimension_numbers<[1], [0], [0], [1], [0, 0, 1, 1], [], []>} : vector<32x8xf32>, vector<8x8xf32>, vector<32x8xf32> -> vector<32x8xf32>
    %cst_124 = arith.constant dense<0.000000e+00> : vector<8x1xf32>
    %271 = tpu.matmul %268, %5, %cst_124 {dimension_numbers = #tpu.dot_dimension_numbers<[1], [0], [0], [1], [0, 0, 1, 1], [], []>} : vector<8x8xf32>, vector<8x1xf32>, vector<8x1xf32> -> vector<8x1xf32>
    %272 = tpu.concatenate %271, %271 in 0 : vector<8x1xf32>, vector<8x1xf32> -> vector<16x1xf32>
    %273 = vector.broadcast %272 : vector<16x1xf32> to vector<16x8xf32>
    %274 = arith.mulf %273, %6 : vector<16x8xf32>
    %cst_125 = arith.constant dense<0.000000e+00> : vector<32x8xf32>
    %275 = tpu.matmul %235, %274, %cst_125 {dimension_numbers = #tpu.dot_dimension_numbers<[1], [0], [0], [1], [0, 0, 1, 1], [], []>} : vector<32x16xf32>, vector<16x8xf32>, vector<32x8xf32> -> vector<32x8xf32>
    %cst_126 = arith.constant dense<0.000000e+00> : vector<32x32xf32>
    %276 = tpu.matmul %275, %270, %cst_126 {dimension_numbers = #tpu.dot_dimension_numbers<[1], [1], [0], [0], [0, 0, 1, 0], [], []>} : vector<32x8xf32>, vector<32x8xf32>, vector<32x32xf32> -> vector<32x32xf32>
    %277 = arith.addf %276, %7 : vector<32x32xf32>
    %278 = arith.negf %277 : vector<32x32xf32>
    %279 = math.exp %278 : vector<32x32xf32>
    %cst_127 = arith.constant 1.000000e+00 : f32
    %280 = vector.broadcast %cst_127 : f32 to vector<32x32xf32>
    %281 = arith.addf %280, %279 : vector<32x32xf32>
    %282 = arith.divf %280, %281 : vector<32x32xf32>
    %cst_128 = arith.constant dense<0.000000e+00> : vector<32x32xf32>
    %283 = tpu.matmul %8, %282, %cst_128 {dimension_numbers = #tpu.dot_dimension_numbers<[1], [0], [0], [1], [0, 0, 1, 1], [], []>} : vector<32x32xf32>, vector<32x32xf32>, vector<32x32xf32> -> vector<32x32xf32>
    %cst_129 = arith.constant dense<0xFF800000> : vector<32xf32>
    %284 = vector.multi_reduction <maximumf>, %283, %cst_129 [0] : vector<32x32xf32> to vector<32xf32>
    %285 = vector.shape_cast %284 : vector<32xf32> to vector<1x32xf32>
    %286 = vector.broadcast %285 : vector<1x32xf32> to vector<32x32xf32>
    %287 = arith.subf %283, %286 : vector<32x32xf32>
    %288 = math.exp %287 : vector<32x32xf32>
    %cst_130 = arith.constant dense<0.000000e+00> : vector<32xf32>
    %289 = vector.multi_reduction <add>, %288, %cst_130 [0] : vector<32x32xf32> to vector<32xf32>
    %290 = vector.shape_cast %289 : vector<32xf32> to vector<1x32xf32>
    %291 = tpu.reciprocal %290 {approx = true} : vector<1x32xf32> -> vector<1x32xf32>
    %292 = vector.broadcast %291 : vector<1x32xf32> to vector<32x32xf32>
    %293 = arith.mulf %288, %292 : vector<32x32xf32>
    %c0_131 = arith.constant 0 : index
    %c0_132 = arith.constant 0 : index
    %c0_133 = arith.constant 0 : index
    %294 = vector.load %arg12[%c0_131, %c0_132, %c0_133] : memref<3x32x32xf32, #tpu.memory_space<vmem>>, vector<1x32x32xf32>
    %295 = vector.shape_cast %294 : vector<1x32x32xf32> to vector<32x32xf32>
    %296 = arith.mulf %295, %293 : vector<32x32xf32>
    %cst_134 = arith.constant dense<0.000000e+00> : vector<32x16xf32>
    %297 = tpu.matmul %296, %235, %cst_134 {dimension_numbers = #tpu.dot_dimension_numbers<[0], [0], [1], [1], [0, 1, 1, 1], [], []>} : vector<32x32xf32>, vector<32x16xf32>, vector<32x16xf32> -> vector<32x16xf32>
    %c96 = arith.constant 96 : index
    %c0_135 = arith.constant 0 : index
    %298 = vector.load %arg24[%c96, %c0_135] : memref<128x48xf32, #tpu.memory_space<vmem>>, vector<32x16xf32>
    tpu.vector_store %arg24[%c96, %c0_135], %297 {strides = array<i32>} : memref<128x48xf32, #tpu.memory_space<vmem>>, vector<32x16xf32>,
    %c1_136 = arith.constant 1 : index
    %c0_137 = arith.constant 0 : index
    %c0_138 = arith.constant 0 : index
    %299 = vector.load %arg12[%c1_136, %c0_137, %c0_138] : memref<3x32x32xf32, #tpu.memory_space<vmem>>, vector<1x32x32xf32>
    %300 = vector.shape_cast %299 : vector<1x32x32xf32> to vector<32x32xf32>
    %301 = arith.mulf %300, %293 : vector<32x32xf32>
    %cst_139 = arith.constant dense<0.000000e+00> : vector<32x16xf32>
    %302 = tpu.matmul %301, %235, %cst_139 {dimension_numbers = #tpu.dot_dimension_numbers<[0], [0], [1], [1], [0, 1, 1, 1], [], []>} : vector<32x32xf32>, vector<32x16xf32>, vector<32x16xf32> -> vector<32x16xf32>
    %c96_140 = arith.constant 96 : index
    %c16_141 = arith.constant 16 : index
    %303 = vector.load %arg24[%c96_140, %c16_141] : memref<128x48xf32, #tpu.memory_space<vmem>>, vector<32x16xf32>
    tpu.vector_store %arg24[%c96_140, %c16_141], %302 {strides = array<i32>} : memref<128x48xf32, #tpu.memory_space<vmem>>, vector<32x16xf32>,
    %c2_142 = arith.constant 2 : index
    %c0_143 = arith.constant 0 : index
    %c0_144 = arith.constant 0 : index
    %304 = vector.load %arg12[%c2_142, %c0_143, %c0_144] : memref<3x32x32xf32, #tpu.memory_space<vmem>>, vector<1x32x32xf32>
    %305 = vector.shape_cast %304 : vector<1x32x32xf32> to vector<32x32xf32>
    %306 = arith.mulf %305, %293 : vector<32x32xf32>
    %cst_145 = arith.constant dense<0.000000e+00> : vector<32x16xf32>
    %307 = tpu.matmul %306, %235, %cst_145 {dimension_numbers = #tpu.dot_dimension_numbers<[0], [0], [1], [1], [0, 1, 1, 1], [], []>} : vector<32x32xf32>, vector<32x16xf32>, vector<32x16xf32> -> vector<32x16xf32>
    %c96_146 = arith.constant 96 : index
    %c32_147 = arith.constant 32 : index
    %308 = vector.load %arg24[%c96_146, %c32_147] : memref<128x48xf32, #tpu.memory_space<vmem>>, vector<32x16xf32>
    tpu.vector_store %arg24[%c96_146, %c32_147], %307 {strides = array<i32>} : memref<128x48xf32, #tpu.memory_space<vmem>>, vector<32x16xf32>,
    %c0_148 = arith.constant 0 : index
    %c0_149 = arith.constant 0 : index
    %309 = vector.load %arg24[%c0_148, %c0_149] : memref<128x48xf32, #tpu.memory_space<vmem>>, vector<128x48xf32>
    %310 = arith.truncf %309 : vector<128x48xf32> to vector<128x48xbf16>
    %c0_150 = arith.constant 0 : index
    %c0_151 = arith.constant 0 : index
    %311 = vector.load %arg13[%c0_150, %c0_151] : memref<48x64xbf16, #tpu.memory_space<vmem>>, vector<48x64xbf16>
    %cst_152 = arith.constant dense<0.000000e+00> : vector<128x64xf32>
    %312 = tpu.matmul %310, %311, %cst_152 {dimension_numbers = #tpu.dot_dimension_numbers<[1], [0], [0], [1], [0, 0, 1, 1], [], []>} : vector<128x48xbf16>, vector<48x64xbf16>, vector<128x64xf32> -> vector<128x64xf32>
    %cst_153 = arith.constant 0.000000e+00 : f32
    %313 = vector.broadcast %cst_153 : f32 to vector<128x64xf32>
    %314 = arith.maximumf %312, %313 : vector<128x64xf32>
    %315 = arith.truncf %314 : vector<128x64xf32> to vector<128x64xbf16>
    %c0_154 = arith.constant 0 : index
    %c0_155 = arith.constant 0 : index
    %316 = vector.load %arg14[%c0_154, %c0_155] : memref<64x64xbf16, #tpu.memory_space<vmem>>, vector<64x64xbf16>
    %cst_156 = arith.constant dense<0.000000e+00> : vector<128x64xf32>
    %317 = tpu.matmul %315, %316, %cst_156 {dimension_numbers = #tpu.dot_dimension_numbers<[1], [0], [0], [1], [0, 0, 1, 1], [], []>} : vector<128x64xbf16>, vector<64x64xbf16>, vector<128x64xf32> -> vector<128x64xf32>
    %c0_157 = arith.constant 0 : index
    %c0_158 = arith.constant 0 : index
    %318 = vector.load %arg15[%c0_157, %c0_158] : memref<1x64xf32, #tpu.memory_space<vmem>>, vector<1x64xf32>
    %319 = vector.broadcast %318 : vector<1x64xf32> to vector<128x64xf32>
    %320 = arith.addf %317, %319 : vector<128x64xf32>
    %321 = arith.truncf %0 : vector<128x16xf32> to vector<128x16xbf16>
    %c0_159 = arith.constant 0 : index
    %c0_160 = arith.constant 0 : index
    %322 = vector.load %arg16[%c0_159, %c0_160] : memref<16x64xbf16, #tpu.memory_space<vmem>>, vector<16x64xbf16>
    %cst_161 = arith.constant dense<0.000000e+00> : vector<128x64xf32>
    %323 = tpu.matmul %321, %322, %cst_161 {dimension_numbers = #tpu.dot_dimension_numbers<[1], [0], [0], [1], [0, 0, 1, 1], [], []>} : vector<128x16xbf16>, vector<16x64xbf16>, vector<128x64xf32> -> vector<128x64xf32>
    %c0_162 = arith.constant 0 : index
    %c0_163 = arith.constant 0 : index
    %324 = vector.load %arg17[%c0_162, %c0_163] : memref<1x64xf32, #tpu.memory_space<vmem>>, vector<1x64xf32>
    %325 = vector.broadcast %324 : vector<1x64xf32> to vector<128x64xf32>
    %326 = arith.addf %323, %325 : vector<128x64xf32>
    %327 = arith.addf %320, %326 : vector<128x64xf32>
    %cst_164 = arith.constant 0.000000e+00 : f32
    %328 = vector.broadcast %cst_164 : f32 to vector<128x64xf32>
    %329 = arith.maximumf %327, %328 : vector<128x64xf32>
    %c0_165 = arith.constant 0 : index
    %c0_166 = arith.constant 0 : index
    %330 = vector.load %arg18[%c0_165, %c0_166] : memref<64x64xf32, #tpu.memory_space<vmem>>, vector<64x64xf32>
    %cst_167 = arith.constant dense<0.000000e+00> : vector<128x64xf32>
    %331 = tpu.matmul %329, %330, %cst_167 {dimension_numbers = #tpu.dot_dimension_numbers<[1], [0], [0], [1], [0, 0, 1, 1], [], []>} : vector<128x64xf32>, vector<64x64xf32>, vector<128x64xf32> -> vector<128x64xf32>
    %332 = arith.subf %329, %331 : vector<128x64xf32>
    %333 = arith.mulf %332, %332 : vector<128x64xf32>
    %c0_168 = arith.constant 0 : index
    %c0_169 = arith.constant 0 : index
    %334 = vector.load %arg18[%c0_168, %c0_169] : memref<64x64xf32, #tpu.memory_space<vmem>>, vector<64x64xf32>
    %cst_170 = arith.constant dense<0.000000e+00> : vector<128x64xf32>
    %335 = tpu.matmul %333, %334, %cst_170 {dimension_numbers = #tpu.dot_dimension_numbers<[1], [0], [0], [1], [0, 0, 1, 1], [], []>} : vector<128x64xf32>, vector<64x64xf32>, vector<128x64xf32> -> vector<128x64xf32>
    %cst_171 = arith.constant 9.99999974E-6 : f32
    %336 = vector.broadcast %cst_171 : f32 to vector<128x64xf32>
    %337 = arith.addf %335, %336 : vector<128x64xf32>
    %338 = math.rsqrt %337 : vector<128x64xf32>
    %339 = arith.mulf %332, %338 : vector<128x64xf32>
    %c0_172 = arith.constant 0 : index
    %c0_173 = arith.constant 0 : index
    %340 = vector.load %arg19[%c0_172, %c0_173] : memref<1x64xf32, #tpu.memory_space<vmem>>, vector<1x64xf32>
    %341 = vector.broadcast %340 : vector<1x64xf32> to vector<128x64xf32>
    %342 = arith.mulf %339, %341 : vector<128x64xf32>
    %c0_174 = arith.constant 0 : index
    %c0_175 = arith.constant 0 : index
    %343 = vector.load %arg20[%c0_174, %c0_175] : memref<1x64xf32, #tpu.memory_space<vmem>>, vector<1x64xf32>
    %344 = vector.broadcast %343 : vector<1x64xf32> to vector<128x64xf32>
    %345 = arith.addf %342, %344 : vector<128x64xf32>
    %c0_176 = arith.constant 0 : index
    %c0_177 = arith.constant 0 : index
    %346 = vector.load %arg21[%c0_176, %c0_177] : memref<4x64xbf16, #tpu.memory_space<vmem>>, vector<4x64xbf16>
    %347 = arith.truncf %345 : vector<128x64xf32> to vector<128x64xbf16>
    %cst_178 = arith.constant dense<0.000000e+00> : vector<4x128xf32>
    %348 = tpu.matmul %346, %347, %cst_178 {dimension_numbers = #tpu.dot_dimension_numbers<[1], [1], [0], [0], [0, 0, 1, 0], [], []>} : vector<4x64xbf16>, vector<128x64xbf16>, vector<4x128xf32> -> vector<4x128xf32>
    %c0_179 = arith.constant 0 : index
    %c0_180 = arith.constant 0 : index
    %349 = vector.load %arg22[%c0_179, %c0_180] : memref<4x1xf32, #tpu.memory_space<vmem>>, vector<4x1xf32>
    %350 = vector.broadcast %349 : vector<4x1xf32> to vector<4x128xf32>
    %351 = arith.addf %348, %350 : vector<4x128xf32>
    %c0_181 = arith.constant 0 : index
    %c0_182 = arith.constant 0 : index
    %c0_183 = arith.constant 0 : index
    %352 = vector.load %arg23[%c0_181, %c0_182, %c0_183] : memref<1x4x128xf32, #tpu.memory_space<vmem>>, vector<1x4x128xf32>
    %353 = vector.shape_cast %352 : vector<1x4x128xf32> to vector<4x128xf32>
    %354 = vector.shape_cast %351 : vector<4x128xf32> to vector<1x4x128xf32>
    tpu.vector_store %arg23[%c0_181, %c0_182, %c0_183], %354 {strides = array<i32>} : memref<1x4x128xf32, #tpu.memory_space<vmem>>, vector<1x4x128xf32>,
    return
  }
  func.func @transform_0(%arg0: i32) -> (i32, i32) {
    %c0_i32 = arith.constant 0 : i32
    %c0_i32_0 = arith.constant 0 : i32
    return %arg0, %c0_i32 : i32, i32
  }
  func.func @transform_1(%arg0: i32) -> (i32, i32) {
    %c0_i32 = arith.constant 0 : i32
    %c0_i32_0 = arith.constant 0 : i32
    %c0_i32_1 = arith.constant 0 : i32
    return %c0_i32, %c0_i32_0 : i32, i32
  }
  func.func @transform_2(%arg0: i32) -> (i32, i32) {
    %c0_i32 = arith.constant 0 : i32
    %c0_i32_0 = arith.constant 0 : i32
    %c0_i32_1 = arith.constant 0 : i32
    return %c0_i32, %c0_i32_0 : i32, i32
  }
  func.func @transform_3(%arg0: i32) -> (i32, i32) {
    %c0_i32 = arith.constant 0 : i32
    %c0_i32_0 = arith.constant 0 : i32
    %c0_i32_1 = arith.constant 0 : i32
    return %c0_i32, %c0_i32_0 : i32, i32
  }
  func.func @transform_4(%arg0: i32) -> (i32, i32) {
    %c0_i32 = arith.constant 0 : i32
    %c0_i32_0 = arith.constant 0 : i32
    %c0_i32_1 = arith.constant 0 : i32
    return %c0_i32, %c0_i32_0 : i32, i32
  }
  func.func @transform_5(%arg0: i32) -> (i32, i32) {
    %c0_i32 = arith.constant 0 : i32
    %c0_i32_0 = arith.constant 0 : i32
    %c0_i32_1 = arith.constant 0 : i32
    return %c0_i32, %c0_i32_0 : i32, i32
  }
  func.func @transform_6(%arg0: i32) -> (i32, i32) {
    %c0_i32 = arith.constant 0 : i32
    %c0_i32_0 = arith.constant 0 : i32
    %c0_i32_1 = arith.constant 0 : i32
    return %c0_i32, %c0_i32_0 : i32, i32
  }
  func.func @transform_7(%arg0: i32) -> (i32, i32) {
    %c0_i32 = arith.constant 0 : i32
    %c0_i32_0 = arith.constant 0 : i32
    %c0_i32_1 = arith.constant 0 : i32
    return %c0_i32, %c0_i32_0 : i32, i32
  }
  func.func @transform_8(%arg0: i32) -> (i32, i32) {
    %c0_i32 = arith.constant 0 : i32
    %c0_i32_0 = arith.constant 0 : i32
    %c0_i32_1 = arith.constant 0 : i32
    return %c0_i32, %c0_i32_0 : i32, i32
  }
  func.func @transform_9(%arg0: i32) -> (i32, i32) {
    %c0_i32 = arith.constant 0 : i32
    %c0_i32_0 = arith.constant 0 : i32
    %c0_i32_1 = arith.constant 0 : i32
    return %c0_i32, %c0_i32_0 : i32, i32
  }
  func.func @transform_10(%arg0: i32) -> (i32, i32) {
    %c0_i32 = arith.constant 0 : i32
    %c0_i32_0 = arith.constant 0 : i32
    %c0_i32_1 = arith.constant 0 : i32
    return %c0_i32, %c0_i32_0 : i32, i32
  }
  func.func @transform_11(%arg0: i32) -> (i32, i32, i32) {
    %c0_i32 = arith.constant 0 : i32
    %c0_i32_0 = arith.constant 0 : i32
    %c0_i32_1 = arith.constant 0 : i32
    %c0_i32_2 = arith.constant 0 : i32
    return %c0_i32, %c0_i32_0, %c0_i32_1 : i32, i32, i32
  }
  func.func @transform_12(%arg0: i32) -> (i32, i32) {
    %c0_i32 = arith.constant 0 : i32
    %c0_i32_0 = arith.constant 0 : i32
    %c0_i32_1 = arith.constant 0 : i32
    return %c0_i32, %c0_i32_0 : i32, i32
  }
  func.func @transform_13(%arg0: i32) -> (i32, i32) {
    %c0_i32 = arith.constant 0 : i32
    %c0_i32_0 = arith.constant 0 : i32
    %c0_i32_1 = arith.constant 0 : i32
    return %c0_i32, %c0_i32_0 : i32, i32
  }
  func.func @transform_14(%arg0: i32) -> (i32, i32) {
    %c0_i32 = arith.constant 0 : i32
    %c0_i32_0 = arith.constant 0 : i32
    %c0_i32_1 = arith.constant 0 : i32
    return %c0_i32, %c0_i32_0 : i32, i32
  }
  func.func @transform_15(%arg0: i32) -> (i32, i32) {
    %c0_i32 = arith.constant 0 : i32
    %c0_i32_0 = arith.constant 0 : i32
    %c0_i32_1 = arith.constant 0 : i32
    return %c0_i32, %c0_i32_0 : i32, i32
  }
  func.func @transform_16(%arg0: i32) -> (i32, i32) {
    %c0_i32 = arith.constant 0 : i32
    %c0_i32_0 = arith.constant 0 : i32
    %c0_i32_1 = arith.constant 0 : i32
    return %c0_i32, %c0_i32_0 : i32, i32
  }
  func.func @transform_17(%arg0: i32) -> (i32, i32) {
    %c0_i32 = arith.constant 0 : i32
    %c0_i32_0 = arith.constant 0 : i32
    %c0_i32_1 = arith.constant 0 : i32
    return %c0_i32, %c0_i32_0 : i32, i32
  }
  func.func @transform_18(%arg0: i32) -> (i32, i32) {
    %c0_i32 = arith.constant 0 : i32
    %c0_i32_0 = arith.constant 0 : i32
    %c0_i32_1 = arith.constant 0 : i32
    return %c0_i32, %c0_i32_0 : i32, i32
  }
  func.func @transform_19(%arg0: i32) -> (i32, i32) {
    %c0_i32 = arith.constant 0 : i32
    %c0_i32_0 = arith.constant 0 : i32
    %c0_i32_1 = arith.constant 0 : i32
    return %c0_i32, %c0_i32_0 : i32, i32
  }
  func.func @transform_20(%arg0: i32) -> (i32, i32) {
    %c0_i32 = arith.constant 0 : i32
    %c0_i32_0 = arith.constant 0 : i32
    %c0_i32_1 = arith.constant 0 : i32
    return %c0_i32, %c0_i32_0 : i32, i32
  }
  func.func @transform_21(%arg0: i32) -> (i32, i32) {
    %c0_i32 = arith.constant 0 : i32
    %c0_i32_0 = arith.constant 0 : i32
    %c0_i32_1 = arith.constant 0 : i32
    return %c0_i32, %c0_i32_0 : i32, i32
  }
  func.func @transform_22(%arg0: i32) -> (i32, i32, i32) {
    %c0_i32 = arith.constant 0 : i32
    %c0_i32_0 = arith.constant 0 : i32
    %c0_i32_1 = arith.constant 0 : i32
    return %arg0, %c0_i32, %c0_i32_0 : i32, i32, i32
  }
}

module attributes {stable_mosaic.version = 11 : i64} {
  func.func @astgcn_submodule_kernel(%arg0: i32, %arg1: memref<128x16xf32, #tpu.memory_space<vmem>>, %arg2: memref<1x32xf32, #tpu.memory_space<vmem>>, %arg3: memref<2x32xf32, #tpu.memory_space<vmem>>, %arg4: memref<16x8xf32, #tpu.memory_space<vmem>>, %arg5: memref<8x8xf32, #tpu.memory_space<vmem>>, %arg6: memref<8x8xf32, #tpu.memory_space<vmem>>, %arg7: memref<8x1xf32, #tpu.memory_space<vmem>>, %arg8: memref<16x8xf32, #tpu.memory_space<vmem>>, %arg9: memref<16x8xf32, #tpu.memory_space<vmem>>, %arg10: memref<32x32xf32, #tpu.memory_space<vmem>>, %arg11: memref<32x32xf32, #tpu.memory_space<vmem>>, %arg12: memref<3x32x32xf32, #tpu.memory_space<vmem>>, %arg13: memref<48x64xbf16, #tpu.memory_space<vmem>>, %arg14: memref<64x64xbf16, #tpu.memory_space<vmem>>, %arg15: memref<1x64xf32, #tpu.memory_space<vmem>>, %arg16: memref<16x64xbf16, #tpu.memory_space<vmem>>, %arg17: memref<1x64xf32, #tpu.memory_space<vmem>>, %arg18: memref<64x64xf32, #tpu.memory_space<vmem>>, %arg19: memref<1x64xf32, #tpu.memory_space<vmem>>, %arg20: memref<1x64xf32, #tpu.memory_space<vmem>>, %arg21: memref<4x64xbf16, #tpu.memory_space<vmem>>, %arg22: memref<4x1xf32, #tpu.memory_space<vmem>>, %arg23: memref<1x4x128xf32, #tpu.memory_space<vmem>>, %arg24: memref<128x48xf32, #tpu.memory_space<vmem>>) attributes {dimension_semantics = [#tpu.dimension_semantics<parallel>], iteration_bounds = array<i64: 2>, scalar_prefetch = 0 : i64, scratch_operands = 1 : i64, tpu.core_type = #tpu.core_type<tc>, window_params = [{transform_indices = @transform_0, window_bounds = array<i64: 128, 16>}, {pipeline_mode = #tpu.pipeline_mode<synchronous>, transform_indices = @transform_1, window_bounds = array<i64: 1, 32>}, {pipeline_mode = #tpu.pipeline_mode<synchronous>, transform_indices = @transform_2, window_bounds = array<i64: 2, 32>}, {pipeline_mode = #tpu.pipeline_mode<synchronous>, transform_indices = @transform_3, window_bounds = array<i64: 16, 8>}, {pipeline_mode = #tpu.pipeline_mode<synchronous>, transform_indices = @transform_4, window_bounds = array<i64: 8, 8>}, {pipeline_mode = #tpu.pipeline_mode<synchronous>, transform_indices = @transform_5, window_bounds = array<i64: 8, 8>}, {pipeline_mode = #tpu.pipeline_mode<synchronous>, transform_indices = @transform_6, window_bounds = array<i64: 8, 1>}, {pipeline_mode = #tpu.pipeline_mode<synchronous>, transform_indices = @transform_7, window_bounds = array<i64: 16, 8>}, {pipeline_mode = #tpu.pipeline_mode<synchronous>, transform_indices = @transform_8, window_bounds = array<i64: 16, 8>}, {pipeline_mode = #tpu.pipeline_mode<synchronous>, transform_indices = @transform_9, window_bounds = array<i64: 32, 32>}, {pipeline_mode = #tpu.pipeline_mode<synchronous>, transform_indices = @transform_10, window_bounds = array<i64: 32, 32>}, {pipeline_mode = #tpu.pipeline_mode<synchronous>, transform_indices = @transform_11, window_bounds = array<i64: 3, 32, 32>}, {pipeline_mode = #tpu.pipeline_mode<synchronous>, transform_indices = @transform_12, window_bounds = array<i64: 48, 64>}, {pipeline_mode = #tpu.pipeline_mode<synchronous>, transform_indices = @transform_13, window_bounds = array<i64: 64, 64>}, {pipeline_mode = #tpu.pipeline_mode<synchronous>, transform_indices = @transform_14, window_bounds = array<i64: 1, 64>}, {pipeline_mode = #tpu.pipeline_mode<synchronous>, transform_indices = @transform_15, window_bounds = array<i64: 16, 64>}, {pipeline_mode = #tpu.pipeline_mode<synchronous>, transform_indices = @transform_16, window_bounds = array<i64: 1, 64>}, {pipeline_mode = #tpu.pipeline_mode<synchronous>, transform_indices = @transform_17, window_bounds = array<i64: 64, 64>}, {pipeline_mode = #tpu.pipeline_mode<synchronous>, transform_indices = @transform_18, window_bounds = array<i64: 1, 64>}, {pipeline_mode = #tpu.pipeline_mode<synchronous>, transform_indices = @transform_19, window_bounds = array<i64: 1, 64>}, {pipeline_mode = #tpu.pipeline_mode<synchronous>, transform_indices = @transform_20, window_bounds = array<i64: 4, 64>}, {pipeline_mode = #tpu.pipeline_mode<synchronous>, transform_indices = @transform_21, window_bounds = array<i64: 4, 1>}, {transform_indices = @transform_22, window_bounds = array<i64: 1, 4, 128>}]} {
    %c0 = arith.constant 0 : index
    %c0_0 = arith.constant 0 : index
    %0 = vector.load %arg1[%c0, %c0_0] : memref<128x16xf32, #tpu.memory_space<vmem>>, vector<128x16xf32>
    %c0_1 = arith.constant 0 : index
    %c0_2 = arith.constant 0 : index
    %1 = vector.load %arg2[%c0_1, %c0_2] : memref<1x32xf32, #tpu.memory_space<vmem>>, vector<1x32xf32>
    %c0_3 = arith.constant 0 : index
    %c0_4 = arith.constant 0 : index
    %2 = vector.load %arg3[%c0_3, %c0_4] : memref<2x32xf32, #tpu.memory_space<vmem>>, vector<2x32xf32>
    %c0_5 = arith.constant 0 : index
    %c0_6 = arith.constant 0 : index
    %3 = vector.load %arg5[%c0_5, %c0_6] : memref<8x8xf32, #tpu.memory_space<vmem>>, vector<8x8xf32>
    %c0_7 = arith.constant 0 : index
    %c0_8 = arith.constant 0 : index
    %4 = vector.load %arg6[%c0_7, %c0_8] : memref<8x8xf32, #tpu.memory_space<vmem>>, vector<8x8xf32>
    %c0_9 = arith.constant 0 : index
    %c0_10 = arith.constant 0 : index
    %5 = vector.load %arg7[%c0_9, %c0_10] : memref<8x1xf32, #tpu.memory_space<vmem>>, vector<8x1xf32>
    %c0_11 = arith.constant 0 : index
    %c0_12 = arith.constant 0 : index
    %6 = vector.load %arg8[%c0_11, %c0_12] : memref<16x8xf32, #tpu.memory_space<vmem>>, vector<16x8xf32>
    %c0_13 = arith.constant 0 : index
    %c0_14 = arith.constant 0 : index
    %7 = vector.load %arg10[%c0_13, %c0_14] : memref<32x32xf32, #tpu.memory_space<vmem>>, vector<32x32xf32>
    %c0_15 = arith.constant 0 : index
    %c0_16 = arith.constant 0 : index
    %8 = vector.load %arg11[%c0_15, %c0_16] : memref<32x32xf32, #tpu.memory_space<vmem>>, vector<32x32xf32>
    %c0_17 = arith.constant 0 : index
    %c0_18 = arith.constant 0 : index
    %9 = vector.load %arg4[%c0_17, %c0_18] : memref<16x8xf32, #tpu.memory_space<vmem>>, vector<16x8xf32>
    %cst = arith.constant dense<0.000000e+00> : vector<128x8xf32>
    %10 = tpu.matmul %0, %9, %cst {dimension_numbers = #tpu.dot_dimension_numbers<[1], [0], [0], [1], [0, 0, 1, 1], [], []>} : vector<128x16xf32>, vector<16x8xf32>, vector<128x8xf32> -> vector<128x8xf32>
    %c0_19 = arith.constant 0 : index
    %c0_20 = arith.constant 0 : index
    %11 = vector.load %arg9[%c0_19, %c0_20] : memref<16x8xf32, #tpu.memory_space<vmem>>, vector<16x8xf32>
    %cst_21 = arith.constant dense<0.000000e+00> : vector<128x8xf32>
    %12 = tpu.matmul %0, %11, %cst_21 {dimension_numbers = #tpu.dot_dimension_numbers<[1], [0], [0], [1], [0, 0, 1, 1], [], []>} : vector<128x16xf32>, vector<16x8xf32>, vector<128x8xf32> -> vector<128x8xf32>
    %13 = vector.extract_strided_slice %0 {offsets = [0, 0], sizes = [32, 16], strides = [1, 1]} : vector<128x16xf32> to vector<32x16xf32>
    %cst_22 = arith.constant dense<0.000000e+00> : vector<16x1xf32>
    %14 = tpu.matmul %13, %1, %cst_22 {dimension_numbers = #tpu.dot_dimension_numbers<[0], [1], [1], [0], [0, 1, 1, 0], [], []>} : vector<32x16xf32>, vector<1x32xf32>, vector<16x1xf32> -> vector<16x1xf32>
    %cst_23 = arith.constant 0.000000e+00 : f32
    %15 = vector.broadcast %cst_23 : f32 to vector<8x32xf32>
    %16 = vector.extract_strided_slice %14 {offsets = [0, 0], sizes = [8, 1], strides = [1, 1]} : vector<16x1xf32> to vector<8x1xf32>
    %17 = vector.extract_strided_slice %2 {offsets = [0, 0], sizes = [1, 32], strides = [1, 1]} : vector<2x32xf32> to vector<1x32xf32>
    %18 = vector.broadcast %16 : vector<8x1xf32> to vector<8x32xf32>
    %19 = vector.broadcast %17 : vector<1x32xf32> to vector<8x32xf32>
    %20 = arith.mulf %18, %19 : vector<8x32xf32>
    %21 = arith.addf %15, %20 : vector<8x32xf32>
    %22 = vector.extract_strided_slice %14 {offsets = [8, 0], sizes = [8, 1], strides = [1, 1]} : vector<16x1xf32> to vector<8x1xf32>
    %23 = vector.extract_strided_slice %2 {offsets = [1, 0], sizes = [1, 32], strides = [1, 1]} : vector<2x32xf32> to vector<1x32xf32>
    %24 = vector.broadcast %22 : vector<8x1xf32> to vector<8x32xf32>
    %25 = vector.broadcast %23 : vector<1x32xf32> to vector<8x32xf32>
    %26 = arith.mulf %24, %25 : vector<8x32xf32>
    %27 = arith.addf %21, %26 : vector<8x32xf32>
    %28 = vector.extract_strided_slice %10 {offsets = [0, 0], sizes = [32, 8], strides = [1, 1]} : vector<128x8xf32> to vector<32x8xf32>
    %cst_24 = arith.constant dense<0.000000e+00> : vector<8x8xf32>
    %29 = tpu.matmul %27, %28, %cst_24 {dimension_numbers = #tpu.dot_dimension_numbers<[1], [0], [0], [1], [0, 0, 1, 1], [], []>} : vector<8x32xf32>, vector<32x8xf32>, vector<8x8xf32> -> vector<8x8xf32>
    %30 = arith.addf %29, %3 : vector<8x8xf32>
    %31 = arith.negf %30 : vector<8x8xf32>
    %32 = math.exp %31 : vector<8x8xf32>
    %cst_25 = arith.constant 1.000000e+00 : f32
    %33 = vector.broadcast %cst_25 : f32 to vector<8x8xf32>
    %34 = arith.addf %33, %32 : vector<8x8xf32>
    %35 = arith.divf %33, %34 : vector<8x8xf32>
    %cst_26 = arith.constant dense<0.000000e+00> : vector<8x8xf32>
    %36 = tpu.matmul %4, %35, %cst_26 {dimension_numbers = #tpu.dot_dimension_numbers<[1], [0], [0], [1], [0, 0, 1, 1], [], []>} : vector<8x8xf32>, vector<8x8xf32>, vector<8x8xf32> -> vector<8x8xf32>
    %cst_27 = arith.constant dense<0xFF800000> : vector<8xf32>
    %37 = vector.multi_reduction <maximumf>, %36, %cst_27 [0] : vector<8x8xf32> to vector<8xf32>
    %38 = vector.shape_cast %37 : vector<8xf32> to vector<1x8xf32>
    %39 = vector.broadcast %38 : vector<1x8xf32> to vector<8x8xf32>
    %40 = arith.subf %36, %39 : vector<8x8xf32>
    %41 = math.exp %40 : vector<8x8xf32>
    %cst_28 = arith.constant dense<0.000000e+00> : vector<8xf32>
    %42 = vector.multi_reduction <add>, %41, %cst_28 [0] : vector<8x8xf32> to vector<8xf32>
    %43 = vector.shape_cast %42 : vector<8xf32> to vector<1x8xf32>
    %44 = tpu.reciprocal %43 {approx = true} : vector<1x8xf32> -> vector<1x8xf32>
    %45 = vector.broadcast %44 : vector<1x8xf32> to vector<8x8xf32>
    %46 = arith.mulf %41, %45 : vector<8x8xf32>
    %47 = vector.extract_strided_slice %12 {offsets = [0, 0], sizes = [32, 8], strides = [1, 1]} : vector<128x8xf32> to vector<32x8xf32>
    %cst_29 = arith.constant dense<0.000000e+00> : vector<32x8xf32>
    %48 = tpu.matmul %47, %46, %cst_29 {dimension_numbers = #tpu.dot_dimension_numbers<[1], [0], [0], [1], [0, 0, 1, 1], [], []>} : vector<32x8xf32>, vector<8x8xf32>, vector<32x8xf32> -> vector<32x8xf32>
    %cst_30 = arith.constant dense<0.000000e+00> : vector<8x1xf32>
    %49 = tpu.matmul %46, %5, %cst_30 {dimension_numbers = #tpu.dot_dimension_numbers<[1], [0], [0], [1], [0, 0, 1, 1], [], []>} : vector<8x8xf32>, vector<8x1xf32>, vector<8x1xf32> -> vector<8x1xf32>
    %50 = tpu.concatenate %49, %49 in 0 : vector<8x1xf32>, vector<8x1xf32> -> vector<16x1xf32>
    %51 = vector.broadcast %50 : vector<16x1xf32> to vector<16x8xf32>
    %52 = arith.mulf %51, %6 : vector<16x8xf32>
    %cst_31 = arith.constant dense<0.000000e+00> : vector<32x8xf32>
    %53 = tpu.matmul %13, %52, %cst_31 {dimension_numbers = #tpu.dot_dimension_numbers<[1], [0], [0], [1], [0, 0, 1, 1], [], []>} : vector<32x16xf32>, vector<16x8xf32>, vector<32x8xf32> -> vector<32x8xf32>
    %cst_32 = arith.constant dense<0.000000e+00> : vector<32x32xf32>
    %54 = tpu.matmul %53, %48, %cst_32 {dimension_numbers = #tpu.dot_dimension_numbers<[1], [1], [0], [0], [0, 0, 1, 0], [], []>} : vector<32x8xf32>, vector<32x8xf32>, vector<32x32xf32> -> vector<32x32xf32>
    %55 = arith.addf %54, %7 : vector<32x32xf32>
    %56 = arith.negf %55 : vector<32x32xf32>
    %57 = math.exp %56 : vector<32x32xf32>
    %cst_33 = arith.constant 1.000000e+00 : f32
    %58 = vector.broadcast %cst_33 : f32 to vector<32x32xf32>
    %59 = arith.addf %58, %57 : vector<32x32xf32>
    %60 = arith.divf %58, %59 : vector<32x32xf32>
    %cst_34 = arith.constant dense<0.000000e+00> : vector<32x32xf32>
    %61 = tpu.matmul %8, %60, %cst_34 {dimension_numbers = #tpu.dot_dimension_numbers<[1], [0], [0], [1], [0, 0, 1, 1], [], []>} : vector<32x32xf32>, vector<32x32xf32>, vector<32x32xf32> -> vector<32x32xf32>
    %cst_35 = arith.constant dense<0xFF800000> : vector<32xf32>
    %62 = vector.multi_reduction <maximumf>, %61, %cst_35 [0] : vector<32x32xf32> to vector<32xf32>
    %63 = vector.shape_cast %62 : vector<32xf32> to vector<1x32xf32>
    %64 = vector.broadcast %63 : vector<1x32xf32> to vector<32x32xf32>
    %65 = arith.subf %61, %64 : vector<32x32xf32>
    %66 = math.exp %65 : vector<32x32xf32>
    %cst_36 = arith.constant dense<0.000000e+00> : vector<32xf32>
    %67 = vector.multi_reduction <add>, %66, %cst_36 [0] : vector<32x32xf32> to vector<32xf32>
    %68 = vector.shape_cast %67 : vector<32xf32> to vector<1x32xf32>
    %69 = tpu.reciprocal %68 {approx = true} : vector<1x32xf32> -> vector<1x32xf32>
    %70 = vector.broadcast %69 : vector<1x32xf32> to vector<32x32xf32>
    %71 = arith.mulf %66, %70 : vector<32x32xf32>
    %c0_37 = arith.constant 0 : index
    %c0_38 = arith.constant 0 : index
    %c0_39 = arith.constant 0 : index
    %72 = vector.load %arg12[%c0_37, %c0_38, %c0_39] : memref<3x32x32xf32, #tpu.memory_space<vmem>>, vector<1x32x32xf32>
    %73 = vector.shape_cast %72 : vector<1x32x32xf32> to vector<32x32xf32>
    %74 = arith.mulf %73, %71 : vector<32x32xf32>
    %cst_40 = arith.constant dense<0.000000e+00> : vector<32x16xf32>
    %75 = tpu.matmul %74, %13, %cst_40 {dimension_numbers = #tpu.dot_dimension_numbers<[0], [0], [1], [1], [0, 1, 1, 1], [], []>} : vector<32x32xf32>, vector<32x16xf32>, vector<32x16xf32> -> vector<32x16xf32>
    %c0_41 = arith.constant 0 : index
    %c0_42 = arith.constant 0 : index
    %76 = vector.load %arg24[%c0_41, %c0_42] : memref<128x48xf32, #tpu.memory_space<vmem>>, vector<32x16xf32>
    tpu.vector_store %arg24[%c0_41, %c0_42], %75 {strides = array<i32>} : memref<128x48xf32, #tpu.memory_space<vmem>>, vector<32x16xf32>,
    %c1 = arith.constant 1 : index
    %c0_43 = arith.constant 0 : index
    %c0_44 = arith.constant 0 : index
    %77 = vector.load %arg12[%c1, %c0_43, %c0_44] : memref<3x32x32xf32, #tpu.memory_space<vmem>>, vector<1x32x32xf32>
    %78 = vector.shape_cast %77 : vector<1x32x32xf32> to vector<32x32xf32>
    %79 = arith.mulf %78, %71 : vector<32x32xf32>
    %cst_45 = arith.constant dense<0.000000e+00> : vector<32x16xf32>
    %80 = tpu.matmul %79, %13, %cst_45 {dimension_numbers = #tpu.dot_dimension_numbers<[0], [0], [1], [1], [0, 1, 1, 1], [], []>} : vector<32x32xf32>, vector<32x16xf32>, vector<32x16xf32> -> vector<32x16xf32>
    %c0_46 = arith.constant 0 : index
    %c16 = arith.constant 16 : index
    %81 = vector.load %arg24[%c0_46, %c16] : memref<128x48xf32, #tpu.memory_space<vmem>>, vector<32x16xf32>
    tpu.vector_store %arg24[%c0_46, %c16], %80 {strides = array<i32>} : memref<128x48xf32, #tpu.memory_space<vmem>>, vector<32x16xf32>,
    %c2 = arith.constant 2 : index
    %c0_47 = arith.constant 0 : index
    %c0_48 = arith.constant 0 : index
    %82 = vector.load %arg12[%c2, %c0_47, %c0_48] : memref<3x32x32xf32, #tpu.memory_space<vmem>>, vector<1x32x32xf32>
    %83 = vector.shape_cast %82 : vector<1x32x32xf32> to vector<32x32xf32>
    %84 = arith.mulf %83, %71 : vector<32x32xf32>
    %cst_49 = arith.constant dense<0.000000e+00> : vector<32x16xf32>
    %85 = tpu.matmul %84, %13, %cst_49 {dimension_numbers = #tpu.dot_dimension_numbers<[0], [0], [1], [1], [0, 1, 1, 1], [], []>} : vector<32x32xf32>, vector<32x16xf32>, vector<32x16xf32> -> vector<32x16xf32>
    %c0_50 = arith.constant 0 : index
    %c32 = arith.constant 32 : index
    %86 = vector.load %arg24[%c0_50, %c32] : memref<128x48xf32, #tpu.memory_space<vmem>>, vector<32x16xf32>
    tpu.vector_store %arg24[%c0_50, %c32], %85 {strides = array<i32>} : memref<128x48xf32, #tpu.memory_space<vmem>>, vector<32x16xf32>,
    %87 = vector.extract_strided_slice %0 {offsets = [32, 0], sizes = [32, 16], strides = [1, 1]} : vector<128x16xf32> to vector<32x16xf32>
    %cst_51 = arith.constant dense<0.000000e+00> : vector<16x1xf32>
    %88 = tpu.matmul %87, %1, %cst_51 {dimension_numbers = #tpu.dot_dimension_numbers<[0], [1], [1], [0], [0, 1, 1, 0], [], []>} : vector<32x16xf32>, vector<1x32xf32>, vector<16x1xf32> -> vector<16x1xf32>
    %cst_52 = arith.constant 0.000000e+00 : f32
    %89 = vector.broadcast %cst_52 : f32 to vector<8x32xf32>
    %90 = vector.extract_strided_slice %88 {offsets = [0, 0], sizes = [8, 1], strides = [1, 1]} : vector<16x1xf32> to vector<8x1xf32>
    %91 = vector.extract_strided_slice %2 {offsets = [0, 0], sizes = [1, 32], strides = [1, 1]} : vector<2x32xf32> to vector<1x32xf32>
    %92 = vector.broadcast %90 : vector<8x1xf32> to vector<8x32xf32>
    %93 = vector.broadcast %91 : vector<1x32xf32> to vector<8x32xf32>
    %94 = arith.mulf %92, %93 : vector<8x32xf32>
    %95 = arith.addf %89, %94 : vector<8x32xf32>
    %96 = vector.extract_strided_slice %88 {offsets = [8, 0], sizes = [8, 1], strides = [1, 1]} : vector<16x1xf32> to vector<8x1xf32>
    %97 = vector.extract_strided_slice %2 {offsets = [1, 0], sizes = [1, 32], strides = [1, 1]} : vector<2x32xf32> to vector<1x32xf32>
    %98 = vector.broadcast %96 : vector<8x1xf32> to vector<8x32xf32>
    %99 = vector.broadcast %97 : vector<1x32xf32> to vector<8x32xf32>
    %100 = arith.mulf %98, %99 : vector<8x32xf32>
    %101 = arith.addf %95, %100 : vector<8x32xf32>
    %102 = vector.extract_strided_slice %10 {offsets = [32, 0], sizes = [32, 8], strides = [1, 1]} : vector<128x8xf32> to vector<32x8xf32>
    %cst_53 = arith.constant dense<0.000000e+00> : vector<8x8xf32>
    %103 = tpu.matmul %101, %102, %cst_53 {dimension_numbers = #tpu.dot_dimension_numbers<[1], [0], [0], [1], [0, 0, 1, 1], [], []>} : vector<8x32xf32>, vector<32x8xf32>, vector<8x8xf32> -> vector<8x8xf32>
    %104 = arith.addf %103, %3 : vector<8x8xf32>
    %105 = arith.negf %104 : vector<8x8xf32>
    %106 = math.exp %105 : vector<8x8xf32>
    %cst_54 = arith.constant 1.000000e+00 : f32
    %107 = vector.broadcast %cst_54 : f32 to vector<8x8xf32>
    %108 = arith.addf %107, %106 : vector<8x8xf32>
    %109 = arith.divf %107, %108 : vector<8x8xf32>
    %cst_55 = arith.constant dense<0.000000e+00> : vector<8x8xf32>
    %110 = tpu.matmul %4, %109, %cst_55 {dimension_numbers = #tpu.dot_dimension_numbers<[1], [0], [0], [1], [0, 0, 1, 1], [], []>} : vector<8x8xf32>, vector<8x8xf32>, vector<8x8xf32> -> vector<8x8xf32>
    %cst_56 = arith.constant dense<0xFF800000> : vector<8xf32>
    %111 = vector.multi_reduction <maximumf>, %110, %cst_56 [0] : vector<8x8xf32> to vector<8xf32>
    %112 = vector.shape_cast %111 : vector<8xf32> to vector<1x8xf32>
    %113 = vector.broadcast %112 : vector<1x8xf32> to vector<8x8xf32>
    %114 = arith.subf %110, %113 : vector<8x8xf32>
    %115 = math.exp %114 : vector<8x8xf32>
    %cst_57 = arith.constant dense<0.000000e+00> : vector<8xf32>
    %116 = vector.multi_reduction <add>, %115, %cst_57 [0] : vector<8x8xf32> to vector<8xf32>
    %117 = vector.shape_cast %116 : vector<8xf32> to vector<1x8xf32>
    %118 = tpu.reciprocal %117 {approx = true} : vector<1x8xf32> -> vector<1x8xf32>
    %119 = vector.broadcast %118 : vector<1x8xf32> to vector<8x8xf32>
    %120 = arith.mulf %115, %119 : vector<8x8xf32>
    %121 = vector.extract_strided_slice %12 {offsets = [32, 0], sizes = [32, 8], strides = [1, 1]} : vector<128x8xf32> to vector<32x8xf32>
    %cst_58 = arith.constant dense<0.000000e+00> : vector<32x8xf32>
    %122 = tpu.matmul %121, %120, %cst_58 {dimension_numbers = #tpu.dot_dimension_numbers<[1], [0], [0], [1], [0, 0, 1, 1], [], []>} : vector<32x8xf32>, vector<8x8xf32>, vector<32x8xf32> -> vector<32x8xf32>
    %cst_59 = arith.constant dense<0.000000e+00> : vector<8x1xf32>
    %123 = tpu.matmul %120, %5, %cst_59 {dimension_numbers = #tpu.dot_dimension_numbers<[1], [0], [0], [1], [0, 0, 1, 1], [], []>} : vector<8x8xf32>, vector<8x1xf32>, vector<8x1xf32> -> vector<8x1xf32>
    %124 = tpu.concatenate %123, %123 in 0 : vector<8x1xf32>, vector<8x1xf32> -> vector<16x1xf32>
    %125 = vector.broadcast %124 : vector<16x1xf32> to vector<16x8xf32>
    %126 = arith.mulf %125, %6 : vector<16x8xf32>
    %cst_60 = arith.constant dense<0.000000e+00> : vector<32x8xf32>
    %127 = tpu.matmul %87, %126, %cst_60 {dimension_numbers = #tpu.dot_dimension_numbers<[1], [0], [0], [1], [0, 0, 1, 1], [], []>} : vector<32x16xf32>, vector<16x8xf32>, vector<32x8xf32> -> vector<32x8xf32>
    %cst_61 = arith.constant dense<0.000000e+00> : vector<32x32xf32>
    %128 = tpu.matmul %127, %122, %cst_61 {dimension_numbers = #tpu.dot_dimension_numbers<[1], [1], [0], [0], [0, 0, 1, 0], [], []>} : vector<32x8xf32>, vector<32x8xf32>, vector<32x32xf32> -> vector<32x32xf32>
    %129 = arith.addf %128, %7 : vector<32x32xf32>
    %130 = arith.negf %129 : vector<32x32xf32>
    %131 = math.exp %130 : vector<32x32xf32>
    %cst_62 = arith.constant 1.000000e+00 : f32
    %132 = vector.broadcast %cst_62 : f32 to vector<32x32xf32>
    %133 = arith.addf %132, %131 : vector<32x32xf32>
    %134 = arith.divf %132, %133 : vector<32x32xf32>
    %cst_63 = arith.constant dense<0.000000e+00> : vector<32x32xf32>
    %135 = tpu.matmul %8, %134, %cst_63 {dimension_numbers = #tpu.dot_dimension_numbers<[1], [0], [0], [1], [0, 0, 1, 1], [], []>} : vector<32x32xf32>, vector<32x32xf32>, vector<32x32xf32> -> vector<32x32xf32>
    %cst_64 = arith.constant dense<0xFF800000> : vector<32xf32>
    %136 = vector.multi_reduction <maximumf>, %135, %cst_64 [0] : vector<32x32xf32> to vector<32xf32>
    %137 = vector.shape_cast %136 : vector<32xf32> to vector<1x32xf32>
    %138 = vector.broadcast %137 : vector<1x32xf32> to vector<32x32xf32>
    %139 = arith.subf %135, %138 : vector<32x32xf32>
    %140 = math.exp %139 : vector<32x32xf32>
    %cst_65 = arith.constant dense<0.000000e+00> : vector<32xf32>
    %141 = vector.multi_reduction <add>, %140, %cst_65 [0] : vector<32x32xf32> to vector<32xf32>
    %142 = vector.shape_cast %141 : vector<32xf32> to vector<1x32xf32>
    %143 = tpu.reciprocal %142 {approx = true} : vector<1x32xf32> -> vector<1x32xf32>
    %144 = vector.broadcast %143 : vector<1x32xf32> to vector<32x32xf32>
    %145 = arith.mulf %140, %144 : vector<32x32xf32>
    %c0_66 = arith.constant 0 : index
    %c0_67 = arith.constant 0 : index
    %c0_68 = arith.constant 0 : index
    %146 = vector.load %arg12[%c0_66, %c0_67, %c0_68] : memref<3x32x32xf32, #tpu.memory_space<vmem>>, vector<1x32x32xf32>
    %147 = vector.shape_cast %146 : vector<1x32x32xf32> to vector<32x32xf32>
    %148 = arith.mulf %147, %145 : vector<32x32xf32>
    %cst_69 = arith.constant dense<0.000000e+00> : vector<32x16xf32>
    %149 = tpu.matmul %148, %87, %cst_69 {dimension_numbers = #tpu.dot_dimension_numbers<[0], [0], [1], [1], [0, 1, 1, 1], [], []>} : vector<32x32xf32>, vector<32x16xf32>, vector<32x16xf32> -> vector<32x16xf32>
    %c32_70 = arith.constant 32 : index
    %c0_71 = arith.constant 0 : index
    %150 = vector.load %arg24[%c32_70, %c0_71] : memref<128x48xf32, #tpu.memory_space<vmem>>, vector<32x16xf32>
    tpu.vector_store %arg24[%c32_70, %c0_71], %149 {strides = array<i32>} : memref<128x48xf32, #tpu.memory_space<vmem>>, vector<32x16xf32>,
    %c1_72 = arith.constant 1 : index
    %c0_73 = arith.constant 0 : index
    %c0_74 = arith.constant 0 : index
    %151 = vector.load %arg12[%c1_72, %c0_73, %c0_74] : memref<3x32x32xf32, #tpu.memory_space<vmem>>, vector<1x32x32xf32>
    %152 = vector.shape_cast %151 : vector<1x32x32xf32> to vector<32x32xf32>
    %153 = arith.mulf %152, %145 : vector<32x32xf32>
    %cst_75 = arith.constant dense<0.000000e+00> : vector<32x16xf32>
    %154 = tpu.matmul %153, %87, %cst_75 {dimension_numbers = #tpu.dot_dimension_numbers<[0], [0], [1], [1], [0, 1, 1, 1], [], []>} : vector<32x32xf32>, vector<32x16xf32>, vector<32x16xf32> -> vector<32x16xf32>
    %c32_76 = arith.constant 32 : index
    %c16_77 = arith.constant 16 : index
    %155 = vector.load %arg24[%c32_76, %c16_77] : memref<128x48xf32, #tpu.memory_space<vmem>>, vector<32x16xf32>
    tpu.vector_store %arg24[%c32_76, %c16_77], %154 {strides = array<i32>} : memref<128x48xf32, #tpu.memory_space<vmem>>, vector<32x16xf32>,
    %c2_78 = arith.constant 2 : index
    %c0_79 = arith.constant 0 : index
    %c0_80 = arith.constant 0 : index
    %156 = vector.load %arg12[%c2_78, %c0_79, %c0_80] : memref<3x32x32xf32, #tpu.memory_space<vmem>>, vector<1x32x32xf32>
    %157 = vector.shape_cast %156 : vector<1x32x32xf32> to vector<32x32xf32>
    %158 = arith.mulf %157, %145 : vector<32x32xf32>
    %cst_81 = arith.constant dense<0.000000e+00> : vector<32x16xf32>
    %159 = tpu.matmul %158, %87, %cst_81 {dimension_numbers = #tpu.dot_dimension_numbers<[0], [0], [1], [1], [0, 1, 1, 1], [], []>} : vector<32x32xf32>, vector<32x16xf32>, vector<32x16xf32> -> vector<32x16xf32>
    %c32_82 = arith.constant 32 : index
    %c32_83 = arith.constant 32 : index
    %160 = vector.load %arg24[%c32_82, %c32_83] : memref<128x48xf32, #tpu.memory_space<vmem>>, vector<32x16xf32>
    tpu.vector_store %arg24[%c32_82, %c32_83], %159 {strides = array<i32>} : memref<128x48xf32, #tpu.memory_space<vmem>>, vector<32x16xf32>,
    %161 = vector.extract_strided_slice %0 {offsets = [64, 0], sizes = [32, 16], strides = [1, 1]} : vector<128x16xf32> to vector<32x16xf32>
    %cst_84 = arith.constant dense<0.000000e+00> : vector<16x1xf32>
    %162 = tpu.matmul %161, %1, %cst_84 {dimension_numbers = #tpu.dot_dimension_numbers<[0], [1], [1], [0], [0, 1, 1, 0], [], []>} : vector<32x16xf32>, vector<1x32xf32>, vector<16x1xf32> -> vector<16x1xf32>
    %cst_85 = arith.constant 0.000000e+00 : f32
    %163 = vector.broadcast %cst_85 : f32 to vector<8x32xf32>
    %164 = vector.extract_strided_slice %162 {offsets = [0, 0], sizes = [8, 1], strides = [1, 1]} : vector<16x1xf32> to vector<8x1xf32>
    %165 = vector.extract_strided_slice %2 {offsets = [0, 0], sizes = [1, 32], strides = [1, 1]} : vector<2x32xf32> to vector<1x32xf32>
    %166 = vector.broadcast %164 : vector<8x1xf32> to vector<8x32xf32>
    %167 = vector.broadcast %165 : vector<1x32xf32> to vector<8x32xf32>
    %168 = arith.mulf %166, %167 : vector<8x32xf32>
    %169 = arith.addf %163, %168 : vector<8x32xf32>
    %170 = vector.extract_strided_slice %162 {offsets = [8, 0], sizes = [8, 1], strides = [1, 1]} : vector<16x1xf32> to vector<8x1xf32>
    %171 = vector.extract_strided_slice %2 {offsets = [1, 0], sizes = [1, 32], strides = [1, 1]} : vector<2x32xf32> to vector<1x32xf32>
    %172 = vector.broadcast %170 : vector<8x1xf32> to vector<8x32xf32>
    %173 = vector.broadcast %171 : vector<1x32xf32> to vector<8x32xf32>
    %174 = arith.mulf %172, %173 : vector<8x32xf32>
    %175 = arith.addf %169, %174 : vector<8x32xf32>
    %176 = vector.extract_strided_slice %10 {offsets = [64, 0], sizes = [32, 8], strides = [1, 1]} : vector<128x8xf32> to vector<32x8xf32>
    %cst_86 = arith.constant dense<0.000000e+00> : vector<8x8xf32>
    %177 = tpu.matmul %175, %176, %cst_86 {dimension_numbers = #tpu.dot_dimension_numbers<[1], [0], [0], [1], [0, 0, 1, 1], [], []>} : vector<8x32xf32>, vector<32x8xf32>, vector<8x8xf32> -> vector<8x8xf32>
    %178 = arith.addf %177, %3 : vector<8x8xf32>
    %179 = arith.negf %178 : vector<8x8xf32>
    %180 = math.exp %179 : vector<8x8xf32>
    %cst_87 = arith.constant 1.000000e+00 : f32
    %181 = vector.broadcast %cst_87 : f32 to vector<8x8xf32>
    %182 = arith.addf %181, %180 : vector<8x8xf32>
    %183 = arith.divf %181, %182 : vector<8x8xf32>
    %cst_88 = arith.constant dense<0.000000e+00> : vector<8x8xf32>
    %184 = tpu.matmul %4, %183, %cst_88 {dimension_numbers = #tpu.dot_dimension_numbers<[1], [0], [0], [1], [0, 0, 1, 1], [], []>} : vector<8x8xf32>, vector<8x8xf32>, vector<8x8xf32> -> vector<8x8xf32>
    %cst_89 = arith.constant dense<0xFF800000> : vector<8xf32>
    %185 = vector.multi_reduction <maximumf>, %184, %cst_89 [0] : vector<8x8xf32> to vector<8xf32>
    %186 = vector.shape_cast %185 : vector<8xf32> to vector<1x8xf32>
    %187 = vector.broadcast %186 : vector<1x8xf32> to vector<8x8xf32>
    %188 = arith.subf %184, %187 : vector<8x8xf32>
    %189 = math.exp %188 : vector<8x8xf32>
    %cst_90 = arith.constant dense<0.000000e+00> : vector<8xf32>
    %190 = vector.multi_reduction <add>, %189, %cst_90 [0] : vector<8x8xf32> to vector<8xf32>
    %191 = vector.shape_cast %190 : vector<8xf32> to vector<1x8xf32>
    %192 = tpu.reciprocal %191 {approx = true} : vector<1x8xf32> -> vector<1x8xf32>
    %193 = vector.broadcast %192 : vector<1x8xf32> to vector<8x8xf32>
    %194 = arith.mulf %189, %193 : vector<8x8xf32>
    %195 = vector.extract_strided_slice %12 {offsets = [64, 0], sizes = [32, 8], strides = [1, 1]} : vector<128x8xf32> to vector<32x8xf32>
    %cst_91 = arith.constant dense<0.000000e+00> : vector<32x8xf32>
    %196 = tpu.matmul %195, %194, %cst_91 {dimension_numbers = #tpu.dot_dimension_numbers<[1], [0], [0], [1], [0, 0, 1, 1], [], []>} : vector<32x8xf32>, vector<8x8xf32>, vector<32x8xf32> -> vector<32x8xf32>
    %cst_92 = arith.constant dense<0.000000e+00> : vector<8x1xf32>
    %197 = tpu.matmul %194, %5, %cst_92 {dimension_numbers = #tpu.dot_dimension_numbers<[1], [0], [0], [1], [0, 0, 1, 1], [], []>} : vector<8x8xf32>, vector<8x1xf32>, vector<8x1xf32> -> vector<8x1xf32>
    %198 = tpu.concatenate %197, %197 in 0 : vector<8x1xf32>, vector<8x1xf32> -> vector<16x1xf32>
    %199 = vector.broadcast %198 : vector<16x1xf32> to vector<16x8xf32>
    %200 = arith.mulf %199, %6 : vector<16x8xf32>
    %cst_93 = arith.constant dense<0.000000e+00> : vector<32x8xf32>
    %201 = tpu.matmul %161, %200, %cst_93 {dimension_numbers = #tpu.dot_dimension_numbers<[1], [0], [0], [1], [0, 0, 1, 1], [], []>} : vector<32x16xf32>, vector<16x8xf32>, vector<32x8xf32> -> vector<32x8xf32>
    %cst_94 = arith.constant dense<0.000000e+00> : vector<32x32xf32>
    %202 = tpu.matmul %201, %196, %cst_94 {dimension_numbers = #tpu.dot_dimension_numbers<[1], [1], [0], [0], [0, 0, 1, 0], [], []>} : vector<32x8xf32>, vector<32x8xf32>, vector<32x32xf32> -> vector<32x32xf32>
    %203 = arith.addf %202, %7 : vector<32x32xf32>
    %204 = arith.negf %203 : vector<32x32xf32>
    %205 = math.exp %204 : vector<32x32xf32>
    %cst_95 = arith.constant 1.000000e+00 : f32
    %206 = vector.broadcast %cst_95 : f32 to vector<32x32xf32>
    %207 = arith.addf %206, %205 : vector<32x32xf32>
    %208 = arith.divf %206, %207 : vector<32x32xf32>
    %cst_96 = arith.constant dense<0.000000e+00> : vector<32x32xf32>
    %209 = tpu.matmul %8, %208, %cst_96 {dimension_numbers = #tpu.dot_dimension_numbers<[1], [0], [0], [1], [0, 0, 1, 1], [], []>} : vector<32x32xf32>, vector<32x32xf32>, vector<32x32xf32> -> vector<32x32xf32>
    %cst_97 = arith.constant dense<0xFF800000> : vector<32xf32>
    %210 = vector.multi_reduction <maximumf>, %209, %cst_97 [0] : vector<32x32xf32> to vector<32xf32>
    %211 = vector.shape_cast %210 : vector<32xf32> to vector<1x32xf32>
    %212 = vector.broadcast %211 : vector<1x32xf32> to vector<32x32xf32>
    %213 = arith.subf %209, %212 : vector<32x32xf32>
    %214 = math.exp %213 : vector<32x32xf32>
    %cst_98 = arith.constant dense<0.000000e+00> : vector<32xf32>
    %215 = vector.multi_reduction <add>, %214, %cst_98 [0] : vector<32x32xf32> to vector<32xf32>
    %216 = vector.shape_cast %215 : vector<32xf32> to vector<1x32xf32>
    %217 = tpu.reciprocal %216 {approx = true} : vector<1x32xf32> -> vector<1x32xf32>
    %218 = vector.broadcast %217 : vector<1x32xf32> to vector<32x32xf32>
    %219 = arith.mulf %214, %218 : vector<32x32xf32>
    %c0_99 = arith.constant 0 : index
    %c0_100 = arith.constant 0 : index
    %c0_101 = arith.constant 0 : index
    %220 = vector.load %arg12[%c0_99, %c0_100, %c0_101] : memref<3x32x32xf32, #tpu.memory_space<vmem>>, vector<1x32x32xf32>
    %221 = vector.shape_cast %220 : vector<1x32x32xf32> to vector<32x32xf32>
    %222 = arith.mulf %221, %219 : vector<32x32xf32>
    %cst_102 = arith.constant dense<0.000000e+00> : vector<32x16xf32>
    %223 = tpu.matmul %222, %161, %cst_102 {dimension_numbers = #tpu.dot_dimension_numbers<[0], [0], [1], [1], [0, 1, 1, 1], [], []>} : vector<32x32xf32>, vector<32x16xf32>, vector<32x16xf32> -> vector<32x16xf32>
    %c64 = arith.constant 64 : index
    %c0_103 = arith.constant 0 : index
    %224 = vector.load %arg24[%c64, %c0_103] : memref<128x48xf32, #tpu.memory_space<vmem>>, vector<32x16xf32>
    tpu.vector_store %arg24[%c64, %c0_103], %223 {strides = array<i32>} : memref<128x48xf32, #tpu.memory_space<vmem>>, vector<32x16xf32>,
    %c1_104 = arith.constant 1 : index
    %c0_105 = arith.constant 0 : index
    %c0_106 = arith.constant 0 : index
    %225 = vector.load %arg12[%c1_104, %c0_105, %c0_106] : memref<3x32x32xf32, #tpu.memory_space<vmem>>, vector<1x32x32xf32>
    %226 = vector.shape_cast %225 : vector<1x32x32xf32> to vector<32x32xf32>
    %227 = arith.mulf %226, %219 : vector<32x32xf32>
    %cst_107 = arith.constant dense<0.000000e+00> : vector<32x16xf32>
    %228 = tpu.matmul %227, %161, %cst_107 {dimension_numbers = #tpu.dot_dimension_numbers<[0], [0], [1], [1], [0, 1, 1, 1], [], []>} : vector<32x32xf32>, vector<32x16xf32>, vector<32x16xf32> -> vector<32x16xf32>
    %c64_108 = arith.constant 64 : index
    %c16_109 = arith.constant 16 : index
    %229 = vector.load %arg24[%c64_108, %c16_109] : memref<128x48xf32, #tpu.memory_space<vmem>>, vector<32x16xf32>
    tpu.vector_store %arg24[%c64_108, %c16_109], %228 {strides = array<i32>} : memref<128x48xf32, #tpu.memory_space<vmem>>, vector<32x16xf32>,
    %c2_110 = arith.constant 2 : index
    %c0_111 = arith.constant 0 : index
    %c0_112 = arith.constant 0 : index
    %230 = vector.load %arg12[%c2_110, %c0_111, %c0_112] : memref<3x32x32xf32, #tpu.memory_space<vmem>>, vector<1x32x32xf32>
    %231 = vector.shape_cast %230 : vector<1x32x32xf32> to vector<32x32xf32>
    %232 = arith.mulf %231, %219 : vector<32x32xf32>
    %cst_113 = arith.constant dense<0.000000e+00> : vector<32x16xf32>
    %233 = tpu.matmul %232, %161, %cst_113 {dimension_numbers = #tpu.dot_dimension_numbers<[0], [0], [1], [1], [0, 1, 1, 1], [], []>} : vector<32x32xf32>, vector<32x16xf32>, vector<32x16xf32> -> vector<32x16xf32>
    %c64_114 = arith.constant 64 : index
    %c32_115 = arith.constant 32 : index
    %234 = vector.load %arg24[%c64_114, %c32_115] : memref<128x48xf32, #tpu.memory_space<vmem>>, vector<32x16xf32>
    tpu.vector_store %arg24[%c64_114, %c32_115], %233 {strides = array<i32>} : memref<128x48xf32, #tpu.memory_space<vmem>>, vector<32x16xf32>,
    %235 = vector.extract_strided_slice %0 {offsets = [96, 0], sizes = [32, 16], strides = [1, 1]} : vector<128x16xf32> to vector<32x16xf32>
    %cst_116 = arith.constant dense<0.000000e+00> : vector<16x1xf32>
    %236 = tpu.matmul %235, %1, %cst_116 {dimension_numbers = #tpu.dot_dimension_numbers<[0], [1], [1], [0], [0, 1, 1, 0], [], []>} : vector<32x16xf32>, vector<1x32xf32>, vector<16x1xf32> -> vector<16x1xf32>
    %cst_117 = arith.constant 0.000000e+00 : f32
    %237 = vector.broadcast %cst_117 : f32 to vector<8x32xf32>
    %238 = vector.extract_strided_slice %236 {offsets = [0, 0], sizes = [8, 1], strides = [1, 1]} : vector<16x1xf32> to vector<8x1xf32>
    %239 = vector.extract_strided_slice %2 {offsets = [0, 0], sizes = [1, 32], strides = [1, 1]} : vector<2x32xf32> to vector<1x32xf32>
    %240 = vector.broadcast %238 : vector<8x1xf32> to vector<8x32xf32>
    %241 = vector.broadcast %239 : vector<1x32xf32> to vector<8x32xf32>
    %242 = arith.mulf %240, %241 : vector<8x32xf32>
    %243 = arith.addf %237, %242 : vector<8x32xf32>
    %244 = vector.extract_strided_slice %236 {offsets = [8, 0], sizes = [8, 1], strides = [1, 1]} : vector<16x1xf32> to vector<8x1xf32>
    %245 = vector.extract_strided_slice %2 {offsets = [1, 0], sizes = [1, 32], strides = [1, 1]} : vector<2x32xf32> to vector<1x32xf32>
    %246 = vector.broadcast %244 : vector<8x1xf32> to vector<8x32xf32>
    %247 = vector.broadcast %245 : vector<1x32xf32> to vector<8x32xf32>
    %248 = arith.mulf %246, %247 : vector<8x32xf32>
    %249 = arith.addf %243, %248 : vector<8x32xf32>
    %250 = vector.extract_strided_slice %10 {offsets = [96, 0], sizes = [32, 8], strides = [1, 1]} : vector<128x8xf32> to vector<32x8xf32>
    %cst_118 = arith.constant dense<0.000000e+00> : vector<8x8xf32>
    %251 = tpu.matmul %249, %250, %cst_118 {dimension_numbers = #tpu.dot_dimension_numbers<[1], [0], [0], [1], [0, 0, 1, 1], [], []>} : vector<8x32xf32>, vector<32x8xf32>, vector<8x8xf32> -> vector<8x8xf32>
    %252 = arith.addf %251, %3 : vector<8x8xf32>
    %253 = arith.negf %252 : vector<8x8xf32>
    %254 = math.exp %253 : vector<8x8xf32>
    %cst_119 = arith.constant 1.000000e+00 : f32
    %255 = vector.broadcast %cst_119 : f32 to vector<8x8xf32>
    %256 = arith.addf %255, %254 : vector<8x8xf32>
    %257 = arith.divf %255, %256 : vector<8x8xf32>
    %cst_120 = arith.constant dense<0.000000e+00> : vector<8x8xf32>
    %258 = tpu.matmul %4, %257, %cst_120 {dimension_numbers = #tpu.dot_dimension_numbers<[1], [0], [0], [1], [0, 0, 1, 1], [], []>} : vector<8x8xf32>, vector<8x8xf32>, vector<8x8xf32> -> vector<8x8xf32>
    %cst_121 = arith.constant dense<0xFF800000> : vector<8xf32>
    %259 = vector.multi_reduction <maximumf>, %258, %cst_121 [0] : vector<8x8xf32> to vector<8xf32>
    %260 = vector.shape_cast %259 : vector<8xf32> to vector<1x8xf32>
    %261 = vector.broadcast %260 : vector<1x8xf32> to vector<8x8xf32>
    %262 = arith.subf %258, %261 : vector<8x8xf32>
    %263 = math.exp %262 : vector<8x8xf32>
    %cst_122 = arith.constant dense<0.000000e+00> : vector<8xf32>
    %264 = vector.multi_reduction <add>, %263, %cst_122 [0] : vector<8x8xf32> to vector<8xf32>
    %265 = vector.shape_cast %264 : vector<8xf32> to vector<1x8xf32>
    %266 = tpu.reciprocal %265 {approx = true} : vector<1x8xf32> -> vector<1x8xf32>
    %267 = vector.broadcast %266 : vector<1x8xf32> to vector<8x8xf32>
    %268 = arith.mulf %263, %267 : vector<8x8xf32>
    %269 = vector.extract_strided_slice %12 {offsets = [96, 0], sizes = [32, 8], strides = [1, 1]} : vector<128x8xf32> to vector<32x8xf32>
    %cst_123 = arith.constant dense<0.000000e+00> : vector<32x8xf32>
    %270 = tpu.matmul %269, %268, %cst_123 {dimension_numbers = #tpu.dot_dimension_numbers<[1], [0], [0], [1], [0, 0, 1, 1], [], []>} : vector<32x8xf32>, vector<8x8xf32>, vector<32x8xf32> -> vector<32x8xf32>
    %cst_124 = arith.constant dense<0.000000e+00> : vector<8x1xf32>
    %271 = tpu.matmul %268, %5, %cst_124 {dimension_numbers = #tpu.dot_dimension_numbers<[1], [0], [0], [1], [0, 0, 1, 1], [], []>} : vector<8x8xf32>, vector<8x1xf32>, vector<8x1xf32> -> vector<8x1xf32>
    %272 = tpu.concatenate %271, %271 in 0 : vector<8x1xf32>, vector<8x1xf32> -> vector<16x1xf32>
    %273 = vector.broadcast %272 : vector<16x1xf32> to vector<16x8xf32>
    %274 = arith.mulf %273, %6 : vector<16x8xf32>
    %cst_125 = arith.constant dense<0.000000e+00> : vector<32x8xf32>
    %275 = tpu.matmul %235, %274, %cst_125 {dimension_numbers = #tpu.dot_dimension_numbers<[1], [0], [0], [1], [0, 0, 1, 1], [], []>} : vector<32x16xf32>, vector<16x8xf32>, vector<32x8xf32> -> vector<32x8xf32>
    %cst_126 = arith.constant dense<0.000000e+00> : vector<32x32xf32>
    %276 = tpu.matmul %275, %270, %cst_126 {dimension_numbers = #tpu.dot_dimension_numbers<[1], [1], [0], [0], [0, 0, 1, 0], [], []>} : vector<32x8xf32>, vector<32x8xf32>, vector<32x32xf32> -> vector<32x32xf32>
    %277 = arith.addf %276, %7 : vector<32x32xf32>
    %278 = arith.negf %277 : vector<32x32xf32>
    %279 = math.exp %278 : vector<32x32xf32>
    %cst_127 = arith.constant 1.000000e+00 : f32
    %280 = vector.broadcast %cst_127 : f32 to vector<32x32xf32>
    %281 = arith.addf %280, %279 : vector<32x32xf32>
    %282 = arith.divf %280, %281 : vector<32x32xf32>
    %cst_128 = arith.constant dense<0.000000e+00> : vector<32x32xf32>
    %283 = tpu.matmul %8, %282, %cst_128 {dimension_numbers = #tpu.dot_dimension_numbers<[1], [0], [0], [1], [0, 0, 1, 1], [], []>} : vector<32x32xf32>, vector<32x32xf32>, vector<32x32xf32> -> vector<32x32xf32>
    %cst_129 = arith.constant dense<0xFF800000> : vector<32xf32>
    %284 = vector.multi_reduction <maximumf>, %283, %cst_129 [0] : vector<32x32xf32> to vector<32xf32>
    %285 = vector.shape_cast %284 : vector<32xf32> to vector<1x32xf32>
    %286 = vector.broadcast %285 : vector<1x32xf32> to vector<32x32xf32>
    %287 = arith.subf %283, %286 : vector<32x32xf32>
    %288 = math.exp %287 : vector<32x32xf32>
    %cst_130 = arith.constant dense<0.000000e+00> : vector<32xf32>
    %289 = vector.multi_reduction <add>, %288, %cst_130 [0] : vector<32x32xf32> to vector<32xf32>
    %290 = vector.shape_cast %289 : vector<32xf32> to vector<1x32xf32>
    %291 = tpu.reciprocal %290 {approx = true} : vector<1x32xf32> -> vector<1x32xf32>
    %292 = vector.broadcast %291 : vector<1x32xf32> to vector<32x32xf32>
    %293 = arith.mulf %288, %292 : vector<32x32xf32>
    %c0_131 = arith.constant 0 : index
    %c0_132 = arith.constant 0 : index
    %c0_133 = arith.constant 0 : index
    %294 = vector.load %arg12[%c0_131, %c0_132, %c0_133] : memref<3x32x32xf32, #tpu.memory_space<vmem>>, vector<1x32x32xf32>
    %295 = vector.shape_cast %294 : vector<1x32x32xf32> to vector<32x32xf32>
    %296 = arith.mulf %295, %293 : vector<32x32xf32>
    %cst_134 = arith.constant dense<0.000000e+00> : vector<32x16xf32>
    %297 = tpu.matmul %296, %235, %cst_134 {dimension_numbers = #tpu.dot_dimension_numbers<[0], [0], [1], [1], [0, 1, 1, 1], [], []>} : vector<32x32xf32>, vector<32x16xf32>, vector<32x16xf32> -> vector<32x16xf32>
    %c96 = arith.constant 96 : index
    %c0_135 = arith.constant 0 : index
    %298 = vector.load %arg24[%c96, %c0_135] : memref<128x48xf32, #tpu.memory_space<vmem>>, vector<32x16xf32>
    tpu.vector_store %arg24[%c96, %c0_135], %297 {strides = array<i32>} : memref<128x48xf32, #tpu.memory_space<vmem>>, vector<32x16xf32>,
    %c1_136 = arith.constant 1 : index
    %c0_137 = arith.constant 0 : index
    %c0_138 = arith.constant 0 : index
    %299 = vector.load %arg12[%c1_136, %c0_137, %c0_138] : memref<3x32x32xf32, #tpu.memory_space<vmem>>, vector<1x32x32xf32>
    %300 = vector.shape_cast %299 : vector<1x32x32xf32> to vector<32x32xf32>
    %301 = arith.mulf %300, %293 : vector<32x32xf32>
    %cst_139 = arith.constant dense<0.000000e+00> : vector<32x16xf32>
    %302 = tpu.matmul %301, %235, %cst_139 {dimension_numbers = #tpu.dot_dimension_numbers<[0], [0], [1], [1], [0, 1, 1, 1], [], []>} : vector<32x32xf32>, vector<32x16xf32>, vector<32x16xf32> -> vector<32x16xf32>
    %c96_140 = arith.constant 96 : index
    %c16_141 = arith.constant 16 : index
    %303 = vector.load %arg24[%c96_140, %c16_141] : memref<128x48xf32, #tpu.memory_space<vmem>>, vector<32x16xf32>
    tpu.vector_store %arg24[%c96_140, %c16_141], %302 {strides = array<i32>} : memref<128x48xf32, #tpu.memory_space<vmem>>, vector<32x16xf32>,
    %c2_142 = arith.constant 2 : index
    %c0_143 = arith.constant 0 : index
    %c0_144 = arith.constant 0 : index
    %304 = vector.load %arg12[%c2_142, %c0_143, %c0_144] : memref<3x32x32xf32, #tpu.memory_space<vmem>>, vector<1x32x32xf32>
    %305 = vector.shape_cast %304 : vector<1x32x32xf32> to vector<32x32xf32>
    %306 = arith.mulf %305, %293 : vector<32x32xf32>
    %cst_145 = arith.constant dense<0.000000e+00> : vector<32x16xf32>
    %307 = tpu.matmul %306, %235, %cst_145 {dimension_numbers = #tpu.dot_dimension_numbers<[0], [0], [1], [1], [0, 1, 1, 1], [], []>} : vector<32x32xf32>, vector<32x16xf32>, vector<32x16xf32> -> vector<32x16xf32>
    %c96_146 = arith.constant 96 : index
    %c32_147 = arith.constant 32 : index
    %308 = vector.load %arg24[%c96_146, %c32_147] : memref<128x48xf32, #tpu.memory_space<vmem>>, vector<32x16xf32>
    tpu.vector_store %arg24[%c96_146, %c32_147], %307 {strides = array<i32>} : memref<128x48xf32, #tpu.memory_space<vmem>>, vector<32x16xf32>,
    %c0_148 = arith.constant 0 : index
    %c0_149 = arith.constant 0 : index
    %309 = vector.load %arg24[%c0_148, %c0_149] : memref<128x48xf32, #tpu.memory_space<vmem>>, vector<128x48xf32>
    %310 = arith.truncf %309 : vector<128x48xf32> to vector<128x48xbf16>
    %c0_150 = arith.constant 0 : index
    %c0_151 = arith.constant 0 : index
    %311 = vector.load %arg13[%c0_150, %c0_151] : memref<48x64xbf16, #tpu.memory_space<vmem>>, vector<48x64xbf16>
    %cst_152 = arith.constant dense<0.000000e+00> : vector<128x64xf32>
    %312 = tpu.matmul %310, %311, %cst_152 {dimension_numbers = #tpu.dot_dimension_numbers<[1], [0], [0], [1], [0, 0, 1, 1], [], []>} : vector<128x48xbf16>, vector<48x64xbf16>, vector<128x64xf32> -> vector<128x64xf32>
    %cst_153 = arith.constant 0.000000e+00 : f32
    %313 = vector.broadcast %cst_153 : f32 to vector<128x64xf32>
    %314 = arith.maximumf %312, %313 : vector<128x64xf32>
    %315 = arith.truncf %314 : vector<128x64xf32> to vector<128x64xbf16>
    %c0_154 = arith.constant 0 : index
    %c0_155 = arith.constant 0 : index
    %316 = vector.load %arg14[%c0_154, %c0_155] : memref<64x64xbf16, #tpu.memory_space<vmem>>, vector<64x64xbf16>
    %cst_156 = arith.constant dense<0.000000e+00> : vector<128x64xf32>
    %317 = tpu.matmul %315, %316, %cst_156 {dimension_numbers = #tpu.dot_dimension_numbers<[1], [0], [0], [1], [0, 0, 1, 1], [], []>} : vector<128x64xbf16>, vector<64x64xbf16>, vector<128x64xf32> -> vector<128x64xf32>
    %c0_157 = arith.constant 0 : index
    %c0_158 = arith.constant 0 : index
    %318 = vector.load %arg15[%c0_157, %c0_158] : memref<1x64xf32, #tpu.memory_space<vmem>>, vector<1x64xf32>
    %319 = vector.broadcast %318 : vector<1x64xf32> to vector<128x64xf32>
    %320 = arith.addf %317, %319 : vector<128x64xf32>
    %321 = arith.truncf %0 : vector<128x16xf32> to vector<128x16xbf16>
    %c0_159 = arith.constant 0 : index
    %c0_160 = arith.constant 0 : index
    %322 = vector.load %arg16[%c0_159, %c0_160] : memref<16x64xbf16, #tpu.memory_space<vmem>>, vector<16x64xbf16>
    %cst_161 = arith.constant dense<0.000000e+00> : vector<128x64xf32>
    %323 = tpu.matmul %321, %322, %cst_161 {dimension_numbers = #tpu.dot_dimension_numbers<[1], [0], [0], [1], [0, 0, 1, 1], [], []>} : vector<128x16xbf16>, vector<16x64xbf16>, vector<128x64xf32> -> vector<128x64xf32>
    %c0_162 = arith.constant 0 : index
    %c0_163 = arith.constant 0 : index
    %324 = vector.load %arg17[%c0_162, %c0_163] : memref<1x64xf32, #tpu.memory_space<vmem>>, vector<1x64xf32>
    %325 = vector.broadcast %324 : vector<1x64xf32> to vector<128x64xf32>
    %326 = arith.addf %323, %325 : vector<128x64xf32>
    %327 = arith.addf %320, %326 : vector<128x64xf32>
    %cst_164 = arith.constant 0.000000e+00 : f32
    %328 = vector.broadcast %cst_164 : f32 to vector<128x64xf32>
    %329 = arith.maximumf %327, %328 : vector<128x64xf32>
    %c0_165 = arith.constant 0 : index
    %c0_166 = arith.constant 0 : index
    %330 = vector.load %arg18[%c0_165, %c0_166] : memref<64x64xf32, #tpu.memory_space<vmem>>, vector<64x64xf32>
    %cst_167 = arith.constant dense<0.000000e+00> : vector<128x64xf32>
    %331 = tpu.matmul %329, %330, %cst_167 {dimension_numbers = #tpu.dot_dimension_numbers<[1], [0], [0], [1], [0, 0, 1, 1], [], []>} : vector<128x64xf32>, vector<64x64xf32>, vector<128x64xf32> -> vector<128x64xf32>
    %332 = arith.subf %329, %331 : vector<128x64xf32>
    %333 = arith.mulf %332, %332 : vector<128x64xf32>
    %c0_168 = arith.constant 0 : index
    %c0_169 = arith.constant 0 : index
    %334 = vector.load %arg18[%c0_168, %c0_169] : memref<64x64xf32, #tpu.memory_space<vmem>>, vector<64x64xf32>
    %cst_170 = arith.constant dense<0.000000e+00> : vector<128x64xf32>
    %335 = tpu.matmul %333, %334, %cst_170 {dimension_numbers = #tpu.dot_dimension_numbers<[1], [0], [0], [1], [0, 0, 1, 1], [], []>} : vector<128x64xf32>, vector<64x64xf32>, vector<128x64xf32> -> vector<128x64xf32>
    %cst_171 = arith.constant 9.99999974E-6 : f32
    %336 = vector.broadcast %cst_171 : f32 to vector<128x64xf32>
    %337 = arith.addf %335, %336 : vector<128x64xf32>
    %338 = math.rsqrt %337 : vector<128x64xf32>
    %339 = arith.mulf %332, %338 : vector<128x64xf32>
    %c0_172 = arith.constant 0 : index
    %c0_173 = arith.constant 0 : index
    %340 = vector.load %arg19[%c0_172, %c0_173] : memref<1x64xf32, #tpu.memory_space<vmem>>, vector<1x64xf32>
    %341 = vector.broadcast %340 : vector<1x64xf32> to vector<128x64xf32>
    %342 = arith.mulf %339, %341 : vector<128x64xf32>
    %c0_174 = arith.constant 0 : index
    %c0_175 = arith.constant 0 : index
    %343 = vector.load %arg20[%c0_174, %c0_175] : memref<1x64xf32, #tpu.memory_space<vmem>>, vector<1x64xf32>
    %344 = vector.broadcast %343 : vector<1x64xf32> to vector<128x64xf32>
    %345 = arith.addf %342, %344 : vector<128x64xf32>
    %c0_176 = arith.constant 0 : index
    %c0_177 = arith.constant 0 : index
    %346 = vector.load %arg21[%c0_176, %c0_177] : memref<4x64xbf16, #tpu.memory_space<vmem>>, vector<4x64xbf16>
    %347 = arith.truncf %345 : vector<128x64xf32> to vector<128x64xbf16>
    %cst_178 = arith.constant dense<0.000000e+00> : vector<4x128xf32>
    %348 = tpu.matmul %346, %347, %cst_178 {dimension_numbers = #tpu.dot_dimension_numbers<[1], [1], [0], [0], [0, 0, 1, 0], [], []>} : vector<4x64xbf16>, vector<128x64xbf16>, vector<4x128xf32> -> vector<4x128xf32>
    %c0_179 = arith.constant 0 : index
    %c0_180 = arith.constant 0 : index
    %349 = vector.load %arg22[%c0_179, %c0_180] : memref<4x1xf32, #tpu.memory_space<vmem>>, vector<4x1xf32>
    %350 = vector.broadcast %349 : vector<4x1xf32> to vector<4x128xf32>
    %351 = arith.addf %348, %350 : vector<4x128xf32>
    %c0_181 = arith.constant 0 : index
    %c0_182 = arith.constant 0 : index
    %c0_183 = arith.constant 0 : index
    %352 = vector.load %arg23[%c0_181, %c0_182, %c0_183] : memref<1x4x128xf32, #tpu.memory_space<vmem>>, vector<1x4x128xf32>
    %353 = vector.shape_cast %352 : vector<1x4x128xf32> to vector<4x128xf32>
    %354 = vector.shape_cast %351 : vector<4x128xf32> to vector<1x4x128xf32>
    tpu.vector_store %arg23[%c0_181, %c0_182, %c0_183], %354 {strides = array<i32>} : memref<1x4x128xf32, #tpu.memory_space<vmem>>, vector<1x4x128xf32>,
    return
  }
  func.func @transform_0(%arg0: i32) -> (i32, i32) {
    %c0_i32 = arith.constant 0 : i32
    %c0_i32_0 = arith.constant 0 : i32
    return %arg0, %c0_i32 : i32, i32
  }
  func.func @transform_1(%arg0: i32) -> (i32, i32) {
    %c0_i32 = arith.constant 0 : i32
    %c0_i32_0 = arith.constant 0 : i32
    %c0_i32_1 = arith.constant 0 : i32
    return %c0_i32, %c0_i32_0 : i32, i32
  }
  func.func @transform_2(%arg0: i32) -> (i32, i32) {
    %c0_i32 = arith.constant 0 : i32
    %c0_i32_0 = arith.constant 0 : i32
    %c0_i32_1 = arith.constant 0 : i32
    return %c0_i32, %c0_i32_0 : i32, i32
  }
  func.func @transform_3(%arg0: i32) -> (i32, i32) {
    %c0_i32 = arith.constant 0 : i32
    %c0_i32_0 = arith.constant 0 : i32
    %c0_i32_1 = arith.constant 0 : i32
    return %c0_i32, %c0_i32_0 : i32, i32
  }
  func.func @transform_4(%arg0: i32) -> (i32, i32) {
    %c0_i32 = arith.constant 0 : i32
    %c0_i32_0 = arith.constant 0 : i32
    %c0_i32_1 = arith.constant 0 : i32
    return %c0_i32, %c0_i32_0 : i32, i32
  }
  func.func @transform_5(%arg0: i32) -> (i32, i32) {
    %c0_i32 = arith.constant 0 : i32
    %c0_i32_0 = arith.constant 0 : i32
    %c0_i32_1 = arith.constant 0 : i32
    return %c0_i32, %c0_i32_0 : i32, i32
  }
  func.func @transform_6(%arg0: i32) -> (i32, i32) {
    %c0_i32 = arith.constant 0 : i32
    %c0_i32_0 = arith.constant 0 : i32
    %c0_i32_1 = arith.constant 0 : i32
    return %c0_i32, %c0_i32_0 : i32, i32
  }
  func.func @transform_7(%arg0: i32) -> (i32, i32) {
    %c0_i32 = arith.constant 0 : i32
    %c0_i32_0 = arith.constant 0 : i32
    %c0_i32_1 = arith.constant 0 : i32
    return %c0_i32, %c0_i32_0 : i32, i32
  }
  func.func @transform_8(%arg0: i32) -> (i32, i32) {
    %c0_i32 = arith.constant 0 : i32
    %c0_i32_0 = arith.constant 0 : i32
    %c0_i32_1 = arith.constant 0 : i32
    return %c0_i32, %c0_i32_0 : i32, i32
  }
  func.func @transform_9(%arg0: i32) -> (i32, i32) {
    %c0_i32 = arith.constant 0 : i32
    %c0_i32_0 = arith.constant 0 : i32
    %c0_i32_1 = arith.constant 0 : i32
    return %c0_i32, %c0_i32_0 : i32, i32
  }
  func.func @transform_10(%arg0: i32) -> (i32, i32) {
    %c0_i32 = arith.constant 0 : i32
    %c0_i32_0 = arith.constant 0 : i32
    %c0_i32_1 = arith.constant 0 : i32
    return %c0_i32, %c0_i32_0 : i32, i32
  }
  func.func @transform_11(%arg0: i32) -> (i32, i32, i32) {
    %c0_i32 = arith.constant 0 : i32
    %c0_i32_0 = arith.constant 0 : i32
    %c0_i32_1 = arith.constant 0 : i32
    %c0_i32_2 = arith.constant 0 : i32
    return %c0_i32, %c0_i32_0, %c0_i32_1 : i32, i32, i32
  }
  func.func @transform_12(%arg0: i32) -> (i32, i32) {
    %c0_i32 = arith.constant 0 : i32
    %c0_i32_0 = arith.constant 0 : i32
    %c0_i32_1 = arith.constant 0 : i32
    return %c0_i32, %c0_i32_0 : i32, i32
  }
  func.func @transform_13(%arg0: i32) -> (i32, i32) {
    %c0_i32 = arith.constant 0 : i32
    %c0_i32_0 = arith.constant 0 : i32
    %c0_i32_1 = arith.constant 0 : i32
    return %c0_i32, %c0_i32_0 : i32, i32
  }
  func.func @transform_14(%arg0: i32) -> (i32, i32) {
    %c0_i32 = arith.constant 0 : i32
    %c0_i32_0 = arith.constant 0 : i32
    %c0_i32_1 = arith.constant 0 : i32
    return %c0_i32, %c0_i32_0 : i32, i32
  }
  func.func @transform_15(%arg0: i32) -> (i32, i32) {
    %c0_i32 = arith.constant 0 : i32
    %c0_i32_0 = arith.constant 0 : i32
    %c0_i32_1 = arith.constant 0 : i32
    return %c0_i32, %c0_i32_0 : i32, i32
  }
  func.func @transform_16(%arg0: i32) -> (i32, i32) {
    %c0_i32 = arith.constant 0 : i32
    %c0_i32_0 = arith.constant 0 : i32
    %c0_i32_1 = arith.constant 0 : i32
    return %c0_i32, %c0_i32_0 : i32, i32
  }
  func.func @transform_17(%arg0: i32) -> (i32, i32) {
    %c0_i32 = arith.constant 0 : i32
    %c0_i32_0 = arith.constant 0 : i32
    %c0_i32_1 = arith.constant 0 : i32
    return %c0_i32, %c0_i32_0 : i32, i32
  }
  func.func @transform_18(%arg0: i32) -> (i32, i32) {
    %c0_i32 = arith.constant 0 : i32
    %c0_i32_0 = arith.constant 0 : i32
    %c0_i32_1 = arith.constant 0 : i32
    return %c0_i32, %c0_i32_0 : i32, i32
  }
  func.func @transform_19(%arg0: i32) -> (i32, i32) {
    %c0_i32 = arith.constant 0 : i32
    %c0_i32_0 = arith.constant 0 : i32
    %c0_i32_1 = arith.constant 0 : i32
    return %c0_i32, %c0_i32_0 : i32, i32
  }
  func.func @transform_20(%arg0: i32) -> (i32, i32) {
    %c0_i32 = arith.constant 0 : i32
    %c0_i32_0 = arith.constant 0 : i32
    %c0_i32_1 = arith.constant 0 : i32
    return %c0_i32, %c0_i32_0 : i32, i32
  }
  func.func @transform_21(%arg0: i32) -> (i32, i32) {
    %c0_i32 = arith.constant 0 : i32
    %c0_i32_0 = arith.constant 0 : i32
    %c0_i32_1 = arith.constant 0 : i32
    return %c0_i32, %c0_i32_0 : i32, i32
  }
  func.func @transform_22(%arg0: i32) -> (i32, i32, i32) {
    %c0_i32 = arith.constant 0 : i32
    %c0_i32_0 = arith.constant 0 : i32
    %c0_i32_1 = arith.constant 0 : i32
    return %arg0, %c0_i32, %c0_i32_0 : i32, i32, i32
  }
}

</mosaic_0001>

<bundles_post_ra>
// kernel: tpu_custom_call.1
= control target key start
LH: loop header
LB: loop body
LE: loop exit
PB: predicated region body
PF: predicated region fallthrough
CT: control target
= control target key end

     0   :  { %s11050_s0 = inlined_call_operand.vmem [shape: f32[256,16], index: 0, kind: input, shape index: {}]   ;;  %s11051_s1 = inlined_call_operand.vmem [shape: f32[1,32], index: 1, kind: input, shape index: {}]   ;;  %s11052_s2 = inlined_call_operand.vmem [shape: f32[2,32], index: 2, kind: input, shape index: {}]   ;;  %s11053_s3 = inlined_call_operand.vmem [shape: f32[16,8], index: 3, kind: input, shape index: {}]   ;;  %s11054_s4 = inlined_call_operand.vmem [shape: f32[8,8], index: 4, kind: input, shape index: {}]   ;;  %s11055_s5 = inlined_call_operand.vmem [shape: f32[8,8], index: 5, kind: input, shape index: {}]   ;;  %s11056_s6 = inlined_call_operand.vmem [shape: f32[8,1], index: 6, kind: input, shape index: {}]   ;;  %s11057_s7 = inlined_call_operand.vmem [shape: f32[16,8], index: 7, kind: input, shape index: {}]   ;;  %s11058_s8 = inlined_call_operand.vmem [shape: f32[16,8], index: 8, kind: input, shape index: {}]   ;;  %s11059_s9 = inlined_call_operand.vmem [shape: f32[32,32], index: 9, kind: input, shape index: {}]   ;;  %s11060_s10 = inlined_call_operand.vmem [shape: f32[32,32], index: 10, kind: input, shape index: {}]   ;;  %s11061_s11 = inlined_call_operand.vmem [shape: f32[3,32,32], index: 11, kind: input, shape index: {}]   ;;  %s11062_s12 = inlined_call_operand.vmem [shape: bf16[48,64], index: 12, kind: input, shape index: {}]   ;;  %s11063_s13 = inlined_call_operand.vmem [shape: bf16[64,64], index: 13, kind: input, shape index: {}]   ;;  %s11064_s14 = inlined_call_operand.vmem [shape: f32[1,64], index: 14, kind: input, shape index: {}]   ;;  %s11065_s15 = inlined_call_operand.vmem [shape: bf16[16,64], index: 15, kind: input, shape index: {}]   ;;  %s11066_s16 = inlined_call_operand.vmem [shape: f32[1,64], index: 16, kind: input, shape index: {}]   ;;  %s11067_s17 = inlined_call_operand.vmem [shape: f32[64,64], index: 17, kind: input, shape index: {}]   ;;  %s11068_s18 = inlined_call_operand.vmem [shape: f32[1,64], index: 18, kind: input, shape index: {}]   ;;  %s11069_s19 = inlined_call_operand.vmem [shape: f32[1,64], index: 19, kind: input, shape index: {}]   ;;  %s11070_s20 = inlined_call_operand.vmem [shape: bf16[4,64], index: 20, kind: input, shape index: {}]   ;;  %s11071_s21 = inlined_call_operand.vmem [shape: f32[4,1], index: 21, kind: input, shape index: {}]   ;;  %s11072_s22 = inlined_call_operand.hbm [shape: f32[2,4,128], index: 22, kind: output, shape index: {}]  }
   0x1   :  { %11102 = sst [smem:[#allocation33_spill]] %s11050_s0 }
   0x2   :  { %11103 = sst [smem:[#allocation34_spill]] %s11051_s1 }
   0x3   :  { %11104 = sst [smem:[#allocation35_spill]] %s11052_s2 }
   0x4   :  { %11105 = sst [smem:[#allocation36_spill]] %s11053_s3 }
   0x5   :  { %11106 = sst [smem:[#allocation37_spill]] %s11054_s4 }
   0x6   :  { %11107 = sst [smem:[#allocation38_spill]] %s11055_s5 }
   0x7   :  { %11108 = sst [smem:[#allocation39_spill]] %s11056_s6 }
   0x8   :  { %11109 = sst [smem:[#allocation40_spill]] %s11057_s7 }
   0x9   :  { %11110 = sst [smem:[#allocation41_spill]] %s11058_s8 }
   0xa   :  { %11111 = sst [smem:[#allocation42_spill]] %s11059_s9 }
   0xb   :  { %27 = vsyncpa [#allocation4], 0 }
   0xc   :  { %29 = vsyncpa [#allocation4 + $0x1], 0  ;;  %s9480_s3 = smov 0   ;;  %s9482_s28 = smov 0  }
   0xd   :  { %s9484_s29 = smov 0   ;;  %s9486_s30 = smov 0  }
   0xe LB: > { %11112 = sst [smem:[#allocation6_spill]] %s9344_s3  ;;  %s9501_s4 = sadd.s32 4294967295, %s9356_s30   ;;  %s9356_s30 = sphi %s9486_s30, %s11191_s30   ;;  %s9352_s29 = sphi %s9484_s29, %s11193_s29   ;;  %s9348_s28 = sphi %s9482_s28, %s11195_s28   ;;  %s9344_s3 = sphi %s9480_s3, %s11194_s3  }
   0xf   : > { %11113 = sst [smem:[#allocation7_spill]] %s9352_s29  ;;  %s7374_s0 = sadd.s32 4294967294, %s9356_s30  }
  0x10   : > { %s9505_s23 = sadd.s32 1, %s9356_s30   ;;  %s509_s1 = sadd.s32 1, %s9352_s29 }
  0x11   : > { %11114 = sst [smem:[#allocation8_spill]] %s9505_s23  ;;  %s506_s5 = ssub.s32 %s9356_s30, %s9505_s23 }
  0x12   : > { %p519_p0 = scmp.ne.s32.totalorder %s9352_s29, %s9348_s28  ;;  %p507_p1 = scmp.eq.s32.totalorder %s506_s5, 0 }
  0x13   : > { %p520_p2 = scmp.eq.s32.totalorder %s9501_s4, 1  ;;  %p525_p3 = scmp.ne.s32.totalorder %s9348_s28, %s9344_s3 }
  0x14   : > { %p526_p4 = scmp.eq.s32.totalorder %s7374_s0, 1  ;;  %p7377_p7 = scmp.ge.s32.totalorder %s9356_s30, 1 }
  0x15   : > { %s9516_s24 = scalar_select %p507_p1, %s9352_s29, %s509_s1  }
  0x16   : > { %p9518_p5 = por %p520_p2, %p519_p0  ;;  %p9522_p6 = por %p526_p4, %p525_p3 }
  0x17   : > { %11115 = sst [smem:[#allocation9_spill]] %s9516_s24  ;;  %p616_p8 = scmp.lt.s32.totalorder %s9356_s30, 3 }
  0x18   : > { %s11117_s25 = scalar_select %p9522_p6, 1, 0 }
  0x19   : > { %p617_p9 = pnand %p7377_p7, %p616_p8 }
  0x1a   : > { %11118 = sst [smem:[#allocation10_spill]] %s11117_s25 }
  0x1b   : > { %620 = sbr.rel (%p617_p9) target bundleno = 10272 (0x2820), region = 108 }
  0x22   : > { %s7379_s26 = sshll.u32 %s9501_s4, 4  ;;  %s11119_s5 = sld [smem:[#allocation36_spill]]  ;;  %vm1091_vm0 = vcmask 261120   ;;  %vm718_vm1 = vcmask 130048   ;;  %v11082_v23 = vmov 0.0|0.0   ;;  %v9359_v31 = vmov 0  }
  0x23   : > { %s11120_s23 = sld [smem:[#allocation34_spill]]  ;;  %p679_p10 = scmp.lt.s32.totalorder %s7379_s26, 31  ;;  %9094 = vset.pattern.permute.xlu1 %v9359_v31  ;;  %vm9360_vm2 = vmmov 0   ;;  %v11084_v47 = vmov 0.0   ;;  %vm1277_vm3 = vcmask 64512   ;;  %vm2200_vm5 = vcmask 261248  }
  0x24   : > { %s11121_s0 = sld [smem:[#allocation33_spill]]  ;;  %s11135_s27 = sld [smem:[#allocation38_spill]]  ;;  %vm9780_vm4 = vmpackc.low %vm1277_vm3, %vm1277_vm3  ;;  %vm2359_vm6 = vcmask 392448   ;;  %vm6231_vm7 = vcmask 392192   ;;  %vm6416_vm8 = vcmask 523264  }
  0x25   : > { %s11197_s26 = smov (!%p679_p10, %s7379_s26), 31  ;;  %s11122_s8 = sld [smem:[#allocation41_spill]] }
  0x26   : > { %s7380_s25 = sshll.u32 %s11197_s26, 3  ;;  %s11136_s24 = sld [smem:[#allocation39_spill]] }
  0x27   : > { %s11140_s7 = sld [smem:[#allocation40_spill]]  ;;  %s11142_s9 = sld [smem:[#allocation42_spill]] }
  0x28   : > { %v716_v0 = vld [vmem:[%s11119_s5] sm:$0xff]  ;;  %v717_v1 = vld [vmem:[%s11119_s5 + $0x8] sm:$0xff]  ;;  %s11100_s26 = smov 16   ;;  %s11098_s2 = smov 32  }
  0x29   : > { %v9538_v2 = vld [vmem:[%s11120_s23] sm:$0x1]  ;;  %v8743_v3 = vpack.c.bf16 %v717_v1, %v716_v0  ;;  %s7687_s29 = sshll.u32 %s9501_s4, 6 }
  0x2a   : > { %s9545_s1 = scalar_lea.vmem %s11121_s0, %s7380_s25  ;;  %s11133_s0 = sld [smem:[#allocation35_spill]] }
  0x2b   : > { %8744 = vmatprep.subr.bf16.mxu0 %v8743_v3  ;;  %8999 = vmatprep.subr.bf16.mxu1 %v8743_v3  ;;  %v9548_v4 = vld [vmem:[%s9545_s1] sm:$0xff]  ;;  %v9552_v5 = vld [vmem:[%s9545_s1 + $0x8] sm:$0xff]  ;;  %v9557_v6 = vld [vmem:[%s9545_s1 + $0x10] sm:$0xff]  ;;  %s11134_s25 = sld [smem:[#allocation37_spill]] }
  0x2c   : > { %8746 = vmatpush3.bf16.msra.mxu0 %v8743_v3  ;;  %9000 = vmatpush3.bf16.msra.mxu1 %v8743_v3  ;;  %v9564_v7 = vld [vmem:[%s9545_s1 + $0x20] sm:$0xff]  ;;  %v9568_v8 = vld [vmem:[%s9545_s1 + $0x18] sm:$0xff]  ;;  %v9573_v9 = vld [vmem:[%s9545_s1 + $0x28] sm:$0xff] }
  0x2d   : > { %8123 = vmatprep.subr.msk.mxu0 %vm1091_vm0, %v9538_v2  ;;  %1059 = vxpose.xlu0.b32.start [1/4] (short) (narrow) %v9548_v4, 16  ;;  %v697_v10 = vld [vmem:[%s9545_s1 + $0x60] sm:$0xff]  ;;  %v698_v11 = vld [vmem:[%s9545_s1 + $0x68] sm:$0xff]  ;;  %v699_v12 = vld [vmem:[%s9545_s1 + $0x70] sm:$0xff] }
  0x2e   : > { %8071 = vmatprep.mubr.msk.f32.mxu0 %vm718_vm1, %v9548_v4  ;;  %v912_v13 = vld [vmem:[%s11122_s8] sm:$0xff]  ;;  %v913_v14 = vld [vmem:[%s11122_s8 + $0x8] sm:$0xff]  ;;  %v9589_v15 = vld [vmem:[%s9545_s1 + $0x30] sm:$0xff]  ;;  %8089 = vmatprep.mubr.msk.f32.mxu1 %vm718_vm1, %v697_v10 }
  0x2f   : > { %8072 = vmatmul.mubr.msk.f32.vlgmr.msra.gmra.mrb[0].mxu0 %vm718_vm1, %v9552_v5  ;;  %v8747_v16 = vpack.c.bf16 %v913_v14, %v912_v13  ;;  %8090 = vmatmul.mubr.msk.f32.vlgmr.msra.gmra.mrb[0].mxu1 %vm718_vm1, %v698_v11  ;;  %v9600_v17 = vld [vmem:[%s9545_s1 + $0x38] sm:$0xff]  ;;  %v9603_v18 = vld [vmem:[%s9545_s1 + $0x40] sm:$0xff]  ;;  %v9611_v19 = vld [vmem:[%s9545_s1 + $0x48] sm:$0xff]  ;;  %v1181_v13 = vlaneseq }
  0x30   : > { %8074 = vmatprep.mubr.msk.f32.mxu0 %vm718_vm1, %v9557_v6  ;;  %8092 = vmatprep.mubr.msk.f32.mxu1 %vm718_vm1, %v699_v12  ;;  %v9614_v20 = vld [vmem:[%s9545_s1 + $0x50] sm:$0xff]  ;;  %v9622_v21 = vld [vmem:[%s9545_s1 + $0x58] sm:$0xff] }
  0x31   : > { %1060 = vxpose.xlu0.b32.cont [2/4] (short) (narrow) %v9552_v5, 16  ;;  %8748 = vmatprep.subr.bf16.mxu1 %v8747_v16  ;;  %v700_v22 = vld [vmem:[%s9545_s1 + $0x78] sm:$0xff]  ;;  %v1182_v14 = vshrl.u32 %v1181_v13, 7 }
  0x32   : > { %8750 = vmatpush3.bf16.msra.mxu1 %v8747_v16 }
  0x33   : > { %8075 = vmatmul.mubr.msk.f32.gmra.mrb[2].mxu0 %vm718_vm1, %v9568_v8  ;;  %8093 = vmatmul.mubr.msk.f32.gmra.mrb[2].mxu1 %vm718_vm1, %v700_v22  ;;  %v1183_v16 = vsub.s32 0, %v1182_v14 }
  0x34   : > { %8077 = vmatprep.mubr.msk.f32.mxu0 %vm718_vm1, %v9564_v7  ;;  %8099 = vmatprep.mubr.msk.f32.mxu1 %vm718_vm1, %v9548_v4 }
  0x35   : > { %8124 = vmatpush3.xpose.msk.msra.mxu0 %vm1091_vm0, %v9538_v2  ;;  %1061 = vxpose.xlu0.b32.cont [3/4] (short) (narrow) %v9557_v6, 16 }
  0x36   : > { %8751 = vmatprep.subr.bf16.mxu1 %v11082_v23  ;;  %8139 = vmatprep.subr.mxu0 %v11084_v47 }
  0x37   : > { %8078 = vmatmul.mubr.msk.f32.gmra.mrb[4].mxu0 %vm718_vm1, %v9573_v9  ;;  %8100 = vmatmul.mubr.msk.f32.vlgmr.msra.gmra.mrb[4].mxu1 %vm718_vm1, %v9552_v5 }
  0x38   : > { %8080 = vmatprep.mubr.msk.f32.mxu0 %vm718_vm1, %v9589_v15  ;;  %8102 = vmatprep.mubr.msk.f32.mxu1 %vm718_vm1, %v9557_v6 }
  0x39   : > { %1062 = vxpose.xlu0.b32.end [4/4] (short) (narrow) %v9568_v8, 16 }
  0x3b   : > { %8081 = vmatmul.mubr.msk.f32.gmra.mrb[6].mxu0 %vm718_vm1, %v9600_v17  ;;  %8103 = vmatmul.mubr.msk.f32.gmra.mrb[6].mxu1 %vm718_vm1, %v9568_v8 }
  0x3c   : > { %8083 = vmatprep.mubr.msk.f32.mxu0 %vm718_vm1, %v9603_v18  ;;  %8105 = vmatprep.mubr.msk.f32.mxu1 %vm718_vm1, %v9564_v7 }
  0x3d   : > { %2364 = vxpose.xlu0.b32.start [1/4] (short) (narrow) %v9564_v7, 16 }
  0x3f   : > { %8084 = vmatmul.mubr.msk.f32.gmra.mrb[8].mxu0 %vm718_vm1, %v9611_v19  ;;  %8106 = vmatmul.mubr.msk.f32.gmra.mrb[8].mxu1 %vm718_vm1, %v9573_v9 }
  0x40   : > { %8086 = vmatprep.mubr.msk.f32.mxu0 %vm718_vm1, %v9614_v20  ;;  %8108 = vmatprep.mubr.msk.f32.mxu1 %vm718_vm1, %v9589_v15 }
  0x41   : > { %2365 = vxpose.xlu0.b32.cont [2/4] (short) (narrow) %v9573_v9, 16 }
  0x43   : > { %8087 = vmatmul.mubr.msk.f32.gmra.mrb[10].mxu0 %vm718_vm1, %v9622_v21  ;;  %8109 = vmatmul.mubr.msk.f32.gmra.mrb[10].mxu1 %vm718_vm1, %v9600_v17 }
  0x44   : > { %8111 = vmatprep.mubr.msk.f32.mxu1 %vm718_vm1, %v9603_v18 }
  0x45   : > { %2366 = vxpose.xlu0.b32.cont [3/4] (short) (narrow) %v9589_v15, 16 }
  0x47   : > { %8112 = vmatmul.mubr.msk.f32.gmra.mrb[12].mxu1 %vm718_vm1, %v9611_v19 }
  0x48   : > { %8114 = vmatprep.mubr.msk.f32.mxu1 %vm718_vm1, %v9614_v20 }
  0x49   : > { %2367 = vxpose.xlu0.b32.end [4/4] (short) (narrow) %v9600_v17, 16 }
  0x4b   : > { %8115 = vmatmul.mubr.msk.f32.gmra.mrb[14].mxu1 %vm718_vm1, %v9622_v21 }
  0x4c   : > { %8117 = vmatprep.mubr.msk.f32.mxu1 %vm718_vm1, %v697_v10 }
  0x4f   : > { %8118 = vmatmul.mubr.msk.f32.gmra.mrb[16].mxu1 %vm718_vm1, %v698_v11 }
  0x50   : > { %8120 = vmatprep.mubr.msk.f32.mxu1 %vm718_vm1, %v699_v12 }
  0x53   : > { %8121 = vmatmul.mubr.msk.f32.gmra.mrb[18].mxu1 %vm718_vm1, %v700_v22  ;;  %v1194_v22 = vsub.s32 1, %v1182_v14 }
  0x54   : > { %8136 = vmatprep.mubr.msk.f32.mxu1 %vm9360_vm2, %v11084_v47 }
  0x72   : > { %9095 = vset.pattern.permute.xlu0 %v9359_v31 }
  0xad   : > { %v1075_v24 = vpop.trf.xlu0 }
  0xae   : > { %8125 = vmatprep.mubr.msk.f32.mxu0 %vm1091_vm0, %v1075_v24  ;;  %v702_v24 = vld [vmem:[%s11133_s0] sm:$0x3] }
  0xb1   : > { %v1076_v25 = vpop.trf.xlu0 }
  0xb2   : > { %8126 = vmatmul.mubr.msk.f32.vlgmr.msra.gmra.mrb[12].mxu0 %vm1091_vm0, %v1076_v25 }
  0xb3   : > { %8141 = vmatprep.mubr.msk.f32.mxu0 %vm9360_vm2, %v11084_v47 }
 0x102   : > { %v8073_v26 = vpop.f32.mrb[0].mxu0  ;;  %v9690_v48 = vpop.f32.mrb[0].mxu1 }
 0x103   : > { %v833_v27 = vpop.f32.mrb[1].mxu0  ;;  %11123 = vst [vmem:[#allocation11_spill] sm:$0xff] %v9690_v48  ;;  %v9694_v49 = vpop.f32.mrb[1].mxu1 }
 0x104   : > { %v8752_v28 = vpack.c.bf16 %v8073_v26, %v833_v27  ;;  %11124 = vst [vmem:[#allocation12_spill] sm:$0xff] %v9694_v49  ;;  %v9737_v26 = vrot.slane %v702_v24, %v1183_v16  ;;  %v9739_v27 = vrot.slane %v702_v24, %v1194_v22  ;;  %v9754_v24 = vld [vmem:[%s11135_s27] sm:$0xff] }
 0x106   : > { %v8076_v29 = vpop.f32.mrb[2].mxu0  ;;  %8753 = vmatpush3.bf16.msra.mxu1 %v8752_v28  ;;  %v9698_v51 = vpop.f32.mrb[2].mxu1 }
 0x107   : > { %v843_v30 = vpop.f32.mrb[3].mxu0  ;;  %8754 = vmatprep.subr.bf16.mxu1 %v11082_v23  ;;  %11125 = vst [vmem:[#allocation13_spill] sm:$0xff] %v9698_v51  ;;  %v9700_v52 = vpop.f32.mrb[3].mxu1 }
 0x108   : > { %v8755_v32 = vpack.c.bf16 %v8076_v29, %v843_v30  ;;  %11126 = vst [vmem:[#allocation14_spill] sm:$0xff] %v9700_v52 }
 0x10a   : > { %v9663_v33 = vpop.f32.mrb[4].mxu0  ;;  %8756 = vmatpush3.bf16.msra.mxu1 %v8755_v32  ;;  %v9704_v54 = vpop.f32.mrb[4].mxu1  ;;  %v9748_v32 = vld [vmem:[%s11134_s25] sm:$0xff] }
 0x10b   : > { %v9665_v34 = vpop.f32.mrb[5].mxu0  ;;  %v980_v55 = vpop.f32.mrb[5].mxu1 }
 0x10e   : > { %v9669_v36 = vpop.f32.mrb[6].mxu0  ;;  %v9706_v56 = vpop.f32.mrb[6].mxu1 }
 0x10f   : > { %v9671_v37 = vpop.f32.mrb[7].mxu0  ;;  %v9708_v57 = vpop.f32.mrb[7].mxu1 }
 0x112   : > { %v9675_v39 = vpop.f32.mrb[8].mxu0  ;;  %v9710_v58 = vpop.f32.mrb[8].mxu1 }
 0x113   : > { %v9677_v40 = vpop.f32.mrb[9].mxu0  ;;  %v9712_v59 = vpop.f32.mrb[9].mxu1 }
 0x116   : > { %v9681_v42 = vpop.f32.mrb[10].mxu0  ;;  %v9714_v60 = vpop.f32.mrb[10].mxu1 }
 0x117   : > { %v9683_v43 = vpop.f32.mrb[11].mxu0  ;;  %v9716_v61 = vpop.f32.mrb[11].mxu1 }
 0x11a   : > { %v9718_v62 = vpop.f32.mrb[12].mxu1 }
 0x11b   : > { %v9720_v63 = vpop.f32.mrb[13].mxu1 }
 0x11e   : > { %v9722_v0 = vpop.f32.mrb[14].mxu1 }
 0x11f   : > { %11127 = vst [vmem:[#allocation15_spill] sm:$0xff] %v9722_v0  ;;  %v9724_v1 = vpop.f32.mrb[15].mxu1 }
 0x120   : > { %11128 = vst [vmem:[#allocation16_spill] sm:$0xff] %v9724_v1 }
 0x122   : > { %v9726_v3 = vpop.f32.mrb[16].mxu1 }
 0x123   : > { %11129 = vst [vmem:[#allocation17_spill] sm:$0xff] %v9726_v3  ;;  %v9728_v10 = vpop.f32.mrb[17].mxu1 }
 0x124   : > { %11130 = vst [vmem:[#allocation18_spill] sm:$0xff] %v9728_v10 }
 0x126   : > { %v9730_v11 = vpop.f32.mrb[18].mxu1 }
 0x127   : > { %11131 = vst [vmem:[#allocation19_spill] sm:$0xff] %v9730_v11  ;;  %v9732_v12 = vpop.f32.mrb[19].mxu1 }
 0x128   : > { %11132 = vst [vmem:[#allocation20_spill] sm:$0xff] %v9732_v12 }
 0x185   : > { %v8127_v45 = vpop.f32.mrb[12].mxu0 }
 0x186   : > { %v1167_v46 = vpop.f32.mrb[13].mxu0 }
 0x187   : > { %1178 = vperm.xlu1 %9094, %v1167_v46  }
 0x18b   : > { %1189 = vperm.xlu1 %9094, %v8127_v45  }
 0x206   : > { %v1179_v25 = vpop.permute.xlu1 %1178 }
 0x207   : > { %v1185_v29 = vmul.f32 %v9737_v26, %v1179_v25  ;;  %v9764_v25 = vld [vmem:[%s11136_s24] sm:$0xff] }
 0x20a   : > { %v1190_v28 = vpop.permute.xlu1 %1189 }
 0x20b   : > { %v1196_v30 = vmul.f32 %v9739_v27, %v1190_v28 }
 0x20d   : > { %v1197_v31 = vadd.f32 %v1196_v30, %v1185_v29 }
 0x20f   : > { %8137 = vmatmul.mubr.msk.f32.vlgmr.msra.gmra.mrb[20].mxu1 %vm1091_vm0, %v1197_v31 }
 0x210   : > { %8146 = vmatprep.mubr.msk.f32.mxu1 %vm1277_vm3, %v980_v55 }
 0x2e2   : > { %v1267_v45 = vpop.f32.mrb[20].mxu1 }
 0x2e3   : > { %v1268_v46 = vadd.f32 %v1267_v45, %v9748_v32  ;;  %v8138_v13 = vpop.f32.mrb[21].mxu1 }
 0x2e5   : > { %v7417_v14 = vmul.f32 -1.442695, %v1268_v46 }
 0x2e7   : > { %9104 = vpow2.f32 %v7417_v14 }
 0x2f1   : > { %v9105_v16 = vpop.eup %9104 }
 0x2f2   : > { %v1274_v22 = vadd.f32 1.0, %v9105_v16 }
 0x2f4   : > { %9106 = vrcp.f32 %v1274_v22 }
 0x2fe   : > { %v9107_v55 = vpop.eup %9106 }
 0x2ff   : > { %8140 = vmatpush3.msra.mxu0 %v9107_v55 }
 0x300   : > { %8142 = vmatmul.mubr.msk.f32.vlgmr.msra.gmra.mrb[14].mxu0 %vm1277_vm3, %v9754_v24  ;;  %8152 = vmatprep.subr.mxu0 %v11084_v47 }
 0x301   : > { %8154 = vmatprep.mubr.msk.f32.mxu0 %vm9360_vm2, %v11084_v47  ;;  %8153 = vmatpush3.msra.mxu0 %v9764_v25 }
 0x3d3   : > { %v1347_v28 = vpop.f32.mrb[14].mxu0 }
 0x3d4   : > { %v1351_v29 = vsel %vm1277_vm3, %v1347_v28, -inf  ;;  %v8143_v30 = vpop.f32.mrb[15].mxu0 }
 0x3d5   : > { %v1352_v31 = vrot.slane %v1351_v29, 4 }
 0x3d7   : > { %v1353_v45 = vmax.f32 %v1351_v29, %v1352_v31 }
 0x3d9   : > { %v1354_v46 = vrot.slane %v1353_v45, 2 }
 0x3db   : > { %v1355_v13 = vmax.f32 %v1353_v45, %v1354_v46  ;;  %v9817_v46 = vpack.c.bf16 %v9568_v8, %v9557_v6 }
 0x3dd   : > { %v1356_v14 = vrot.slane %v1355_v13, 1  ;;  %11141 = vst [vmem:[#allocation22_spill] sm:$0xff] %v9817_v46 }
 0x3df   : > { %v1357_v16 = vmax.f32 %v1355_v13, %v1356_v14 }
 0x3e1   : > { %v1358_v22 = vsub.f32 %v1347_v28, %v1357_v16  ;;  %v9843_v16 = vld [vmem:[%s11142_s9] sm:$0xff] }
 0x3e3   : > { %v1359_v55 = vmul.f32 1.442695, %v1358_v22 }
 0x3e5   : > { %9108 = vpow2.f32 %v1359_v55 }
 0x3ef   : > { %v9109_v53 = vpop.eup %9108 }
 0x3f0   : > { %v1361_v50 = vsel %vm1277_vm3, %v9109_v53, 0.0 }
 0x3f1   : > { %v1362_v44 = vrot.slane %v1361_v50, 4 }
 0x3f3   : > { %v1363_v41 = vadd.f32 %v1362_v44, %v1361_v50 }
 0x3f5   : > { %v1364_v38 = vrot.slane %v1363_v41, 2 }
 0x3f7   : > { %v1365_v35 = vadd.f32 %v1364_v38, %v1363_v41 }
 0x3f9   : > { %v1366_v23 = vrot.slane %v1365_v35, 1 }
 0x3fb   : > { %v1367_v47 = vadd.f32 %v1366_v23, %v1365_v35 }
 0x3fd   : > { %9110 = vrcp.f32 %v1367_v47 }
 0x407   : > { %v9111_v30 = vpop.eup %9110 }
 0x408   : > { %v1369_v11 = vmul.f32 %v9111_v30, %v9109_v53 }
 0x40a   : > { %8144 = vmatprep.subr.mxu1 %v1369_v11  ;;  %8155 = vmatmul.mubr.msk.f32.vlgmr.msra.gmra.mrb[16].mxu0 %vm1277_vm3, %v1369_v11 }
 0x40b   : > { %8145 = vmatpush3.msra.mxu1 %v1369_v11  ;;  %8161 = vmatprep.mubr.msk.f32.mxu0 %vm718_vm1, %v9548_v4  ;;  %v9805_v11 = vld [vmem:[%s11140_s7 + $0x8] sm:$0xff] }
 0x40c   : > { %8147 = vmatmul.mubr.msk.f32.vlgmr.msra.gmra.mrb[22].mxu1 %vm1277_vm3, %v9704_v54 }
 0x40d   : > { %8149 = vmatprep.mubr.msk.f32.mxu1 %vm1277_vm3, %v9708_v57  ;;  %v9800_v57 = vld [vmem:[%s11140_s7] sm:$0xff] }
 0x410   : > { %8150 = vmatmul.mubr.msk.f32.gmra.mrb[24].mxu1 %vm1277_vm3, %v9706_v56  ;;  %v9792_v56 = vpack.c.bf16 %v9552_v5, %v9548_v4 }
 0x412   : > { %11139 = vst [vmem:[#allocation21_spill] sm:$0xff] %v9792_v56 }
 0x4dd   : > { %v1536_v23 = vpop.f32.mrb[16].mxu0 }
 0x4de   : > { %1542 = vperm.xlu1 %9094, %v1536_v23   ;;  %v8156_v35 = vpop.f32.mrb[17].mxu0 }
 0x4df   : > { %v8148_v38 = vpop.f32.mrb[22].mxu1  ;;  %v9850_v35 = vld [vmem:[%s11142_s9 + $0x18] sm:$0xff] }
 0x4e0   : > { %v1448_v41 = vpop.f32.mrb[23].mxu1 }
 0x4e1   : > { %v8761_v47 = vpack.c.bf16 %v8148_v38, %v1448_v41  ;;  %v9855_v41 = vld [vmem:[%s11142_s9 + $0x10] sm:$0xff] }
 0x4e3   : > { %v8151_v50 = vpop.f32.mrb[24].mxu1  ;;  %8763 = vmatprep.subr.msk.bf16.mxu1 %vm9780_vm4, %v8761_v47 }
 0x4e4   : > { %v1458_v53 = vpop.f32.mrb[25].mxu1  ;;  %8766 = vmatpush3.bf16.xpose.msk.msra.mxu1 %vm9780_vm4, %v8761_v47 }
 0x4e5   : > { %v8767_v54 = vpack.c.bf16 %v8151_v50, %v1458_v53 }
 0x4e7   : > { %8769 = vmatprep.subr.msk.bf16.mxu1 %vm9780_vm4, %v8767_v54 }
 0x4ec   : > { %8772 = vmatpush3.bf16.xpose.msk.msra.mxu1 %vm9780_vm4, %v8767_v54 }
 0x4ed   : > { %8790 = vmatprep.subr.bf16.mxu1 %v9792_v56 }
 0x55d   : > { %v1543_v28 = vpop.permute.xlu1 %1542 }
 0x55e   : > { %v1545_v29 = vmul.f32 %v1543_v28, %v9800_v57  ;;  %v1546_v4 = vmul.f32 %v1543_v28, %v9805_v11 }
 0x560   : > { %v8757_v31 = vpack.c.bf16 %v1546_v4, %v1545_v29 }
 0x562   : > { %8758 = vmatprep.subr.bf16.mxu0 %v8757_v31 }
 0x563   : > { %8760 = vmatpush3.bf16.msra.mxu0 %v8757_v31 }
 0x566   : > { %8162 = vmatmul.mubr.msk.f32.vlgmr.msra.gmra.mrb[18].mxu0 %vm718_vm1, %v9552_v5 }
 0x567   : > { %8164 = vmatprep.mubr.msk.f32.mxu0 %vm718_vm1, %v9557_v6  ;;  %v9831_v6 = vld [vmem:[%s11060_s10] sm:$0xff] }
 0x56a   : > { %8165 = vmatmul.mubr.msk.f32.gmra.mrb[20].mxu0 %vm718_vm1, %v9568_v8  ;;  %v9838_v8 = vld [vmem:[%s11142_s9 + $0x8] sm:$0xff] }
 0x56b   : > { %8189 = vmatprep.mubr.msk.f32.mxu0 %vm1091_vm0, %v9831_v6 }
 0x639   : > { %v8163_v45 = vpop.f32.mrb[18].mxu0 }
 0x63a   : > { %v1613_v13 = vpop.f32.mrb[19].mxu0 }
 0x63b   : > { %8175 = vmatprep.mubr.msk.f32.mxu1 %vm1277_vm3, %v1613_v13 }
 0x63c   : > { %8176 = vmatmul.mubr.msk.f32.vlgmr.msra.gmra.mrb[26].mxu1 %vm1277_vm3, %v8163_v45 }
 0x63d   : > { %v8166_v14 = vpop.f32.mrb[20].mxu0  ;;  %8792 = vmatpush3.bf16.msra.mxu1 %v9792_v56 }
 0x63e   : > { %v1623_v5 = vpop.f32.mrb[21].mxu0  ;;  %8794 = vmatprep.subr.bf16.mxu1 %v9817_v46 }
 0x63f   : > { %8178 = vmatprep.mubr.msk.f32.mxu1 %vm1277_vm3, %v1623_v5 }
 0x640   : > { %8179 = vmatmul.mubr.msk.f32.gmra.mrb[28].mxu1 %vm1277_vm3, %v8166_v14 }
 0x641   : > { %8796 = vmatpush3.bf16.msra.mxu1 %v9817_v46 }
 0x642   : > { %8237 = vmatprep.subr.msk.mxu1 %vm1091_vm0, %v9538_v2 }
 0x70f   : > { %v8177_v22 = vpop.f32.mrb[26].mxu1 }
 0x710   : > { %v1728_v55 = vadd.f32 %v8177_v22, %v9838_v8  ;;  %v1722_v30 = vpop.f32.mrb[27].mxu1 }
 0x711   : > { %v1723_v23 = vadd.f32 %v1722_v30, %v9843_v16 }
 0x712   : > { %v7437_v38 = vmul.f32 -1.442695, %v1728_v55 }
 0x713   : > { %v7436_v47 = vmul.f32 -1.442695, %v1723_v23  ;;  %v8180_v50 = vpop.f32.mrb[28].mxu1 }
 0x714   : > { %9112 = vpow2.f32 %v7437_v38  ;;  %v1738_v53 = vadd.f32 %v8180_v50, %v9850_v35  ;;  %v1732_v54 = vpop.f32.mrb[29].mxu1 }
 0x715   : > { %9114 = vpow2.f32 %v7436_v47  ;;  %v1733_v28 = vadd.f32 %v1732_v54, %v9855_v41 }
 0x716   : > { %v7439_v29 = vmul.f32 -1.442695, %v1738_v53 }
 0x717   : > { %v7438_v4 = vmul.f32 -1.442695, %v1733_v28  ;;  %v9862_v28 = vld [vmem:[%s11060_s10 + $0x8] sm:$0xff] }
 0x718   : > { %9116 = vpow2.f32 %v7439_v29  ;;  %v9867_v29 = vld [vmem:[%s11060_s10 + $0x10] sm:$0xff] }
 0x719   : > { %9118 = vpow2.f32 %v7438_v4  ;;  %v9877_v4 = vld [vmem:[%s11060_s10 + $0x18] sm:$0xff] }
 0x71e   : > { %v9113_v31 = vpop.eup %9112 }
 0x71f   : > { %v9115_v45 = vpop.eup %9114  ;;  %v1754_v13 = vadd.f32 1.0, %v9113_v31 }
 0x720   : > { %v1753_v14 = vadd.f32 1.0, %v9115_v45 }
 0x721   : > { %9120 = vrcp.f32 %v1754_v13 }
 0x722   : > { %v9117_v5 = vpop.eup %9116  ;;  %9122 = vrcp.f32 %v1753_v14 }
 0x723   : > { %v9119_v22 = vpop.eup %9118  ;;  %v1756_v55 = vadd.f32 1.0, %v9117_v5 }
 0x724   : > { %v1755_v30 = vadd.f32 1.0, %v9119_v22 }
 0x725   : > { %9124 = vrcp.f32 %v1756_v55 }
 0x726   : > { %9126 = vrcp.f32 %v1755_v30 }
 0x72b   : > { %v9121_v23 = vpop.eup %9120 }
 0x72c   : > { %v9123_v38 = vpop.eup %9122 }
 0x72d   : > { %v8773_v47 = vpack.c.bf16 %v9121_v23, %v9123_v38 }
 0x72f   : > { %v9125_v50 = vpop.eup %9124  ;;  %8774 = vmatprep.subr.bf16.mxu0 %v8773_v47 }
 0x730   : > { %v9127_v53 = vpop.eup %9126  ;;  %8776 = vmatpush3.bf16.msra.mxu0 %v8773_v47 }
 0x731   : > { %v8777_v54 = vpack.c.bf16 %v9125_v50, %v9127_v53 }
 0x733   : > { %8778 = vmatprep.subr.bf16.mxu0 %v8777_v54 }
 0x734   : > { %8780 = vmatpush3.bf16.msra.mxu0 %v8777_v54 }
 0x735   : > { %8782 = vmatprep.subr.bf16.mxu0 %v9792_v56 }
 0x737   : > { %8190 = vmatmul.mubr.msk.f32.vlgmr.msra.gmra.mrb[22].mxu0 %vm1091_vm0, %v9862_v28 }
 0x738   : > { %8192 = vmatprep.mubr.msk.f32.mxu0 %vm1091_vm0, %v9867_v29  ;;  %8784 = vmatpush3.bf16.msra.mxu0 %v9792_v56 }
 0x739   : > { %8786 = vmatprep.subr.bf16.mxu0 %v9817_v46 }
 0x73b   : > { %8193 = vmatmul.mubr.msk.f32.gmra.mrb[24].mxu0 %vm1091_vm0, %v9877_v4 }
 0x73c   : > { %8788 = vmatpush3.bf16.msra.mxu0 %v9817_v46 }
 0x73d   : > { %8798 = vmatprep.subr.bf16.mxu0 %v9792_v56 }
 0x80a   : > { %v8191_v31 = vpop.f32.mrb[22].mxu0 }
 0x80b   : > { %v1863_v45 = vsel %vm1091_vm0, %v8191_v31, -inf  ;;  %v1843_v13 = vpop.f32.mrb[23].mxu0 }
 0x80c   : > { %v1862_v14 = vsel %vm1091_vm0, %v1843_v13, -inf }
 0x80d   : > { %v1866_v5 = vmax.f32 %v1862_v14, %v1863_v45 }
 0x80e   : > { %v8194_v22 = vpop.f32.mrb[24].mxu0 }
 0x80f   : > { %v1865_v55 = vsel %vm1091_vm0, %v8194_v22, -inf  ;;  %v1853_v30 = vpop.f32.mrb[25].mxu0 }
 0x810   : > { %v1864_v23 = vsel %vm1091_vm0, %v1853_v30, -inf }
 0x811   : > { %v1867_v38 = vmax.f32 %v1864_v23, %v1865_v55 }
 0x813   : > { %v1868_v47 = vmax.f32 %v1866_v5, %v1867_v38 }
 0x815   : > { %v1869_v50 = vrot.slane %v1868_v47, 4 }
 0x817   : > { %v1870_v53 = vmax.f32 %v1868_v47, %v1869_v50  ;;  %v9896_v50 = vld [vmem:[%s11061_s11 + $0x20] sm:$0xff] }
 0x819   : > { %v1871_v54 = vrot.slane %v1870_v53, 2 }
 0x81b   : > { %v1872_v12 = vmax.f32 %v1870_v53, %v1871_v54 }
 0x81d   : > { %v1873_v3 = vrot.slane %v1872_v12, 1 }
 0x81f   : > { %v1874_v10 = vmax.f32 %v1872_v12, %v1873_v3 }
 0x821   : > { %v1875_v52 = vsub.f32 %v1843_v13, %v1874_v10  ;;  %v1876_v51 = vsub.f32 %v8191_v31, %v1874_v10  ;;  %v1877_v49 = vsub.f32 %v1853_v30, %v1874_v10  ;;  %v1878_v48 = vsub.f32 %v8194_v22, %v1874_v10 }
 0x823   : > { %v1879_v0 = vmul.f32 1.442695, %v1875_v52  ;;  %v1881_v45 = vmul.f32 1.442695, %v1876_v51  ;;  %v1883_v14 = vmul.f32 1.442695, %v1877_v49 }
 0x824   : > { %v1885_v1 = vmul.f32 1.442695, %v1878_v48 }
 0x825   : > { %9128 = vpow2.f32 %v1879_v0 }
 0x826   : > { %9130 = vpow2.f32 %v1881_v45 }
 0x827   : > { %9132 = vpow2.f32 %v1883_v14 }
 0x828   : > { %9134 = vpow2.f32 %v1885_v1 }
 0x82f   : > { %v9129_v55 = vpop.eup %9128 }
 0x830   : > { %v9131_v5 = vpop.eup %9130  ;;  %v1887_v23 = vsel %vm1091_vm0, %v9129_v55, 0.0 }
 0x831   : > { %v9133_v38 = vpop.eup %9132  ;;  %v1888_v47 = vsel %vm1091_vm0, %v9131_v5, 0.0 }
 0x832   : > { %v9135_v3 = vpop.eup %9134  ;;  %v1889_v12 = vadd.f32 %v1888_v47, %v1887_v23  ;;  %v1890_v31 = vsel %vm1091_vm0, %v9133_v38, 0.0  ;;  %v9902_v47 = vld [vmem:[%s11061_s11 + $0x28] sm:$0xff] }
 0x833   : > { %v1892_v51 = vsel %vm1091_vm0, %v9135_v3, 0.0 }
 0x834   : > { %v1891_v10 = vadd.f32 %v1890_v31, %v1889_v12  ;;  %v9908_v31 = vld [vmem:[%s11061_s11 + $0x30] sm:$0xff] }
 0x836   : > { %v1893_v49 = vadd.f32 %v1892_v51, %v1891_v10  ;;  %v11143_v51 = vmov 0.0  }
 0x838   : > { %v1894_v48 = vrot.slane %v1893_v49, 4 }
 0x83a   : > { %v1895_v52 = vadd.f32 %v1894_v48, %v1893_v49  ;;  %v2380_v48 = vpop.trf.xlu0 }
 0x83c   : > { %v1896_v0 = vrot.slane %v1895_v52, 2 }
 0x83e   : > { %v1897_v13 = vadd.f32 %v1896_v0, %v1895_v52  ;;  %v2381_v0 = vpop.trf.xlu0 }
 0x840   : > { %v1898_v1 = vrot.slane %v1897_v13, 1 }
 0x842   : > { %v1899_v22 = vadd.f32 %v1898_v1, %v1897_v13 }
 0x844   : > { %9136 = vrcp.f32 %v1899_v22 }
 0x84e   : > { %v9137_v30 = vpop.eup %9136 }
 0x84f   : > { %v1901_v53 = vmul.f32 %v9137_v30, %v9129_v55  ;;  %v1902_v54 = vmul.f32 %v9137_v30, %v9131_v5  ;;  %v1903_v45 = vmul.f32 %v9137_v30, %v9133_v38  ;;  %v1904_v14 = vmul.f32 %v9137_v30, %v9135_v3  ;;  %v9914_v5 = vld [vmem:[%s11061_s11 + $0x38] sm:$0xff] }
 0x851   : > { %v2051_v23 = vmul.f32 %v9896_v50, %v1901_v53  ;;  %v2052_v12 = vmul.f32 %v9902_v47, %v1902_v54  ;;  %v2053_v55 = vmul.f32 %v9908_v31, %v1903_v45  ;;  %v2054_v38 = vmul.f32 %v9914_v5, %v1904_v14 }
 0x853   : > { %2055 = vxpose.xlu1.b32.start [1/4] (short) (narrow) %v2051_v23, 32 }
 0x857   : > { %2056 = vxpose.xlu1.b32.cont [2/4] (short) (narrow) %v2052_v12, 32  ;;  %v9939_v12 = vld [vmem:[%s11061_s11] sm:$0xff] }
 0x85b   : > { %2057 = vxpose.xlu1.b32.cont [3/4] (short) (narrow) %v2053_v55, 32  ;;  %v1909_v55 = vmul.f32 %v9939_v12, %v1901_v53 }
 0x85f   : > { %2058 = vxpose.xlu1.b32.end [4/4] (short) (narrow) %v2054_v38, 32  ;;  %v9945_v38 = vld [vmem:[%s11061_s11 + $0x8] sm:$0xff] }
 0x8d3   : > { %v2071_v3 = vpop.trf.xlu1 }
 0x8d4   : > { %8217 = vmatprep.mubr.msk.f32.mxu1 %vm1091_vm0, %v2071_v3  ;;  %v1910_v3 = vmul.f32 %v9945_v38, %v1902_v54 }
 0x8d7   : > { %v2072_v10 = vpop.trf.xlu1 }
 0x8d8   : > { %8218 = vmatmul.mubr.msk.f32.vlgmr.msra.gmra.mrb[30].mxu1 %vm1091_vm0, %v2072_v10  ;;  %v9951_v10 = vld [vmem:[%s11061_s11 + $0x10] sm:$0xff] }
 0x8d9   : > { %8238 = vmatpush3.xpose.msk.msra.mxu1 %vm1091_vm0, %v9538_v2 }
 0x8da   : > { %8253 = vmatprep.subr.mxu1 %v11143_v51 }
 0x8db   : > { %v2073_v49 = vpop.trf.xlu1 }
 0x8dc   : > { %8220 = vmatprep.mubr.msk.f32.mxu1 %vm1091_vm0, %v2073_v49  ;;  %v9956_v49 = vld [vmem:[%s11061_s11 + $0x40] sm:$0xff] }
 0x8df   : > { %v2074_v52 = vpop.trf.xlu1 }
 0x8e0   : > { %8221 = vmatmul.mubr.msk.f32.gmra.mrb[32].mxu1 %vm1091_vm0, %v2074_v52  ;;  %v9962_v52 = vld [vmem:[%s11061_s11 + $0x18] sm:$0xff] }
 0x8e1   : > { %8239 = vmatprep.mubr.msk.f32.mxu1 %vm1091_vm0, %v2380_v48  ;;  %v1911_v48 = vmul.f32 %v9951_v10, %v1903_v45 }
 0x8e4   : > { %8240 = vmatmul.mubr.msk.f32.vlgmr.msra.gmra.mrb[34].mxu1 %vm1091_vm0, %v2381_v0  ;;  %v2210_v0 = vmul.f32 %v9956_v49, %v1901_v53  ;;  %v9981_v53 = vld [vmem:[%s11061_s11 + $0x58] sm:$0xff] }
 0x8e5   : > { %8255 = vmatprep.mubr.msk.f32.mxu1 %vm9360_vm2, %v11143_v51 }
 0x9ab   : > { %v9928_v13 = vpop.f32.mrb[30].mxu1 }
 0x9ac   : > { %11144 = vst [vmem:[#allocation23_spill] sm:$0xff] %v9928_v13  ;;  %v9930_v2 = vpop.f32.mrb[31].mxu1 }
 0x9ad   : > { %11145 = vst [vmem:[#allocation24_spill] sm:$0xff] %v9930_v2 }
 0x9b3   : > { %v9932_v1 = vpop.f32.mrb[32].mxu1 }
 0x9b4   : > { %11146 = vst [vmem:[#allocation25_spill] sm:$0xff] %v9932_v1  ;;  %v9934_v22 = vpop.f32.mrb[33].mxu1 }
 0x9b5   : > { %11147 = vst [vmem:[#allocation26_spill] sm:$0xff] %v9934_v22 }
 0x9b7   : > { %v8241_v30 = vpop.f32.mrb[34].mxu1 }
 0x9b8   : > { %2486 = vperm.xlu1 %9094, %v8241_v30   ;;  %v2468_v23 = vpop.f32.mrb[35].mxu1  ;;  %v9968_v30 = vld [vmem:[%s11061_s11 + $0x48] sm:$0xff] }
 0x9b9   : > { %2479 = vperm.xlu0 %9095, %v2468_v23   ;;  %v1912_v23 = vmul.f32 %v9962_v52, %v1904_v14 }
 0x9d7   : > { %1913 = vxpose.xlu0.b32.start [1/4] (short) (narrow) %v1909_v55, 32  ;;  %v2211_v55 = vmul.f32 %v9968_v30, %v1902_v54 }
 0x9db   : > { %1914 = vxpose.xlu0.b32.cont [2/4] (short) (narrow) %v1910_v3, 32  ;;  %v9975_v3 = vld [vmem:[%s11061_s11 + $0x50] sm:$0xff] }
 0x9df   : > { %1915 = vxpose.xlu0.b32.cont [3/4] (short) (narrow) %v1911_v48, 32  ;;  %v2212_v48 = vmul.f32 %v9975_v3, %v1903_v45 }
 0x9e1   : > { %2214 = vxpose.xlu1.b32.start [1/4] (short) (narrow) %v2210_v0, 32  ;;  %v2213_v0 = vmul.f32 %v9981_v53, %v1904_v14  ;;  %v11148_v14 = vmov 0.0|0.0  }
 0x9e3   : > { %1916 = vxpose.xlu0.b32.end [4/4] (short) (narrow) %v1912_v23, 32 }
 0x9e5   : > { %2215 = vxpose.xlu1.b32.cont [2/4] (short) (narrow) %v2211_v55, 32 }
 0x9e9   : > { %2216 = vxpose.xlu1.b32.cont [3/4] (short) (narrow) %v2212_v48, 32 }
 0x9ed   : > { %2217 = vxpose.xlu1.b32.end [4/4] (short) (narrow) %v2213_v0, 32  ;;  %v11149_v0 = vpack.c.bf16 %v9663_v33, %v9665_v34 }
 0xa37   : > { %v2487_v22 = vpop.permute.xlu1 %2486 }
 0xa38   : > { %v2480_v23 = vpop.permute.xlu0 %2479 }
 0xa57   : > { %v1929_v1 = vpop.trf.xlu0 }
 0xa58   : > { %8203 = vmatprep.mubr.msk.f32.mxu0 %vm1091_vm0, %v1929_v1 }
 0xa5b   : > { %v1930_v54 = vpop.trf.xlu0 }
 0xa5c   : > { %8204 = vmatmul.mubr.msk.f32.vlgmr.msra.gmra.mrb[26].mxu0 %vm1091_vm0, %v1930_v54 }
 0xa5d   : > { %8800 = vmatpush3.bf16.msra.mxu0 %v9792_v56 }
 0xa5e   : > { %8802 = vmatprep.subr.bf16.mxu0 %v9817_v46 }
 0xa5f   : > { %v1931_v45 = vpop.trf.xlu0 }
 0xa60   : > { %8206 = vmatprep.mubr.msk.f32.mxu0 %vm1091_vm0, %v1931_v45  ;;  %v2489_v45 = vmul.f32 %v2487_v22, %v9739_v27 }
 0xa61   : > { %v2230_v55 = vpop.trf.xlu1  ;;  %8804 = vmatpush3.bf16.msra.mxu0 %v9817_v46  ;;  %v2482_v46 = vmul.f32 %v2480_v23, %v9737_v26 }
 0xa62   : > { %8805 = vmatprep.subr.bf16.mxu0 %v11148_v14 }
 0xa63   : > { %v1932_v48 = vpop.trf.xlu0  ;;  %v2490_v33 = vadd.f32 %v2489_v45, %v2482_v46 }
 0xa64   : > { %8207 = vmatmul.mubr.msk.f32.gmra.mrb[28].mxu0 %vm1091_vm0, %v1932_v48  ;;  %v11150_v48 = vpack.c.bf16 %v9669_v36, %v9671_v37 }
 0xa65   : > { %v2231_v1 = vpop.trf.xlu1  ;;  %8231 = vmatprep.mubr.msk.f32.mxu0 %vm1091_vm0, %v2230_v55 }
 0xa68   : > { %8232 = vmatmul.mubr.msk.f32.vlgmr.msra.gmra.mrb[30].mxu0 %vm1091_vm0, %v2231_v1 }
 0xa69   : > { %8807 = vmatpush3.bf16.msra.mxu0 %v11149_v0  ;;  %v2232_v54 = vpop.trf.xlu1 }
 0xa6a   : > { %8234 = vmatprep.mubr.msk.f32.mxu0 %vm1091_vm0, %v2232_v54  ;;  %8808 = vmatprep.subr.bf16.mxu0 %v11148_v14 }
 0xa6d   : > { %8810 = vmatpush3.bf16.msra.mxu0 %v11150_v48  ;;  %v2233_v55 = vpop.trf.xlu1 }
 0xa6e   : > { %8235 = vmatmul.mubr.msk.f32.gmra.mrb[32].mxu0 %vm1091_vm0, %v2233_v55  ;;  %8266 = vmatprep.subr.mxu0 %v11143_v51 }
 0xa6f   : > { %8250 = vmatprep.mubr.msk.f32.mxu0 %vm9360_vm2, %v11143_v51 }
 0xa72   : > { %8251 = vmatmul.mubr.msk.f32.vlgmr.msra.gmra.mrb[34].mxu0 %vm1091_vm0, %v2490_v33 }
 0xa73   : > { %8267 = vmatpush3.msra.mxu0 %v9764_v25  ;;  %8268 = vmatprep.mubr.msk.f32.mxu0 %vm9360_vm2, %v11143_v51 }
 0xb2f   : > { %v8205_v34 = vpop.f32.mrb[26].mxu0 }
 0xb30   : > { %2043 = vst.msk [vmem:[#allocation2 + $0x8] sm:$0xff] %vm718_vm1, %v8205_v34  ;;  %v2023_v36 = vpop.f32.mrb[27].mxu0 }
 0xb31   : > { %2042 = vst.msk [vmem:[#allocation2] sm:$0xff] %vm718_vm1, %v2023_v36 }
 0xb37   : > { %v8208_v37 = vpop.f32.mrb[28].mxu0 }
 0xb38   : > { %2045 = vst.msk [vmem:[#allocation2 + $0x18] sm:$0xff] %vm718_vm1, %v8208_v37  ;;  %v2033_v22 = vpop.f32.mrb[29].mxu0 }
 0xb39   : > { %2044 = vst.msk [vmem:[#allocation2 + $0x10] sm:$0xff] %vm718_vm1, %v2033_v22 }
 0xb3b   : > { %v10016_v46 = vpop.f32.mrb[30].mxu0 }
 0xb3c   : > { %11151 = vst [vmem:[#allocation27_spill] sm:$0xff] %v10016_v46  ;;  %v10018_v23 = vpop.f32.mrb[31].mxu0 }
 0xb3d   : > { %11152 = vst [vmem:[#allocation28_spill] sm:$0xff] %v10018_v23 }
 0xb41   : > { %v10020_v25 = vpop.f32.mrb[32].mxu0 }
 0xb42   : > { %11153 = vst [vmem:[#allocation29_spill] sm:$0xff] %v10020_v25  ;;  %v10022_v1 = vpop.f32.mrb[33].mxu0 }
 0xb43   : > { %11154 = vst [vmem:[#allocation30_spill] sm:$0xff] %v10022_v1 }
 0xb45   : > { %v2560_v0 = vpop.f32.mrb[34].mxu0 }
 0xb46   : > { %v2561_v54 = vadd.f32 %v2560_v0, %v9748_v32  ;;  %v8252_v45 = vpop.f32.mrb[35].mxu0 }
 0xb48   : > { %v7468_v48 = vmul.f32 -1.442695, %v2561_v54 }
 0xb4a   : > { %9138 = vpow2.f32 %v7468_v48 }
 0xb54   : > { %v9139_v55 = vpop.eup %9138 }
 0xb55   : > { %v2567_v33 = vadd.f32 1.0, %v9139_v55 }
 0xb57   : > { %9140 = vrcp.f32 %v2567_v33 }
 0xb61   : > { %v9141_v34 = vpop.eup %9140 }
 0xb62   : > { %8254 = vmatpush3.msra.mxu1 %v9141_v34 }
 0xb63   : > { %8256 = vmatmul.mubr.msk.f32.vlgmr.msra.gmra.mrb[36].mxu1 %vm1277_vm3, %v9754_v24 }
 0xb64   : > { %8260 = vmatprep.mubr.msk.f32.mxu1 %vm1277_vm3, %v9712_v59 }
 0xc36   : > { %v2636_v36 = vpop.f32.mrb[36].mxu1 }
 0xc37   : > { %v2640_v37 = vsel %vm1277_vm3, %v2636_v36, -inf  ;;  %v8257_v22 = vpop.f32.mrb[37].mxu1 }
 0xc38   : > { %v2641_v56 = vrot.slane %v2640_v37, 4 }
 0xc3a   : > { %v2642_v32 = vmax.f32 %v2640_v37, %v2641_v56 }
 0xc3c   : > { %v2643_v0 = vrot.slane %v2642_v32, 2 }
 0xc3e   : > { %v2644_v54 = vmax.f32 %v2642_v32, %v2643_v0 }
 0xc40   : > { %v2645_v45 = vrot.slane %v2644_v54, 1 }
 0xc42   : > { %v2646_v48 = vmax.f32 %v2644_v54, %v2645_v45 }
 0xc44   : > { %v2647_v55 = vsub.f32 %v2636_v36, %v2646_v48 }
 0xc46   : > { %v2648_v33 = vmul.f32 1.442695, %v2647_v55 }
 0xc48   : > { %9142 = vpow2.f32 %v2648_v33 }
 0xc52   : > { %v9143_v34 = vpop.eup %9142 }
 0xc53   : > { %v2650_v1 = vsel %vm1277_vm3, %v9143_v34, 0.0 }
 0xc54   : > { %v2651_v24 = vrot.slane %v2650_v1, 4 }
 0xc56   : > { %v2652_v23 = vadd.f32 %v2651_v24, %v2650_v1 }
 0xc58   : > { %v2653_v2 = vrot.slane %v2652_v23, 2 }
 0xc5a   : > { %v2654_v59 = vadd.f32 %v2653_v2, %v2652_v23 }
 0xc5c   : > { %v2655_v25 = vrot.slane %v2654_v59, 1 }
 0xc5e   : > { %v2656_v46 = vadd.f32 %v2655_v25, %v2654_v59 }
 0xc60   : > { %9144 = vrcp.f32 %v2656_v46 }
 0xc6a   : > { %v9145_v22 = vpop.eup %9144 }
 0xc6b   : > { %v2658_v13 = vmul.f32 %v9145_v22, %v9143_v34 }
 0xc6d   : > { %8258 = vmatprep.subr.mxu1 %v2658_v13  ;;  %8269 = vmatmul.mubr.msk.f32.vlgmr.msra.gmra.mrb[36].mxu0 %vm1277_vm3, %v2658_v13 }
 0xc6e   : > { %8259 = vmatpush3.msra.mxu1 %v2658_v13  ;;  %8275 = vmatprep.mubr.msk.f32.mxu0 %vm718_vm1, %v9564_v7 }
 0xc6f   : > { %8261 = vmatmul.mubr.msk.f32.vlgmr.msra.gmra.mrb[38].mxu1 %vm1277_vm3, %v9710_v58 }
 0xc70   : > { %8263 = vmatprep.mubr.msk.f32.mxu1 %vm1277_vm3, %v9716_v61 }
 0xc73   : > { %8264 = vmatmul.mubr.msk.f32.gmra.mrb[40].mxu1 %vm1277_vm3, %v9714_v60  ;;  %v10048_v60 = vpack.c.bf16 %v9573_v9, %v9564_v7 }
 0xc75   : > { %11155 = vst [vmem:[#allocation31_spill] sm:$0xff] %v10048_v60 }
 0xd40   : > { %v2825_v56 = vpop.f32.mrb[36].mxu0 }
 0xd41   : > { %2831 = vperm.xlu0 %9095, %v2825_v56   ;;  %v8270_v2 = vpop.f32.mrb[37].mxu0 }
 0xd42   : > { %v8262_v46 = vpop.f32.mrb[38].mxu1 }
 0xd43   : > { %v2737_v23 = vpop.f32.mrb[39].mxu1 }
 0xd44   : > { %v8815_v25 = vpack.c.bf16 %v8262_v46, %v2737_v23 }
 0xd46   : > { %v8265_v1 = vpop.f32.mrb[40].mxu1  ;;  %8817 = vmatprep.subr.msk.bf16.mxu1 %vm9780_vm4, %v8815_v25 }
 0xd47   : > { %v2747_v13 = vpop.f32.mrb[41].mxu1  ;;  %8820 = vmatpush3.bf16.xpose.msk.msra.mxu1 %vm9780_vm4, %v8815_v25 }
 0xd48   : > { %v8821_v58 = vpack.c.bf16 %v8265_v1, %v2747_v13 }
 0xd4a   : > { %8823 = vmatprep.subr.msk.bf16.mxu1 %vm9780_vm4, %v8821_v58 }
 0xd4f   : > { %8826 = vmatpush3.bf16.xpose.msk.msra.mxu1 %vm9780_vm4, %v8821_v58 }
 0xd50   : > { %8844 = vmatprep.subr.bf16.mxu1 %v10048_v60 }
 0xd5f   : > { %3637 = vxpose.xlu0.b32.start [1/4] (short) (narrow) %v9603_v18, 16 }
 0xd63   : > { %3638 = vxpose.xlu0.b32.cont [2/4] (short) (narrow) %v9611_v19, 16  ;;  %v10069_v19 = vpack.c.bf16 %v9600_v17, %v9589_v15 }
 0xd65   : > { %11156 = vst [vmem:[#allocation32_spill] sm:$0xff] %v10069_v19 }
 0xd67   : > { %3639 = vxpose.xlu0.b32.cont [3/4] (short) (narrow) %v9614_v20, 16 }
 0xd6b   : > { %3640 = vxpose.xlu0.b32.end [4/4] (short) (narrow) %v9622_v21, 16 }
 0xdc0   : > { %v2832_v61 = vpop.permute.xlu0 %2831 }
 0xdc1   : > { %v2834_v36 = vmul.f32 %v2832_v61, %v9800_v57  ;;  %v2835_v37 = vmul.f32 %v2832_v61, %v9805_v11 }
 0xdc3   : > { %v8811_v7 = vpack.c.bf16 %v2835_v37, %v2834_v36 }
 0xdc5   : > { %8812 = vmatprep.subr.bf16.mxu0 %v8811_v7 }
 0xdc6   : > { %8814 = vmatpush3.bf16.msra.mxu0 %v8811_v7 }
 0xdc9   : > { %8276 = vmatmul.mubr.msk.f32.vlgmr.msra.gmra.mrb[38].mxu0 %vm718_vm1, %v9573_v9 }
 0xdca   : > { %8278 = vmatprep.mubr.msk.f32.mxu0 %vm718_vm1, %v9589_v15  ;;  %v10081_v15 = vld [vmem:[%s11120_s23] sm:$0x1] }
 0xdcd   : > { %8279 = vmatmul.mubr.msk.f32.gmra.mrb[40].mxu0 %vm718_vm1, %v9600_v17 }
 0xdce   : > { %8303 = vmatprep.mubr.msk.f32.mxu0 %vm1091_vm0, %v9831_v6 }
 0xe9c   : > { %v8277_v18 = vpop.f32.mrb[38].mxu0 }
 0xe9d   : > { %v2902_v20 = vpop.f32.mrb[39].mxu0 }
 0xe9e   : > { %8289 = vmatprep.mubr.msk.f32.mxu1 %vm1277_vm3, %v2902_v20 }
 0xe9f   : > { %8290 = vmatmul.mubr.msk.f32.vlgmr.msra.gmra.mrb[42].mxu1 %vm1277_vm3, %v8277_v18 }
 0xea0   : > { %v8280_v9 = vpop.f32.mrb[40].mxu0  ;;  %8846 = vmatpush3.bf16.msra.mxu1 %v10048_v60 }
 0xea1   : > { %v2912_v21 = vpop.f32.mrb[41].mxu0  ;;  %8848 = vmatprep.subr.bf16.mxu1 %v10069_v19 }
 0xea2   : > { %8292 = vmatprep.mubr.msk.f32.mxu1 %vm1277_vm3, %v2912_v21 }
 0xea3   : > { %8293 = vmatmul.mubr.msk.f32.gmra.mrb[44].mxu1 %vm1277_vm3, %v8280_v9 }
 0xea4   : > { %8850 = vmatpush3.bf16.msra.mxu1 %v10069_v19 }
 0xea5   : > { %8351 = vmatprep.subr.msk.mxu1 %vm1091_vm0, %v10081_v15 }
 0xf72   : > { %v8291_v17 = vpop.f32.mrb[42].mxu1 }
 0xf73   : > { %v3017_v57 = vadd.f32 %v8291_v17, %v9838_v8  ;;  %v3011_v11 = vpop.f32.mrb[43].mxu1 }
 0xf74   : > { %v3012_v6 = vadd.f32 %v3011_v11, %v9843_v16 }
 0xf75   : > { %v7488_v32 = vmul.f32 -1.442695, %v3017_v57 }
 0xf76   : > { %v7487_v0 = vmul.f32 -1.442695, %v3012_v6  ;;  %v8294_v54 = vpop.f32.mrb[44].mxu1 }
 0xf77   : > { %9146 = vpow2.f32 %v7488_v32  ;;  %v3027_v45 = vadd.f32 %v8294_v54, %v9850_v35  ;;  %v3021_v48 = vpop.f32.mrb[45].mxu1 }
 0xf78   : > { %9148 = vpow2.f32 %v7487_v0  ;;  %v3022_v55 = vadd.f32 %v3021_v48, %v9855_v41 }
 0xf79   : > { %v7490_v33 = vmul.f32 -1.442695, %v3027_v45 }
 0xf7a   : > { %v7489_v34 = vmul.f32 -1.442695, %v3022_v55 }
 0xf7b   : > { %9150 = vpow2.f32 %v7490_v33 }
 0xf7c   : > { %9152 = vpow2.f32 %v7489_v34 }
 0xf81   : > { %v9147_v24 = vpop.eup %9146 }
 0xf82   : > { %v9149_v59 = vpop.eup %9148  ;;  %v3043_v8 = vadd.f32 1.0, %v9147_v24 }
 0xf83   : > { %v3042_v22 = vadd.f32 1.0, %v9149_v59 }
 0xf84   : > { %9154 = vrcp.f32 %v3043_v8 }
 0xf85   : > { %v9151_v16 = vpop.eup %9150  ;;  %9156 = vrcp.f32 %v3042_v22 }
 0xf86   : > { %v9153_v56 = vpop.eup %9152  ;;  %v3045_v2 = vadd.f32 1.0, %v9151_v16 }
 0xf87   : > { %v3044_v46 = vadd.f32 1.0, %v9153_v56 }
 0xf88   : > { %9158 = vrcp.f32 %v3045_v2 }
 0xf89   : > { %9160 = vrcp.f32 %v3044_v46 }
 0xf8e   : > { %v9155_v35 = vpop.eup %9154 }
 0xf8f   : > { %v9157_v23 = vpop.eup %9156 }
 0xf90   : > { %v8827_v25 = vpack.c.bf16 %v9155_v35, %v9157_v23 }
 0xf92   : > { %v9159_v41 = vpop.eup %9158  ;;  %8828 = vmatprep.subr.bf16.mxu0 %v8827_v25 }
 0xf93   : > { %v9161_v1 = vpop.eup %9160  ;;  %8830 = vmatpush3.bf16.msra.mxu0 %v8827_v25 }
 0xf94   : > { %v8831_v13 = vpack.c.bf16 %v9159_v41, %v9161_v1 }
 0xf96   : > { %8832 = vmatprep.subr.bf16.mxu0 %v8831_v13 }
 0xf97   : > { %8834 = vmatpush3.bf16.msra.mxu0 %v8831_v13 }
 0xf98   : > { %8836 = vmatprep.subr.bf16.mxu0 %v10048_v60 }
 0xf9a   : > { %8304 = vmatmul.mubr.msk.f32.vlgmr.msra.gmra.mrb[42].mxu0 %vm1091_vm0, %v9862_v28 }
 0xf9b   : > { %8306 = vmatprep.mubr.msk.f32.mxu0 %vm1091_vm0, %v9867_v29  ;;  %8838 = vmatpush3.bf16.msra.mxu0 %v10048_v60 }
 0xf9c   : > { %8840 = vmatprep.subr.bf16.mxu0 %v10069_v19 }
 0xf9e   : > { %8307 = vmatmul.mubr.msk.f32.gmra.mrb[44].mxu0 %vm1091_vm0, %v9877_v4 }
 0xf9f   : > { %8842 = vmatpush3.bf16.msra.mxu0 %v10069_v19 }
 0xfa0   : > { %8852 = vmatprep.subr.bf16.mxu0 %v10048_v60 }
0x106d   : > { %v8305_v58 = vpop.f32.mrb[42].mxu0 }
0x106e   : > { %v3140_v61 = vsel %vm1091_vm0, %v8305_v58, -inf  ;;  %v3120_v36 = vpop.f32.mrb[43].mxu0 }
0x106f   : > { %v3139_v28 = vsel %vm1091_vm0, %v3120_v36, -inf }
0x1070   : > { %v3143_v37 = vmax.f32 %v3139_v28, %v3140_v61 }
0x1071   : > { %v8308_v7 = vpop.f32.mrb[44].mxu0 }
0x1072   : > { %v3142_v29 = vsel %vm1091_vm0, %v8308_v7, -inf  ;;  %v3130_v18 = vpop.f32.mrb[45].mxu0 }
0x1073   : > { %v3141_v20 = vsel %vm1091_vm0, %v3130_v18, -inf }
0x1074   : > { %v3144_v9 = vmax.f32 %v3141_v20, %v3142_v29 }
0x1076   : > { %v3145_v21 = vmax.f32 %v3143_v37, %v3144_v9 }
0x1078   : > { %v3146_v4 = vrot.slane %v3145_v21, 4 }
0x107a   : > { %v3147_v17 = vmax.f32 %v3145_v21, %v3146_v4 }
0x107c   : > { %v3148_v57 = vrot.slane %v3147_v17, 2 }
0x107e   : > { %v3149_v11 = vmax.f32 %v3147_v17, %v3148_v57 }
0x1080   : > { %v3150_v6 = vrot.slane %v3149_v11, 1 }
0x1082   : > { %v3151_v32 = vmax.f32 %v3149_v11, %v3150_v6 }
0x1084   : > { %v3152_v0 = vsub.f32 %v3120_v36, %v3151_v32  ;;  %v3153_v54 = vsub.f32 %v8305_v58, %v3151_v32  ;;  %v3154_v45 = vsub.f32 %v3130_v18, %v3151_v32  ;;  %v3155_v48 = vsub.f32 %v8308_v7, %v3151_v32 }
0x1086   : > { %v3156_v55 = vmul.f32 1.442695, %v3152_v0  ;;  %v3158_v33 = vmul.f32 1.442695, %v3153_v54  ;;  %v3160_v34 = vmul.f32 1.442695, %v3154_v45 }
0x1087   : > { %v3162_v24 = vmul.f32 1.442695, %v3155_v48 }
0x1088   : > { %9162 = vpow2.f32 %v3156_v55 }
0x1089   : > { %9164 = vpow2.f32 %v3158_v33 }
0x108a   : > { %9166 = vpow2.f32 %v3160_v34 }
0x108b   : > { %9168 = vpow2.f32 %v3162_v24 }
0x1092   : > { %v9163_v59 = vpop.eup %9162 }
0x1093   : > { %v9165_v8 = vpop.eup %9164  ;;  %v3164_v22 = vsel %vm1091_vm0, %v9163_v59, 0.0 }
0x1094   : > { %v9167_v16 = vpop.eup %9166  ;;  %v3165_v56 = vsel %vm1091_vm0, %v9165_v8, 0.0 }
0x1095   : > { %v9169_v2 = vpop.eup %9168  ;;  %v3166_v46 = vadd.f32 %v3165_v56, %v3164_v22  ;;  %v3167_v35 = vsel %vm1091_vm0, %v9167_v16, 0.0 }
0x1096   : > { %v3169_v25 = vsel %vm1091_vm0, %v9169_v2, 0.0 }
0x1097   : > { %v3168_v23 = vadd.f32 %v3167_v35, %v3166_v46 }
0x1099   : > { %v3170_v41 = vadd.f32 %v3169_v25, %v3168_v23 }
0x109b   : > { %v3171_v1 = vrot.slane %v3170_v41, 4 }
0x109d   : > { %v3172_v13 = vadd.f32 %v3171_v1, %v3170_v41 }
0x109f   : > { %v3173_v58 = vrot.slane %v3172_v13, 2 }
0x10a1   : > { %v3174_v61 = vadd.f32 %v3173_v58, %v3172_v13 }
0x10a3   : > { %v3175_v36 = vrot.slane %v3174_v61, 1 }
0x10a5   : > { %v3176_v28 = vadd.f32 %v3175_v36, %v3174_v61 }
0x10a7   : > { %9170 = vrcp.f32 %v3176_v28 }
0x10b1   : > { %v9171_v37 = vpop.eup %9170 }
0x10b2   : > { %v3178_v7 = vmul.f32 %v9171_v37, %v9163_v59  ;;  %v3179_v29 = vmul.f32 %v9171_v37, %v9165_v8  ;;  %v3180_v18 = vmul.f32 %v9171_v37, %v9167_v16  ;;  %v3181_v20 = vmul.f32 %v9171_v37, %v9169_v2  ;;  %v10187_v37 = vld [vmem:[%s11134_s25] sm:$0xff] }
0x10b4   : > { %v3327_v9 = vmul.f32 %v9896_v50, %v3178_v7  ;;  %v3186_v21 = vmul.f32 %v3178_v7, %v9939_v12  ;;  %v3328_v4 = vmul.f32 %v9902_v47, %v3179_v29  ;;  %v3187_v17 = vmul.f32 %v3179_v29, %v9945_v38  ;;  %v3653_v38 = vpop.trf.xlu0 }
0x10b5   : > { %v3329_v57 = vmul.f32 %v9908_v31, %v3180_v18  ;;  %v3188_v11 = vmul.f32 %v3180_v18, %v9951_v10  ;;  %v3330_v6 = vmul.f32 %v9914_v5, %v3181_v20  ;;  %v3189_v50 = vmul.f32 %v3181_v20, %v9962_v52 }
0x10b6   : > { %3331 = vxpose.xlu1.b32.start [1/4] (short) (narrow) %v3327_v9, 32  ;;  %3190 = vxpose.xlu0.b32.start [1/4] (short) (narrow) %v3186_v21, 32  ;;  %v3484_v59 = vmul.f32 %v9956_v49, %v3178_v7  ;;  %v3485_v8 = vmul.f32 %v9968_v30, %v3179_v29  ;;  %v3486_v22 = vmul.f32 %v9975_v3, %v3180_v18 }
0x10b7   : > { %v3487_v16 = vmul.f32 %v9981_v53, %v3181_v20  ;;  %v11157_v49 = vpack.c.bf16 %v9675_v39, %v9677_v40  ;;  %v11158_v3 = vpack.c.bf16 %v9681_v42, %v9683_v43  ;;  %v10167_v40 = vld [vmem:[%s11136_s24] sm:$0xff] }
0x10b8   : > { %v3654_v10 = vpop.trf.xlu0 }
0x10ba   : > { %3332 = vxpose.xlu1.b32.cont [2/4] (short) (narrow) %v3328_v4, 32  ;;  %3191 = vxpose.xlu0.b32.cont [2/4] (short) (narrow) %v3187_v17, 32  ;;  %v10193_v4 = vld [vmem:[%s11135_s27] sm:$0xff] }
0x10be   : > { %3333 = vxpose.xlu1.b32.cont [3/4] (short) (narrow) %v3329_v57, 32  ;;  %3192 = vxpose.xlu0.b32.cont [3/4] (short) (narrow) %v3188_v11, 32 }
0x10c2   : > { %3334 = vxpose.xlu1.b32.end [4/4] (short) (narrow) %v3330_v6, 32  ;;  %3193 = vxpose.xlu0.b32.end [4/4] (short) (narrow) %v3189_v50, 32 }
0x1136   : > { %v3347_v12 = vpop.trf.xlu1  ;;  %v3206_v55 = vpop.trf.xlu0 }
0x1137   : > { %8331 = vmatprep.mubr.msk.f32.mxu1 %vm1091_vm0, %v3347_v12  ;;  %8317 = vmatprep.mubr.msk.f32.mxu0 %vm1091_vm0, %v3206_v55 }
0x113a   : > { %v3348_v47 = vpop.trf.xlu1  ;;  %v3207_v33 = vpop.trf.xlu0 }
0x113b   : > { %8332 = vmatmul.mubr.msk.f32.vlgmr.msra.gmra.mrb[46].mxu1 %vm1091_vm0, %v3348_v47  ;;  %8318 = vmatmul.mubr.msk.f32.vlgmr.msra.gmra.mrb[46].mxu0 %vm1091_vm0, %v3207_v33 }
0x113c   : > { %8352 = vmatpush3.xpose.msk.msra.mxu1 %vm1091_vm0, %v10081_v15  ;;  %8854 = vmatpush3.bf16.msra.mxu0 %v10048_v60 }
0x113d   : > { %8367 = vmatprep.subr.mxu1 %v11143_v51  ;;  %8856 = vmatprep.subr.bf16.mxu0 %v10069_v19 }
0x113e   : > { %v3349_v31 = vpop.trf.xlu1  ;;  %v3208_v34 = vpop.trf.xlu0 }
0x113f   : > { %8334 = vmatprep.mubr.msk.f32.mxu1 %vm1091_vm0, %v3349_v31  ;;  %8320 = vmatprep.mubr.msk.f32.mxu0 %vm1091_vm0, %v3208_v34 }
0x1140   : > { %8858 = vmatpush3.bf16.msra.mxu0 %v10069_v19 }
0x1141   : > { %8859 = vmatprep.subr.bf16.mxu0 %v11148_v14 }
0x1142   : > { %v3350_v5 = vpop.trf.xlu1  ;;  %v3209_v24 = vpop.trf.xlu0 }
0x1143   : > { %8335 = vmatmul.mubr.msk.f32.gmra.mrb[48].mxu1 %vm1091_vm0, %v3350_v5  ;;  %8321 = vmatmul.mubr.msk.f32.gmra.mrb[48].mxu0 %vm1091_vm0, %v3209_v24 }
0x1144   : > { %8353 = vmatprep.mubr.msk.f32.mxu1 %vm1091_vm0, %v3653_v38 }
0x1147   : > { %8354 = vmatmul.mubr.msk.f32.vlgmr.msra.gmra.mrb[50].mxu1 %vm1091_vm0, %v3654_v10 }
0x1148   : > { %8369 = vmatprep.mubr.msk.f32.mxu1 %vm9360_vm2, %v11143_v51 }
0x120e   : > { %v10127_v52 = vpop.f32.mrb[46].mxu1  ;;  %v8319_v42 = vpop.f32.mrb[46].mxu0 }
0x120f   : > { %v10129_v32 = vpop.f32.mrb[47].mxu1  ;;  %3320 = vst.msk [vmem:[#allocation2 + $0x28] sm:$0xff] %vm718_vm1, %v8319_v42  ;;  %v3300_v43 = vpop.f32.mrb[47].mxu0  ;;  %v10223_v42 = vld [vmem:[%s9545_s1 + $0x60] sm:$0xff] }
0x1210   : > { %3319 = vst.msk [vmem:[#allocation2 + $0x20] sm:$0xff] %vm718_vm1, %v3300_v43  ;;  %v10227_v43 = vld [vmem:[%s9545_s1 + $0x68] sm:$0xff] }
0x1216   : > { %v10131_v0 = vpop.f32.mrb[48].mxu1  ;;  %v8322_v41 = vpop.f32.mrb[48].mxu0 }
0x1217   : > { %v10133_v54 = vpop.f32.mrb[49].mxu1  ;;  %3322 = vst.msk [vmem:[#allocation2 + $0x38] sm:$0xff] %vm718_vm1, %v8322_v41  ;;  %v3310_v1 = vpop.f32.mrb[49].mxu0  ;;  %v10231_v41 = vld [vmem:[%s9545_s1 + $0x70] sm:$0xff] }
0x1218   : > { %3321 = vst.msk [vmem:[#allocation2 + $0x30] sm:$0xff] %vm718_vm1, %v3310_v1  ;;  %v10235_v1 = vld [vmem:[%s9545_s1 + $0x78] sm:$0xff] }
0x121a   : > { %v8355_v45 = vpop.f32.mrb[50].mxu1 }
0x121b   : > { %3759 = vperm.xlu1 %9094, %v8355_v45   ;;  %v3741_v48 = vpop.f32.mrb[51].mxu1 }
0x121f   : > { %3752 = vperm.xlu1 %9094, %v3741_v48  }
0x1248   : > { %3488 = vxpose.xlu1.b32.start [1/4] (short) (narrow) %v3484_v59, 32 }
0x124c   : > { %3489 = vxpose.xlu1.b32.cont [2/4] (short) (narrow) %v3485_v8, 32 }
0x1250   : > { %3490 = vxpose.xlu1.b32.cont [3/4] (short) (narrow) %v3486_v22, 32 }
0x1254   : > { %3491 = vxpose.xlu1.b32.end [4/4] (short) (narrow) %v3487_v16, 32  ;;  %v9276_v16 = vld [vmem:[%s9545_s1 + $0x40] sm:$0xff] }
0x129a   : > { %v3760_v56 = vpop.permute.xlu1 %3759 }
0x129b   : > { %v3762_v25 = vmul.f32 %v3760_v56, %v9739_v27  ;;  %v11159_v56 = vld [vmem:[#allocation16_spill] sm:$0xff] }
0x129e   : > { %v3753_v2 = vpop.permute.xlu1 %3752 }
0x129f   : > { %v3755_v53 = vmul.f32 %v3753_v2, %v9737_v26  ;;  %v11160_v2 = vld [vmem:[#allocation15_spill] sm:$0xff] }
0x12a1   : > { %v3763_v39 = vadd.f32 %v3762_v25, %v3755_v53  ;;  %v9277_v25 = vld [vmem:[%s9545_s1 + $0x48] sm:$0xff] }
0x12c8   : > { %v3504_v46 = vpop.trf.xlu1 }
0x12c9   : > { %8345 = vmatprep.mubr.msk.f32.mxu0 %vm1091_vm0, %v3504_v46 }
0x12cc   : > { %v3505_v35 = vpop.trf.xlu1 }
0x12cd   : > { %8346 = vmatmul.mubr.msk.f32.vlgmr.msra.gmra.mrb[50].mxu0 %vm1091_vm0, %v3505_v35 }
0x12ce   : > { %8861 = vmatpush3.bf16.msra.mxu0 %v11157_v49 }
0x12cf   : > { %8862 = vmatprep.subr.bf16.mxu0 %v11148_v14 }
0x12d0   : > { %v3506_v30 = vpop.trf.xlu1 }
0x12d1   : > { %8348 = vmatprep.mubr.msk.f32.mxu0 %vm1091_vm0, %v3506_v30 }
0x12d2   : > { %8864 = vmatpush3.bf16.msra.mxu0 %v11158_v3 }
0x12d3   : > { %8380 = vmatprep.subr.mxu0 %v11143_v51 }
0x12d4   : > { %v3507_v23 = vpop.trf.xlu1 }
0x12d5   : > { %8349 = vmatmul.mubr.msk.f32.gmra.mrb[52].mxu0 %vm1091_vm0, %v3507_v23 }
0x12d6   : > { %8364 = vmatprep.mubr.msk.f32.mxu0 %vm9360_vm2, %v11143_v51 }
0x12d9   : > { %8365 = vmatmul.mubr.msk.f32.vlgmr.msra.gmra.mrb[54].mxu0 %vm1091_vm0, %v3763_v39  ;;  %v10217_v39 = vpack.c.bf16 %v9277_v25, %v9276_v16 }
0x12da   : > { %8381 = vmatpush3.msra.mxu0 %v10167_v40  ;;  %8382 = vmatprep.mubr.msk.f32.mxu0 %vm9360_vm2, %v11143_v51 }
0x12db   : > { %11161 = vst [vmem:[#allocation16_spill] sm:$0xff] %v10217_v39 }
0x13a0   : > { %v10176_v13 = vpop.f32.mrb[50].mxu0 }
0x13a1   : > { %v10178_v58 = vpop.f32.mrb[51].mxu0 }
0x13a8   : > { %v10180_v61 = vpop.f32.mrb[52].mxu0 }
0x13a9   : > { %v10182_v36 = vpop.f32.mrb[53].mxu0 }
0x13ac   : > { %v3833_v28 = vpop.f32.mrb[54].mxu0 }
0x13ad   : > { %v3834_v7 = vadd.f32 %v10187_v37, %v3833_v28  ;;  %v8366_v29 = vpop.f32.mrb[55].mxu0 }
0x13af   : > { %v7519_v18 = vmul.f32 -1.442695, %v3834_v7  ;;  %v10241_v7 = vld [vmem:[%s11140_s7] sm:$0xff] }
0x13b1   : > { %9172 = vpow2.f32 %v7519_v18  ;;  %v10247_v18 = vld [vmem:[%s11140_s7 + $0x8] sm:$0xff] }
0x13bb   : > { %v9173_v20 = vpop.eup %9172 }
0x13bc   : > { %v3840_v9 = vadd.f32 1.0, %v9173_v20 }
0x13be   : > { %9174 = vrcp.f32 %v3840_v9 }
0x13c8   : > { %v9175_v21 = vpop.eup %9174 }
0x13c9   : > { %8368 = vmatpush3.msra.mxu1 %v9175_v21  ;;  %v9284_v21 = vld [vmem:[%s9545_s1 + $0x50] sm:$0xff] }
0x13ca   : > { %8370 = vmatmul.mubr.msk.f32.vlgmr.msra.gmra.mrb[52].mxu1 %vm1277_vm3, %v10193_v4 }
0x13cb   : > { %8374 = vmatprep.mubr.msk.f32.mxu1 %vm1277_vm3, %v9720_v63 }
0x149d   : > { %v3909_v17 = vpop.f32.mrb[52].mxu1 }
0x149e   : > { %v3913_v57 = vsel %vm1277_vm3, %v3909_v17, -inf  ;;  %v8371_v11 = vpop.f32.mrb[53].mxu1 }
0x149f   : > { %v3914_v6 = vrot.slane %v3913_v57, 4 }
0x14a1   : > { %v3915_v50 = vmax.f32 %v3913_v57, %v3914_v6  ;;  %v10258_v57 = vld [vmem:[%s11060_s10] sm:$0xff] }
0x14a3   : > { %v3916_v12 = vrot.slane %v3915_v50, 2 }
0x14a5   : > { %v3917_v47 = vmax.f32 %v3915_v50, %v3916_v12 }
0x14a7   : > { %v3918_v31 = vrot.slane %v3917_v47, 1 }
0x14a9   : > { %v3919_v38 = vmax.f32 %v3917_v47, %v3918_v31 }
0x14ab   : > { %v3920_v5 = vsub.f32 %v3909_v17, %v3919_v38  ;;  %v9285_v17 = vld [vmem:[%s9545_s1 + $0x58] sm:$0xff]  ;;  %v10276_v38 = vld [vmem:[%s11142_s9 + $0x8] sm:$0xff]  ;;  %s11181_s1 = smov 16  }
0x14ac   : > { %v10262_v6 = vpack.c.bf16 %v9285_v17, %v9284_v21 }
0x14ad   : > { %v3921_v10 = vmul.f32 1.442695, %v3920_v5 }
0x14ae   : > { %11162 = vst [vmem:[#allocation15_spill] sm:$0xff] %v10262_v6 }
0x14af   : > { %9176 = vpow2.f32 %v3921_v10 }
0x14b9   : > { %v9177_v45 = vpop.eup %9176 }
0x14ba   : > { %v3923_v48 = vsel %vm1277_vm3, %v9177_v45, 0.0 }
0x14bb   : > { %v3924_v55 = vrot.slane %v3923_v48, 4 }
0x14bd   : > { %v3925_v33 = vadd.f32 %v3924_v55, %v3923_v48 }
0x14bf   : > { %v3926_v63 = vrot.slane %v3925_v33, 2 }
0x14c1   : > { %v3927_v34 = vadd.f32 %v3926_v63, %v3925_v33 }
0x14c3   : > { %v3928_v24 = vrot.slane %v3927_v34, 1 }
0x14c5   : > { %v3929_v59 = vadd.f32 %v3928_v24, %v3927_v34  ;;  %v10288_v34 = vld [vmem:[%s11142_s9 + $0x18] sm:$0xff] }
0x14c7   : > { %9178 = vrcp.f32 %v3929_v59 }
0x14d1   : > { %v9179_v8 = vpop.eup %9178 }
0x14d2   : > { %v3931_v22 = vmul.f32 %v9179_v8, %v9177_v45  ;;  %v10282_v45 = vld [vmem:[%s11142_s9] sm:$0xff]  ;;  %v10294_v8 = vld [vmem:[%s11142_s9 + $0x10] sm:$0xff]  ;;  %s11008_s9 = scalar_lea.hbm %s11072_s22, %s7687_s29 }
0x14d4   : > { %8372 = vmatprep.subr.mxu1 %v3931_v22  ;;  %8383 = vmatmul.mubr.msk.f32.vlgmr.msra.gmra.mrb[56].mxu0 %vm1277_vm3, %v3931_v22 }
0x14d5   : > { %8373 = vmatpush3.msra.mxu1 %v3931_v22  ;;  %8389 = vmatprep.mubr.msk.f32.mxu0 %vm718_vm1, %v9276_v16 }
0x14d6   : > { %8375 = vmatmul.mubr.msk.f32.vlgmr.msra.gmra.mrb[54].mxu1 %vm1277_vm3, %v9718_v62 }
0x14d7   : > { %8377 = vmatprep.mubr.msk.f32.mxu1 %vm1277_vm3, %v11159_v56 }
0x14da   : > { %8378 = vmatmul.mubr.msk.f32.gmra.mrb[56].mxu1 %vm1277_vm3, %v11160_v2 }
0x15a7   : > { %v4098_v46 = vpop.f32.mrb[56].mxu0 }
0x15a8   : > { %4104 = vperm.xlu0 %9095, %v4098_v46   ;;  %v8384_v35 = vpop.f32.mrb[57].mxu0 }
0x15a9   : > { %v8376_v49 = vpop.f32.mrb[54].mxu1 }
0x15aa   : > { %v4010_v30 = vpop.f32.mrb[55].mxu1 }
0x15ab   : > { %v8869_v3 = vpack.c.bf16 %v8376_v49, %v4010_v30 }
0x15ad   : > { %v8379_v53 = vpop.f32.mrb[56].mxu1  ;;  %8871 = vmatprep.subr.msk.bf16.mxu1 %vm9780_vm4, %v8869_v3 }
0x15ae   : > { %v4020_v62 = vpop.f32.mrb[57].mxu1  ;;  %8874 = vmatpush3.bf16.xpose.msk.msra.mxu1 %vm9780_vm4, %v8869_v3 }
0x15af   : > { %v8875_v23 = vpack.c.bf16 %v8379_v53, %v4020_v62 }
0x15b1   : > { %8877 = vmatprep.subr.msk.bf16.mxu1 %vm9780_vm4, %v8875_v23 }
0x15b6   : > { %8880 = vmatpush3.bf16.xpose.msk.msra.mxu1 %vm9780_vm4, %v8875_v23 }
0x15b7   : > { %8898 = vmatprep.subr.bf16.mxu1 %v10217_v39 }
0x15c6   : > { %4910 = vxpose.xlu0.b32.start [1/4] (short) (narrow) %v10223_v42, 16 }
0x15ca   : > { %4911 = vxpose.xlu0.b32.cont [2/4] (short) (narrow) %v10227_v43, 16 }
0x15ce   : > { %4912 = vxpose.xlu0.b32.cont [3/4] (short) (narrow) %v10231_v41, 16 }
0x15d2   : > { %4913 = vxpose.xlu0.b32.end [4/4] (short) (narrow) %v10235_v1, 16 }
0x1627   : > { %v4105_v28 = vpop.permute.xlu0 %4104 }
0x1628   : > { %v4107_v29 = vmul.f32 %v10241_v7, %v4105_v28  ;;  %v4108_v20 = vmul.f32 %v10247_v18, %v4105_v28 }
0x162a   : > { %v8865_v9 = vpack.c.bf16 %v4108_v20, %v4107_v29 }
0x162c   : > { %8866 = vmatprep.subr.bf16.mxu0 %v8865_v9 }
0x162d   : > { %8868 = vmatpush3.bf16.msra.mxu0 %v8865_v9 }
0x1630   : > { %8390 = vmatmul.mubr.msk.f32.vlgmr.msra.gmra.mrb[58].mxu0 %vm718_vm1, %v9277_v25 }
0x1631   : > { %8392 = vmatprep.mubr.msk.f32.mxu0 %vm718_vm1, %v9284_v21  ;;  %v10301_v21 = vld [vmem:[%s11060_s10 + $0x8] sm:$0xff] }
0x1634   : > { %8393 = vmatmul.mubr.msk.f32.gmra.mrb[60].mxu0 %vm718_vm1, %v9285_v17  ;;  %v10308_v17 = vld [vmem:[%s11060_s10 + $0x10] sm:$0xff] }
0x1635   : > { %8417 = vmatprep.mubr.msk.f32.mxu0 %vm1091_vm0, %v10258_v57 }
0x1703   : > { %v8391_v11 = vpop.f32.mrb[58].mxu0 }
0x1704   : > { %v4175_v50 = vpop.f32.mrb[59].mxu0 }
0x1705   : > { %8403 = vmatprep.mubr.msk.f32.mxu1 %vm1277_vm3, %v4175_v50 }
0x1706   : > { %8404 = vmatmul.mubr.msk.f32.vlgmr.msra.gmra.mrb[58].mxu1 %vm1277_vm3, %v8391_v11  ;;  %v10317_v11 = vld [vmem:[%s11060_s10 + $0x18] sm:$0xff] }
0x1707   : > { %v8394_v12 = vpop.f32.mrb[60].mxu0  ;;  %8900 = vmatpush3.bf16.msra.mxu1 %v10217_v39 }
0x1708   : > { %v4185_v47 = vpop.f32.mrb[61].mxu0  ;;  %8902 = vmatprep.subr.bf16.mxu1 %v10262_v6 }
0x1709   : > { %8406 = vmatprep.mubr.msk.f32.mxu1 %vm1277_vm3, %v4185_v47 }
0x170a   : > { %8407 = vmatmul.mubr.msk.f32.gmra.mrb[60].mxu1 %vm1277_vm3, %v8394_v12 }
0x170b   : > { %8904 = vmatpush3.bf16.msra.mxu1 %v10262_v6 }
0x170c   : > { %8465 = vmatprep.subr.msk.mxu1 %vm1091_vm0, %v10081_v15 }
0x17d9   : > { %v8405_v31 = vpop.f32.mrb[58].mxu1 }
0x17da   : > { %v4290_v5 = vadd.f32 %v10276_v38, %v8405_v31  ;;  %v4284_v10 = vpop.f32.mrb[59].mxu1 }
0x17db   : > { %v4285_v48 = vadd.f32 %v10282_v45, %v4284_v10 }
0x17dc   : > { %v7539_v55 = vmul.f32 -1.442695, %v4290_v5 }
0x17dd   : > { %v7538_v33 = vmul.f32 -1.442695, %v4285_v48  ;;  %v8408_v63 = vpop.f32.mrb[60].mxu1 }
0x17de   : > { %9180 = vpow2.f32 %v7539_v55  ;;  %v4300_v24 = vadd.f32 %v10288_v34, %v8408_v63  ;;  %v4294_v59 = vpop.f32.mrb[61].mxu1 }
0x17df   : > { %9182 = vpow2.f32 %v7538_v33  ;;  %v4295_v22 = vadd.f32 %v10294_v8, %v4294_v59 }
0x17e0   : > { %v7541_v16 = vmul.f32 -1.442695, %v4300_v24 }
0x17e1   : > { %v7540_v56 = vmul.f32 -1.442695, %v4295_v22 }
0x17e2   : > { %9184 = vpow2.f32 %v7541_v16 }
0x17e3   : > { %9186 = vpow2.f32 %v7540_v56 }
0x17e8   : > { %v9181_v2 = vpop.eup %9180 }
0x17e9   : > { %v9183_v46 = vpop.eup %9182  ;;  %v4316_v35 = vadd.f32 1.0, %v9181_v2 }
0x17ea   : > { %v4315_v49 = vadd.f32 1.0, %v9183_v46 }
0x17eb   : > { %9188 = vrcp.f32 %v4316_v35 }
0x17ec   : > { %v9185_v30 = vpop.eup %9184  ;;  %9190 = vrcp.f32 %v4315_v49 }
0x17ed   : > { %v9187_v3 = vpop.eup %9186  ;;  %v4318_v53 = vadd.f32 1.0, %v9185_v30 }
0x17ee   : > { %v4317_v62 = vadd.f32 1.0, %v9187_v3 }
0x17ef   : > { %9192 = vrcp.f32 %v4318_v53 }
0x17f0   : > { %9194 = vrcp.f32 %v4317_v62 }
0x17f5   : > { %v9189_v23 = vpop.eup %9188 }
0x17f6   : > { %v9191_v25 = vpop.eup %9190 }
0x17f7   : > { %v8881_v28 = vpack.c.bf16 %v9189_v23, %v9191_v25 }
0x17f9   : > { %v9193_v29 = vpop.eup %9192  ;;  %8882 = vmatprep.subr.bf16.mxu0 %v8881_v28 }
0x17fa   : > { %v9195_v20 = vpop.eup %9194  ;;  %8884 = vmatpush3.bf16.msra.mxu0 %v8881_v28 }
0x17fb   : > { %v8885_v9 = vpack.c.bf16 %v9193_v29, %v9195_v20 }
0x17fd   : > { %8886 = vmatprep.subr.bf16.mxu0 %v8885_v9 }
0x17fe   : > { %8888 = vmatpush3.bf16.msra.mxu0 %v8885_v9 }
0x17ff   : > { %8890 = vmatprep.subr.bf16.mxu0 %v10217_v39 }
0x1801   : > { %8418 = vmatmul.mubr.msk.f32.vlgmr.msra.gmra.mrb[62].mxu0 %vm1091_vm0, %v10301_v21 }
0x1802   : > { %8420 = vmatprep.mubr.msk.f32.mxu0 %vm1091_vm0, %v10308_v17  ;;  %8892 = vmatpush3.bf16.msra.mxu0 %v10217_v39 }
0x1803   : > { %8894 = vmatprep.subr.bf16.mxu0 %v10262_v6 }
0x1805   : > { %8421 = vmatmul.mubr.msk.f32.gmra.mrb[64].mxu0 %vm1091_vm0, %v10317_v11 }
0x1806   : > { %8896 = vmatpush3.bf16.msra.mxu0 %v10262_v6 }
0x1807   : > { %8906 = vmatprep.subr.bf16.mxu0 %v10217_v39 }
0x18d4   : > { %v8419_v50 = vpop.f32.mrb[62].mxu0 }
0x18d5   : > { %v4413_v12 = vsel %vm1091_vm0, %v8419_v50, -inf  ;;  %v4393_v47 = vpop.f32.mrb[63].mxu0 }
0x18d6   : > { %v4412_v31 = vsel %vm1091_vm0, %v4393_v47, -inf }
0x18d7   : > { %v4416_v5 = vmax.f32 %v4412_v31, %v4413_v12 }
0x18d8   : > { %v8422_v10 = vpop.f32.mrb[64].mxu0 }
0x18d9   : > { %v4415_v48 = vsel %vm1091_vm0, %v8422_v10, -inf  ;;  %v4403_v55 = vpop.f32.mrb[65].mxu0 }
0x18da   : > { %v4414_v33 = vsel %vm1091_vm0, %v4403_v55, -inf }
0x18db   : > { %v4417_v63 = vmax.f32 %v4414_v33, %v4415_v48 }
0x18dd   : > { %v4418_v24 = vmax.f32 %v4416_v5, %v4417_v63 }
0x18df   : > { %v4419_v59 = vrot.slane %v4418_v24, 4 }
0x18e1   : > { %v4420_v22 = vmax.f32 %v4418_v24, %v4419_v59 }
0x18e3   : > { %v4421_v16 = vrot.slane %v4420_v22, 2 }
0x18e5   : > { %v4422_v56 = vmax.f32 %v4420_v22, %v4421_v16 }
0x18e7   : > { %v4423_v2 = vrot.slane %v4422_v56, 1 }
0x18e9   : > { %v4424_v46 = vmax.f32 %v4422_v56, %v4423_v2  ;;  %v10334_v56 = vld [vmem:[%s11061_s11 + $0x20] sm:$0xff] }
0x18eb   : > { %v4425_v35 = vsub.f32 %v4393_v47, %v4424_v46  ;;  %v4426_v49 = vsub.f32 %v8419_v50, %v4424_v46  ;;  %v4427_v30 = vsub.f32 %v4403_v55, %v4424_v46  ;;  %v4428_v3 = vsub.f32 %v8422_v10, %v4424_v46 }
0x18ed   : > { %v4429_v53 = vmul.f32 1.442695, %v4425_v35  ;;  %v4431_v62 = vmul.f32 1.442695, %v4426_v49  ;;  %v4433_v23 = vmul.f32 1.442695, %v4427_v30 }
0x18ee   : > { %v4435_v25 = vmul.f32 1.442695, %v4428_v3  ;;  %v10340_v3 = vld [vmem:[%s11061_s11 + $0x28] sm:$0xff] }
0x18ef   : > { %9196 = vpow2.f32 %v4429_v53 }
0x18f0   : > { %9198 = vpow2.f32 %v4431_v62  ;;  %v10346_v62 = vld [vmem:[%s11061_s11 + $0x30] sm:$0xff] }
0x18f1   : > { %9200 = vpow2.f32 %v4433_v23 }
0x18f2   : > { %9202 = vpow2.f32 %v4435_v25  ;;  %v10352_v25 = vld [vmem:[%s11061_s11 + $0x38] sm:$0xff] }
0x18f9   : > { %v9197_v28 = vpop.eup %9196 }
0x18fa   : > { %v9199_v29 = vpop.eup %9198  ;;  %v4437_v20 = vsel %vm1091_vm0, %v9197_v28, 0.0 }
0x18fb   : > { %v9201_v9 = vpop.eup %9200  ;;  %v4438_v12 = vsel %vm1091_vm0, %v9199_v29, 0.0 }
0x18fc   : > { %v9203_v31 = vpop.eup %9202  ;;  %v4439_v47 = vadd.f32 %v4438_v12, %v4437_v20  ;;  %v4440_v50 = vsel %vm1091_vm0, %v9201_v9, 0.0  ;;  %v4926_v12 = vpop.trf.xlu0 }
0x18fd   : > { %v4442_v10 = vsel %vm1091_vm0, %v9203_v31, 0.0 }
0x18fe   : > { %v4441_v5 = vadd.f32 %v4440_v50, %v4439_v47 }
0x1900   : > { %v4443_v48 = vadd.f32 %v4442_v10, %v4441_v5  ;;  %v4927_v47 = vpop.trf.xlu0 }
0x1902   : > { %v4444_v55 = vrot.slane %v4443_v48, 4 }
0x1904   : > { %v4445_v33 = vadd.f32 %v4444_v55, %v4443_v48 }
0x1906   : > { %v4446_v63 = vrot.slane %v4445_v33, 2 }
0x1908   : > { %v4447_v24 = vadd.f32 %v4446_v63, %v4445_v33  ;;  %v10377_v33 = vld [vmem:[%s11061_s11 + $0x40] sm:$0xff] }
0x190a   : > { %v4448_v59 = vrot.slane %v4447_v24, 1 }
0x190c   : > { %v4449_v22 = vadd.f32 %v4448_v59, %v4447_v24  ;;  %v10383_v24 = vld [vmem:[%s11061_s11 + $0x48] sm:$0xff] }
0x190e   : > { %9204 = vrcp.f32 %v4449_v22  ;;  %v10389_v22 = vld [vmem:[%s11061_s11 + $0x50] sm:$0xff] }
0x1918   : > { %v9205_v16 = vpop.eup %9204 }
0x1919   : > { %v4451_v2 = vmul.f32 %v9205_v16, %v9197_v28  ;;  %v4452_v46 = vmul.f32 %v9205_v16, %v9199_v29  ;;  %v4453_v35 = vmul.f32 %v9205_v16, %v9201_v9  ;;  %v4454_v49 = vmul.f32 %v9205_v16, %v9203_v31 }
0x191b   : > { %v4600_v30 = vmul.f32 %v10334_v56, %v4451_v2  ;;  %v4601_v53 = vmul.f32 %v10340_v3, %v4452_v46  ;;  %v4602_v23 = vmul.f32 %v10346_v62, %v4453_v35  ;;  %v4603_v28 = vmul.f32 %v10352_v25, %v4454_v49 }
0x191c   : > { %v4757_v63 = vmul.f32 %v10377_v33, %v4451_v2  ;;  %v4758_v59 = vmul.f32 %v10383_v24, %v4452_v46  ;;  %v4759_v16 = vmul.f32 %v10389_v22, %v4453_v35 }
0x191d   : > { %4604 = vxpose.xlu1.b32.start [1/4] (short) (narrow) %v4600_v30, 32  ;;  %v10395_v30 = vld [vmem:[%s11061_s11 + $0x58] sm:$0xff] }
0x1921   : > { %4605 = vxpose.xlu1.b32.cont [2/4] (short) (narrow) %v4601_v53, 32  ;;  %v10400_v53 = vld [vmem:[%s11061_s11] sm:$0xff] }
0x1925   : > { %4606 = vxpose.xlu1.b32.cont [3/4] (short) (narrow) %v4602_v23, 32  ;;  %v4760_v23 = vmul.f32 %v10395_v30, %v4454_v49 }
0x1929   : > { %4607 = vxpose.xlu1.b32.end [4/4] (short) (narrow) %v4603_v28, 32  ;;  %v4459_v28 = vmul.f32 %v10400_v53, %v4451_v2  ;;  %v10419_v2 = vld [vmem:[%s11061_s11 + $0x18] sm:$0xff] }
0x199d   : > { %v4620_v29 = vpop.trf.xlu1 }
0x199e   : > { %8445 = vmatprep.mubr.msk.f32.mxu1 %vm1091_vm0, %v4620_v29  ;;  %v10407_v29 = vld [vmem:[%s11061_s11 + $0x8] sm:$0xff] }
0x19a1   : > { %v4621_v20 = vpop.trf.xlu1 }
0x19a2   : > { %8446 = vmatmul.mubr.msk.f32.vlgmr.msra.gmra.mrb[62].mxu1 %vm1091_vm0, %v4621_v20  ;;  %v4460_v20 = vmul.f32 %v10407_v29, %v4452_v46 }
0x19a3   : > { %8466 = vmatpush3.xpose.msk.msra.mxu1 %vm1091_vm0, %v10081_v15 }
0x19a4   : > { %8481 = vmatprep.subr.mxu1 %v11143_v51 }
0x19a5   : > { %v4622_v9 = vpop.trf.xlu1 }
0x19a6   : > { %8448 = vmatprep.mubr.msk.f32.mxu1 %vm1091_vm0, %v4622_v9  ;;  %v10413_v9 = vld [vmem:[%s11061_s11 + $0x10] sm:$0xff] }
0x19a9   : > { %v4623_v31 = vpop.trf.xlu1 }
0x19aa   : > { %8449 = vmatmul.mubr.msk.f32.gmra.mrb[64].mxu1 %vm1091_vm0, %v4623_v31  ;;  %v4462_v31 = vmul.f32 %v10419_v2, %v4454_v49 }
0x19ab   : > { %8467 = vmatprep.mubr.msk.f32.mxu1 %vm1091_vm0, %v4926_v12  ;;  %v4461_v12 = vmul.f32 %v10413_v9, %v4453_v35 }
0x19ae   : > { %8468 = vmatmul.mubr.msk.f32.vlgmr.msra.gmra.mrb[66].mxu1 %vm1091_vm0, %v4927_v47 }
0x19af   : > { %8483 = vmatprep.mubr.msk.f32.mxu1 %vm9360_vm2, %v11143_v51 }
0x1a75   : > { %v10366_v50 = vpop.f32.mrb[62].mxu1 }
0x1a76   : > { %v10368_v15 = vpop.f32.mrb[63].mxu1 }
0x1a7d   : > { %v10370_v5 = vpop.f32.mrb[64].mxu1 }
0x1a7e   : > { %v10372_v10 = vpop.f32.mrb[65].mxu1 }
0x1a81   : > { %v8469_v48 = vpop.f32.mrb[66].mxu1 }
0x1a82   : > { %5032 = vperm.xlu0 %9095, %v8469_v48   ;;  %v5014_v55 = vpop.f32.mrb[67].mxu1 }
0x1a83   : > { %5025 = vperm.xlu1 %9094, %v5014_v55  }
0x1aa0   : > { %4761 = vxpose.xlu0.b32.start [1/4] (short) (narrow) %v4757_v63, 32 }
0x1aa4   : > { %4762 = vxpose.xlu0.b32.cont [2/4] (short) (narrow) %v4758_v59, 32 }
0x1aa8   : > { %4763 = vxpose.xlu0.b32.cont [3/4] (short) (narrow) %v4759_v16, 32 }
0x1aac   : > { %4764 = vxpose.xlu0.b32.end [4/4] (short) (narrow) %v4760_v23, 32  ;;  %4463 = vxpose.xlu1.b32.start [1/4] (short) (narrow) %v4459_v28, 32  ;;  %v11163_v23 = vld [vmem:[#allocation11_spill] sm:$0xff]  ;;  %v11164_v28 = vld [vmem:[#allocation12_spill] sm:$0xff] }
0x1ab0   : > { %4464 = vxpose.xlu1.b32.cont [2/4] (short) (narrow) %v4460_v20, 32  ;;  %v11165_v20 = vpack.c.bf16 %v11163_v23, %v11164_v28 }
0x1ab4   : > { %4465 = vxpose.xlu1.b32.cont [3/4] (short) (narrow) %v4461_v12, 32 }
0x1ab8   : > { %4466 = vxpose.xlu1.b32.end [4/4] (short) (narrow) %v4462_v31, 32 }
0x1b01   : > { %v5033_v47 = vpop.permute.xlu0 %5032 }
0x1b02   : > { %v5026_v48 = vpop.permute.xlu1 %5025  ;;  %v5035_v31 = vmul.f32 %v5033_v47, %v9739_v27 }
0x1b20   : > { %v4777_v55 = vpop.trf.xlu0 }
0x1b24   : > { %v4778_v35 = vpop.trf.xlu0 }
0x1b28   : > { %v4779_v16 = vpop.trf.xlu0 }
0x1b2c   : > { %v4479_v46 = vpop.trf.xlu1  ;;  %v4780_v12 = vpop.trf.xlu0 }
0x1b2d   : > { %8431 = vmatprep.mubr.msk.f32.mxu0 %vm1091_vm0, %v4479_v46  ;;  %v5028_v46 = vmul.f32 %v5026_v48, %v9737_v26 }
0x1b30   : > { %v4480_v63 = vpop.trf.xlu1 }
0x1b31   : > { %8432 = vmatmul.mubr.msk.f32.vlgmr.msra.gmra.mrb[66].mxu0 %vm1091_vm0, %v4480_v63  ;;  %v11166_v63 = vld [vmem:[#allocation13_spill] sm:$0xff] }
0x1b32   : > { %8908 = vmatpush3.bf16.msra.mxu0 %v10217_v39 }
0x1b33   : > { %8910 = vmatprep.subr.bf16.mxu0 %v10262_v6 }
0x1b34   : > { %v4481_v59 = vpop.trf.xlu1 }
0x1b35   : > { %8434 = vmatprep.mubr.msk.f32.mxu0 %vm1091_vm0, %v4481_v59  ;;  %v11167_v59 = vld [vmem:[#allocation14_spill] sm:$0xff] }
0x1b36   : > { %8912 = vmatpush3.bf16.msra.mxu0 %v10262_v6 }
0x1b37   : > { %8913 = vmatprep.subr.bf16.mxu0 %v11148_v14 }
0x1b38   : > { %v4482_v49 = vpop.trf.xlu1 }
0x1b39   : > { %8435 = vmatmul.mubr.msk.f32.gmra.mrb[68].mxu0 %vm1091_vm0, %v4482_v49 }
0x1b3a   : > { %8459 = vmatprep.mubr.msk.f32.mxu0 %vm1091_vm0, %v4777_v55  ;;  %v11168_v55 = vpack.c.bf16 %v11166_v63, %v11167_v59  ;;  %v11169_v59 = vld [vmem:[#allocation18_spill] sm:$0xff] }
0x1b3d   : > { %8460 = vmatmul.mubr.msk.f32.vlgmr.msra.gmra.mrb[70].mxu0 %vm1091_vm0, %v4778_v35  ;;  %v5036_v35 = vadd.f32 %v5035_v31, %v5028_v46 }
0x1b3e   : > { %8915 = vmatpush3.bf16.msra.mxu0 %v11165_v20  ;;  %8462 = vmatprep.mubr.msk.f32.mxu0 %vm1091_vm0, %v4779_v16 }
0x1b3f   : > { %8916 = vmatprep.subr.bf16.mxu0 %v11148_v14 }
0x1b41   : > { %8463 = vmatmul.mubr.msk.f32.gmra.mrb[72].mxu0 %vm1091_vm0, %v4780_v12 }
0x1b42   : > { %8918 = vmatpush3.bf16.msra.mxu0 %v11168_v55  ;;  %8478 = vmatprep.mubr.msk.f32.mxu0 %vm9360_vm2, %v11143_v51 }
0x1b43   : > { %8494 = vmatprep.subr.mxu0 %v11143_v51 }
0x1b45   : > { %8479 = vmatmul.mubr.msk.f32.vlgmr.msra.gmra.mrb[74].mxu0 %vm1091_vm0, %v5036_v35 }
0x1b46   : > { %8495 = vmatpush3.msra.mxu0 %v10167_v40  ;;  %8496 = vmatprep.mubr.msk.f32.mxu0 %vm9360_vm2, %v11143_v51 }
0x1c04   : > { %v8433_v26 = vpop.f32.mrb[66].mxu0 }
0x1c05   : > { %4593 = vst.msk [vmem:[#allocation2 + $0x48] sm:$0xff] %vm718_vm1, %v8433_v26  ;;  %v4573_v27 = vpop.f32.mrb[67].mxu0 }
0x1c06   : > { %4592 = vst.msk [vmem:[#allocation2 + $0x40] sm:$0xff] %vm718_vm1, %v4573_v27 }
0x1c0c   : > { %v8436_v14 = vpop.f32.mrb[68].mxu0 }
0x1c0d   : > { %4595 = vst.msk [vmem:[#allocation2 + $0x58] sm:$0xff] %vm718_vm1, %v8436_v14  ;;  %v4583_v47 = vpop.f32.mrb[69].mxu0 }
0x1c0e   : > { %4594 = vst.msk [vmem:[#allocation2 + $0x50] sm:$0xff] %vm718_vm1, %v4583_v47 }
0x1c10   : > { %v10454_v48 = vpop.f32.mrb[70].mxu0 }
0x1c11   : > { %v10456_v49 = vpop.f32.mrb[71].mxu0 }
0x1c14   : > { %v10458_v40 = vpop.f32.mrb[72].mxu0 }
0x1c15   : > { %v10460_v16 = vpop.f32.mrb[73].mxu0 }
0x1c18   : > { %v5106_v23 = vpop.f32.mrb[74].mxu0 }
0x1c19   : > { %v5107_v28 = vadd.f32 %v10187_v37, %v5106_v23  ;;  %v8480_v20 = vpop.f32.mrb[75].mxu0 }
0x1c1b   : > { %v7570_v12 = vmul.f32 -1.442695, %v5107_v28 }
0x1c1d   : > { %9206 = vpow2.f32 %v7570_v12 }
0x1c27   : > { %v9207_v31 = vpop.eup %9206 }
0x1c28   : > { %v5113_v46 = vadd.f32 1.0, %v9207_v31 }
0x1c2a   : > { %9208 = vrcp.f32 %v5113_v46 }
0x1c34   : > { %v9209_v63 = vpop.eup %9208 }
0x1c35   : > { %8482 = vmatpush3.msra.mxu1 %v9209_v63 }
0x1c36   : > { %8484 = vmatmul.mubr.msk.f32.vlgmr.msra.gmra.mrb[68].mxu1 %vm1277_vm3, %v10193_v4 }
0x1c37   : > { %8488 = vmatprep.mubr.msk.f32.mxu1 %vm1277_vm3, %v11169_v59 }
0x1d09   : > { %v5182_v55 = vpop.f32.mrb[68].mxu1 }
0x1d0a   : > { %v5186_v35 = vsel %vm1277_vm3, %v5182_v55, -inf  ;;  %v8485_v26 = vpop.f32.mrb[69].mxu1 }
0x1d0b   : > { %v5187_v27 = vrot.slane %v5186_v35, 4 }
0x1d0d   : > { %v5188_v37 = vmax.f32 %v5186_v35, %v5187_v27  ;;  %v11171_v35 = vld [vmem:[#allocation20_spill] sm:$0xff]  ;;  %v11172_v27 = vld [vmem:[#allocation19_spill] sm:$0xff] }
0x1d0f   : > { %v5189_v14 = vrot.slane %v5188_v37, 2 }
0x1d11   : > { %v5190_v47 = vmax.f32 %v5188_v37, %v5189_v14 }
0x1d13   : > { %v5191_v23 = vrot.slane %v5190_v47, 1 }
0x1d15   : > { %v5192_v28 = vmax.f32 %v5190_v47, %v5191_v23 }
0x1d17   : > { %v5193_v20 = vsub.f32 %v5182_v55, %v5192_v28  ;;  %v11170_v55 = vld [vmem:[#allocation17_spill] sm:$0xff]  ;;  %v10486_v28 = vpack.c.bf16 %v10227_v43, %v10223_v42 }
0x1d19   : > { %v5194_v12 = vmul.f32 1.442695, %v5193_v20 }
0x1d1b   : > { %9210 = vpow2.f32 %v5194_v12 }
0x1d25   : > { %v9211_v31 = vpop.eup %9210 }
0x1d26   : > { %v5196_v46 = vsel %vm1277_vm3, %v9211_v31, 0.0 }
0x1d27   : > { %v5197_v4 = vrot.slane %v5196_v46, 4 }
0x1d29   : > { %v5198_v63 = vadd.f32 %v5197_v4, %v5196_v46 }
0x1d2b   : > { %v5199_v6 = vrot.slane %v5198_v63, 2 }
0x1d2d   : > { %v5200_v59 = vadd.f32 %v5199_v6, %v5198_v63 }
0x1d2f   : > { %v5201_v39 = vrot.slane %v5200_v59, 1 }
0x1d31   : > { %v5202_v19 = vadd.f32 %v5201_v39, %v5200_v59 }
0x1d33   : > { %9212 = vrcp.f32 %v5202_v19 }
0x1d3d   : > { %v9213_v26 = vpop.eup %9212 }
0x1d3e   : > { %v5204_v60 = vmul.f32 %v9213_v26, %v9211_v31 }
0x1d40   : > { %8486 = vmatprep.subr.mxu1 %v5204_v60  ;;  %8497 = vmatmul.mubr.msk.f32.vlgmr.msra.gmra.mrb[76].mxu0 %vm1277_vm3, %v5204_v60 }
0x1d41   : > { %8487 = vmatpush3.msra.mxu1 %v5204_v60  ;;  %8503 = vmatprep.mubr.msk.f32.mxu0 %vm718_vm1, %v10223_v42 }
0x1d42   : > { %8489 = vmatmul.mubr.msk.f32.vlgmr.msra.gmra.mrb[70].mxu1 %vm1277_vm3, %v11170_v55 }
0x1d43   : > { %8491 = vmatprep.mubr.msk.f32.mxu1 %vm1277_vm3, %v11171_v35 }
0x1d46   : > { %8492 = vmatmul.mubr.msk.f32.gmra.mrb[72].mxu1 %vm1277_vm3, %v11172_v27 }
0x1e13   : > { %v5371_v39 = vpop.f32.mrb[76].mxu0 }
0x1e14   : > { %5377 = vperm.xlu1 %9094, %v5371_v39   ;;  %v8498_v19 = vpop.f32.mrb[77].mxu0 }
0x1e15   : > { %v8490_v6 = vpop.f32.mrb[70].mxu1 }
0x1e16   : > { %v5283_v37 = vpop.f32.mrb[71].mxu1 }
0x1e17   : > { %v8923_v14 = vpack.c.bf16 %v8490_v6, %v5283_v37 }
0x1e19   : > { %v8493_v47 = vpop.f32.mrb[72].mxu1  ;;  %8925 = vmatprep.subr.msk.bf16.mxu1 %vm9780_vm4, %v8923_v14 }
0x1e1a   : > { %v5293_v60 = vpop.f32.mrb[73].mxu1  ;;  %8928 = vmatpush3.bf16.xpose.msk.msra.mxu1 %vm9780_vm4, %v8923_v14 }
0x1e1b   : > { %v8929_v23 = vpack.c.bf16 %v8493_v47, %v5293_v60 }
0x1e1d   : > { %8931 = vmatprep.subr.msk.bf16.mxu1 %vm9780_vm4, %v8929_v23 }
0x1e22   : > { %8934 = vmatpush3.bf16.xpose.msk.msra.mxu1 %vm9780_vm4, %v8929_v23 }
0x1e23   : > { %8952 = vmatprep.subr.bf16.mxu1 %v10486_v28 }
0x1e93   : > { %v5378_v20 = vpop.permute.xlu1 %5377 }
0x1e94   : > { %v5380_v12 = vmul.f32 %v10241_v7, %v5378_v20  ;;  %v5381_v31 = vmul.f32 %v10247_v18, %v5378_v20  ;;  %v10504_v7 = vpack.c.bf16 %v10235_v1, %v10231_v41 }
0x1e96   : > { %v8919_v46 = vpack.c.bf16 %v5381_v31, %v5380_v12 }
0x1e98   : > { %8920 = vmatprep.subr.bf16.mxu0 %v8919_v46 }
0x1e99   : > { %8922 = vmatpush3.bf16.msra.mxu0 %v8919_v46 }
0x1e9c   : > { %8504 = vmatmul.mubr.msk.f32.vlgmr.msra.gmra.mrb[78].mxu0 %vm718_vm1, %v10227_v43 }
0x1e9d   : > { %8506 = vmatprep.mubr.msk.f32.mxu0 %vm718_vm1, %v10231_v41 }
0x1ea0   : > { %8507 = vmatmul.mubr.msk.f32.gmra.mrb[80].mxu0 %vm718_vm1, %v10235_v1 }
0x1ea1   : > { %8531 = vmatprep.mubr.msk.f32.mxu0 %vm1091_vm0, %v10258_v57 }
0x1f6f   : > { %v8505_v44 = vpop.f32.mrb[78].mxu0 }
0x1f70   : > { %v5448_v42 = vpop.f32.mrb[79].mxu0 }
0x1f71   : > { %8517 = vmatprep.mubr.msk.f32.mxu1 %vm1277_vm3, %v5448_v42 }
0x1f72   : > { %8518 = vmatmul.mubr.msk.f32.vlgmr.msra.gmra.mrb[74].mxu1 %vm1277_vm3, %v8505_v44 }
0x1f73   : > { %v8508_v43 = vpop.f32.mrb[80].mxu0  ;;  %8954 = vmatpush3.bf16.msra.mxu1 %v10486_v28 }
0x1f74   : > { %v5458_v18 = vpop.f32.mrb[81].mxu0  ;;  %8956 = vmatprep.subr.bf16.mxu1 %v10504_v7 }
0x1f75   : > { %8520 = vmatprep.mubr.msk.f32.mxu1 %vm1277_vm3, %v5458_v18 }
0x1f76   : > { %8521 = vmatmul.mubr.msk.f32.gmra.mrb[76].mxu1 %vm1277_vm3, %v8508_v43 }
0x1f77   : > { %8958 = vmatpush3.bf16.msra.mxu1 %v10504_v7 }
0x2045   : > { %v8519_v57 = vpop.f32.mrb[74].mxu1 }
0x2046   : > { %v5563_v4 = vadd.f32 %v10276_v38, %v8519_v57  ;;  %v5557_v63 = vpop.f32.mrb[75].mxu1 }
0x2047   : > { %v5558_v41 = vadd.f32 %v10282_v45, %v5557_v63 }
0x2048   : > { %v7590_v1 = vmul.f32 -1.442695, %v5563_v4 }
0x2049   : > { %v7589_v59 = vmul.f32 -1.442695, %v5558_v41  ;;  %v8522_v26 = vpop.f32.mrb[76].mxu1 }
0x204a   : > { %9214 = vpow2.f32 %v7590_v1  ;;  %v5573_v55 = vadd.f32 %v10288_v34, %v8522_v26  ;;  %v5567_v35 = vpop.f32.mrb[77].mxu1 }
0x204b   : > { %9216 = vpow2.f32 %v7589_v59  ;;  %v5568_v27 = vadd.f32 %v10294_v8, %v5567_v35 }
0x204c   : > { %v7592_v39 = vmul.f32 -1.442695, %v5573_v55 }
0x204d   : > { %v7591_v19 = vmul.f32 -1.442695, %v5568_v27 }
0x204e   : > { %9218 = vpow2.f32 %v7592_v39 }
0x204f   : > { %9220 = vpow2.f32 %v7591_v19 }
0x2054   : > { %v9215_v6 = vpop.eup %9214 }
0x2055   : > { %v9217_v37 = vpop.eup %9216  ;;  %v5589_v38 = vadd.f32 1.0, %v9215_v6 }
0x2056   : > { %v5588_v14 = vadd.f32 1.0, %v9217_v37 }
0x2057   : > { %9222 = vrcp.f32 %v5589_v38 }
0x2058   : > { %v9219_v45 = vpop.eup %9218  ;;  %9224 = vrcp.f32 %v5588_v14 }
0x2059   : > { %v9221_v47 = vpop.eup %9220  ;;  %v5591_v60 = vadd.f32 1.0, %v9219_v45 }
0x205a   : > { %v5590_v23 = vadd.f32 1.0, %v9221_v47 }
0x205b   : > { %9226 = vrcp.f32 %v5591_v60 }
0x205c   : > { %9228 = vrcp.f32 %v5590_v23 }
0x2061   : > { %v9223_v34 = vpop.eup %9222 }
0x2062   : > { %v9225_v20 = vpop.eup %9224 }
0x2063   : > { %v8935_v12 = vpack.c.bf16 %v9223_v34, %v9225_v20 }
0x2065   : > { %v9227_v8 = vpop.eup %9226  ;;  %8936 = vmatprep.subr.bf16.mxu0 %v8935_v12 }
0x2066   : > { %v9229_v31 = vpop.eup %9228  ;;  %8938 = vmatpush3.bf16.msra.mxu0 %v8935_v12 }
0x2067   : > { %v8939_v46 = vpack.c.bf16 %v9227_v8, %v9229_v31 }
0x2069   : > { %8940 = vmatprep.subr.bf16.mxu0 %v8939_v46 }
0x206a   : > { %8942 = vmatpush3.bf16.msra.mxu0 %v8939_v46 }
0x206b   : > { %8944 = vmatprep.subr.bf16.mxu0 %v10486_v28 }
0x206d   : > { %8532 = vmatmul.mubr.msk.f32.vlgmr.msra.gmra.mrb[82].mxu0 %vm1091_vm0, %v10301_v21 }
0x206e   : > { %8534 = vmatprep.mubr.msk.f32.mxu0 %vm1091_vm0, %v10308_v17  ;;  %8946 = vmatpush3.bf16.msra.mxu0 %v10486_v28 }
0x206f   : > { %8948 = vmatprep.subr.bf16.mxu0 %v10504_v7 }
0x2071   : > { %8535 = vmatmul.mubr.msk.f32.gmra.mrb[84].mxu0 %vm1091_vm0, %v10317_v11 }
0x2072   : > { %8950 = vmatpush3.bf16.msra.mxu0 %v10504_v7 }
0x2073   : > { %8960 = vmatprep.subr.bf16.mxu0 %v10486_v28 }
0x2140   : > { %v8533_v44 = vpop.f32.mrb[82].mxu0 }
0x2141   : > { %v5686_v42 = vsel %vm1091_vm0, %v8533_v44, -inf  ;;  %v5666_v43 = vpop.f32.mrb[83].mxu0 }
0x2142   : > { %v5685_v21 = vsel %vm1091_vm0, %v5666_v43, -inf }
0x2143   : > { %v5689_v18 = vmax.f32 %v5685_v21, %v5686_v42 }
0x2144   : > { %v8536_v57 = vpop.f32.mrb[84].mxu0 }
0x2145   : > { %v5688_v17 = vsel %vm1091_vm0, %v8536_v57, -inf  ;;  %v5676_v4 = vpop.f32.mrb[85].mxu0 }
0x2146   : > { %v5687_v63 = vsel %vm1091_vm0, %v5676_v4, -inf }
0x2147   : > { %v5690_v41 = vmax.f32 %v5687_v63, %v5688_v17 }
0x2149   : > { %v5691_v1 = vmax.f32 %v5689_v18, %v5690_v41 }
0x214b   : > { %v5692_v11 = vrot.slane %v5691_v1, 4 }
0x214d   : > { %v5693_v59 = vmax.f32 %v5691_v1, %v5692_v11 }
0x214f   : > { %v5694_v26 = vrot.slane %v5693_v59, 2 }
0x2151   : > { %v5695_v55 = vmax.f32 %v5693_v59, %v5694_v26 }
0x2153   : > { %v5696_v35 = vrot.slane %v5695_v55, 1 }
0x2155   : > { %v5697_v27 = vmax.f32 %v5695_v55, %v5696_v35 }
0x2157   : > { %v5698_v39 = vsub.f32 %v5666_v43, %v5697_v27  ;;  %v5699_v19 = vsub.f32 %v8533_v44, %v5697_v27  ;;  %v5700_v6 = vsub.f32 %v5676_v4, %v5697_v27  ;;  %v5701_v37 = vsub.f32 %v8536_v57, %v5697_v27 }
0x2159   : > { %v5702_v38 = vmul.f32 1.442695, %v5698_v39  ;;  %v5704_v14 = vmul.f32 1.442695, %v5699_v19  ;;  %v5706_v45 = vmul.f32 1.442695, %v5700_v6 }
0x215a   : > { %v5708_v47 = vmul.f32 1.442695, %v5701_v37 }
0x215b   : > { %9230 = vpow2.f32 %v5702_v38 }
0x215c   : > { %9232 = vpow2.f32 %v5704_v14 }
0x215d   : > { %9234 = vpow2.f32 %v5706_v45 }
0x215e   : > { %9236 = vpow2.f32 %v5708_v47 }
0x2165   : > { %v9231_v60 = vpop.eup %9230 }
0x2166   : > { %v9233_v23 = vpop.eup %9232  ;;  %v5710_v34 = vsel %vm1091_vm0, %v9231_v60, 0.0 }
0x2167   : > { %v9235_v20 = vpop.eup %9234  ;;  %v5711_v12 = vsel %vm1091_vm0, %v9233_v23, 0.0 }
0x2168   : > { %v9237_v8 = vpop.eup %9236  ;;  %v5712_v31 = vadd.f32 %v5711_v12, %v5710_v34  ;;  %v5713_v46 = vsel %vm1091_vm0, %v9235_v20, 0.0 }
0x2169   : > { %v5715_v42 = vsel %vm1091_vm0, %v9237_v8, 0.0 }
0x216a   : > { %v5714_v44 = vadd.f32 %v5713_v46, %v5712_v31 }
0x216c   : > { %v5716_v43 = vadd.f32 %v5715_v42, %v5714_v44 }
0x216e   : > { %v5717_v21 = vrot.slane %v5716_v43, 4 }
0x2170   : > { %v5718_v18 = vadd.f32 %v5717_v21, %v5716_v43 }
0x2172   : > { %v5719_v57 = vrot.slane %v5718_v18, 2 }
0x2174   : > { %v5720_v17 = vadd.f32 %v5719_v57, %v5718_v18 }
0x2176   : > { %v5721_v4 = vrot.slane %v5720_v17, 1 }
0x2178   : > { %v5722_v63 = vadd.f32 %v5721_v4, %v5720_v17 }
0x217a   : > { %9238 = vrcp.f32 %v5722_v63 }
0x2184   : > { %v9239_v41 = vpop.eup %9238 }
0x2185   : > { %v5726_v1 = vmul.f32 %v9239_v41, %v9235_v20  ;;  %v5724_v11 = vmul.f32 %v9239_v41, %v9231_v60  ;;  %v5725_v59 = vmul.f32 %v9239_v41, %v9233_v23  ;;  %v5727_v26 = vmul.f32 %v9239_v41, %v9237_v8 }
0x2187   : > { %v5873_v55 = vmul.f32 %v10334_v56, %v5724_v11  ;;  %v5732_v35 = vmul.f32 %v5724_v11, %v10400_v53  ;;  %v5874_v27 = vmul.f32 %v10340_v3, %v5725_v59  ;;  %v5733_v39 = vmul.f32 %v5725_v59, %v10407_v29 }
0x2188   : > { %v5875_v19 = vmul.f32 %v10346_v62, %v5726_v1  ;;  %v5734_v6 = vmul.f32 %v5726_v1, %v10413_v9  ;;  %v5876_v37 = vmul.f32 %v10352_v25, %v5727_v26  ;;  %v5735_v56 = vmul.f32 %v5727_v26, %v10419_v2  ;;  %v11173_v9 = vld [vmem:[#allocation23_spill] sm:$0xff] }
0x2189   : > { %5877 = vxpose.xlu1.b32.start [1/4] (short) (narrow) %v5873_v55, 32  ;;  %5736 = vxpose.xlu0.b32.start [1/4] (short) (narrow) %v5732_v35, 32  ;;  %v6030_v53 = vmul.f32 %v10377_v33, %v5724_v11  ;;  %v6031_v3 = vmul.f32 %v10383_v24, %v5725_v59  ;;  %v6032_v29 = vmul.f32 %v10389_v22, %v5726_v1  ;;  %v11174_v25 = vld [vmem:[#allocation27_spill] sm:$0xff]  ;;  %v11175_v33 = vld [vmem:[#allocation29_spill] sm:$0xff]  ;;  %v11176_v24 = vld [vmem:[#allocation24_spill] sm:$0xff] }
0x218a   : > { %v6033_v62 = vmul.f32 %v10395_v30, %v5727_v26  ;;  %v9096_v22 = vld [vmem:[%s11062_s12] sm:$0xff]  }
0x218b   : > { %8579 = vmatprep.subr.bf16.mxu1 %v9096_v22 }
0x218d   : > { %5878 = vxpose.xlu1.b32.cont [2/4] (short) (narrow) %v5874_v27, 32  ;;  %5737 = vxpose.xlu0.b32.cont [2/4] (short) (narrow) %v5733_v39, 32 }
0x2191   : > { %5879 = vxpose.xlu1.b32.cont [3/4] (short) (narrow) %v5875_v19, 32  ;;  %5738 = vxpose.xlu0.b32.cont [3/4] (short) (narrow) %v5734_v6, 32 }
0x2195   : > { %5880 = vxpose.xlu1.b32.end [4/4] (short) (narrow) %v5876_v37, 32  ;;  %5739 = vxpose.xlu0.b32.end [4/4] (short) (narrow) %v5735_v56, 32 }
0x2199   : > { %6034 = vxpose.xlu0.b32.start [1/4] (short) (narrow) %v6030_v53, 32 }
0x219d   : > { %6035 = vxpose.xlu0.b32.cont [2/4] (short) (narrow) %v6031_v3, 32 }
0x21a1   : > { %6036 = vxpose.xlu0.b32.cont [3/4] (short) (narrow) %v6032_v29, 32 }
0x21a5   : > { %6037 = vxpose.xlu0.b32.end [4/4] (short) (narrow) %v6033_v62, 32 }
0x21b3   : > { %2190 = vrot.lane.b32.xlu1 %v11173_v9, %s11100_s26 }
0x21b7   : > { %2349 = vrot.lane.b32.xlu1 %v11174_v25, %s11098_s2 }
0x21bb   : > { %2353 = vrot.lane.b32.xlu1 %v11175_v33, %s11098_s2 }
0x21bf   : > { %3466 = vrot.lane.b32.xlu1 %v10127_v52, %s11100_s26  ;;  %v11177_v52 = vld [vmem:[#allocation26_spill] sm:$0xff] }
0x21c3   : > { %3470 = vrot.lane.b32.xlu1 %v10131_v0, %s11100_s26  ;;  %v11178_v0 = vld [vmem:[#allocation25_spill] sm:$0xff] }
0x21c7   : > { %3623 = vrot.lane.b32.xlu1 %v10176_v13, %s11098_s2  ;;  %v11179_v13 = vld [vmem:[#allocation28_spill] sm:$0xff] }
0x21cb   : > { %3627 = vrot.lane.b32.xlu1 %v10180_v61, %s11098_s2  ;;  %v11180_v61 = vld [vmem:[#allocation30_spill] sm:$0xff] }
0x21ce   : > { %2188 = vrot.lane.b32.xlu0 %v11176_v24, %s11100_s26 }
0x21cf   : > { %4739 = vrot.lane.b32.xlu1 %v10366_v50, %s11100_s26 }
0x21d2   : > { %2192 = vrot.lane.b32.xlu0 %v11177_v52, %s11100_s26  ;;  %v9100_v52 = vld [vmem:[%s11063_s13 + $0x8] sm:$0xff]  }
0x21d3   : > { %4743 = vrot.lane.b32.xlu1 %v10370_v5, %s11100_s26 }
0x21d6   : > { %2194 = vrot.lane.b32.xlu0 %v11178_v0, %s11100_s26  ;;  %v9101_v0 = vld [vmem:[%s11063_s13 + $0x10] sm:$0xff]  }
0x21d7   : > { %4896 = vrot.lane.b32.xlu1 %v10454_v48, %s11098_s2 }
0x21da   : > { %2347 = vrot.lane.b32.xlu0 %v11179_v13, %s11098_s2  ;;  %v9102_v13 = vld [vmem:[%s11063_s13 + $0x18] sm:$0xff]  }
0x21db   : > { %4900 = vrot.lane.b32.xlu1 %v10458_v40, %s11098_s2 }
0x21de   : > { %2351 = vrot.lane.b32.xlu0 %v11180_v61, %s11098_s2 }
0x21e2   : > { %3464 = vrot.lane.b32.xlu0 %v10129_v32, %s11100_s26 }
0x21e6   : > { %3468 = vrot.lane.b32.xlu0 %v10133_v54, %s11100_s26 }
0x21ea   : > { %3621 = vrot.lane.b32.xlu0 %v10178_v58, %s11098_s2  ;;  %v9097_v58 = vld [vmem:[%s11062_s12 + $0x8] sm:$0xff]  }
0x21ee   : > { %3625 = vrot.lane.b32.xlu0 %v10182_v36, %s11098_s2 }
0x21f2   : > { %4737 = vrot.lane.b32.xlu0 %v10368_v15, %s11100_s26  ;;  %v9098_v15 = vld [vmem:[%s11062_s12 + $0x10] sm:$0xff]  }
0x21f6   : > { %4741 = vrot.lane.b32.xlu0 %v10372_v10, %s11100_s26  ;;  %s11182_s26 = smov 32  }
0x21fa   : > { %4894 = vrot.lane.b32.xlu0 %v10456_v49, %s11098_s2 }
0x21fe   : > { %4898 = vrot.lane.b32.xlu0 %v10460_v16, %s11098_s2  ;;  %s675_s2 = sand.u32 1, %s9348_s28  }
0x21ff   : > { %s7378_s0 = sshll.u32 %s675_s2, 2  ;;  %s7302_s4 = scalar_lea.sflag [#allocation4], %s675_s2 }
0x2200   : > { %s677_s8 = scalar_lea.vmem [#allocation3], %s7378_s0 }
0x2201   : > { %s7315_s3 = sshll.u32 %s677_s8, 4  ;;  %s11010_s3 = int_to_ptr.vmem [resolvable:$true] %s7315_s3 }
0x2209   : > { %v5752_v32 = vpop.trf.xlu0  ;;  %v5893_v54 = vpop.trf.xlu1 }
0x220a   : > { %8545 = vmatprep.mubr.msk.f32.mxu0 %vm1091_vm0, %v5752_v32  ;;  %8559 = vmatprep.mubr.msk.f32.mxu1 %vm1091_vm0, %v5893_v54 }
0x220d   : > { %v5753_v36 = vpop.trf.xlu0  ;;  %v5894_v50 = vpop.trf.xlu1 }
0x220e   : > { %8546 = vmatmul.mubr.msk.f32.vlgmr.msra.gmra.mrb[86].mxu0 %vm1091_vm0, %v5753_v36  ;;  %8560 = vmatmul.mubr.msk.f32.vlgmr.msra.gmra.mrb[78].mxu1 %vm1091_vm0, %v5894_v50 }
0x220f   : > { %8962 = vmatpush3.bf16.msra.mxu0 %v10486_v28  ;;  %8580 = vmatpush3.bf16.msra.mxu1 %v9096_v22  ;;  %v9099_v22 = vld [vmem:[%s11063_s13] sm:$0xff]  }
0x2210   : > { %8964 = vmatprep.subr.bf16.mxu0 %v10504_v7  ;;  %8581 = vmatprep.subr.bf16.mxu1 %v9097_v58 }
0x2211   : > { %v5754_v5 = vpop.trf.xlu0  ;;  %v5895_v10 = vpop.trf.xlu1 }
0x2212   : > { %8548 = vmatprep.mubr.msk.f32.mxu0 %vm1091_vm0, %v5754_v5  ;;  %8562 = vmatprep.mubr.msk.f32.mxu1 %vm1091_vm0, %v5895_v10 }
0x2213   : > { %8966 = vmatpush3.bf16.msra.mxu0 %v10504_v7  ;;  %8582 = vmatpush3.bf16.msra.mxu1 %v9097_v58 }
0x2214   : > { %8583 = vmatprep.subr.bf16.mxu1 %v9098_v15  ;;  %8601 = vmatprep.subr.bf16.mxu0 %v9099_v22 }
0x2215   : > { %v5755_v30 = vpop.trf.xlu0  ;;  %v5896_v2 = vpop.trf.xlu1 }
0x2216   : > { %8549 = vmatmul.mubr.msk.f32.gmra.mrb[88].mxu0 %vm1091_vm0, %v5755_v30  ;;  %8563 = vmatmul.mubr.msk.f32.gmra.mrb[80].mxu1 %vm1091_vm0, %v5896_v2 }
0x2217   : > { %8584 = vmatpush3.bf16.msra.mxu1 %v9098_v15 }
0x2219   : > { %v6050_v48 = vpop.trf.xlu0 }
0x221a   : > { %8573 = vmatprep.mubr.msk.f32.mxu0 %vm1091_vm0, %v6050_v48 }
0x221d   : > { %v6051_v49 = vpop.trf.xlu0 }
0x221e   : > { %8574 = vmatmul.mubr.msk.f32.vlgmr.msra.gmra.mrb[90].mxu0 %vm1091_vm0, %v6051_v49  ;;  %v7227_v49 = vld [vmem:[%s11071_s21] sm:$0xf] }
0x221f   : > { %8602 = vmatpush3.bf16.msra.mxu0 %v9099_v22 }
0x2220   : > { %8603 = vmatprep.subr.bf16.mxu0 %v9100_v52 }
0x2221   : > { %v6052_v40 = vpop.trf.xlu0 }
0x2222   : > { %8576 = vmatprep.mubr.msk.f32.mxu0 %vm1091_vm0, %v6052_v40  ;;  %v9103_v40 = vld [vmem:[%s11065_s15] sm:$0xff]  }
0x2223   : > { %8604 = vmatpush3.bf16.msra.mxu0 %v9100_v52  ;;  %v6714_v52 = vld [vmem:[%s11067_s17] sm:$0xff] }
0x2224   : > { %8605 = vmatprep.subr.bf16.mxu0 %v9101_v0 }
0x2225   : > { %v2191_v16 = vpop.permute.xlu1 %2190  ;;  %v6053_v38 = vpop.trf.xlu0 }
0x2226   : > { %2202 = vst.msk [vmem:[#allocation2 + $0x8] sm:$0xff] %vm2200_vm5, %v2191_v16  ;;  %8577 = vmatmul.mubr.msk.f32.gmra.mrb[92].mxu0 %vm1091_vm0, %v6053_v38 }
0x2227   : > { %8606 = vmatpush3.bf16.msra.mxu0 %v9101_v0  ;;  %v6715_v0 = vld [vmem:[%s11067_s17 + $0x8] sm:$0xff] }
0x2228   : > { %8607 = vmatprep.subr.bf16.mxu0 %v9102_v13 }
0x2229   : > { %v2350_v14 = vpop.permute.xlu1 %2349 }
0x222a   : > { %2361 = vst.msk [vmem:[#allocation2 + $0x8] sm:$0xff] %vm2359_vm6, %v2350_v14 }
0x222b   : > { %8608 = vmatpush3.bf16.msra.mxu0 %v9102_v13  ;;  %v6716_v13 = vld [vmem:[%s11067_s17 + $0x10] sm:$0xff] }
0x222c   : > { %8625 = vmatprep.subr.bf16.mxu0 %v9103_v40 }
0x222d   : > { %v2354_v45 = vpop.permute.xlu1 %2353 }
0x2231   : > { %v3467_v47 = vpop.permute.xlu1 %3466  ;;  %v6184_v17 = vld [vmem:[#allocation2 + $0x8] sm:$0xff] }
0x2232   : > { %3477 = vst.msk [vmem:[#allocation2 + $0x28] sm:$0xff] %vm2200_vm5, %v3467_v47 }
0x2235   : > { %v3471_v60 = vpop.permute.xlu1 %3470 }
0x2236   : > { %3479 = vst.msk [vmem:[#allocation2 + $0x38] sm:$0xff] %vm2200_vm5, %v3471_v60 }
0x2239   : > { %v3624_v23 = vpop.permute.xlu1 %3623 }
0x223a   : > { %3634 = vst.msk [vmem:[#allocation2 + $0x28] sm:$0xff] %vm2359_vm6, %v3624_v23 }
0x223d   : > { %v3628_v34 = vpop.permute.xlu1 %3627 }
0x223e   : > { %3636 = vst.msk [vmem:[#allocation2 + $0x38] sm:$0xff] %vm2359_vm6, %v3628_v34 }
0x2240   : > { %v2189_v20 = vpop.permute.xlu0 %2188 }
0x2241   : > { %2201 = vst.msk [vmem:[#allocation2] sm:$0xff] %vm2200_vm5, %v2189_v20  ;;  %v4740_v12 = vpop.permute.xlu1 %4739  ;;  %v6188_v27 = vld [vmem:[#allocation2 + $0x28] sm:$0xff] }
0x2242   : > { %4750 = vst.msk [vmem:[#allocation2 + $0x48] sm:$0xff] %vm2200_vm5, %v4740_v12 }
0x2244   : > { %v2193_v8 = vpop.permute.xlu0 %2192 }
0x2245   : > { %2203 = vst.msk [vmem:[#allocation2 + $0x10] sm:$0xff] %vm2200_vm5, %v2193_v8  ;;  %v4744_v31 = vpop.permute.xlu1 %4743  ;;  %v6190_v37 = vld [vmem:[#allocation2 + $0x38] sm:$0xff] }
0x2246   : > { %4752 = vst.msk [vmem:[#allocation2 + $0x58] sm:$0xff] %vm2200_vm5, %v4744_v31 }
0x2248   : > { %v2195_v46 = vpop.permute.xlu0 %2194 }
0x2249   : > { %2204 = vst.msk [vmem:[#allocation2 + $0x18] sm:$0xff] %vm2200_vm5, %v2195_v46  ;;  %v4897_v44 = vpop.permute.xlu1 %4896 }
0x224a   : > { %2363 = vst.msk [vmem:[#allocation2 + $0x18] sm:$0xff] %vm2359_vm6, %v2354_v45  ;;  %4907 = vst.msk [vmem:[#allocation2 + $0x48] sm:$0xff] %vm2359_vm6, %v4897_v44 }
0x224c   : > { %v2348_v42 = vpop.permute.xlu0 %2347 }
0x224d   : > { %2360 = vst.msk [vmem:[#allocation2] sm:$0xff] %vm2359_vm6, %v2348_v42  ;;  %v4901_v43 = vpop.permute.xlu1 %4900 }
0x224e   : > { %4909 = vst.msk [vmem:[#allocation2 + $0x58] sm:$0xff] %vm2359_vm6, %v4901_v43 }
0x2250   : > { %v2352_v21 = vpop.permute.xlu0 %2351 }
0x2251   : > { %2362 = vst.msk [vmem:[#allocation2 + $0x10] sm:$0xff] %vm2359_vm6, %v2352_v21  ;;  %v6186_v1 = vld [vmem:[#allocation2 + $0x18] sm:$0xff]  ;;  %v6192_v62 = vld [vmem:[#allocation2 + $0x48] sm:$0xff] }
0x2254   : > { %v3465_v18 = vpop.permute.xlu0 %3464  ;;  %v6183_v57 = vld [vmem:[#allocation2] sm:$0xff] }
0x2255   : > { %3476 = vst.msk [vmem:[#allocation2 + $0x20] sm:$0xff] %vm2200_vm5, %v3465_v18  ;;  %v6199_v4 = vpack.c.bf16 %v6184_v17, %v6183_v57  ;;  %v6194_v33 = vld [vmem:[#allocation2 + $0x58] sm:$0xff] }
0x2257   : > { %8585 = vmatprep.mubr.msk.bf16.mxu1 %vm6231_vm7, %v6199_v4 }
0x2258   : > { %v3469_v63 = vpop.permute.xlu0 %3468  ;;  %v6185_v41 = vld [vmem:[#allocation2 + $0x10] sm:$0xff] }
0x2259   : > { %3478 = vst.msk [vmem:[#allocation2 + $0x30] sm:$0xff] %vm2200_vm5, %v3469_v63  ;;  %v6200_v11 = vpack.c.bf16 %v6186_v1, %v6185_v41 }
0x225b   : > { %8586 = vmatmul.mubr.msk.bf16.vlgmr.msra.gmra.mrb[84].mxu1 %vm6231_vm7, %v6200_v11 }
0x225c   : > { %v3622_v59 = vpop.permute.xlu0 %3621 }
0x225d   : > { %3633 = vst.msk [vmem:[#allocation2 + $0x20] sm:$0xff] %vm2359_vm6, %v3622_v59 }
0x2260   : > { %v3626_v26 = vpop.permute.xlu0 %3625 }
0x2261   : > { %3635 = vst.msk [vmem:[#allocation2 + $0x30] sm:$0xff] %vm2359_vm6, %v3626_v26 }
0x2264   : > { %v4738_v55 = vpop.permute.xlu0 %4737  ;;  %v6187_v35 = vld [vmem:[#allocation2 + $0x20] sm:$0xff] }
0x2265   : > { %4749 = vst.msk [vmem:[#allocation2 + $0x40] sm:$0xff] %vm2200_vm5, %v4738_v55  ;;  %v6201_v39 = vpack.c.bf16 %v6188_v27, %v6187_v35 }
0x2267   : > { %8589 = vmatprep.mubr.msk.bf16.mxu1 %vm6231_vm7, %v6201_v39 }
0x2268   : > { %v4742_v19 = vpop.permute.xlu0 %4741  ;;  %v6189_v6 = vld [vmem:[#allocation2 + $0x30] sm:$0xff] }
0x2269   : > { %4751 = vst.msk [vmem:[#allocation2 + $0x50] sm:$0xff] %vm2200_vm5, %v4742_v19  ;;  %v6202_v56 = vpack.c.bf16 %v6190_v37, %v6189_v6 }
0x226b   : > { %8590 = vmatmul.mubr.msk.bf16.gmra.mrb[88].mxu1 %vm6231_vm7, %v6202_v56 }
0x226c   : > { %v4895_v53 = vpop.permute.xlu0 %4894 }
0x226d   : > { %4906 = vst.msk [vmem:[#allocation2 + $0x40] sm:$0xff] %vm2359_vm6, %v4895_v53 }
0x2270   : > { %v4899_v3 = vpop.permute.xlu0 %4898 }
0x2271   : > { %4908 = vst.msk [vmem:[#allocation2 + $0x50] sm:$0xff] %vm2359_vm6, %v4899_v3 }
0x2274   : > { %v6191_v29 = vld [vmem:[#allocation2 + $0x40] sm:$0xff] }
0x2275   : > { %v6203_v9 = vpack.c.bf16 %v6192_v62, %v6191_v29 }
0x2277   : > { %8593 = vmatprep.mubr.msk.bf16.mxu1 %vm6231_vm7, %v6203_v9 }
0x2278   : > { %v6193_v25 = vld [vmem:[#allocation2 + $0x50] sm:$0xff] }
0x2279   : > { %v6204_v24 = vpack.c.bf16 %v6194_v33, %v6193_v25 }
0x227b   : > { %8594 = vmatmul.mubr.msk.bf16.gmra.mrb[92].mxu1 %vm6231_vm7, %v6204_v24 }
0x22e1   : > { %v8547_v61 = vpop.f32.mrb[86].mxu0  ;;  %v8561_v32 = vpop.f32.mrb[78].mxu1 }
0x22e2   : > { %5866 = vst.msk [vmem:[#allocation2 + $0x68] sm:$0xff] %vm718_vm1, %v8547_v61  ;;  %v5846_v54 = vpop.f32.mrb[87].mxu0  ;;  %v5987_v58 = vpop.f32.mrb[79].mxu1  ;;  %6012 = vrot.lane.b32.xlu1 %v8561_v32, %s11181_s1  ;;  %v8967_v61 = vpack.c.bf16 %v6715_v0, %v6714_v52  ;;  %v6717_v32 = vld [vmem:[%s11067_s17 + $0x18] sm:$0xff] }
0x22e3   : > { %5865 = vst.msk [vmem:[#allocation2 + $0x60] sm:$0xff] %vm718_vm1, %v5846_v54  ;;  %6010 = vrot.lane.b32.xlu0 %v5987_v58, %s11181_s1  ;;  %v10708_v54 = vpack.c.bf16 %v6717_v32, %v6716_v13  ;;  %v6718_v58 = vld [vmem:[%s11067_s17 + $0x20] sm:$0xff] }
0x22e4   : > { %8968 = vmatprep.subr.bf16.mxu1 %v8967_v61 }
0x22e5   : > { %8970 = vmatpush3.bf16.msra.mxu1 %v8967_v61 }
0x22e6   : > { %8972 = vmatprep.subr.bf16.mxu1 %v10708_v54 }
0x22e9   : > { %v8550_v36 = vpop.f32.mrb[88].mxu0  ;;  %v8564_v50 = vpop.f32.mrb[80].mxu1  ;;  %8974 = vmatpush3.bf16.msra.mxu1 %v10708_v54 }
0x22ea   : > { %5868 = vst.msk [vmem:[#allocation2 + $0x78] sm:$0xff] %vm718_vm1, %v8550_v36  ;;  %v5856_v15 = vpop.f32.mrb[89].mxu0  ;;  %v5997_v5 = vpop.f32.mrb[81].mxu1  ;;  %6016 = vrot.lane.b32.xlu1 %v8564_v50, %s11181_s1  ;;  %v6719_v36 = vld [vmem:[%s11067_s17 + $0x28] sm:$0xff] }
0x22eb   : > { %5867 = vst.msk [vmem:[#allocation2 + $0x70] sm:$0xff] %vm718_vm1, %v5856_v15  ;;  %6014 = vrot.lane.b32.xlu0 %v5997_v5, %s11181_s1  ;;  %v10717_v50 = vpack.c.bf16 %v6719_v36, %v6718_v58  ;;  %s9294_s1 = scalar_lea.vmem %s11010_s3, 64 }
0x22ec   : > { %p9295_p11 = scmp.ne.s32.totalorder %s11010_s3, %s9294_s1 }
0x22ed   : > { %8976 = vmatprep.subr.bf16.mxu1 %v10717_v50 }
0x22ee   : > { %8978 = vmatpush3.bf16.msra.mxu1 %v10717_v50  ;;  %p9296_p12 = pnand %p9295_p11, %p9518_p5 }
0x22f0   : > { %p9297_p13 = pneg %p9296_p12 }
0x22f1   : > { %v8575_v10 = vpop.f32.mrb[90].mxu0 }
0x22f2   : > { %v6144_v30 = vpop.f32.mrb[91].mxu0  ;;  %6169 = vrot.lane.b32.xlu1 %v8575_v10, %s11182_s26 }
0x22f3   : > { %6167 = vrot.lane.b32.xlu0 %v6144_v30, %s11182_s26 }
0x22f9   : > { %v8578_v2 = vpop.f32.mrb[92].mxu0 }
0x22fa   : > { %v6154_v48 = vpop.f32.mrb[93].mxu0  ;;  %6173 = vrot.lane.b32.xlu1 %v8578_v2, %s11182_s26 }
0x22fb   : > { %6171 = vrot.lane.b32.xlu0 %v6154_v48, %s11182_s26  ;;  %s9364_s26 = smov [#allocation3]  }
0x22fc   : > { %s9298_s0 = sshll.u32 %s9364_s26, 4  ;;  %s9299_s0 = int_to_ptr.vmem [resolvable:$false] %s9298_s0 }
0x22fd   : > { %s9300_s5 = scalar_lea.vmem %s9299_s0, 128  ;;  %p9301_p0 = scmp.lt.s32.totalorder %s11010_s3, %s9299_s0 }
0x22fe   : > { %p9302_p1 = scmp.lt.s32.totalorder %s9300_s5, %s9294_s1 }
0x22ff   : > { %7230 = vperm.xlu0 %9095, %v7227_v49  }
0x2300   : > { %p9303_p2 = por %p9302_p1, %p9301_p0 }
0x2302   : > { %p9304_p3 = pnand %p9303_p2, %p9297_p13 }
0x232e   : > { %v8587_v16 = vpop.f32.mrb[84].mxu1 }
0x232f   : > { %v6290_v38 = vpop.f32.mrb[85].mxu1  ;;  %v6355_v45 = vmax.f32 %v8587_v16, 0.0 }
0x2330   : > { %v8588_v14 = vpop.f32.mrb[86].mxu1  ;;  %v6353_v23 = vmax.f32 %v6290_v38, 0.0 }
0x2331   : > { %v6356_v47 = vmax.f32 %v8588_v14, 0.0  ;;  %v6293_v60 = vpop.f32.mrb[87].mxu1  ;;  %v11183_v14 = vld [vmem:[#allocation21_spill] sm:$0xff] }
0x2332   : > { %v6354_v34 = vmax.f32 %v6293_v60, 0.0  ;;  %v11186_v60 = vld [vmem:[#allocation32_spill] sm:$0xff] }
0x2333   : > { %v6370_v20 = vpack.c.bf16 %v6356_v47, %v6355_v45  ;;  %v11184_v45 = vld [vmem:[#allocation22_spill] sm:$0xff]  ;;  %v11185_v47 = vld [vmem:[#allocation31_spill] sm:$0xff] }
0x2334   : > { %v6369_v12 = vpack.c.bf16 %v6354_v34, %v6353_v23  ;;  %v11187_v23 = vld [vmem:[#allocation16_spill] sm:$0xff]  ;;  %v11188_v34 = vld [vmem:[#allocation15_spill] sm:$0xff] }
0x2336   : > { %8609 = vmatprep.mubr.msk.bf16.mxu0 %vm6416_vm8, %v6369_v12  ;;  %v6721_v12 = vld [vmem:[%s11067_s17 + $0x38] sm:$0xff] }
0x2337   : > { %8610 = vmatmul.mubr.msk.bf16.vlgmr.msra.gmra.mrb[96].mxu0 %vm6416_vm8, %v6370_v20  ;;  %v6720_v20 = vld [vmem:[%s11067_s17 + $0x30] sm:$0xff] }
0x2338   : > { %8626 = vmatpush3.bf16.msra.mxu0 %v9103_v40 }
0x2339   : > { %8723 = vmatprep.subr.bf16.mxu0 %v11143_v51 }
0x233e   : > { %v8591_v8 = vpop.f32.mrb[88].mxu1 }
0x233f   : > { %v6306_v31 = vpop.f32.mrb[89].mxu1  ;;  %v6359_v44 = vmax.f32 %v8591_v8, 0.0  ;;  %v8979_v8 = vpack.c.bf16 %v6721_v12, %v6720_v20 }
0x2340   : > { %v8592_v46 = vpop.f32.mrb[90].mxu1  ;;  %v6357_v21 = vmax.f32 %v6306_v31, 0.0 }
0x2341   : > { %v6360_v42 = vmax.f32 %v8592_v46, 0.0  ;;  %v6309_v43 = vpop.f32.mrb[91].mxu1  ;;  %8980 = vmatprep.subr.bf16.mxu1 %v8979_v8 }
0x2342   : > { %v6358_v18 = vmax.f32 %v6309_v43, 0.0  ;;  %8982 = vmatpush3.bf16.msra.mxu1 %v8979_v8 }
0x2343   : > { %v6372_v57 = vpack.c.bf16 %v6360_v42, %v6359_v44  ;;  %8984 = vmatprep.subr.bf16.mxu1 %v8967_v61 }
0x2344   : > { %v6371_v17 = vpack.c.bf16 %v6358_v18, %v6357_v21 }
0x2346   : > { %8613 = vmatprep.mubr.msk.bf16.mxu0 %vm6416_vm8, %v6371_v17 }
0x2347   : > { %8614 = vmatmul.mubr.msk.bf16.gmra.mrb[100].mxu0 %vm6416_vm8, %v6372_v57 }
0x234e   : > { %v8595_v4 = vpop.f32.mrb[92].mxu1 }
0x234f   : > { %v6322_v63 = vpop.f32.mrb[93].mxu1  ;;  %v6363_v1 = vmax.f32 %v8595_v4, 0.0 }
0x2350   : > { %v8596_v41 = vpop.f32.mrb[94].mxu1  ;;  %v6361_v26 = vmax.f32 %v6322_v63, 0.0 }
0x2351   : > { %v6364_v11 = vmax.f32 %v8596_v41, 0.0  ;;  %v6325_v59 = vpop.f32.mrb[95].mxu1 }
0x2352   : > { %v6362_v55 = vmax.f32 %v6325_v59, 0.0 }
0x2353   : > { %v6374_v35 = vpack.c.bf16 %v6364_v11, %v6363_v1 }
0x2354   : > { %v6373_v27 = vpack.c.bf16 %v6362_v55, %v6361_v26  ;;  %v6013_v39 = vpop.permute.xlu1 %6012 }
0x2355   : > { %6023 = vst.msk [vmem:[#allocation2 + $0x68] sm:$0xff] %vm2200_vm5, %v6013_v39  ;;  %v6011_v19 = vpop.permute.xlu0 %6010 }
0x2356   : > { %8617 = vmatprep.mubr.msk.bf16.mxu0 %vm6416_vm8, %v6373_v27  ;;  %6022 = vst.msk [vmem:[#allocation2 + $0x60] sm:$0xff] %vm2200_vm5, %v6011_v19 }
0x2357   : > { %8618 = vmatmul.mubr.msk.bf16.gmra.mrb[104].mxu0 %vm6416_vm8, %v6374_v35 }
0x235c   : > { %v6017_v6 = vpop.permute.xlu1 %6016 }
0x235d   : > { %6025 = vst.msk [vmem:[#allocation2 + $0x78] sm:$0xff] %vm2200_vm5, %v6017_v6  ;;  %v6015_v37 = vpop.permute.xlu0 %6014 }
0x235e   : > { %6024 = vst.msk [vmem:[#allocation2 + $0x70] sm:$0xff] %vm2200_vm5, %v6015_v37 }
0x2364   : > { %v6170_v56 = vpop.permute.xlu1 %6169 }
0x2365   : > { %6180 = vst.msk [vmem:[#allocation2 + $0x68] sm:$0xff] %vm2359_vm6, %v6170_v56  ;;  %v6168_v53 = vpop.permute.xlu0 %6167 }
0x2366   : > { %6179 = vst.msk [vmem:[#allocation2 + $0x60] sm:$0xff] %vm2359_vm6, %v6168_v53 }
0x236c   : > { %v6174_v3 = vpop.permute.xlu1 %6173  ;;  %v6196_v29 = vld [vmem:[#allocation2 + $0x68] sm:$0xff] }
0x236d   : > { %6182 = vst.msk [vmem:[#allocation2 + $0x78] sm:$0xff] %vm2359_vm6, %v6174_v3  ;;  %v6172_v62 = vpop.permute.xlu0 %6171  ;;  %v6195_v9 = vld [vmem:[#allocation2 + $0x60] sm:$0xff] }
0x236e   : > { %6181 = vst.msk [vmem:[#allocation2 + $0x70] sm:$0xff] %vm2359_vm6, %v6172_v62  ;;  %v6205_v25 = vpack.c.bf16 %v6196_v29, %v6195_v9 }
0x2370   : > { %8597 = vmatprep.mubr.msk.bf16.mxu1 %vm6231_vm7, %v6205_v25 }
0x2374   : > { %v6198_v33 = vld [vmem:[#allocation2 + $0x78] sm:$0xff] }
0x2375   : > { %v6197_v24 = vld [vmem:[#allocation2 + $0x70] sm:$0xff] }
0x2376   : > { %v6206_v22 = vpack.c.bf16 %v6198_v33, %v6197_v24 }
0x2378   : > { %8598 = vmatmul.mubr.msk.bf16.gmra.mrb[96].mxu1 %vm6231_vm7, %v6206_v22 }
0x244b   : > { %v8599_v15 = vpop.f32.mrb[96].mxu1 }
0x244c   : > { %v6338_v5 = vpop.f32.mrb[97].mxu1  ;;  %v6367_v30 = vmax.f32 %v8599_v15, 0.0 }
0x244d   : > { %v8600_v10 = vpop.f32.mrb[98].mxu1  ;;  %v6365_v49 = vmax.f32 %v6338_v5, 0.0 }
0x244e   : > { %v6368_v2 = vmax.f32 %v8600_v10, 0.0  ;;  %v6341_v48 = vpop.f32.mrb[99].mxu1 }
0x244f   : > { %v6366_v40 = vmax.f32 %v6341_v48, 0.0 }
0x2450   : > { %v6376_v16 = vpack.c.bf16 %v6368_v2, %v6367_v30 }
0x2451   : > { %v6375_v38 = vpack.c.bf16 %v6366_v40, %v6365_v49 }
0x2453   : > { %8621 = vmatprep.mubr.msk.bf16.mxu0 %vm6416_vm8, %v6375_v38 }
0x2454   : > { %8622 = vmatmul.mubr.msk.bf16.gmra.mrb[108].mxu0 %vm6416_vm8, %v6376_v16 }
0x2455   : > { %8627 = vmatprep.mubr.msk.bf16.mxu0 %vm718_vm1, %v11183_v14 }
0x245c   : > { %8628 = vmatmul.mubr.msk.bf16.vlgmr.msra.gmra.mrb[96].mxu0 %vm718_vm1, %v11184_v45 }
0x245d   : > { %8631 = vmatprep.mubr.msk.bf16.mxu0 %vm718_vm1, %v11185_v47 }
0x2464   : > { %8632 = vmatmul.mubr.msk.bf16.gmra.mrb[100].mxu0 %vm718_vm1, %v11186_v60 }
0x2465   : > { %8635 = vmatprep.mubr.msk.bf16.mxu0 %vm718_vm1, %v11187_v23 }
0x246c   : > { %8636 = vmatmul.mubr.msk.bf16.gmra.mrb[104].mxu0 %vm718_vm1, %v11188_v34 }
0x246d   : > { %8639 = vmatprep.mubr.msk.bf16.mxu0 %vm718_vm1, %v10486_v28  ;;  %v7628_v28 = vld [vmem:[%s11064_s14] ss:$0 sm:$0xff] }
0x2474   : > { %8640 = vmatmul.mubr.msk.bf16.gmra.mrb[108].mxu0 %vm718_vm1, %v10504_v7  ;;  %v7641_v7 = vld [vmem:[%s11066_s16] ss:$0 sm:$0xff] }
0x2475   : > { %8739 = vmatprep.mubr.msk.bf16.mxu0 %vm9360_vm2, %v11143_v51  ;;  %v10754_v46 = vadd.f32 %v7641_v7, %v7628_v28 }
0x252f   : > { %v8629_v31 = vpop.f32.mrb[96].mxu0 }
0x2530   : > { %v9001_v44 = vadd.f32 %v8629_v31, %v7628_v28  ;;  %v6619_v42 = vpop.f32.mrb[97].mxu0 }
0x2531   : > { %v9003_v43 = vadd.f32 %v7628_v28, %v6619_v42  ;;  %v8630_v21 = vpop.f32.mrb[98].mxu0 }
0x2532   : > { %v6622_v18 = vpop.f32.mrb[99].mxu0  ;;  %v10756_v57 = vadd.f32 %v9001_v44, %v7641_v7  ;;  %v10766_v1 = vadd.f32 %v10754_v46, %v8630_v21 }
0x2533   : > { %v10758_v17 = vadd.f32 %v9003_v43, %v7641_v7  ;;  %v10761_v4 = vadd.f32 %v10754_v46, %v6622_v18 }
0x2534   : > { %v6700_v11 = vmax.f32 %v10756_v57, 0.0  ;;  %v6701_v27 = vmax.f32 %v10766_v1, 0.0 }
0x2535   : > { %v6698_v63 = vmax.f32 %v10758_v17, 0.0  ;;  %v6699_v41 = vmax.f32 %v10761_v4, 0.0 }
0x2537   : > { %v8633_v59 = vpop.f32.mrb[100].mxu0  ;;  %8659 = vmatprep.mubr.msk.f32.mxu1 %vm6416_vm8, %v6698_v63 }
0x2538   : > { %v6635_v26 = vpop.f32.mrb[101].mxu0  ;;  %8660 = vmatmul.mubr.msk.f32.vlgmr.msra.gmra.mrb[82].mxu1 %vm6416_vm8, %v6699_v41  ;;  %v10784_v19 = vadd.f32 %v10754_v46, %v8633_v59 }
0x2539   : > { %v10776_v55 = vadd.f32 %v10754_v46, %v6635_v26  ;;  %v8634_v35 = vpop.f32.mrb[102].mxu0  ;;  %8662 = vmatprep.mubr.msk.f32.mxu1 %vm6416_vm8, %v6700_v11  ;;  %8986 = vmatpush3.bf16.msra.mxu1 %v8967_v61 }
0x253a   : > { %v6638_v39 = vpop.f32.mrb[103].mxu0  ;;  %8988 = vmatprep.subr.bf16.mxu1 %v10708_v54  ;;  %v10797_v53 = vadd.f32 %v10754_v46, %v8634_v35  ;;  %v6704_v3 = vmax.f32 %v10784_v19, 0.0 }
0x253b   : > { %v6702_v6 = vmax.f32 %v10776_v55, 0.0  ;;  %v10788_v37 = vadd.f32 %v10754_v46, %v6638_v39 }
0x253c   : > { %8663 = vmatmul.mubr.msk.f32.gmra.mrb[100].mxu1 %vm6416_vm8, %v6701_v27  ;;  %v6705_v33 = vmax.f32 %v10797_v53, 0.0 }
0x253d   : > { %v6703_v56 = vmax.f32 %v10788_v37, 0.0  ;;  %8665 = vmatprep.mubr.msk.f32.mxu1 %vm6416_vm8, %v6702_v6  ;;  %8990 = vmatpush3.bf16.msra.mxu1 %v10708_v54 }
0x253e   : > { %8992 = vmatprep.subr.bf16.mxu1 %v10717_v50 }
0x253f   : > { %v8637_v29 = vpop.f32.mrb[104].mxu0 }
0x2540   : > { %v6651_v62 = vpop.f32.mrb[105].mxu0  ;;  %8666 = vmatmul.mubr.msk.f32.gmra.mrb[102].mxu1 %vm6416_vm8, %v6703_v56  ;;  %v10811_v22 = vadd.f32 %v10754_v46, %v8637_v29 }
0x2541   : > { %v10803_v9 = vadd.f32 %v10754_v46, %v6651_v62  ;;  %v8638_v25 = vpop.f32.mrb[106].mxu0  ;;  %8668 = vmatprep.mubr.msk.f32.mxu1 %vm6416_vm8, %v6704_v3  ;;  %8994 = vmatpush3.bf16.msra.mxu1 %v10717_v50 }
0x2542   : > { %v6654_v24 = vpop.f32.mrb[107].mxu0  ;;  %8996 = vmatprep.subr.bf16.mxu1 %v8979_v8  ;;  %v9022_v61 = vadd.f32 %v10754_v46, %v8638_v25  ;;  %v6708_v32 = vmax.f32 %v10811_v22, 0.0 }
0x2543   : > { %v6706_v52 = vmax.f32 %v10803_v9, 0.0  ;;  %v9024_v0 = vadd.f32 %v10754_v46, %v6654_v24 }
0x2544   : > { %8669 = vmatmul.mubr.msk.f32.gmra.mrb[104].mxu1 %vm6416_vm8, %v6705_v33  ;;  %v6709_v15 = vmax.f32 %v9022_v61, 0.0 }
0x2545   : > { %v6707_v13 = vmax.f32 %v9024_v0, 0.0  ;;  %8671 = vmatprep.mubr.msk.f32.mxu1 %vm6416_vm8, %v6706_v52  ;;  %8998 = vmatpush3.bf16.msra.mxu1 %v8979_v8 }
0x2547   : > { %v8641_v54 = vpop.f32.mrb[108].mxu0 }
0x2548   : > { %v6667_v58 = vpop.f32.mrb[109].mxu0  ;;  %8672 = vmatmul.mubr.msk.f32.gmra.mrb[106].mxu1 %vm6416_vm8, %v6707_v13  ;;  %v10825_v10 = vadd.f32 %v10754_v46, %v8641_v54 }
0x2549   : > { %v10821_v36 = vadd.f32 %v10754_v46, %v6667_v58  ;;  %v8642_v50 = vpop.f32.mrb[110].mxu0  ;;  %8674 = vmatprep.mubr.msk.f32.mxu1 %vm6416_vm8, %v6708_v32 }
0x254a   : > { %v6670_v5 = vpop.f32.mrb[111].mxu0  ;;  %v9030_v49 = vadd.f32 %v10754_v46, %v8642_v50  ;;  %v6712_v40 = vmax.f32 %v10825_v10, 0.0 }
0x254b   : > { %v6710_v30 = vmax.f32 %v10821_v36, 0.0  ;;  %v9032_v2 = vadd.f32 %v10754_v46, %v6670_v5 }
0x254c   : > { %8675 = vmatmul.mubr.msk.f32.gmra.mrb[108].mxu1 %vm6416_vm8, %v6709_v15  ;;  %v6713_v16 = vmax.f32 %v9030_v49, 0.0 }
0x254d   : > { %v6711_v48 = vmax.f32 %v9032_v2, 0.0  ;;  %8677 = vmatprep.mubr.msk.f32.mxu1 %vm6416_vm8, %v6710_v30 }
0x2550   : > { %8678 = vmatmul.mubr.msk.f32.gmra.mrb[110].mxu1 %vm6416_vm8, %v6711_v48 }
0x2551   : > { %8680 = vmatprep.mubr.msk.f32.mxu1 %vm6416_vm8, %v6712_v40 }
0x2554   : > { %8681 = vmatmul.mubr.msk.f32.gmra.mrb[112].mxu1 %vm6416_vm8, %v6713_v16 }
0x260b   : > { %v8661_v38 = vpop.f32.mrb[82].mxu1 }
0x260c   : > { %v10838_v14 = vsub.f32 %v6699_v41, %v8661_v38  ;;  %v6836_v45 = vpop.f32.mrb[83].mxu1 }
0x260d   : > { %v10842_v47 = vsub.f32 %v6698_v63, %v6836_v45  ;;  %v10929_v45 = vld [vmem:[%s11068_s18] ss:$0 sm:$0xff] }
0x260e   : > { %v6932_v34 = vmul.f32 %v10838_v14, %v10838_v14 }
0x260f   : > { %v6931_v60 = vmul.f32 %v10842_v47, %v10842_v47  ;;  %v8664_v23 = vpop.f32.mrb[100].mxu1 }
0x2610   : > { %v10848_v20 = vsub.f32 %v6701_v27, %v8664_v23  ;;  %v6846_v12 = vpop.f32.mrb[101].mxu1 }
0x2611   : > { %v10852_v8 = vsub.f32 %v6700_v11, %v6846_v12  ;;  %8699 = vmatprep.mubr.msk.f32.mxu1 %vm6416_vm8, %v6931_v60 }
0x2612   : > { %8700 = vmatmul.mubr.msk.f32.vlgmr.msra.gmra.mrb[114].mxu1 %vm6416_vm8, %v6932_v34  ;;  %v6934_v31 = vmul.f32 %v10848_v20, %v10848_v20 }
0x2613   : > { %v6933_v28 = vmul.f32 %v10852_v8, %v10852_v8  ;;  %v8667_v7 = vpop.f32.mrb[102].mxu1 }
0x2614   : > { %v10860_v46 = vsub.f32 %v6703_v56, %v8667_v7  ;;  %v6856_v44 = vpop.f32.mrb[103].mxu1 }
0x2615   : > { %v10864_v42 = vsub.f32 %v6702_v6, %v6856_v44  ;;  %8702 = vmatprep.mubr.msk.f32.mxu1 %vm6416_vm8, %v6933_v28  ;;  %v10936_v28 = vld [vmem:[%s11069_s19] ss:$0 sm:$0xff] }
0x2616   : > { %8703 = vmatmul.mubr.msk.f32.gmra.mrb[116].mxu1 %vm6416_vm8, %v6934_v31  ;;  %v6936_v18 = vmul.f32 %v10860_v46, %v10860_v46 }
0x2617   : > { %v6935_v43 = vmul.f32 %v10864_v42, %v10864_v42  ;;  %v8670_v21 = vpop.f32.mrb[104].mxu1 }
0x2618   : > { %v10872_v57 = vsub.f32 %v6705_v33, %v8670_v21  ;;  %v6866_v17 = vpop.f32.mrb[105].mxu1 }
0x2619   : > { %v10876_v4 = vsub.f32 %v6704_v3, %v6866_v17  ;;  %8705 = vmatprep.mubr.msk.f32.mxu1 %vm6416_vm8, %v6935_v43 }
0x261a   : > { %8706 = vmatmul.mubr.msk.f32.gmra.mrb[118].mxu1 %vm6416_vm8, %v6936_v18  ;;  %v6938_v1 = vmul.f32 %v10872_v57, %v10872_v57 }
0x261b   : > { %v6937_v63 = vmul.f32 %v10876_v4, %v10876_v4  ;;  %v8673_v41 = vpop.f32.mrb[106].mxu1 }
0x261c   : > { %v10884_v11 = vsub.f32 %v6707_v13, %v8673_v41  ;;  %v6876_v59 = vpop.f32.mrb[107].mxu1 }
0x261d   : > { %v10886_v26 = vsub.f32 %v6706_v52, %v6876_v59  ;;  %8708 = vmatprep.mubr.msk.f32.mxu1 %vm6416_vm8, %v6937_v63 }
0x261e   : > { %8709 = vmatmul.mubr.msk.f32.gmra.mrb[120].mxu1 %vm6416_vm8, %v6938_v1  ;;  %v6940_v27 = vmul.f32 %v10884_v11, %v10884_v11 }
0x261f   : > { %v6939_v55 = vmul.f32 %v10886_v26, %v10886_v26  ;;  %v8676_v35 = vpop.f32.mrb[108].mxu1 }
0x2620   : > { %v10894_v39 = vsub.f32 %v6709_v15, %v8676_v35  ;;  %v6886_v19 = vpop.f32.mrb[109].mxu1 }
0x2621   : > { %v10896_v6 = vsub.f32 %v6708_v32, %v6886_v19  ;;  %8711 = vmatprep.mubr.msk.f32.mxu1 %vm6416_vm8, %v6939_v55 }
0x2622   : > { %8712 = vmatmul.mubr.msk.f32.gmra.mrb[122].mxu1 %vm6416_vm8, %v6940_v27  ;;  %v6942_v53 = vmul.f32 %v10894_v39, %v10894_v39 }
0x2623   : > { %v6941_v37 = vmul.f32 %v10896_v6, %v10896_v6  ;;  %v8679_v56 = vpop.f32.mrb[110].mxu1 }
0x2624   : > { %v10904_v3 = vsub.f32 %v6711_v48, %v8679_v56  ;;  %v6896_v29 = vpop.f32.mrb[111].mxu1 }
0x2625   : > { %v10906_v62 = vsub.f32 %v6710_v30, %v6896_v29  ;;  %8714 = vmatprep.mubr.msk.f32.mxu1 %vm6416_vm8, %v6941_v37 }
0x2626   : > { %8715 = vmatmul.mubr.msk.f32.gmra.mrb[124].mxu1 %vm6416_vm8, %v6942_v53  ;;  %v6944_v33 = vmul.f32 %v10904_v3, %v10904_v3 }
0x2627   : > { %v6943_v9 = vmul.f32 %v10906_v62, %v10906_v62  ;;  %v8682_v25 = vpop.f32.mrb[112].mxu1 }
0x2628   : > { %v10914_v24 = vsub.f32 %v6713_v16, %v8682_v25  ;;  %v6906_v22 = vpop.f32.mrb[113].mxu1 }
0x2629   : > { %v10916_v52 = vsub.f32 %v6712_v40, %v6906_v22  ;;  %8717 = vmatprep.mubr.msk.f32.mxu1 %vm6416_vm8, %v6943_v9 }
0x262a   : > { %8718 = vmatmul.mubr.msk.f32.gmra.mrb[126].mxu1 %vm6416_vm8, %v6944_v33  ;;  %v6946_v13 = vmul.f32 %v10914_v24, %v10914_v24 }
0x262b   : > { %v6945_v0 = vmul.f32 %v10916_v52, %v10916_v52 }
0x262d   : > { %8720 = vmatprep.mubr.msk.f32.mxu1 %vm6416_vm8, %v6945_v0 }
0x262e   : > { %8721 = vmatmul.mubr.msk.f32.gmra.mrb[128].mxu1 %vm6416_vm8, %v6946_v13 }
0x26e5   : > { %v8701_v61 = vpop.f32.mrb[114].mxu1 }
0x26e6   : > { %v7067_v32 = vadd.f32 1e-05, %v8701_v61  ;;  %v7061_v54 = vpop.f32.mrb[115].mxu1 }
0x26e7   : > { %v7062_v58 = vadd.f32 1e-05, %v7061_v54 }
0x26e8   : > { %9240 = vrsqrt.f32 %v7067_v32 }
0x26e9   : > { %9242 = vrsqrt.f32 %v7062_v58  ;;  %v8704_v36 = vpop.f32.mrb[116].mxu1 }
0x26ea   : > { %v7077_v50 = vadd.f32 1e-05, %v8704_v36  ;;  %v7071_v15 = vpop.f32.mrb[117].mxu1 }
0x26eb   : > { %v7072_v5 = vadd.f32 1e-05, %v7071_v15 }
0x26ec   : > { %9244 = vrsqrt.f32 %v7077_v50 }
0x26ed   : > { %9246 = vrsqrt.f32 %v7072_v5  ;;  %v8707_v10 = vpop.f32.mrb[118].mxu1 }
0x26ee   : > { %v7087_v30 = vadd.f32 1e-05, %v8707_v10  ;;  %v7081_v2 = vpop.f32.mrb[119].mxu1 }
0x26ef   : > { %v7082_v48 = vadd.f32 1e-05, %v7081_v2 }
0x26f0   : > { %9248 = vrsqrt.f32 %v7087_v30 }
0x26f1   : > { %9250 = vrsqrt.f32 %v7082_v48  ;;  %v8710_v49 = vpop.f32.mrb[120].mxu1 }
0x26f2   : > { %v9241_v40 = vpop.eup %9240  ;;  %v7097_v16 = vadd.f32 1e-05, %v8710_v49  ;;  %v7091_v38 = vpop.f32.mrb[121].mxu1 }
0x26f3   : > { %v9243_v60 = vpop.eup %9242  ;;  %v7092_v23 = vadd.f32 1e-05, %v7091_v38  ;;  %v7157_v34 = vmul.f32 %v9241_v40, %v10838_v14 }
0x26f4   : > { %9252 = vrsqrt.f32 %v7097_v16  ;;  %v7156_v12 = vmul.f32 %v9243_v60, %v10842_v47 }
0x26f5   : > { %9254 = vrsqrt.f32 %v7092_v23  ;;  %v8713_v7 = vpop.f32.mrb[122].mxu1  ;;  %v7180_v31 = vmul.f32 %v10929_v45, %v7157_v34 }
0x26f6   : > { %v9245_v44 = vpop.eup %9244  ;;  %v7107_v43 = vadd.f32 1e-05, %v8713_v7  ;;  %v7101_v21 = vpop.f32.mrb[123].mxu1  ;;  %v7179_v18 = vmul.f32 %v10929_v45, %v7156_v12 }
0x26f7   : > { %v9247_v17 = vpop.eup %9246  ;;  %v7102_v63 = vadd.f32 1e-05, %v7101_v21  ;;  %v7203_v14 = vadd.f32 %v10936_v28, %v7180_v31  ;;  %v7159_v47 = vmul.f32 %v9245_v44, %v10848_v20 }
0x26f8   : > { %9256 = vrsqrt.f32 %v7107_v43  ;;  %v7202_v41 = vadd.f32 %v10936_v28, %v7179_v18  ;;  %v7158_v1 = vmul.f32 %v9247_v17, %v10852_v8 }
0x26f9   : > { %9258 = vrsqrt.f32 %v7102_v63  ;;  %v8716_v59 = vpop.f32.mrb[124].mxu1  ;;  %v7182_v55 = vmul.f32 %v10929_v45, %v7159_v47 }
0x26fa   : > { %v9249_v35 = vpop.eup %9248  ;;  %v7117_v27 = vadd.f32 1e-05, %v8716_v59  ;;  %v7111_v19 = vpop.f32.mrb[125].mxu1  ;;  %v7219_v37 = vpack.c.bf16 %v7203_v14, %v7202_v41  ;;  %v7181_v56 = vmul.f32 %v10929_v45, %v7158_v1 }
0x26fb   : > { %v9251_v53 = vpop.eup %9250  ;;  %v7112_v29 = vadd.f32 1e-05, %v7111_v19  ;;  %v7205_v9 = vadd.f32 %v10936_v28, %v7182_v55  ;;  %v7161_v20 = vmul.f32 %v9249_v35, %v10860_v46 }
0x26fc   : > { %9260 = vrsqrt.f32 %v7117_v27  ;;  %v7237_v25 = vsel %vm6416_vm8, %v7219_v37, 0  ;;  %v7204_v8 = vadd.f32 %v10936_v28, %v7181_v56  ;;  %v7160_v33 = vmul.f32 %v9251_v53, %v10864_v42 }
0x26fd   : > { %9262 = vrsqrt.f32 %v7112_v29  ;;  %v8719_v22 = vpop.f32.mrb[126].mxu1  ;;  %8724 = vmatpush3.bf16.xpose.msra.mxu0 %v7237_v25  ;;  %v7184_v0 = vmul.f32 %v10929_v45, %v7161_v20 }
0x26fe   : > { %v9253_v13 = vpop.eup %9252  ;;  %v7127_v61 = vadd.f32 1e-05, %v8719_v22  ;;  %v7121_v32 = vpop.f32.mrb[127].mxu1  ;;  %8725 = vmatprep.subr.bf16.mxu0 %v11143_v51  ;;  %v7220_v54 = vpack.c.bf16 %v7205_v9, %v7204_v8  ;;  %v7183_v46 = vmul.f32 %v10929_v45, %v7160_v33 }
0x26ff   : > { %v9255_v58 = vpop.eup %9254  ;;  %v7122_v36 = vadd.f32 1e-05, %v7121_v32  ;;  %v7207_v50 = vadd.f32 %v10936_v28, %v7184_v0  ;;  %v7163_v15 = vmul.f32 %v9253_v13, %v10872_v57  ;;  %v7231_v32 = vpop.permute.xlu0 %7230 }
0x2700   : > { %9264 = vrsqrt.f32 %v7127_v61  ;;  %v7206_v42 = vadd.f32 %v10936_v28, %v7183_v46  ;;  %v7162_v5 = vmul.f32 %v9255_v58, %v10876_v4  ;;  %v7240_v34 = vsel %vm6416_vm8, %v7220_v54, 0  ;;  %v7218_v61 = vld [vmem:[%s11070_s20] sm:$0x3] }
0x2701   : > { %9266 = vrsqrt.f32 %v7122_v36  ;;  %v8722_v10 = vpop.f32.mrb[128].mxu1  ;;  %v7186_v30 = vmul.f32 %v10929_v45, %v7163_v15 }
0x2702   : > { %v9257_v2 = vpop.eup %9256  ;;  %v7137_v48 = vadd.f32 1e-05, %v8722_v10  ;;  %v7131_v49 = vpop.f32.mrb[129].mxu1  ;;  %v7221_v40 = vpack.c.bf16 %v7207_v50, %v7206_v42  ;;  %v7185_v16 = vmul.f32 %v10929_v45, %v7162_v5 }
0x2703   : > { %v9259_v38 = vpop.eup %9258  ;;  %v7132_v60 = vadd.f32 1e-05, %v7131_v49  ;;  %v7209_v23 = vadd.f32 %v10936_v28, %v7186_v30  ;;  %v7165_v57 = vmul.f32 %v9257_v2, %v10884_v11 }
0x2704   : > { %9268 = vrsqrt.f32 %v7137_v48  ;;  %v7208_v4 = vadd.f32 %v10936_v28, %v7185_v16  ;;  %v7164_v12 = vmul.f32 %v9259_v38, %v10886_v26  ;;  %v7243_v35 = vsel %vm6416_vm8, %v7221_v40, 0 }
0x2705   : > { %9270 = vrsqrt.f32 %v7132_v60  ;;  %8726 = vmatpush3.bf16.xpose.msra.mxu0 %v7240_v34  ;;  %v7188_v7 = vmul.f32 %v10929_v45, %v7165_v57 }
0x2706   : > { %v9261_v31 = vpop.eup %9260  ;;  %8727 = vmatprep.subr.bf16.mxu0 %v11143_v51  ;;  %v7222_v44 = vpack.c.bf16 %v7209_v23, %v7208_v4  ;;  %v7187_v43 = vmul.f32 %v10929_v45, %v7164_v12 }
0x2707   : > { %v9263_v21 = vpop.eup %9262  ;;  %v7211_v11 = vadd.f32 %v10936_v28, %v7188_v7  ;;  %v7167_v18 = vmul.f32 %v9261_v31, %v10894_v39 }
0x2708   : > { %v7210_v17 = vadd.f32 %v10936_v28, %v7187_v43  ;;  %v7166_v63 = vmul.f32 %v9263_v21, %v10896_v6  ;;  %v7246_v22 = vsel %vm6416_vm8, %v7222_v44, 0 }
0x2709   : > { %v7190_v26 = vmul.f32 %v10929_v45, %v7167_v18 }
0x270a   : > { %v9265_v14 = vpop.eup %9264  ;;  %v7223_v47 = vpack.c.bf16 %v7211_v11, %v7210_v17  ;;  %v7189_v41 = vmul.f32 %v10929_v45, %v7166_v63 }
0x270b   : > { %v9267_v1 = vpop.eup %9266  ;;  %v7213_v59 = vadd.f32 %v10936_v28, %v7190_v26  ;;  %v7169_v55 = vmul.f32 %v9265_v14, %v10904_v3 }
0x270c   : > { %v7212_v27 = vadd.f32 %v10936_v28, %v7189_v41  ;;  %v7168_v39 = vmul.f32 %v9267_v1, %v10906_v62 }
0x270d   : > { %8728 = vmatpush3.bf16.xpose.msra.mxu0 %v7243_v35  ;;  %v7192_v6 = vmul.f32 %v10929_v45, %v7169_v55 }
0x270e   : > { %v9269_v19 = vpop.eup %9268  ;;  %8729 = vmatprep.subr.bf16.mxu0 %v11143_v51  ;;  %v7224_v37 = vpack.c.bf16 %v7213_v59, %v7212_v27  ;;  %v7191_v56 = vmul.f32 %v10929_v45, %v7168_v39 }
0x270f   : > { %v9271_v53 = vpop.eup %9270  ;;  %v7215_v29 = vadd.f32 %v10936_v28, %v7192_v6  ;;  %v7171_v3 = vmul.f32 %v9269_v19, %v10914_v24 }
0x2710   : > { %v7170_v9 = vmul.f32 %v9271_v53, %v10916_v52  ;;  %v7214_v20 = vadd.f32 %v10936_v28, %v7191_v56  ;;  %v7249_v52 = vsel %vm6416_vm8, %v7223_v47, 0  ;;  %v7252_v13 = vsel %vm6416_vm8, %v7224_v37, 0 }
0x2711   : > { %v7194_v62 = vmul.f32 %v10929_v45, %v7171_v3 }
0x2712   : > { %v7225_v25 = vpack.c.bf16 %v7215_v29, %v7214_v20  ;;  %v7193_v8 = vmul.f32 %v10929_v45, %v7170_v9 }
0x2713   : > { %v7217_v33 = vadd.f32 %v10936_v28, %v7194_v62 }
0x2714   : > { %v7216_v0 = vadd.f32 %v10936_v28, %v7193_v8  ;;  %v7255_v45 = vsel %vm6416_vm8, %v7225_v25, 0 }
0x2715   : > { %8730 = vmatpush3.bf16.xpose.msra.mxu0 %v7246_v22 }
0x2716   : > { %8731 = vmatprep.subr.bf16.mxu0 %v11143_v51  ;;  %v7226_v24 = vpack.c.bf16 %v7217_v33, %v7216_v0 }
0x2718   : > { %v7258_v28 = vsel %vm6416_vm8, %v7226_v24, 0 }
0x271d   : > { %8732 = vmatpush3.bf16.xpose.msra.mxu0 %v7249_v52 }
0x271e   : > { %8733 = vmatprep.subr.bf16.mxu0 %v11143_v51 }
0x2725   : > { %8734 = vmatpush3.bf16.xpose.msra.mxu0 %v7252_v13 }
0x2726   : > { %8735 = vmatprep.subr.bf16.mxu0 %v11143_v51 }
0x272d   : > { %8736 = vmatpush3.bf16.xpose.msra.mxu0 %v7255_v45 }
0x272e   : > { %8737 = vmatprep.subr.bf16.mxu0 %v11143_v51 }
0x2735   : > { %8738 = vmatpush3.bf16.xpose.msra.mxu0 %v7258_v28 }
0x273c   : > { %8740 = vmatmul.mubr.msk.bf16.vlgmr.msra.gmra.mrb[112].mxu0 %vm6416_vm8, %v7218_v61 }
0x280f   : > { %v7294_v54 = vpop.f32.mrb[112].mxu0 }
0x2810   : > { %v7295_v46 = vadd.f32 %v7294_v54, %v7231_v32  ;;  %v8741_v58 = vpop.f32.mrb[113].mxu0 }
0x2811   : > { %v7297_v51 = vpop.f32.mrb[114].mxu0 }
0x2812   : > { %7300 = vst [vmem:[%s677_s8] sm:$0xf] %v7295_v46  ;;  %v8742_v36 = vpop.f32.mrb[115].mxu0 }
0x2813   : > { %9307 = shalt.err (!%p9304_p3)
}
0x2814   : > { %s9308_s2 = scalar_lea.hbm %s11008_s9, 64  ;;  %s9312_s7 = scalar_lea.hbm %s11072_s22, 128 }
0x2815   : > { %p9309_p4 = scmp.ne.s32.totalorder %s11008_s9, %s9308_s2  ;;  %p9313_p9 = scmp.lt.u32.totalorder %s11008_s9, %s11072_s22 }
0x2816   : > { %p9314_p10 = scmp.lt.u32.totalorder %s9312_s7, %s9308_s2  ;;  %p9316_p12 = scmp.lt.u32.totalorder %s9308_s2, %s11008_s9 }
0x2817   : > { %p9310_p7 = pnand %p9309_p4, %p9518_p5 }
0x2818   : > { %p9315_p11 = por %p9314_p10, %p9313_p9 }
0x2819   : > { %p9311_p8 = pneg %p9310_p7 }
0x281a   : > { %p9317_p13 = por %p9316_p12, %p9315_p11 }
0x281c   : > { %p9318_p0 = pnand %p9317_p13, %p9311_p8 }
0x281e   : > { %9321 = shalt.err (!%p9318_p0)
}
0x281f   : > { %9049 = dma.vmem_to_hbm [thread:$0]  (%p9518_p5), %s11010_s3, 64, %s11008_s9, %s7302_s4  }
0x2820 PF: > { %s11189_s1 = sld [smem:[#allocation6_spill]]  ;;  %p9055_p1 = scmp.ge.s32.totalorder %s9356_s30, 2 }
0x2822   : > { %p9052_p2 = pnand %p9055_p1, %p9522_p6 }
0x2826   : > { %s7327_s29 = sand.u32 1, %s11189_s1  }
0x2827   : > { %s7328_s8 = scalar_lea.sflag [#allocation4], %s7327_s29 }
0x2828   : > { %9339 = dma.done.wait (!%p9052_p2), %s7328_s8, 64  }
0x2829   : > { %9341 = vsyncadd (!%p9052_p2), %s7328_s8, 4294967232  ;;  %s11191_s30 = sld [smem:[#allocation8_spill]]  ;;  %s11192_s2 = sld [smem:[#allocation7_spill]] }
0x282a   : > { %s11193_s29 = sld [smem:[#allocation9_spill]]  ;;  %s11194_s3 = smov %s9348_s28 }
0x282f   : > { %p32_p3 = scmp.ge.s32.totalorder %s11191_s30, 4   ;;  %s11195_s28 = smov %s11192_s2 }
0x2831   :  { %34 = sbr.rel (!%p32_p3) target bundleno = 14 (0xe), region = 145 }
0x2838   :  { %7333 = vsyncpa [#allocation4], 1 }
0x2839   :  { %7335 = vsyncpa [#allocation4 + $0x1], 1 }

// kernel: tpu_custom_call.1
= control target key start
LH: loop header
LB: loop body
LE: loop exit
PB: predicated region body
PF: predicated region fallthrough
CT: control target
= control target key end

     0   :  { %s11050_s0 = inlined_call_operand.vmem [shape: f32[256,16], index: 0, kind: input, shape index: {}]   ;;  %s11051_s1 = inlined_call_operand.vmem [shape: f32[1,32], index: 1, kind: input, shape index: {}]   ;;  %s11052_s2 = inlined_call_operand.vmem [shape: f32[2,32], index: 2, kind: input, shape index: {}]   ;;  %s11053_s3 = inlined_call_operand.vmem [shape: f32[16,8], index: 3, kind: input, shape index: {}]   ;;  %s11054_s4 = inlined_call_operand.vmem [shape: f32[8,8], index: 4, kind: input, shape index: {}]   ;;  %s11055_s5 = inlined_call_operand.vmem [shape: f32[8,8], index: 5, kind: input, shape index: {}]   ;;  %s11056_s6 = inlined_call_operand.vmem [shape: f32[8,1], index: 6, kind: input, shape index: {}]   ;;  %s11057_s7 = inlined_call_operand.vmem [shape: f32[16,8], index: 7, kind: input, shape index: {}]   ;;  %s11058_s8 = inlined_call_operand.vmem [shape: f32[16,8], index: 8, kind: input, shape index: {}]   ;;  %s11059_s9 = inlined_call_operand.vmem [shape: f32[32,32], index: 9, kind: input, shape index: {}]   ;;  %s11060_s10 = inlined_call_operand.vmem [shape: f32[32,32], index: 10, kind: input, shape index: {}]   ;;  %s11061_s11 = inlined_call_operand.vmem [shape: f32[3,32,32], index: 11, kind: input, shape index: {}]   ;;  %s11062_s12 = inlined_call_operand.vmem [shape: bf16[48,64], index: 12, kind: input, shape index: {}]   ;;  %s11063_s13 = inlined_call_operand.vmem [shape: bf16[64,64], index: 13, kind: input, shape index: {}]   ;;  %s11064_s14 = inlined_call_operand.vmem [shape: f32[1,64], index: 14, kind: input, shape index: {}]   ;;  %s11065_s15 = inlined_call_operand.vmem [shape: bf16[16,64], index: 15, kind: input, shape index: {}]   ;;  %s11066_s16 = inlined_call_operand.vmem [shape: f32[1,64], index: 16, kind: input, shape index: {}]   ;;  %s11067_s17 = inlined_call_operand.vmem [shape: f32[64,64], index: 17, kind: input, shape index: {}]   ;;  %s11068_s18 = inlined_call_operand.vmem [shape: f32[1,64], index: 18, kind: input, shape index: {}]   ;;  %s11069_s19 = inlined_call_operand.vmem [shape: f32[1,64], index: 19, kind: input, shape index: {}]   ;;  %s11070_s20 = inlined_call_operand.vmem [shape: bf16[4,64], index: 20, kind: input, shape index: {}]   ;;  %s11071_s21 = inlined_call_operand.vmem [shape: f32[4,1], index: 21, kind: input, shape index: {}]   ;;  %s11072_s22 = inlined_call_operand.hbm [shape: f32[2,4,128], index: 22, kind: output, shape index: {}]  }
   0x1   :  { %11102 = sst [smem:[#allocation33_spill]] %s11050_s0 }
   0x2   :  { %11103 = sst [smem:[#allocation34_spill]] %s11051_s1 }
   0x3   :  { %11104 = sst [smem:[#allocation35_spill]] %s11052_s2 }
   0x4   :  { %11105 = sst [smem:[#allocation36_spill]] %s11053_s3 }
   0x5   :  { %11106 = sst [smem:[#allocation37_spill]] %s11054_s4 }
   0x6   :  { %11107 = sst [smem:[#allocation38_spill]] %s11055_s5 }
   0x7   :  { %11108 = sst [smem:[#allocation39_spill]] %s11056_s6 }
   0x8   :  { %11109 = sst [smem:[#allocation40_spill]] %s11057_s7 }
   0x9   :  { %11110 = sst [smem:[#allocation41_spill]] %s11058_s8 }
   0xa   :  { %11111 = sst [smem:[#allocation42_spill]] %s11059_s9 }
   0xb   :  { %27 = vsyncpa [#allocation4], 0 }
   0xc   :  { %29 = vsyncpa [#allocation4 + $0x1], 0  ;;  %s9480_s3 = smov 0   ;;  %s9482_s28 = smov 0  }
   0xd   :  { %s9484_s29 = smov 0   ;;  %s9486_s30 = smov 0  }
   0xe LB: > { %11112 = sst [smem:[#allocation6_spill]] %s9344_s3  ;;  %s9501_s4 = sadd.s32 4294967295, %s9356_s30   ;;  %s9356_s30 = sphi %s9486_s30, %s11191_s30   ;;  %s9352_s29 = sphi %s9484_s29, %s11193_s29   ;;  %s9348_s28 = sphi %s9482_s28, %s11195_s28   ;;  %s9344_s3 = sphi %s9480_s3, %s11194_s3  }
   0xf   : > { %11113 = sst [smem:[#allocation7_spill]] %s9352_s29  ;;  %s7374_s0 = sadd.s32 4294967294, %s9356_s30  }
  0x10   : > { %s9505_s23 = sadd.s32 1, %s9356_s30   ;;  %s509_s1 = sadd.s32 1, %s9352_s29 }
  0x11   : > { %11114 = sst [smem:[#allocation8_spill]] %s9505_s23  ;;  %s506_s5 = ssub.s32 %s9356_s30, %s9505_s23 }
  0x12   : > { %p519_p0 = scmp.ne.s32.totalorder %s9352_s29, %s9348_s28  ;;  %p507_p1 = scmp.eq.s32.totalorder %s506_s5, 0 }
  0x13   : > { %p520_p2 = scmp.eq.s32.totalorder %s9501_s4, 1  ;;  %p525_p3 = scmp.ne.s32.totalorder %s9348_s28, %s9344_s3 }
  0x14   : > { %p526_p4 = scmp.eq.s32.totalorder %s7374_s0, 1  ;;  %p7377_p7 = scmp.ge.s32.totalorder %s9356_s30, 1 }
  0x15   : > { %s9516_s24 = scalar_select %p507_p1, %s9352_s29, %s509_s1  }
  0x16   : > { %p9518_p5 = por %p520_p2, %p519_p0  ;;  %p9522_p6 = por %p526_p4, %p525_p3 }
  0x17   : > { %11115 = sst [smem:[#allocation9_spill]] %s9516_s24  ;;  %p616_p8 = scmp.lt.s32.totalorder %s9356_s30, 3 }
  0x18   : > { %s11117_s25 = scalar_select %p9522_p6, 1, 0 }
  0x19   : > { %p617_p9 = pnand %p7377_p7, %p616_p8 }
  0x1a   : > { %11118 = sst [smem:[#allocation10_spill]] %s11117_s25 }
  0x1b   : > { %620 = sbr.rel (%p617_p9) target bundleno = 10272 (0x2820), region = 108 }
  0x22   : > { %s7379_s26 = sshll.u32 %s9501_s4, 4  ;;  %s11119_s5 = sld [smem:[#allocation36_spill]]  ;;  %vm1091_vm0 = vcmask 261120   ;;  %vm718_vm1 = vcmask 130048   ;;  %v11082_v23 = vmov 0.0|0.0   ;;  %v9359_v31 = vmov 0  }
  0x23   : > { %s11120_s23 = sld [smem:[#allocation34_spill]]  ;;  %p679_p10 = scmp.lt.s32.totalorder %s7379_s26, 31  ;;  %9094 = vset.pattern.permute.xlu1 %v9359_v31  ;;  %vm9360_vm2 = vmmov 0   ;;  %v11084_v47 = vmov 0.0   ;;  %vm1277_vm3 = vcmask 64512   ;;  %vm2200_vm5 = vcmask 261248  }
  0x24   : > { %s11121_s0 = sld [smem:[#allocation33_spill]]  ;;  %s11135_s27 = sld [smem:[#allocation38_spill]]  ;;  %vm9780_vm4 = vmpackc.low %vm1277_vm3, %vm1277_vm3  ;;  %vm2359_vm6 = vcmask 392448   ;;  %vm6231_vm7 = vcmask 392192   ;;  %vm6416_vm8 = vcmask 523264  }
  0x25   : > { %s11197_s26 = smov (!%p679_p10, %s7379_s26), 31  ;;  %s11122_s8 = sld [smem:[#allocation41_spill]] }
  0x26   : > { %s7380_s25 = sshll.u32 %s11197_s26, 3  ;;  %s11136_s24 = sld [smem:[#allocation39_spill]] }
  0x27   : > { %s11140_s7 = sld [smem:[#allocation40_spill]]  ;;  %s11142_s9 = sld [smem:[#allocation42_spill]] }
  0x28   : > { %v716_v0 = vld [vmem:[%s11119_s5] sm:$0xff]  ;;  %v717_v1 = vld [vmem:[%s11119_s5 + $0x8] sm:$0xff]  ;;  %s11100_s26 = smov 16   ;;  %s11098_s2 = smov 32  }
  0x29   : > { %v9538_v2 = vld [vmem:[%s11120_s23] sm:$0x1]  ;;  %v8743_v3 = vpack.c.bf16 %v717_v1, %v716_v0  ;;  %s7687_s29 = sshll.u32 %s9501_s4, 6 }
  0x2a   : > { %s9545_s1 = scalar_lea.vmem %s11121_s0, %s7380_s25  ;;  %s11133_s0 = sld [smem:[#allocation35_spill]] }
  0x2b   : > { %8744 = vmatprep.subr.bf16.mxu0 %v8743_v3  ;;  %8999 = vmatprep.subr.bf16.mxu1 %v8743_v3  ;;  %v9548_v4 = vld [vmem:[%s9545_s1] sm:$0xff]  ;;  %v9552_v5 = vld [vmem:[%s9545_s1 + $0x8] sm:$0xff]  ;;  %v9557_v6 = vld [vmem:[%s9545_s1 + $0x10] sm:$0xff]  ;;  %s11134_s25 = sld [smem:[#allocation37_spill]] }
  0x2c   : > { %8746 = vmatpush3.bf16.msra.mxu0 %v8743_v3  ;;  %9000 = vmatpush3.bf16.msra.mxu1 %v8743_v3  ;;  %v9564_v7 = vld [vmem:[%s9545_s1 + $0x20] sm:$0xff]  ;;  %v9568_v8 = vld [vmem:[%s9545_s1 + $0x18] sm:$0xff]  ;;  %v9573_v9 = vld [vmem:[%s9545_s1 + $0x28] sm:$0xff] }
  0x2d   : > { %8123 = vmatprep.subr.msk.mxu0 %vm1091_vm0, %v9538_v2  ;;  %1059 = vxpose.xlu0.b32.start [1/4] (short) (narrow) %v9548_v4, 16  ;;  %v697_v10 = vld [vmem:[%s9545_s1 + $0x60] sm:$0xff]  ;;  %v698_v11 = vld [vmem:[%s9545_s1 + $0x68] sm:$0xff]  ;;  %v699_v12 = vld [vmem:[%s9545_s1 + $0x70] sm:$0xff] }
  0x2e   : > { %8071 = vmatprep.mubr.msk.f32.mxu0 %vm718_vm1, %v9548_v4  ;;  %v912_v13 = vld [vmem:[%s11122_s8] sm:$0xff]  ;;  %v913_v14 = vld [vmem:[%s11122_s8 + $0x8] sm:$0xff]  ;;  %v9589_v15 = vld [vmem:[%s9545_s1 + $0x30] sm:$0xff]  ;;  %8089 = vmatprep.mubr.msk.f32.mxu1 %vm718_vm1, %v697_v10 }
  0x2f   : > { %8072 = vmatmul.mubr.msk.f32.vlgmr.msra.gmra.mrb[0].mxu0 %vm718_vm1, %v9552_v5  ;;  %v8747_v16 = vpack.c.bf16 %v913_v14, %v912_v13  ;;  %8090 = vmatmul.mubr.msk.f32.vlgmr.msra.gmra.mrb[0].mxu1 %vm718_vm1, %v698_v11  ;;  %v9600_v17 = vld [vmem:[%s9545_s1 + $0x38] sm:$0xff]  ;;  %v9603_v18 = vld [vmem:[%s9545_s1 + $0x40] sm:$0xff]  ;;  %v9611_v19 = vld [vmem:[%s9545_s1 + $0x48] sm:$0xff]  ;;  %v1181_v13 = vlaneseq }
  0x30   : > { %8074 = vmatprep.mubr.msk.f32.mxu0 %vm718_vm1, %v9557_v6  ;;  %8092 = vmatprep.mubr.msk.f32.mxu1 %vm718_vm1, %v699_v12  ;;  %v9614_v20 = vld [vmem:[%s9545_s1 + $0x50] sm:$0xff]  ;;  %v9622_v21 = vld [vmem:[%s9545_s1 + $0x58] sm:$0xff] }
  0x31   : > { %1060 = vxpose.xlu0.b32.cont [2/4] (short) (narrow) %v9552_v5, 16  ;;  %8748 = vmatprep.subr.bf16.mxu1 %v8747_v16  ;;  %v700_v22 = vld [vmem:[%s9545_s1 + $0x78] sm:$0xff]  ;;  %v1182_v14 = vshrl.u32 %v1181_v13, 7 }
  0x32   : > { %8750 = vmatpush3.bf16.msra.mxu1 %v8747_v16 }
  0x33   : > { %8075 = vmatmul.mubr.msk.f32.gmra.mrb[2].mxu0 %vm718_vm1, %v9568_v8  ;;  %8093 = vmatmul.mubr.msk.f32.gmra.mrb[2].mxu1 %vm718_vm1, %v700_v22  ;;  %v1183_v16 = vsub.s32 0, %v1182_v14 }
  0x34   : > { %8077 = vmatprep.mubr.msk.f32.mxu0 %vm718_vm1, %v9564_v7  ;;  %8099 = vmatprep.mubr.msk.f32.mxu1 %vm718_vm1, %v9548_v4 }
  0x35   : > { %8124 = vmatpush3.xpose.msk.msra.mxu0 %vm1091_vm0, %v9538_v2  ;;  %1061 = vxpose.xlu0.b32.cont [3/4] (short) (narrow) %v9557_v6, 16 }
  0x36   : > { %8751 = vmatprep.subr.bf16.mxu1 %v11082_v23  ;;  %8139 = vmatprep.subr.mxu0 %v11084_v47 }
  0x37   : > { %8078 = vmatmul.mubr.msk.f32.gmra.mrb[4].mxu0 %vm718_vm1, %v9573_v9  ;;  %8100 = vmatmul.mubr.msk.f32.vlgmr.msra.gmra.mrb[4].mxu1 %vm718_vm1, %v9552_v5 }
  0x38   : > { %8080 = vmatprep.mubr.msk.f32.mxu0 %vm718_vm1, %v9589_v15  ;;  %8102 = vmatprep.mubr.msk.f32.mxu1 %vm718_vm1, %v9557_v6 }
  0x39   : > { %1062 = vxpose.xlu0.b32.end [4/4] (short) (narrow) %v9568_v8, 16 }
  0x3b   : > { %8081 = vmatmul.mubr.msk.f32.gmra.mrb[6].mxu0 %vm718_vm1, %v9600_v17  ;;  %8103 = vmatmul.mubr.msk.f32.gmra.mrb[6].mxu1 %vm718_vm1, %v9568_v8 }
  0x3c   : > { %8083 = vmatprep.mubr.msk.f32.mxu0 %vm718_vm1, %v9603_v18  ;;  %8105 = vmatprep.mubr.msk.f32.mxu1 %vm718_vm1, %v9564_v7 }
  0x3d   : > { %2364 = vxpose.xlu0.b32.start [1/4] (short) (narrow) %v9564_v7, 16 }
  0x3f   : > { %8084 = vmatmul.mubr.msk.f32.gmra.mrb[8].mxu0 %vm718_vm1, %v9611_v19  ;;  %8106 = vmatmul.mubr.msk.f32.gmra.mrb[8].mxu1 %vm718_vm1, %v9573_v9 }
  0x40   : > { %8086 = vmatprep.mubr.msk.f32.mxu0 %vm718_vm1, %v9614_v20  ;;  %8108 = vmatprep.mubr.msk.f32.mxu1 %vm718_vm1, %v9589_v15 }
  0x41   : > { %2365 = vxpose.xlu0.b32.cont [2/4] (short) (narrow) %v9573_v9, 16 }
  0x43   : > { %8087 = vmatmul.mubr.msk.f32.gmra.mrb[10].mxu0 %vm718_vm1, %v9622_v21  ;;  %8109 = vmatmul.mubr.msk.f32.gmra.mrb[10].mxu1 %vm718_vm1, %v9600_v17 }
  0x44   : > { %8111 = vmatprep.mubr.msk.f32.mxu1 %vm718_vm1, %v9603_v18 }
  0x45   : > { %2366 = vxpose.xlu0.b32.cont [3/4] (short) (narrow) %v9589_v15, 16 }
  0x47   : > { %8112 = vmatmul.mubr.msk.f32.gmra.mrb[12].mxu1 %vm718_vm1, %v9611_v19 }
  0x48   : > { %8114 = vmatprep.mubr.msk.f32.mxu1 %vm718_vm1, %v9614_v20 }
  0x49   : > { %2367 = vxpose.xlu0.b32.end [4/4] (short) (narrow) %v9600_v17, 16 }
  0x4b   : > { %8115 = vmatmul.mubr.msk.f32.gmra.mrb[14].mxu1 %vm718_vm1, %v9622_v21 }
  0x4c   : > { %8117 = vmatprep.mubr.msk.f32.mxu1 %vm718_vm1, %v697_v10 }
  0x4f   : > { %8118 = vmatmul.mubr.msk.f32.gmra.mrb[16].mxu1 %vm718_vm1, %v698_v11 }
  0x50   : > { %8120 = vmatprep.mubr.msk.f32.mxu1 %vm718_vm1, %v699_v12 }
  0x53   : > { %8121 = vmatmul.mubr.msk.f32.gmra.mrb[18].mxu1 %vm718_vm1, %v700_v22  ;;  %v1194_v22 = vsub.s32 1, %v1182_v14 }
  0x54   : > { %8136 = vmatprep.mubr.msk.f32.mxu1 %vm9360_vm2, %v11084_v47 }
  0x72   : > { %9095 = vset.pattern.permute.xlu0 %v9359_v31 }
  0xad   : > { %v1075_v24 = vpop.trf.xlu0 }
  0xae   : > { %8125 = vmatprep.mubr.msk.f32.mxu0 %vm1091_vm0, %v1075_v24  ;;  %v702_v24 = vld [vmem:[%s11133_s0] sm:$0x3] }
  0xb1   : > { %v1076_v25 = vpop.trf.xlu0 }
  0xb2   : > { %8126 = vmatmul.mubr.msk.f32.vlgmr.msra.gmra.mrb[12].mxu0 %vm1091_vm0, %v1076_v25 }
  0xb3   : > { %8141 = vmatprep.mubr.msk.f32.mxu0 %vm9360_vm2, %v11084_v47 }
 0x102   : > { %v8073_v26 = vpop.f32.mrb[0].mxu0  ;;  %v9690_v48 = vpop.f32.mrb[0].mxu1 }
 0x103   : > { %v833_v27 = vpop.f32.mrb[1].mxu0  ;;  %11123 = vst [vmem:[#allocation11_spill] sm:$0xff] %v9690_v48  ;;  %v9694_v49 = vpop.f32.mrb[1].mxu1 }
 0x104   : > { %v8752_v28 = vpack.c.bf16 %v8073_v26, %v833_v27  ;;  %11124 = vst [vmem:[#allocation12_spill] sm:$0xff] %v9694_v49  ;;  %v9737_v26 = vrot.slane %v702_v24, %v1183_v16  ;;  %v9739_v27 = vrot.slane %v702_v24, %v1194_v22  ;;  %v9754_v24 = vld [vmem:[%s11135_s27] sm:$0xff] }
 0x106   : > { %v8076_v29 = vpop.f32.mrb[2].mxu0  ;;  %8753 = vmatpush3.bf16.msra.mxu1 %v8752_v28  ;;  %v9698_v51 = vpop.f32.mrb[2].mxu1 }
 0x107   : > { %v843_v30 = vpop.f32.mrb[3].mxu0  ;;  %8754 = vmatprep.subr.bf16.mxu1 %v11082_v23  ;;  %11125 = vst [vmem:[#allocation13_spill] sm:$0xff] %v9698_v51  ;;  %v9700_v52 = vpop.f32.mrb[3].mxu1 }
 0x108   : > { %v8755_v32 = vpack.c.bf16 %v8076_v29, %v843_v30  ;;  %11126 = vst [vmem:[#allocation14_spill] sm:$0xff] %v9700_v52 }
 0x10a   : > { %v9663_v33 = vpop.f32.mrb[4].mxu0  ;;  %8756 = vmatpush3.bf16.msra.mxu1 %v8755_v32  ;;  %v9704_v54 = vpop.f32.mrb[4].mxu1  ;;  %v9748_v32 = vld [vmem:[%s11134_s25] sm:$0xff] }
 0x10b   : > { %v9665_v34 = vpop.f32.mrb[5].mxu0  ;;  %v980_v55 = vpop.f32.mrb[5].mxu1 }
 0x10e   : > { %v9669_v36 = vpop.f32.mrb[6].mxu0  ;;  %v9706_v56 = vpop.f32.mrb[6].mxu1 }
 0x10f   : > { %v9671_v37 = vpop.f32.mrb[7].mxu0  ;;  %v9708_v57 = vpop.f32.mrb[7].mxu1 }
 0x112   : > { %v9675_v39 = vpop.f32.mrb[8].mxu0  ;;  %v9710_v58 = vpop.f32.mrb[8].mxu1 }
 0x113   : > { %v9677_v40 = vpop.f32.mrb[9].mxu0  ;;  %v9712_v59 = vpop.f32.mrb[9].mxu1 }
 0x116   : > { %v9681_v42 = vpop.f32.mrb[10].mxu0  ;;  %v9714_v60 = vpop.f32.mrb[10].mxu1 }
 0x117   : > { %v9683_v43 = vpop.f32.mrb[11].mxu0  ;;  %v9716_v61 = vpop.f32.mrb[11].mxu1 }
 0x11a   : > { %v9718_v62 = vpop.f32.mrb[12].mxu1 }
 0x11b   : > { %v9720_v63 = vpop.f32.mrb[13].mxu1 }
 0x11e   : > { %v9722_v0 = vpop.f32.mrb[14].mxu1 }
 0x11f   : > { %11127 = vst [vmem:[#allocation15_spill] sm:$0xff] %v9722_v0  ;;  %v9724_v1 = vpop.f32.mrb[15].mxu1 }
 0x120   : > { %11128 = vst [vmem:[#allocation16_spill] sm:$0xff] %v9724_v1 }
 0x122   : > { %v9726_v3 = vpop.f32.mrb[16].mxu1 }
 0x123   : > { %11129 = vst [vmem:[#allocation17_spill] sm:$0xff] %v9726_v3  ;;  %v9728_v10 = vpop.f32.mrb[17].mxu1 }
 0x124   : > { %11130 = vst [vmem:[#allocation18_spill] sm:$0xff] %v9728_v10 }
 0x126   : > { %v9730_v11 = vpop.f32.mrb[18].mxu1 }
 0x127   : > { %11131 = vst [vmem:[#allocation19_spill] sm:$0xff] %v9730_v11  ;;  %v9732_v12 = vpop.f32.mrb[19].mxu1 }
 0x128   : > { %11132 = vst [vmem:[#allocation20_spill] sm:$0xff] %v9732_v12 }
 0x185   : > { %v8127_v45 = vpop.f32.mrb[12].mxu0 }
 0x186   : > { %v1167_v46 = vpop.f32.mrb[13].mxu0 }
 0x187   : > { %1178 = vperm.xlu1 %9094, %v1167_v46  }
 0x18b   : > { %1189 = vperm.xlu1 %9094, %v8127_v45  }
 0x206   : > { %v1179_v25 = vpop.permute.xlu1 %1178 }
 0x207   : > { %v1185_v29 = vmul.f32 %v9737_v26, %v1179_v25  ;;  %v9764_v25 = vld [vmem:[%s11136_s24] sm:$0xff] }
 0x20a   : > { %v1190_v28 = vpop.permute.xlu1 %1189 }
 0x20b   : > { %v1196_v30 = vmul.f32 %v9739_v27, %v1190_v28 }
 0x20d   : > { %v1197_v31 = vadd.f32 %v1196_v30, %v1185_v29 }
 0x20f   : > { %8137 = vmatmul.mubr.msk.f32.vlgmr.msra.gmra.mrb[20].mxu1 %vm1091_vm0, %v1197_v31 }
 0x210   : > { %8146 = vmatprep.mubr.msk.f32.mxu1 %vm1277_vm3, %v980_v55 }
 0x2e2   : > { %v1267_v45 = vpop.f32.mrb[20].mxu1 }
 0x2e3   : > { %v1268_v46 = vadd.f32 %v1267_v45, %v9748_v32  ;;  %v8138_v13 = vpop.f32.mrb[21].mxu1 }
 0x2e5   : > { %v7417_v14 = vmul.f32 -1.442695, %v1268_v46 }
 0x2e7   : > { %9104 = vpow2.f32 %v7417_v14 }
 0x2f1   : > { %v9105_v16 = vpop.eup %9104 }
 0x2f2   : > { %v1274_v22 = vadd.f32 1.0, %v9105_v16 }
 0x2f4   : > { %9106 = vrcp.f32 %v1274_v22 }
 0x2fe   : > { %v9107_v55 = vpop.eup %9106 }
 0x2ff   : > { %8140 = vmatpush3.msra.mxu0 %v9107_v55 }
 0x300   : > { %8142 = vmatmul.mubr.msk.f32.vlgmr.msra.gmra.mrb[14].mxu0 %vm1277_vm3, %v9754_v24  ;;  %8152 = vmatprep.subr.mxu0 %v11084_v47 }
 0x301   : > { %8154 = vmatprep.mubr.msk.f32.mxu0 %vm9360_vm2, %v11084_v47  ;;  %8153 = vmatpush3.msra.mxu0 %v9764_v25 }
 0x3d3   : > { %v1347_v28 = vpop.f32.mrb[14].mxu0 }
 0x3d4   : > { %v1351_v29 = vsel %vm1277_vm3, %v1347_v28, -inf  ;;  %v8143_v30 = vpop.f32.mrb[15].mxu0 }
 0x3d5   : > { %v1352_v31 = vrot.slane %v1351_v29, 4 }
 0x3d7   : > { %v1353_v45 = vmax.f32 %v1351_v29, %v1352_v31 }
 0x3d9   : > { %v1354_v46 = vrot.slane %v1353_v45, 2 }
 0x3db   : > { %v1355_v13 = vmax.f32 %v1353_v45, %v1354_v46  ;;  %v9817_v46 = vpack.c.bf16 %v9568_v8, %v9557_v6 }
 0x3dd   : > { %v1356_v14 = vrot.slane %v1355_v13, 1  ;;  %11141 = vst [vmem:[#allocation22_spill] sm:$0xff] %v9817_v46 }
 0x3df   : > { %v1357_v16 = vmax.f32 %v1355_v13, %v1356_v14 }
 0x3e1   : > { %v1358_v22 = vsub.f32 %v1347_v28, %v1357_v16  ;;  %v9843_v16 = vld [vmem:[%s11142_s9] sm:$0xff] }
 0x3e3   : > { %v1359_v55 = vmul.f32 1.442695, %v1358_v22 }
 0x3e5   : > { %9108 = vpow2.f32 %v1359_v55 }
 0x3ef   : > { %v9109_v53 = vpop.eup %9108 }
 0x3f0   : > { %v1361_v50 = vsel %vm1277_vm3, %v9109_v53, 0.0 }
 0x3f1   : > { %v1362_v44 = vrot.slane %v1361_v50, 4 }
 0x3f3   : > { %v1363_v41 = vadd.f32 %v1362_v44, %v1361_v50 }
 0x3f5   : > { %v1364_v38 = vrot.slane %v1363_v41, 2 }
 0x3f7   : > { %v1365_v35 = vadd.f32 %v1364_v38, %v1363_v41 }
 0x3f9   : > { %v1366_v23 = vrot.slane %v1365_v35, 1 }
 0x3fb   : > { %v1367_v47 = vadd.f32 %v1366_v23, %v1365_v35 }
 0x3fd   : > { %9110 = vrcp.f32 %v1367_v47 }
 0x407   : > { %v9111_v30 = vpop.eup %9110 }
 0x408   : > { %v1369_v11 = vmul.f32 %v9111_v30, %v9109_v53 }
 0x40a   : > { %8144 = vmatprep.subr.mxu1 %v1369_v11  ;;  %8155 = vmatmul.mubr.msk.f32.vlgmr.msra.gmra.mrb[16].mxu0 %vm1277_vm3, %v1369_v11 }
 0x40b   : > { %8145 = vmatpush3.msra.mxu1 %v1369_v11  ;;  %8161 = vmatprep.mubr.msk.f32.mxu0 %vm718_vm1, %v9548_v4  ;;  %v9805_v11 = vld [vmem:[%s11140_s7 + $0x8] sm:$0xff] }
 0x40c   : > { %8147 = vmatmul.mubr.msk.f32.vlgmr.msra.gmra.mrb[22].mxu1 %vm1277_vm3, %v9704_v54 }
 0x40d   : > { %8149 = vmatprep.mubr.msk.f32.mxu1 %vm1277_vm3, %v9708_v57  ;;  %v9800_v57 = vld [vmem:[%s11140_s7] sm:$0xff] }
 0x410   : > { %8150 = vmatmul.mubr.msk.f32.gmra.mrb[24].mxu1 %vm1277_vm3, %v9706_v56  ;;  %v9792_v56 = vpack.c.bf16 %v9552_v5, %v9548_v4 }
 0x412   : > { %11139 = vst [vmem:[#allocation21_spill] sm:$0xff] %v9792_v56 }
 0x4dd   : > { %v1536_v23 = vpop.f32.mrb[16].mxu0 }
 0x4de   : > { %1542 = vperm.xlu1 %9094, %v1536_v23   ;;  %v8156_v35 = vpop.f32.mrb[17].mxu0 }
 0x4df   : > { %v8148_v38 = vpop.f32.mrb[22].mxu1  ;;  %v9850_v35 = vld [vmem:[%s11142_s9 + $0x18] sm:$0xff] }
 0x4e0   : > { %v1448_v41 = vpop.f32.mrb[23].mxu1 }
 0x4e1   : > { %v8761_v47 = vpack.c.bf16 %v8148_v38, %v1448_v41  ;;  %v9855_v41 = vld [vmem:[%s11142_s9 + $0x10] sm:$0xff] }
 0x4e3   : > { %v8151_v50 = vpop.f32.mrb[24].mxu1  ;;  %8763 = vmatprep.subr.msk.bf16.mxu1 %vm9780_vm4, %v8761_v47 }
 0x4e4   : > { %v1458_v53 = vpop.f32.mrb[25].mxu1  ;;  %8766 = vmatpush3.bf16.xpose.msk.msra.mxu1 %vm9780_vm4, %v8761_v47 }
 0x4e5   : > { %v8767_v54 = vpack.c.bf16 %v8151_v50, %v1458_v53 }
 0x4e7   : > { %8769 = vmatprep.subr.msk.bf16.mxu1 %vm9780_vm4, %v8767_v54 }
 0x4ec   : > { %8772 = vmatpush3.bf16.xpose.msk.msra.mxu1 %vm9780_vm4, %v8767_v54 }
 0x4ed   : > { %8790 = vmatprep.subr.bf16.mxu1 %v9792_v56 }
 0x55d   : > { %v1543_v28 = vpop.permute.xlu1 %1542 }
 0x55e   : > { %v1545_v29 = vmul.f32 %v1543_v28, %v9800_v57  ;;  %v1546_v4 = vmul.f32 %v1543_v28, %v9805_v11 }
 0x560   : > { %v8757_v31 = vpack.c.bf16 %v1546_v4, %v1545_v29 }
 0x562   : > { %8758 = vmatprep.subr.bf16.mxu0 %v8757_v31 }
 0x563   : > { %8760 = vmatpush3.bf16.msra.mxu0 %v8757_v31 }
 0x566   : > { %8162 = vmatmul.mubr.msk.f32.vlgmr.msra.gmra.mrb[18].mxu0 %vm718_vm1, %v9552_v5 }
 0x567   : > { %8164 = vmatprep.mubr.msk.f32.mxu0 %vm718_vm1, %v9557_v6  ;;  %v9831_v6 = vld [vmem:[%s11060_s10] sm:$0xff] }
 0x56a   : > { %8165 = vmatmul.mubr.msk.f32.gmra.mrb[20].mxu0 %vm718_vm1, %v9568_v8  ;;  %v9838_v8 = vld [vmem:[%s11142_s9 + $0x8] sm:$0xff] }
 0x56b   : > { %8189 = vmatprep.mubr.msk.f32.mxu0 %vm1091_vm0, %v9831_v6 }
 0x639   : > { %v8163_v45 = vpop.f32.mrb[18].mxu0 }
 0x63a   : > { %v1613_v13 = vpop.f32.mrb[19].mxu0 }
 0x63b   : > { %8175 = vmatprep.mubr.msk.f32.mxu1 %vm1277_vm3, %v1613_v13 }
 0x63c   : > { %8176 = vmatmul.mubr.msk.f32.vlgmr.msra.gmra.mrb[26].mxu1 %vm1277_vm3, %v8163_v45 }
 0x63d   : > { %v8166_v14 = vpop.f32.mrb[20].mxu0  ;;  %8792 = vmatpush3.bf16.msra.mxu1 %v9792_v56 }
 0x63e   : > { %v1623_v5 = vpop.f32.mrb[21].mxu0  ;;  %8794 = vmatprep.subr.bf16.mxu1 %v9817_v46 }
 0x63f   : > { %8178 = vmatprep.mubr.msk.f32.mxu1 %vm1277_vm3, %v1623_v5 }
 0x640   : > { %8179 = vmatmul.mubr.msk.f32.gmra.mrb[28].mxu1 %vm1277_vm3, %v8166_v14 }
 0x641   : > { %8796 = vmatpush3.bf16.msra.mxu1 %v9817_v46 }
 0x642   : > { %8237 = vmatprep.subr.msk.mxu1 %vm1091_vm0, %v9538_v2 }
 0x70f   : > { %v8177_v22 = vpop.f32.mrb[26].mxu1 }
 0x710   : > { %v1728_v55 = vadd.f32 %v8177_v22, %v9838_v8  ;;  %v1722_v30 = vpop.f32.mrb[27].mxu1 }
 0x711   : > { %v1723_v23 = vadd.f32 %v1722_v30, %v9843_v16 }
 0x712   : > { %v7437_v38 = vmul.f32 -1.442695, %v1728_v55 }
 0x713   : > { %v7436_v47 = vmul.f32 -1.442695, %v1723_v23  ;;  %v8180_v50 = vpop.f32.mrb[28].mxu1 }
 0x714   : > { %9112 = vpow2.f32 %v7437_v38  ;;  %v1738_v53 = vadd.f32 %v8180_v50, %v9850_v35  ;;  %v1732_v54 = vpop.f32.mrb[29].mxu1 }
 0x715   : > { %9114 = vpow2.f32 %v7436_v47  ;;  %v1733_v28 = vadd.f32 %v1732_v54, %v9855_v41 }
 0x716   : > { %v7439_v29 = vmul.f32 -1.442695, %v1738_v53 }
 0x717   : > { %v7438_v4 = vmul.f32 -1.442695, %v1733_v28  ;;  %v9862_v28 = vld [vmem:[%s11060_s10 + $0x8] sm:$0xff] }
 0x718   : > { %9116 = vpow2.f32 %v7439_v29  ;;  %v9867_v29 = vld [vmem:[%s11060_s10 + $0x10] sm:$0xff] }
 0x719   : > { %9118 = vpow2.f32 %v7438_v4  ;;  %v9877_v4 = vld [vmem:[%s11060_s10 + $0x18] sm:$0xff] }
 0x71e   : > { %v9113_v31 = vpop.eup %9112 }
 0x71f   : > { %v9115_v45 = vpop.eup %9114  ;;  %v1754_v13 = vadd.f32 1.0, %v9113_v31 }
 0x720   : > { %v1753_v14 = vadd.f32 1.0, %v9115_v45 }
 0x721   : > { %9120 = vrcp.f32 %v1754_v13 }
 0x722   : > { %v9117_v5 = vpop.eup %9116  ;;  %9122 = vrcp.f32 %v1753_v14 }
 0x723   : > { %v9119_v22 = vpop.eup %9118  ;;  %v1756_v55 = vadd.f32 1.0, %v9117_v5 }
 0x724   : > { %v1755_v30 = vadd.f32 1.0, %v9119_v22 }
 0x725   : > { %9124 = vrcp.f32 %v1756_v55 }
 0x726   : > { %9126 = vrcp.f32 %v1755_v30 }
 0x72b   : > { %v9121_v23 = vpop.eup %9120 }
 0x72c   : > { %v9123_v38 = vpop.eup %9122 }
 0x72d   : > { %v8773_v47 = vpack.c.bf16 %v9121_v23, %v9123_v38 }
 0x72f   : > { %v9125_v50 = vpop.eup %9124  ;;  %8774 = vmatprep.subr.bf16.mxu0 %v8773_v47 }
 0x730   : > { %v9127_v53 = vpop.eup %9126  ;;  %8776 = vmatpush3.bf16.msra.mxu0 %v8773_v47 }
 0x731   : > { %v8777_v54 = vpack.c.bf16 %v9125_v50, %v9127_v53 }
 0x733   : > { %8778 = vmatprep.subr.bf16.mxu0 %v8777_v54 }
 0x734   : > { %8780 = vmatpush3.bf16.msra.mxu0 %v8777_v54 }
 0x735   : > { %8782 = vmatprep.subr.bf16.mxu0 %v9792_v56 }
 0x737   : > { %8190 = vmatmul.mubr.msk.f32.vlgmr.msra.gmra.mrb[22].mxu0 %vm1091_vm0, %v9862_v28 }
 0x738   : > { %8192 = vmatprep.mubr.msk.f32.mxu0 %vm1091_vm0, %v9867_v29  ;;  %8784 = vmatpush3.bf16.msra.mxu0 %v9792_v56 }
 0x739   : > { %8786 = vmatprep.subr.bf16.mxu0 %v9817_v46 }
 0x73b   : > { %8193 = vmatmul.mubr.msk.f32.gmra.mrb[24].mxu0 %vm1091_vm0, %v9877_v4 }
 0x73c   : > { %8788 = vmatpush3.bf16.msra.mxu0 %v9817_v46 }
 0x73d   : > { %8798 = vmatprep.subr.bf16.mxu0 %v9792_v56 }
 0x80a   : > { %v8191_v31 = vpop.f32.mrb[22].mxu0 }
 0x80b   : > { %v1863_v45 = vsel %vm1091_vm0, %v8191_v31, -inf  ;;  %v1843_v13 = vpop.f32.mrb[23].mxu0 }
 0x80c   : > { %v1862_v14 = vsel %vm1091_vm0, %v1843_v13, -inf }
 0x80d   : > { %v1866_v5 = vmax.f32 %v1862_v14, %v1863_v45 }
 0x80e   : > { %v8194_v22 = vpop.f32.mrb[24].mxu0 }
 0x80f   : > { %v1865_v55 = vsel %vm1091_vm0, %v8194_v22, -inf  ;;  %v1853_v30 = vpop.f32.mrb[25].mxu0 }
 0x810   : > { %v1864_v23 = vsel %vm1091_vm0, %v1853_v30, -inf }
 0x811   : > { %v1867_v38 = vmax.f32 %v1864_v23, %v1865_v55 }
 0x813   : > { %v1868_v47 = vmax.f32 %v1866_v5, %v1867_v38 }
 0x815   : > { %v1869_v50 = vrot.slane %v1868_v47, 4 }
 0x817   : > { %v1870_v53 = vmax.f32 %v1868_v47, %v1869_v50  ;;  %v9896_v50 = vld [vmem:[%s11061_s11 + $0x20] sm:$0xff] }
 0x819   : > { %v1871_v54 = vrot.slane %v1870_v53, 2 }
 0x81b   : > { %v1872_v12 = vmax.f32 %v1870_v53, %v1871_v54 }
 0x81d   : > { %v1873_v3 = vrot.slane %v1872_v12, 1 }
 0x81f   : > { %v1874_v10 = vmax.f32 %v1872_v12, %v1873_v3 }
 0x821   : > { %v1875_v52 = vsub.f32 %v1843_v13, %v1874_v10  ;;  %v1876_v51 = vsub.f32 %v8191_v31, %v1874_v10  ;;  %v1877_v49 = vsub.f32 %v1853_v30, %v1874_v10  ;;  %v1878_v48 = vsub.f32 %v8194_v22, %v1874_v10 }
 0x823   : > { %v1879_v0 = vmul.f32 1.442695, %v1875_v52  ;;  %v1881_v45 = vmul.f32 1.442695, %v1876_v51  ;;  %v1883_v14 = vmul.f32 1.442695, %v1877_v49 }
 0x824   : > { %v1885_v1 = vmul.f32 1.442695, %v1878_v48 }
 0x825   : > { %9128 = vpow2.f32 %v1879_v0 }
 0x826   : > { %9130 = vpow2.f32 %v1881_v45 }
 0x827   : > { %9132 = vpow2.f32 %v1883_v14 }
 0x828   : > { %9134 = vpow2.f32 %v1885_v1 }
 0x82f   : > { %v9129_v55 = vpop.eup %9128 }
 0x830   : > { %v9131_v5 = vpop.eup %9130  ;;  %v1887_v23 = vsel %vm1091_vm0, %v9129_v55, 0.0 }
 0x831   : > { %v9133_v38 = vpop.eup %9132  ;;  %v1888_v47 = vsel %vm1091_vm0, %v9131_v5, 0.0 }
 0x832   : > { %v9135_v3 = vpop.eup %9134  ;;  %v1889_v12 = vadd.f32 %v1888_v47, %v1887_v23  ;;  %v1890_v31 = vsel %vm1091_vm0, %v9133_v38, 0.0  ;;  %v9902_v47 = vld [vmem:[%s11061_s11 + $0x28] sm:$0xff] }
 0x833   : > { %v1892_v51 = vsel %vm1091_vm0, %v9135_v3, 0.0 }
 0x834   : > { %v1891_v10 = vadd.f32 %v1890_v31, %v1889_v12  ;;  %v9908_v31 = vld [vmem:[%s11061_s11 + $0x30] sm:$0xff] }
 0x836   : > { %v1893_v49 = vadd.f32 %v1892_v51, %v1891_v10  ;;  %v11143_v51 = vmov 0.0  }
 0x838   : > { %v1894_v48 = vrot.slane %v1893_v49, 4 }
 0x83a   : > { %v1895_v52 = vadd.f32 %v1894_v48, %v1893_v49  ;;  %v2380_v48 = vpop.trf.xlu0 }
 0x83c   : > { %v1896_v0 = vrot.slane %v1895_v52, 2 }
 0x83e   : > { %v1897_v13 = vadd.f32 %v1896_v0, %v1895_v52  ;;  %v2381_v0 = vpop.trf.xlu0 }
 0x840   : > { %v1898_v1 = vrot.slane %v1897_v13, 1 }
 0x842   : > { %v1899_v22 = vadd.f32 %v1898_v1, %v1897_v13 }
 0x844   : > { %9136 = vrcp.f32 %v1899_v22 }
 0x84e   : > { %v9137_v30 = vpop.eup %9136 }
 0x84f   : > { %v1901_v53 = vmul.f32 %v9137_v30, %v9129_v55  ;;  %v1902_v54 = vmul.f32 %v9137_v30, %v9131_v5  ;;  %v1903_v45 = vmul.f32 %v9137_v30, %v9133_v38  ;;  %v1904_v14 = vmul.f32 %v9137_v30, %v9135_v3  ;;  %v9914_v5 = vld [vmem:[%s11061_s11 + $0x38] sm:$0xff] }
 0x851   : > { %v2051_v23 = vmul.f32 %v9896_v50, %v1901_v53  ;;  %v2052_v12 = vmul.f32 %v9902_v47, %v1902_v54  ;;  %v2053_v55 = vmul.f32 %v9908_v31, %v1903_v45  ;;  %v2054_v38 = vmul.f32 %v9914_v5, %v1904_v14 }
 0x853   : > { %2055 = vxpose.xlu1.b32.start [1/4] (short) (narrow) %v2051_v23, 32 }
 0x857   : > { %2056 = vxpose.xlu1.b32.cont [2/4] (short) (narrow) %v2052_v12, 32  ;;  %v9939_v12 = vld [vmem:[%s11061_s11] sm:$0xff] }
 0x85b   : > { %2057 = vxpose.xlu1.b32.cont [3/4] (short) (narrow) %v2053_v55, 32  ;;  %v1909_v55 = vmul.f32 %v9939_v12, %v1901_v53 }
 0x85f   : > { %2058 = vxpose.xlu1.b32.end [4/4] (short) (narrow) %v2054_v38, 32  ;;  %v9945_v38 = vld [vmem:[%s11061_s11 + $0x8] sm:$0xff] }
 0x8d3   : > { %v2071_v3 = vpop.trf.xlu1 }
 0x8d4   : > { %8217 = vmatprep.mubr.msk.f32.mxu1 %vm1091_vm0, %v2071_v3  ;;  %v1910_v3 = vmul.f32 %v9945_v38, %v1902_v54 }
 0x8d7   : > { %v2072_v10 = vpop.trf.xlu1 }
 0x8d8   : > { %8218 = vmatmul.mubr.msk.f32.vlgmr.msra.gmra.mrb[30].mxu1 %vm1091_vm0, %v2072_v10  ;;  %v9951_v10 = vld [vmem:[%s11061_s11 + $0x10] sm:$0xff] }
 0x8d9   : > { %8238 = vmatpush3.xpose.msk.msra.mxu1 %vm1091_vm0, %v9538_v2 }
 0x8da   : > { %8253 = vmatprep.subr.mxu1 %v11143_v51 }
 0x8db   : > { %v2073_v49 = vpop.trf.xlu1 }
 0x8dc   : > { %8220 = vmatprep.mubr.msk.f32.mxu1 %vm1091_vm0, %v2073_v49  ;;  %v9956_v49 = vld [vmem:[%s11061_s11 + $0x40] sm:$0xff] }
 0x8df   : > { %v2074_v52 = vpop.trf.xlu1 }
 0x8e0   : > { %8221 = vmatmul.mubr.msk.f32.gmra.mrb[32].mxu1 %vm1091_vm0, %v2074_v52  ;;  %v9962_v52 = vld [vmem:[%s11061_s11 + $0x18] sm:$0xff] }
 0x8e1   : > { %8239 = vmatprep.mubr.msk.f32.mxu1 %vm1091_vm0, %v2380_v48  ;;  %v1911_v48 = vmul.f32 %v9951_v10, %v1903_v45 }
 0x8e4   : > { %8240 = vmatmul.mubr.msk.f32.vlgmr.msra.gmra.mrb[34].mxu1 %vm1091_vm0, %v2381_v0  ;;  %v2210_v0 = vmul.f32 %v9956_v49, %v1901_v53  ;;  %v9981_v53 = vld [vmem:[%s11061_s11 + $0x58] sm:$0xff] }
 0x8e5   : > { %8255 = vmatprep.mubr.msk.f32.mxu1 %vm9360_vm2, %v11143_v51 }
 0x9ab   : > { %v9928_v13 = vpop.f32.mrb[30].mxu1 }
 0x9ac   : > { %11144 = vst [vmem:[#allocation23_spill] sm:$0xff] %v9928_v13  ;;  %v9930_v2 = vpop.f32.mrb[31].mxu1 }
 0x9ad   : > { %11145 = vst [vmem:[#allocation24_spill] sm:$0xff] %v9930_v2 }
 0x9b3   : > { %v9932_v1 = vpop.f32.mrb[32].mxu1 }
 0x9b4   : > { %11146 = vst [vmem:[#allocation25_spill] sm:$0xff] %v9932_v1  ;;  %v9934_v22 = vpop.f32.mrb[33].mxu1 }
 0x9b5   : > { %11147 = vst [vmem:[#allocation26_spill] sm:$0xff] %v9934_v22 }
 0x9b7   : > { %v8241_v30 = vpop.f32.mrb[34].mxu1 }
 0x9b8   : > { %2486 = vperm.xlu1 %9094, %v8241_v30   ;;  %v2468_v23 = vpop.f32.mrb[35].mxu1  ;;  %v9968_v30 = vld [vmem:[%s11061_s11 + $0x48] sm:$0xff] }
 0x9b9   : > { %2479 = vperm.xlu0 %9095, %v2468_v23   ;;  %v1912_v23 = vmul.f32 %v9962_v52, %v1904_v14 }
 0x9d7   : > { %1913 = vxpose.xlu0.b32.start [1/4] (short) (narrow) %v1909_v55, 32  ;;  %v2211_v55 = vmul.f32 %v9968_v30, %v1902_v54 }
 0x9db   : > { %1914 = vxpose.xlu0.b32.cont [2/4] (short) (narrow) %v1910_v3, 32  ;;  %v9975_v3 = vld [vmem:[%s11061_s11 + $0x50] sm:$0xff] }
 0x9df   : > { %1915 = vxpose.xlu0.b32.cont [3/4] (short) (narrow) %v1911_v48, 32  ;;  %v2212_v48 = vmul.f32 %v9975_v3, %v1903_v45 }
 0x9e1   : > { %2214 = vxpose.xlu1.b32.start [1/4] (short) (narrow) %v2210_v0, 32  ;;  %v2213_v0 = vmul.f32 %v9981_v53, %v1904_v14  ;;  %v11148_v14 = vmov 0.0|0.0  }
 0x9e3   : > { %1916 = vxpose.xlu0.b32.end [4/4] (short) (narrow) %v1912_v23, 32 }
 0x9e5   : > { %2215 = vxpose.xlu1.b32.cont [2/4] (short) (narrow) %v2211_v55, 32 }
 0x9e9   : > { %2216 = vxpose.xlu1.b32.cont [3/4] (short) (narrow) %v2212_v48, 32 }
 0x9ed   : > { %2217 = vxpose.xlu1.b32.end [4/4] (short) (narrow) %v2213_v0, 32  ;;  %v11149_v0 = vpack.c.bf16 %v9663_v33, %v9665_v34 }
 0xa37   : > { %v2487_v22 = vpop.permute.xlu1 %2486 }
 0xa38   : > { %v2480_v23 = vpop.permute.xlu0 %2479 }
 0xa57   : > { %v1929_v1 = vpop.trf.xlu0 }
 0xa58   : > { %8203 = vmatprep.mubr.msk.f32.mxu0 %vm1091_vm0, %v1929_v1 }
 0xa5b   : > { %v1930_v54 = vpop.trf.xlu0 }
 0xa5c   : > { %8204 = vmatmul.mubr.msk.f32.vlgmr.msra.gmra.mrb[26].mxu0 %vm1091_vm0, %v1930_v54 }
 0xa5d   : > { %8800 = vmatpush3.bf16.msra.mxu0 %v9792_v56 }
 0xa5e   : > { %8802 = vmatprep.subr.bf16.mxu0 %v9817_v46 }
 0xa5f   : > { %v1931_v45 = vpop.trf.xlu0 }
 0xa60   : > { %8206 = vmatprep.mubr.msk.f32.mxu0 %vm1091_vm0, %v1931_v45  ;;  %v2489_v45 = vmul.f32 %v2487_v22, %v9739_v27 }
 0xa61   : > { %v2230_v55 = vpop.trf.xlu1  ;;  %8804 = vmatpush3.bf16.msra.mxu0 %v9817_v46  ;;  %v2482_v46 = vmul.f32 %v2480_v23, %v9737_v26 }
 0xa62   : > { %8805 = vmatprep.subr.bf16.mxu0 %v11148_v14 }
 0xa63   : > { %v1932_v48 = vpop.trf.xlu0  ;;  %v2490_v33 = vadd.f32 %v2489_v45, %v2482_v46 }
 0xa64   : > { %8207 = vmatmul.mubr.msk.f32.gmra.mrb[28].mxu0 %vm1091_vm0, %v1932_v48  ;;  %v11150_v48 = vpack.c.bf16 %v9669_v36, %v9671_v37 }
 0xa65   : > { %v2231_v1 = vpop.trf.xlu1  ;;  %8231 = vmatprep.mubr.msk.f32.mxu0 %vm1091_vm0, %v2230_v55 }
 0xa68   : > { %8232 = vmatmul.mubr.msk.f32.vlgmr.msra.gmra.mrb[30].mxu0 %vm1091_vm0, %v2231_v1 }
 0xa69   : > { %8807 = vmatpush3.bf16.msra.mxu0 %v11149_v0  ;;  %v2232_v54 = vpop.trf.xlu1 }
 0xa6a   : > { %8234 = vmatprep.mubr.msk.f32.mxu0 %vm1091_vm0, %v2232_v54  ;;  %8808 = vmatprep.subr.bf16.mxu0 %v11148_v14 }
 0xa6d   : > { %8810 = vmatpush3.bf16.msra.mxu0 %v11150_v48  ;;  %v2233_v55 = vpop.trf.xlu1 }
 0xa6e   : > { %8235 = vmatmul.mubr.msk.f32.gmra.mrb[32].mxu0 %vm1091_vm0, %v2233_v55  ;;  %8266 = vmatprep.subr.mxu0 %v11143_v51 }
 0xa6f   : > { %8250 = vmatprep.mubr.msk.f32.mxu0 %vm9360_vm2, %v11143_v51 }
 0xa72   : > { %8251 = vmatmul.mubr.msk.f32.vlgmr.msra.gmra.mrb[34].mxu0 %vm1091_vm0, %v2490_v33 }
 0xa73   : > { %8267 = vmatpush3.msra.mxu0 %v9764_v25  ;;  %8268 = vmatprep.mubr.msk.f32.mxu0 %vm9360_vm2, %v11143_v51 }
 0xb2f   : > { %v8205_v34 = vpop.f32.mrb[26].mxu0 }
 0xb30   : > { %2043 = vst.msk [vmem:[#allocation2 + $0x8] sm:$0xff] %vm718_vm1, %v8205_v34  ;;  %v2023_v36 = vpop.f32.mrb[27].mxu0 }
 0xb31   : > { %2042 = vst.msk [vmem:[#allocation2] sm:$0xff] %vm718_vm1, %v2023_v36 }
 0xb37   : > { %v8208_v37 = vpop.f32.mrb[28].mxu0 }
 0xb38   : > { %2045 = vst.msk [vmem:[#allocation2 + $0x18] sm:$0xff] %vm718_vm1, %v8208_v37  ;;  %v2033_v22 = vpop.f32.mrb[29].mxu0 }
 0xb39   : > { %2044 = vst.msk [vmem:[#allocation2 + $0x10] sm:$0xff] %vm718_vm1, %v2033_v22 }
 0xb3b   : > { %v10016_v46 = vpop.f32.mrb[30].mxu0 }
 0xb3c   : > { %11151 = vst [vmem:[#allocation27_spill] sm:$0xff] %v10016_v46  ;;  %v10018_v23 = vpop.f32.mrb[31].mxu0 }
 0xb3d   : > { %11152 = vst [vmem:[#allocation28_spill] sm:$0xff] %v10018_v23 }
 0xb41   : > { %v10020_v25 = vpop.f32.mrb[32].mxu0 }
 0xb42   : > { %11153 = vst [vmem:[#allocation29_spill] sm:$0xff] %v10020_v25  ;;  %v10022_v1 = vpop.f32.mrb[33].mxu0 }
 0xb43   : > { %11154 = vst [vmem:[#allocation30_spill] sm:$0xff] %v10022_v1 }
 0xb45   : > { %v2560_v0 = vpop.f32.mrb[34].mxu0 }
 0xb46   : > { %v2561_v54 = vadd.f32 %v2560_v0, %v9748_v32  ;;  %v8252_v45 = vpop.f32.mrb[35].mxu0 }
 0xb48   : > { %v7468_v48 = vmul.f32 -1.442695, %v2561_v54 }
 0xb4a   : > { %9138 = vpow2.f32 %v7468_v48 }
 0xb54   : > { %v9139_v55 = vpop.eup %9138 }
 0xb55   : > { %v2567_v33 = vadd.f32 1.0, %v9139_v55 }
 0xb57   : > { %9140 = vrcp.f32 %v2567_v33 }
 0xb61   : > { %v9141_v34 = vpop.eup %9140 }
 0xb62   : > { %8254 = vmatpush3.msra.mxu1 %v9141_v34 }
 0xb63   : > { %8256 = vmatmul.mubr.msk.f32.vlgmr.msra.gmra.mrb[36].mxu1 %vm1277_vm3, %v9754_v24 }
 0xb64   : > { %8260 = vmatprep.mubr.msk.f32.mxu1 %vm1277_vm3, %v9712_v59 }
 0xc36   : > { %v2636_v36 = vpop.f32.mrb[36].mxu1 }
 0xc37   : > { %v2640_v37 = vsel %vm1277_vm3, %v2636_v36, -inf  ;;  %v8257_v22 = vpop.f32.mrb[37].mxu1 }
 0xc38   : > { %v2641_v56 = vrot.slane %v2640_v37, 4 }
 0xc3a   : > { %v2642_v32 = vmax.f32 %v2640_v37, %v2641_v56 }
 0xc3c   : > { %v2643_v0 = vrot.slane %v2642_v32, 2 }
 0xc3e   : > { %v2644_v54 = vmax.f32 %v2642_v32, %v2643_v0 }
 0xc40   : > { %v2645_v45 = vrot.slane %v2644_v54, 1 }
 0xc42   : > { %v2646_v48 = vmax.f32 %v2644_v54, %v2645_v45 }
 0xc44   : > { %v2647_v55 = vsub.f32 %v2636_v36, %v2646_v48 }
 0xc46   : > { %v2648_v33 = vmul.f32 1.442695, %v2647_v55 }
 0xc48   : > { %9142 = vpow2.f32 %v2648_v33 }
 0xc52   : > { %v9143_v34 = vpop.eup %9142 }
 0xc53   : > { %v2650_v1 = vsel %vm1277_vm3, %v9143_v34, 0.0 }
 0xc54   : > { %v2651_v24 = vrot.slane %v2650_v1, 4 }
 0xc56   : > { %v2652_v23 = vadd.f32 %v2651_v24, %v2650_v1 }
 0xc58   : > { %v2653_v2 = vrot.slane %v2652_v23, 2 }
 0xc5a   : > { %v2654_v59 = vadd.f32 %v2653_v2, %v2652_v23 }
 0xc5c   : > { %v2655_v25 = vrot.slane %v2654_v59, 1 }
 0xc5e   : > { %v2656_v46 = vadd.f32 %v2655_v25, %v2654_v59 }
 0xc60   : > { %9144 = vrcp.f32 %v2656_v46 }
 0xc6a   : > { %v9145_v22 = vpop.eup %9144 }
 0xc6b   : > { %v2658_v13 = vmul.f32 %v9145_v22, %v9143_v34 }
 0xc6d   : > { %8258 = vmatprep.subr.mxu1 %v2658_v13  ;;  %8269 = vmatmul.mubr.msk.f32.vlgmr.msra.gmra.mrb[36].mxu0 %vm1277_vm3, %v2658_v13 }
 0xc6e   : > { %8259 = vmatpush3.msra.mxu1 %v2658_v13  ;;  %8275 = vmatprep.mubr.msk.f32.mxu0 %vm718_vm1, %v9564_v7 }
 0xc6f   : > { %8261 = vmatmul.mubr.msk.f32.vlgmr.msra.gmra.mrb[38].mxu1 %vm1277_vm3, %v9710_v58 }
 0xc70   : > { %8263 = vmatprep.mubr.msk.f32.mxu1 %vm1277_vm3, %v9716_v61 }
 0xc73   : > { %8264 = vmatmul.mubr.msk.f32.gmra.mrb[40].mxu1 %vm1277_vm3, %v9714_v60  ;;  %v10048_v60 = vpack.c.bf16 %v9573_v9, %v9564_v7 }
 0xc75   : > { %11155 = vst [vmem:[#allocation31_spill] sm:$0xff] %v10048_v60 }
 0xd40   : > { %v2825_v56 = vpop.f32.mrb[36].mxu0 }
 0xd41   : > { %2831 = vperm.xlu0 %9095, %v2825_v56   ;;  %v8270_v2 = vpop.f32.mrb[37].mxu0 }
 0xd42   : > { %v8262_v46 = vpop.f32.mrb[38].mxu1 }
 0xd43   : > { %v2737_v23 = vpop.f32.mrb[39].mxu1 }
 0xd44   : > { %v8815_v25 = vpack.c.bf16 %v8262_v46, %v2737_v23 }
 0xd46   : > { %v8265_v1 = vpop.f32.mrb[40].mxu1  ;;  %8817 = vmatprep.subr.msk.bf16.mxu1 %vm9780_vm4, %v8815_v25 }
 0xd47   : > { %v2747_v13 = vpop.f32.mrb[41].mxu1  ;;  %8820 = vmatpush3.bf16.xpose.msk.msra.mxu1 %vm9780_vm4, %v8815_v25 }
 0xd48   : > { %v8821_v58 = vpack.c.bf16 %v8265_v1, %v2747_v13 }
 0xd4a   : > { %8823 = vmatprep.subr.msk.bf16.mxu1 %vm9780_vm4, %v8821_v58 }
 0xd4f   : > { %8826 = vmatpush3.bf16.xpose.msk.msra.mxu1 %vm9780_vm4, %v8821_v58 }
 0xd50   : > { %8844 = vmatprep.subr.bf16.mxu1 %v10048_v60 }
 0xd5f   : > { %3637 = vxpose.xlu0.b32.start [1/4] (short) (narrow) %v9603_v18, 16 }
 0xd63   : > { %3638 = vxpose.xlu0.b32.cont [2/4] (short) (narrow) %v9611_v19, 16  ;;  %v10069_v19 = vpack.c.bf16 %v9600_v17, %v9589_v15 }
 0xd65   : > { %11156 = vst [vmem:[#allocation32_spill] sm:$0xff] %v10069_v19 }
 0xd67   : > { %3639 = vxpose.xlu0.b32.cont [3/4] (short) (narrow) %v9614_v20, 16 }
 0xd6b   : > { %3640 = vxpose.xlu0.b32.end [4/4] (short) (narrow) %v9622_v21, 16 }
 0xdc0   : > { %v2832_v61 = vpop.permute.xlu0 %2831 }
 0xdc1   : > { %v2834_v36 = vmul.f32 %v2832_v61, %v9800_v57  ;;  %v2835_v37 = vmul.f32 %v2832_v61, %v9805_v11 }
 0xdc3   : > { %v8811_v7 = vpack.c.bf16 %v2835_v37, %v2834_v36 }
 0xdc5   : > { %8812 = vmatprep.subr.bf16.mxu0 %v8811_v7 }
 0xdc6   : > { %8814 = vmatpush3.bf16.msra.mxu0 %v8811_v7 }
 0xdc9   : > { %8276 = vmatmul.mubr.msk.f32.vlgmr.msra.gmra.mrb[38].mxu0 %vm718_vm1, %v9573_v9 }
 0xdca   : > { %8278 = vmatprep.mubr.msk.f32.mxu0 %vm718_vm1, %v9589_v15  ;;  %v10081_v15 = vld [vmem:[%s11120_s23] sm:$0x1] }
 0xdcd   : > { %8279 = vmatmul.mubr.msk.f32.gmra.mrb[40].mxu0 %vm718_vm1, %v9600_v17 }
 0xdce   : > { %8303 = vmatprep.mubr.msk.f32.mxu0 %vm1091_vm0, %v9831_v6 }
 0xe9c   : > { %v8277_v18 = vpop.f32.mrb[38].mxu0 }
 0xe9d   : > { %v2902_v20 = vpop.f32.mrb[39].mxu0 }
 0xe9e   : > { %8289 = vmatprep.mubr.msk.f32.mxu1 %vm1277_vm3, %v2902_v20 }
 0xe9f   : > { %8290 = vmatmul.mubr.msk.f32.vlgmr.msra.gmra.mrb[42].mxu1 %vm1277_vm3, %v8277_v18 }
 0xea0   : > { %v8280_v9 = vpop.f32.mrb[40].mxu0  ;;  %8846 = vmatpush3.bf16.msra.mxu1 %v10048_v60 }
 0xea1   : > { %v2912_v21 = vpop.f32.mrb[41].mxu0  ;;  %8848 = vmatprep.subr.bf16.mxu1 %v10069_v19 }
 0xea2   : > { %8292 = vmatprep.mubr.msk.f32.mxu1 %vm1277_vm3, %v2912_v21 }
 0xea3   : > { %8293 = vmatmul.mubr.msk.f32.gmra.mrb[44].mxu1 %vm1277_vm3, %v8280_v9 }
 0xea4   : > { %8850 = vmatpush3.bf16.msra.mxu1 %v10069_v19 }
 0xea5   : > { %8351 = vmatprep.subr.msk.mxu1 %vm1091_vm0, %v10081_v15 }
 0xf72   : > { %v8291_v17 = vpop.f32.mrb[42].mxu1 }
 0xf73   : > { %v3017_v57 = vadd.f32 %v8291_v17, %v9838_v8  ;;  %v3011_v11 = vpop.f32.mrb[43].mxu1 }
 0xf74   : > { %v3012_v6 = vadd.f32 %v3011_v11, %v9843_v16 }
 0xf75   : > { %v7488_v32 = vmul.f32 -1.442695, %v3017_v57 }
 0xf76   : > { %v7487_v0 = vmul.f32 -1.442695, %v3012_v6  ;;  %v8294_v54 = vpop.f32.mrb[44].mxu1 }
 0xf77   : > { %9146 = vpow2.f32 %v7488_v32  ;;  %v3027_v45 = vadd.f32 %v8294_v54, %v9850_v35  ;;  %v3021_v48 = vpop.f32.mrb[45].mxu1 }
 0xf78   : > { %9148 = vpow2.f32 %v7487_v0  ;;  %v3022_v55 = vadd.f32 %v3021_v48, %v9855_v41 }
 0xf79   : > { %v7490_v33 = vmul.f32 -1.442695, %v3027_v45 }
 0xf7a   : > { %v7489_v34 = vmul.f32 -1.442695, %v3022_v55 }
 0xf7b   : > { %9150 = vpow2.f32 %v7490_v33 }
 0xf7c   : > { %9152 = vpow2.f32 %v7489_v34 }
 0xf81   : > { %v9147_v24 = vpop.eup %9146 }
 0xf82   : > { %v9149_v59 = vpop.eup %9148  ;;  %v3043_v8 = vadd.f32 1.0, %v9147_v24 }
 0xf83   : > { %v3042_v22 = vadd.f32 1.0, %v9149_v59 }
 0xf84   : > { %9154 = vrcp.f32 %v3043_v8 }
 0xf85   : > { %v9151_v16 = vpop.eup %9150  ;;  %9156 = vrcp.f32 %v3042_v22 }
 0xf86   : > { %v9153_v56 = vpop.eup %9152  ;;  %v3045_v2 = vadd.f32 1.0, %v9151_v16 }
 0xf87   : > { %v3044_v46 = vadd.f32 1.0, %v9153_v56 }
 0xf88   : > { %9158 = vrcp.f32 %v3045_v2 }
 0xf89   : > { %9160 = vrcp.f32 %v3044_v46 }
 0xf8e   : > { %v9155_v35 = vpop.eup %9154 }
 0xf8f   : > { %v9157_v23 = vpop.eup %9156 }
 0xf90   : > { %v8827_v25 = vpack.c.bf16 %v9155_v35, %v9157_v23 }
 0xf92   : > { %v9159_v41 = vpop.eup %9158  ;;  %8828 = vmatprep.subr.bf16.mxu0 %v8827_v25 }
 0xf93   : > { %v9161_v1 = vpop.eup %9160  ;;  %8830 = vmatpush3.bf16.msra.mxu0 %v8827_v25 }
 0xf94   : > { %v8831_v13 = vpack.c.bf16 %v9159_v41, %v9161_v1 }
 0xf96   : > { %8832 = vmatprep.subr.bf16.mxu0 %v8831_v13 }
 0xf97   : > { %8834 = vmatpush3.bf16.msra.mxu0 %v8831_v13 }
 0xf98   : > { %8836 = vmatprep.subr.bf16.mxu0 %v10048_v60 }
 0xf9a   : > { %8304 = vmatmul.mubr.msk.f32.vlgmr.msra.gmra.mrb[42].mxu0 %vm1091_vm0, %v9862_v28 }
 0xf9b   : > { %8306 = vmatprep.mubr.msk.f32.mxu0 %vm1091_vm0, %v9867_v29  ;;  %8838 = vmatpush3.bf16.msra.mxu0 %v10048_v60 }
 0xf9c   : > { %8840 = vmatprep.subr.bf16.mxu0 %v10069_v19 }
 0xf9e   : > { %8307 = vmatmul.mubr.msk.f32.gmra.mrb[44].mxu0 %vm1091_vm0, %v9877_v4 }
 0xf9f   : > { %8842 = vmatpush3.bf16.msra.mxu0 %v10069_v19 }
 0xfa0   : > { %8852 = vmatprep.subr.bf16.mxu0 %v10048_v60 }
0x106d   : > { %v8305_v58 = vpop.f32.mrb[42].mxu0 }
0x106e   : > { %v3140_v61 = vsel %vm1091_vm0, %v8305_v58, -inf  ;;  %v3120_v36 = vpop.f32.mrb[43].mxu0 }
0x106f   : > { %v3139_v28 = vsel %vm1091_vm0, %v3120_v36, -inf }
0x1070   : > { %v3143_v37 = vmax.f32 %v3139_v28, %v3140_v61 }
0x1071   : > { %v8308_v7 = vpop.f32.mrb[44].mxu0 }
0x1072   : > { %v3142_v29 = vsel %vm1091_vm0, %v8308_v7, -inf  ;;  %v3130_v18 = vpop.f32.mrb[45].mxu0 }
0x1073   : > { %v3141_v20 = vsel %vm1091_vm0, %v3130_v18, -inf }
0x1074   : > { %v3144_v9 = vmax.f32 %v3141_v20, %v3142_v29 }
0x1076   : > { %v3145_v21 = vmax.f32 %v3143_v37, %v3144_v9 }
0x1078   : > { %v3146_v4 = vrot.slane %v3145_v21, 4 }
0x107a   : > { %v3147_v17 = vmax.f32 %v3145_v21, %v3146_v4 }
0x107c   : > { %v3148_v57 = vrot.slane %v3147_v17, 2 }
0x107e   : > { %v3149_v11 = vmax.f32 %v3147_v17, %v3148_v57 }
0x1080   : > { %v3150_v6 = vrot.slane %v3149_v11, 1 }
0x1082   : > { %v3151_v32 = vmax.f32 %v3149_v11, %v3150_v6 }
0x1084   : > { %v3152_v0 = vsub.f32 %v3120_v36, %v3151_v32  ;;  %v3153_v54 = vsub.f32 %v8305_v58, %v3151_v32  ;;  %v3154_v45 = vsub.f32 %v3130_v18, %v3151_v32  ;;  %v3155_v48 = vsub.f32 %v8308_v7, %v3151_v32 }
0x1086   : > { %v3156_v55 = vmul.f32 1.442695, %v3152_v0  ;;  %v3158_v33 = vmul.f32 1.442695, %v3153_v54  ;;  %v3160_v34 = vmul.f32 1.442695, %v3154_v45 }
0x1087   : > { %v3162_v24 = vmul.f32 1.442695, %v3155_v48 }
0x1088   : > { %9162 = vpow2.f32 %v3156_v55 }
0x1089   : > { %9164 = vpow2.f32 %v3158_v33 }
0x108a   : > { %9166 = vpow2.f32 %v3160_v34 }
0x108b   : > { %9168 = vpow2.f32 %v3162_v24 }
0x1092   : > { %v9163_v59 = vpop.eup %9162 }
0x1093   : > { %v9165_v8 = vpop.eup %9164  ;;  %v3164_v22 = vsel %vm1091_vm0, %v9163_v59, 0.0 }
0x1094   : > { %v9167_v16 = vpop.eup %9166  ;;  %v3165_v56 = vsel %vm1091_vm0, %v9165_v8, 0.0 }
0x1095   : > { %v9169_v2 = vpop.eup %9168  ;;  %v3166_v46 = vadd.f32 %v3165_v56, %v3164_v22  ;;  %v3167_v35 = vsel %vm1091_vm0, %v9167_v16, 0.0 }
0x1096   : > { %v3169_v25 = vsel %vm1091_vm0, %v9169_v2, 0.0 }
0x1097   : > { %v3168_v23 = vadd.f32 %v3167_v35, %v3166_v46 }
0x1099   : > { %v3170_v41 = vadd.f32 %v3169_v25, %v3168_v23 }
0x109b   : > { %v3171_v1 = vrot.slane %v3170_v41, 4 }
0x109d   : > { %v3172_v13 = vadd.f32 %v3171_v1, %v3170_v41 }
0x109f   : > { %v3173_v58 = vrot.slane %v3172_v13, 2 }
0x10a1   : > { %v3174_v61 = vadd.f32 %v3173_v58, %v3172_v13 }
0x10a3   : > { %v3175_v36 = vrot.slane %v3174_v61, 1 }
0x10a5   : > { %v3176_v28 = vadd.f32 %v3175_v36, %v3174_v61 }
0x10a7   : > { %9170 = vrcp.f32 %v3176_v28 }
0x10b1   : > { %v9171_v37 = vpop.eup %9170 }
0x10b2   : > { %v3178_v7 = vmul.f32 %v9171_v37, %v9163_v59  ;;  %v3179_v29 = vmul.f32 %v9171_v37, %v9165_v8  ;;  %v3180_v18 = vmul.f32 %v9171_v37, %v9167_v16  ;;  %v3181_v20 = vmul.f32 %v9171_v37, %v9169_v2  ;;  %v10187_v37 = vld [vmem:[%s11134_s25] sm:$0xff] }
0x10b4   : > { %v3327_v9 = vmul.f32 %v9896_v50, %v3178_v7  ;;  %v3186_v21 = vmul.f32 %v3178_v7, %v9939_v12  ;;  %v3328_v4 = vmul.f32 %v9902_v47, %v3179_v29  ;;  %v3187_v17 = vmul.f32 %v3179_v29, %v9945_v38  ;;  %v3653_v38 = vpop.trf.xlu0 }
0x10b5   : > { %v3329_v57 = vmul.f32 %v9908_v31, %v3180_v18  ;;  %v3188_v11 = vmul.f32 %v3180_v18, %v9951_v10  ;;  %v3330_v6 = vmul.f32 %v9914_v5, %v3181_v20  ;;  %v3189_v50 = vmul.f32 %v3181_v20, %v9962_v52 }
0x10b6   : > { %3331 = vxpose.xlu1.b32.start [1/4] (short) (narrow) %v3327_v9, 32  ;;  %3190 = vxpose.xlu0.b32.start [1/4] (short) (narrow) %v3186_v21, 32  ;;  %v3484_v59 = vmul.f32 %v9956_v49, %v3178_v7  ;;  %v3485_v8 = vmul.f32 %v9968_v30, %v3179_v29  ;;  %v3486_v22 = vmul.f32 %v9975_v3, %v3180_v18 }
0x10b7   : > { %v3487_v16 = vmul.f32 %v9981_v53, %v3181_v20  ;;  %v11157_v49 = vpack.c.bf16 %v9675_v39, %v9677_v40  ;;  %v11158_v3 = vpack.c.bf16 %v9681_v42, %v9683_v43  ;;  %v10167_v40 = vld [vmem:[%s11136_s24] sm:$0xff] }
0x10b8   : > { %v3654_v10 = vpop.trf.xlu0 }
0x10ba   : > { %3332 = vxpose.xlu1.b32.cont [2/4] (short) (narrow) %v3328_v4, 32  ;;  %3191 = vxpose.xlu0.b32.cont [2/4] (short) (narrow) %v3187_v17, 32  ;;  %v10193_v4 = vld [vmem:[%s11135_s27] sm:$0xff] }
0x10be   : > { %3333 = vxpose.xlu1.b32.cont [3/4] (short) (narrow) %v3329_v57, 32  ;;  %3192 = vxpose.xlu0.b32.cont [3/4] (short) (narrow) %v3188_v11, 32 }
0x10c2   : > { %3334 = vxpose.xlu1.b32.end [4/4] (short) (narrow) %v3330_v6, 32  ;;  %3193 = vxpose.xlu0.b32.end [4/4] (short) (narrow) %v3189_v50, 32 }
0x1136   : > { %v3347_v12 = vpop.trf.xlu1  ;;  %v3206_v55 = vpop.trf.xlu0 }
0x1137   : > { %8331 = vmatprep.mubr.msk.f32.mxu1 %vm1091_vm0, %v3347_v12  ;;  %8317 = vmatprep.mubr.msk.f32.mxu0 %vm1091_vm0, %v3206_v55 }
0x113a   : > { %v3348_v47 = vpop.trf.xlu1  ;;  %v3207_v33 = vpop.trf.xlu0 }
0x113b   : > { %8332 = vmatmul.mubr.msk.f32.vlgmr.msra.gmra.mrb[46].mxu1 %vm1091_vm0, %v3348_v47  ;;  %8318 = vmatmul.mubr.msk.f32.vlgmr.msra.gmra.mrb[46].mxu0 %vm1091_vm0, %v3207_v33 }
0x113c   : > { %8352 = vmatpush3.xpose.msk.msra.mxu1 %vm1091_vm0, %v10081_v15  ;;  %8854 = vmatpush3.bf16.msra.mxu0 %v10048_v60 }
0x113d   : > { %8367 = vmatprep.subr.mxu1 %v11143_v51  ;;  %8856 = vmatprep.subr.bf16.mxu0 %v10069_v19 }
0x113e   : > { %v3349_v31 = vpop.trf.xlu1  ;;  %v3208_v34 = vpop.trf.xlu0 }
0x113f   : > { %8334 = vmatprep.mubr.msk.f32.mxu1 %vm1091_vm0, %v3349_v31  ;;  %8320 = vmatprep.mubr.msk.f32.mxu0 %vm1091_vm0, %v3208_v34 }
0x1140   : > { %8858 = vmatpush3.bf16.msra.mxu0 %v10069_v19 }
0x1141   : > { %8859 = vmatprep.subr.bf16.mxu0 %v11148_v14 }
0x1142   : > { %v3350_v5 = vpop.trf.xlu1  ;;  %v3209_v24 = vpop.trf.xlu0 }
0x1143   : > { %8335 = vmatmul.mubr.msk.f32.gmra.mrb[48].mxu1 %vm1091_vm0, %v3350_v5  ;;  %8321 = vmatmul.mubr.msk.f32.gmra.mrb[48].mxu0 %vm1091_vm0, %v3209_v24 }
0x1144   : > { %8353 = vmatprep.mubr.msk.f32.mxu1 %vm1091_vm0, %v3653_v38 }
0x1147   : > { %8354 = vmatmul.mubr.msk.f32.vlgmr.msra.gmra.mrb[50].mxu1 %vm1091_vm0, %v3654_v10 }
0x1148   : > { %8369 = vmatprep.mubr.msk.f32.mxu1 %vm9360_vm2, %v11143_v51 }
0x120e   : > { %v10127_v52 = vpop.f32.mrb[46].mxu1  ;;  %v8319_v42 = vpop.f32.mrb[46].mxu0 }
0x120f   : > { %v10129_v32 = vpop.f32.mrb[47].mxu1  ;;  %3320 = vst.msk [vmem:[#allocation2 + $0x28] sm:$0xff] %vm718_vm1, %v8319_v42  ;;  %v3300_v43 = vpop.f32.mrb[47].mxu0  ;;  %v10223_v42 = vld [vmem:[%s9545_s1 + $0x60] sm:$0xff] }
0x1210   : > { %3319 = vst.msk [vmem:[#allocation2 + $0x20] sm:$0xff] %vm718_vm1, %v3300_v43  ;;  %v10227_v43 = vld [vmem:[%s9545_s1 + $0x68] sm:$0xff] }
0x1216   : > { %v10131_v0 = vpop.f32.mrb[48].mxu1  ;;  %v8322_v41 = vpop.f32.mrb[48].mxu0 }
0x1217   : > { %v10133_v54 = vpop.f32.mrb[49].mxu1  ;;  %3322 = vst.msk [vmem:[#allocation2 + $0x38] sm:$0xff] %vm718_vm1, %v8322_v41  ;;  %v3310_v1 = vpop.f32.mrb[49].mxu0  ;;  %v10231_v41 = vld [vmem:[%s9545_s1 + $0x70] sm:$0xff] }
0x1218   : > { %3321 = vst.msk [vmem:[#allocation2 + $0x30] sm:$0xff] %vm718_vm1, %v3310_v1  ;;  %v10235_v1 = vld [vmem:[%s9545_s1 + $0x78] sm:$0xff] }
0x121a   : > { %v8355_v45 = vpop.f32.mrb[50].mxu1 }
0x121b   : > { %3759 = vperm.xlu1 %9094, %v8355_v45   ;;  %v3741_v48 = vpop.f32.mrb[51].mxu1 }
0x121f   : > { %3752 = vperm.xlu1 %9094, %v3741_v48  }
0x1248   : > { %3488 = vxpose.xlu1.b32.start [1/4] (short) (narrow) %v3484_v59, 32 }
0x124c   : > { %3489 = vxpose.xlu1.b32.cont [2/4] (short) (narrow) %v3485_v8, 32 }
0x1250   : > { %3490 = vxpose.xlu1.b32.cont [3/4] (short) (narrow) %v3486_v22, 32 }
0x1254   : > { %3491 = vxpose.xlu1.b32.end [4/4] (short) (narrow) %v3487_v16, 32  ;;  %v9276_v16 = vld [vmem:[%s9545_s1 + $0x40] sm:$0xff] }
0x129a   : > { %v3760_v56 = vpop.permute.xlu1 %3759 }
0x129b   : > { %v3762_v25 = vmul.f32 %v3760_v56, %v9739_v27  ;;  %v11159_v56 = vld [vmem:[#allocation16_spill] sm:$0xff] }
0x129e   : > { %v3753_v2 = vpop.permute.xlu1 %3752 }
0x129f   : > { %v3755_v53 = vmul.f32 %v3753_v2, %v9737_v26  ;;  %v11160_v2 = vld [vmem:[#allocation15_spill] sm:$0xff] }
0x12a1   : > { %v3763_v39 = vadd.f32 %v3762_v25, %v3755_v53  ;;  %v9277_v25 = vld [vmem:[%s9545_s1 + $0x48] sm:$0xff] }
0x12c8   : > { %v3504_v46 = vpop.trf.xlu1 }
0x12c9   : > { %8345 = vmatprep.mubr.msk.f32.mxu0 %vm1091_vm0, %v3504_v46 }
0x12cc   : > { %v3505_v35 = vpop.trf.xlu1 }
0x12cd   : > { %8346 = vmatmul.mubr.msk.f32.vlgmr.msra.gmra.mrb[50].mxu0 %vm1091_vm0, %v3505_v35 }
0x12ce   : > { %8861 = vmatpush3.bf16.msra.mxu0 %v11157_v49 }
0x12cf   : > { %8862 = vmatprep.subr.bf16.mxu0 %v11148_v14 }
0x12d0   : > { %v3506_v30 = vpop.trf.xlu1 }
0x12d1   : > { %8348 = vmatprep.mubr.msk.f32.mxu0 %vm1091_vm0, %v3506_v30 }
0x12d2   : > { %8864 = vmatpush3.bf16.msra.mxu0 %v11158_v3 }
0x12d3   : > { %8380 = vmatprep.subr.mxu0 %v11143_v51 }
0x12d4   : > { %v3507_v23 = vpop.trf.xlu1 }
0x12d5   : > { %8349 = vmatmul.mubr.msk.f32.gmra.mrb[52].mxu0 %vm1091_vm0, %v3507_v23 }
0x12d6   : > { %8364 = vmatprep.mubr.msk.f32.mxu0 %vm9360_vm2, %v11143_v51 }
0x12d9   : > { %8365 = vmatmul.mubr.msk.f32.vlgmr.msra.gmra.mrb[54].mxu0 %vm1091_vm0, %v3763_v39  ;;  %v10217_v39 = vpack.c.bf16 %v9277_v25, %v9276_v16 }
0x12da   : > { %8381 = vmatpush3.msra.mxu0 %v10167_v40  ;;  %8382 = vmatprep.mubr.msk.f32.mxu0 %vm9360_vm2, %v11143_v51 }
0x12db   : > { %11161 = vst [vmem:[#allocation16_spill] sm:$0xff] %v10217_v39 }
0x13a0   : > { %v10176_v13 = vpop.f32.mrb[50].mxu0 }
0x13a1   : > { %v10178_v58 = vpop.f32.mrb[51].mxu0 }
0x13a8   : > { %v10180_v61 = vpop.f32.mrb[52].mxu0 }
0x13a9   : > { %v10182_v36 = vpop.f32.mrb[53].mxu0 }
0x13ac   : > { %v3833_v28 = vpop.f32.mrb[54].mxu0 }
0x13ad   : > { %v3834_v7 = vadd.f32 %v10187_v37, %v3833_v28  ;;  %v8366_v29 = vpop.f32.mrb[55].mxu0 }
0x13af   : > { %v7519_v18 = vmul.f32 -1.442695, %v3834_v7  ;;  %v10241_v7 = vld [vmem:[%s11140_s7] sm:$0xff] }
0x13b1   : > { %9172 = vpow2.f32 %v7519_v18  ;;  %v10247_v18 = vld [vmem:[%s11140_s7 + $0x8] sm:$0xff] }
0x13bb   : > { %v9173_v20 = vpop.eup %9172 }
0x13bc   : > { %v3840_v9 = vadd.f32 1.0, %v9173_v20 }
0x13be   : > { %9174 = vrcp.f32 %v3840_v9 }
0x13c8   : > { %v9175_v21 = vpop.eup %9174 }
0x13c9   : > { %8368 = vmatpush3.msra.mxu1 %v9175_v21  ;;  %v9284_v21 = vld [vmem:[%s9545_s1 + $0x50] sm:$0xff] }
0x13ca   : > { %8370 = vmatmul.mubr.msk.f32.vlgmr.msra.gmra.mrb[52].mxu1 %vm1277_vm3, %v10193_v4 }
0x13cb   : > { %8374 = vmatprep.mubr.msk.f32.mxu1 %vm1277_vm3, %v9720_v63 }
0x149d   : > { %v3909_v17 = vpop.f32.mrb[52].mxu1 }
0x149e   : > { %v3913_v57 = vsel %vm1277_vm3, %v3909_v17, -inf  ;;  %v8371_v11 = vpop.f32.mrb[53].mxu1 }
0x149f   : > { %v3914_v6 = vrot.slane %v3913_v57, 4 }
0x14a1   : > { %v3915_v50 = vmax.f32 %v3913_v57, %v3914_v6  ;;  %v10258_v57 = vld [vmem:[%s11060_s10] sm:$0xff] }
0x14a3   : > { %v3916_v12 = vrot.slane %v3915_v50, 2 }
0x14a5   : > { %v3917_v47 = vmax.f32 %v3915_v50, %v3916_v12 }
0x14a7   : > { %v3918_v31 = vrot.slane %v3917_v47, 1 }
0x14a9   : > { %v3919_v38 = vmax.f32 %v3917_v47, %v3918_v31 }
0x14ab   : > { %v3920_v5 = vsub.f32 %v3909_v17, %v3919_v38  ;;  %v9285_v17 = vld [vmem:[%s9545_s1 + $0x58] sm:$0xff]  ;;  %v10276_v38 = vld [vmem:[%s11142_s9 + $0x8] sm:$0xff]  ;;  %s11181_s1 = smov 16  }
0x14ac   : > { %v10262_v6 = vpack.c.bf16 %v9285_v17, %v9284_v21 }
0x14ad   : > { %v3921_v10 = vmul.f32 1.442695, %v3920_v5 }
0x14ae   : > { %11162 = vst [vmem:[#allocation15_spill] sm:$0xff] %v10262_v6 }
0x14af   : > { %9176 = vpow2.f32 %v3921_v10 }
0x14b9   : > { %v9177_v45 = vpop.eup %9176 }
0x14ba   : > { %v3923_v48 = vsel %vm1277_vm3, %v9177_v45, 0.0 }
0x14bb   : > { %v3924_v55 = vrot.slane %v3923_v48, 4 }
0x14bd   : > { %v3925_v33 = vadd.f32 %v3924_v55, %v3923_v48 }
0x14bf   : > { %v3926_v63 = vrot.slane %v3925_v33, 2 }
0x14c1   : > { %v3927_v34 = vadd.f32 %v3926_v63, %v3925_v33 }
0x14c3   : > { %v3928_v24 = vrot.slane %v3927_v34, 1 }
0x14c5   : > { %v3929_v59 = vadd.f32 %v3928_v24, %v3927_v34  ;;  %v10288_v34 = vld [vmem:[%s11142_s9 + $0x18] sm:$0xff] }
0x14c7   : > { %9178 = vrcp.f32 %v3929_v59 }
0x14d1   : > { %v9179_v8 = vpop.eup %9178 }
0x14d2   : > { %v3931_v22 = vmul.f32 %v9179_v8, %v9177_v45  ;;  %v10282_v45 = vld [vmem:[%s11142_s9] sm:$0xff]  ;;  %v10294_v8 = vld [vmem:[%s11142_s9 + $0x10] sm:$0xff]  ;;  %s11008_s9 = scalar_lea.hbm %s11072_s22, %s7687_s29 }
0x14d4   : > { %8372 = vmatprep.subr.mxu1 %v3931_v22  ;;  %8383 = vmatmul.mubr.msk.f32.vlgmr.msra.gmra.mrb[56].mxu0 %vm1277_vm3, %v3931_v22 }
0x14d5   : > { %8373 = vmatpush3.msra.mxu1 %v3931_v22  ;;  %8389 = vmatprep.mubr.msk.f32.mxu0 %vm718_vm1, %v9276_v16 }
0x14d6   : > { %8375 = vmatmul.mubr.msk.f32.vlgmr.msra.gmra.mrb[54].mxu1 %vm1277_vm3, %v9718_v62 }
0x14d7   : > { %8377 = vmatprep.mubr.msk.f32.mxu1 %vm1277_vm3, %v11159_v56 }
0x14da   : > { %8378 = vmatmul.mubr.msk.f32.gmra.mrb[56].mxu1 %vm1277_vm3, %v11160_v2 }
0x15a7   : > { %v4098_v46 = vpop.f32.mrb[56].mxu0 }
0x15a8   : > { %4104 = vperm.xlu0 %9095, %v4098_v46   ;;  %v8384_v35 = vpop.f32.mrb[57].mxu0 }
0x15a9   : > { %v8376_v49 = vpop.f32.mrb[54].mxu1 }
0x15aa   : > { %v4010_v30 = vpop.f32.mrb[55].mxu1 }
0x15ab   : > { %v8869_v3 = vpack.c.bf16 %v8376_v49, %v4010_v30 }
0x15ad   : > { %v8379_v53 = vpop.f32.mrb[56].mxu1  ;;  %8871 = vmatprep.subr.msk.bf16.mxu1 %vm9780_vm4, %v8869_v3 }
0x15ae   : > { %v4020_v62 = vpop.f32.mrb[57].mxu1  ;;  %8874 = vmatpush3.bf16.xpose.msk.msra.mxu1 %vm9780_vm4, %v8869_v3 }
0x15af   : > { %v8875_v23 = vpack.c.bf16 %v8379_v53, %v4020_v62 }
0x15b1   : > { %8877 = vmatprep.subr.msk.bf16.mxu1 %vm9780_vm4, %v8875_v23 }
0x15b6   : > { %8880 = vmatpush3.bf16.xpose.msk.msra.mxu1 %vm9780_vm4, %v8875_v23 }
0x15b7   : > { %8898 = vmatprep.subr.bf16.mxu1 %v10217_v39 }
0x15c6   : > { %4910 = vxpose.xlu0.b32.start [1/4] (short) (narrow) %v10223_v42, 16 }
0x15ca   : > { %4911 = vxpose.xlu0.b32.cont [2/4] (short) (narrow) %v10227_v43, 16 }
0x15ce   : > { %4912 = vxpose.xlu0.b32.cont [3/4] (short) (narrow) %v10231_v41, 16 }
0x15d2   : > { %4913 = vxpose.xlu0.b32.end [4/4] (short) (narrow) %v10235_v1, 16 }
0x1627   : > { %v4105_v28 = vpop.permute.xlu0 %4104 }
0x1628   : > { %v4107_v29 = vmul.f32 %v10241_v7, %v4105_v28  ;;  %v4108_v20 = vmul.f32 %v10247_v18, %v4105_v28 }
0x162a   : > { %v8865_v9 = vpack.c.bf16 %v4108_v20, %v4107_v29 }
0x162c   : > { %8866 = vmatprep.subr.bf16.mxu0 %v8865_v9 }
0x162d   : > { %8868 = vmatpush3.bf16.msra.mxu0 %v8865_v9 }
0x1630   : > { %8390 = vmatmul.mubr.msk.f32.vlgmr.msra.gmra.mrb[58].mxu0 %vm718_vm1, %v9277_v25 }
0x1631   : > { %8392 = vmatprep.mubr.msk.f32.mxu0 %vm718_vm1, %v9284_v21  ;;  %v10301_v21 = vld [vmem:[%s11060_s10 + $0x8] sm:$0xff] }
0x1634   : > { %8393 = vmatmul.mubr.msk.f32.gmra.mrb[60].mxu0 %vm718_vm1, %v9285_v17  ;;  %v10308_v17 = vld [vmem:[%s11060_s10 + $0x10] sm:$0xff] }
0x1635   : > { %8417 = vmatprep.mubr.msk.f32.mxu0 %vm1091_vm0, %v10258_v57 }
0x1703   : > { %v8391_v11 = vpop.f32.mrb[58].mxu0 }
0x1704   : > { %v4175_v50 = vpop.f32.mrb[59].mxu0 }
0x1705   : > { %8403 = vmatprep.mubr.msk.f32.mxu1 %vm1277_vm3, %v4175_v50 }
0x1706   : > { %8404 = vmatmul.mubr.msk.f32.vlgmr.msra.gmra.mrb[58].mxu1 %vm1277_vm3, %v8391_v11  ;;  %v10317_v11 = vld [vmem:[%s11060_s10 + $0x18] sm:$0xff] }
0x1707   : > { %v8394_v12 = vpop.f32.mrb[60].mxu0  ;;  %8900 = vmatpush3.bf16.msra.mxu1 %v10217_v39 }
0x1708   : > { %v4185_v47 = vpop.f32.mrb[61].mxu0  ;;  %8902 = vmatprep.subr.bf16.mxu1 %v10262_v6 }
0x1709   : > { %8406 = vmatprep.mubr.msk.f32.mxu1 %vm1277_vm3, %v4185_v47 }
0x170a   : > { %8407 = vmatmul.mubr.msk.f32.gmra.mrb[60].mxu1 %vm1277_vm3, %v8394_v12 }
0x170b   : > { %8904 = vmatpush3.bf16.msra.mxu1 %v10262_v6 }
0x170c   : > { %8465 = vmatprep.subr.msk.mxu1 %vm1091_vm0, %v10081_v15 }
0x17d9   : > { %v8405_v31 = vpop.f32.mrb[58].mxu1 }
0x17da   : > { %v4290_v5 = vadd.f32 %v10276_v38, %v8405_v31  ;;  %v4284_v10 = vpop.f32.mrb[59].mxu1 }
0x17db   : > { %v4285_v48 = vadd.f32 %v10282_v45, %v4284_v10 }
0x17dc   : > { %v7539_v55 = vmul.f32 -1.442695, %v4290_v5 }
0x17dd   : > { %v7538_v33 = vmul.f32 -1.442695, %v4285_v48  ;;  %v8408_v63 = vpop.f32.mrb[60].mxu1 }
0x17de   : > { %9180 = vpow2.f32 %v7539_v55  ;;  %v4300_v24 = vadd.f32 %v10288_v34, %v8408_v63  ;;  %v4294_v59 = vpop.f32.mrb[61].mxu1 }
0x17df   : > { %9182 = vpow2.f32 %v7538_v33  ;;  %v4295_v22 = vadd.f32 %v10294_v8, %v4294_v59 }
0x17e0   : > { %v7541_v16 = vmul.f32 -1.442695, %v4300_v24 }
0x17e1   : > { %v7540_v56 = vmul.f32 -1.442695, %v4295_v22 }
0x17e2   : > { %9184 = vpow2.f32 %v7541_v16 }
0x17e3   : > { %9186 = vpow2.f32 %v7540_v56 }
0x17e8   : > { %v9181_v2 = vpop.eup %9180 }
0x17e9   : > { %v9183_v46 = vpop.eup %9182  ;;  %v4316_v35 = vadd.f32 1.0, %v9181_v2 }
0x17ea   : > { %v4315_v49 = vadd.f32 1.0, %v9183_v46 }
0x17eb   : > { %9188 = vrcp.f32 %v4316_v35 }
0x17ec   : > { %v9185_v30 = vpop.eup %9184  ;;  %9190 = vrcp.f32 %v4315_v49 }
0x17ed   : > { %v9187_v3 = vpop.eup %9186  ;;  %v4318_v53 = vadd.f32 1.0, %v9185_v30 }
0x17ee   : > { %v4317_v62 = vadd.f32 1.0, %v9187_v3 }
0x17ef   : > { %9192 = vrcp.f32 %v4318_v53 }
0x17f0   : > { %9194 = vrcp.f32 %v4317_v62 }
0x17f5   : > { %v9189_v23 = vpop.eup %9188 }
0x17f6   : > { %v9191_v25 = vpop.eup %9190 }
0x17f7   : > { %v8881_v28 = vpack.c.bf16 %v9189_v23, %v9191_v25 }
0x17f9   : > { %v9193_v29 = vpop.eup %9192  ;;  %8882 = vmatprep.subr.bf16.mxu0 %v8881_v28 }
0x17fa   : > { %v9195_v20 = vpop.eup %9194  ;;  %8884 = vmatpush3.bf16.msra.mxu0 %v8881_v28 }
0x17fb   : > { %v8885_v9 = vpack.c.bf16 %v9193_v29, %v9195_v20 }
0x17fd   : > { %8886 = vmatprep.subr.bf16.mxu0 %v8885_v9 }
0x17fe   : > { %8888 = vmatpush3.bf16.msra.mxu0 %v8885_v9 }
0x17ff   : > { %8890 = vmatprep.subr.bf16.mxu0 %v10217_v39 }
0x1801   : > { %8418 = vmatmul.mubr.msk.f32.vlgmr.msra.gmra.mrb[62].mxu0 %vm1091_vm0, %v10301_v21 }
0x1802   : > { %8420 = vmatprep.mubr.msk.f32.mxu0 %vm1091_vm0, %v10308_v17  ;;  %8892 = vmatpush3.bf16.msra.mxu0 %v10217_v39 }
0x1803   : > { %8894 = vmatprep.subr.bf16.mxu0 %v10262_v6 }
0x1805   : > { %8421 = vmatmul.mubr.msk.f32.gmra.mrb[64].mxu0 %vm1091_vm0, %v10317_v11 }
0x1806   : > { %8896 = vmatpush3.bf16.msra.mxu0 %v10262_v6 }
0x1807   : > { %8906 = vmatprep.subr.bf16.mxu0 %v10217_v39 }
0x18d4   : > { %v8419_v50 = vpop.f32.mrb[62].mxu0 }
0x18d5   : > { %v4413_v12 = vsel %vm1091_vm0, %v8419_v50, -inf  ;;  %v4393_v47 = vpop.f32.mrb[63].mxu0 }
0x18d6   : > { %v4412_v31 = vsel %vm1091_vm0, %v4393_v47, -inf }
0x18d7   : > { %v4416_v5 = vmax.f32 %v4412_v31, %v4413_v12 }
0x18d8   : > { %v8422_v10 = vpop.f32.mrb[64].mxu0 }
0x18d9   : > { %v4415_v48 = vsel %vm1091_vm0, %v8422_v10, -inf  ;;  %v4403_v55 = vpop.f32.mrb[65].mxu0 }
0x18da   : > { %v4414_v33 = vsel %vm1091_vm0, %v4403_v55, -inf }
0x18db   : > { %v4417_v63 = vmax.f32 %v4414_v33, %v4415_v48 }
0x18dd   : > { %v4418_v24 = vmax.f32 %v4416_v5, %v4417_v63 }
0x18df   : > { %v4419_v59 = vrot.slane %v4418_v24, 4 }
0x18e1   : > { %v4420_v22 = vmax.f32 %v4418_v24, %v4419_v59 }
0x18e3   : > { %v4421_v16 = vrot.slane %v4420_v22, 2 }
0x18e5   : > { %v4422_v56 = vmax.f32 %v4420_v22, %v4421_v16 }
0x18e7   : > { %v4423_v2 = vrot.slane %v4422_v56, 1 }
0x18e9   : > { %v4424_v46 = vmax.f32 %v4422_v56, %v4423_v2  ;;  %v10334_v56 = vld [vmem:[%s11061_s11 + $0x20] sm:$0xff] }
0x18eb   : > { %v4425_v35 = vsub.f32 %v4393_v47, %v4424_v46  ;;  %v4426_v49 = vsub.f32 %v8419_v50, %v4424_v46  ;;  %v4427_v30 = vsub.f32 %v4403_v55, %v4424_v46  ;;  %v4428_v3 = vsub.f32 %v8422_v10, %v4424_v46 }
0x18ed   : > { %v4429_v53 = vmul.f32 1.442695, %v4425_v35  ;;  %v4431_v62 = vmul.f32 1.442695, %v4426_v49  ;;  %v4433_v23 = vmul.f32 1.442695, %v4427_v30 }
0x18ee   : > { %v4435_v25 = vmul.f32 1.442695, %v4428_v3  ;;  %v10340_v3 = vld [vmem:[%s11061_s11 + $0x28] sm:$0xff] }
0x18ef   : > { %9196 = vpow2.f32 %v4429_v53 }
0x18f0   : > { %9198 = vpow2.f32 %v4431_v62  ;;  %v10346_v62 = vld [vmem:[%s11061_s11 + $0x30] sm:$0xff] }
0x18f1   : > { %9200 = vpow2.f32 %v4433_v23 }
0x18f2   : > { %9202 = vpow2.f32 %v4435_v25  ;;  %v10352_v25 = vld [vmem:[%s11061_s11 + $0x38] sm:$0xff] }
0x18f9   : > { %v9197_v28 = vpop.eup %9196 }
0x18fa   : > { %v9199_v29 = vpop.eup %9198  ;;  %v4437_v20 = vsel %vm1091_vm0, %v9197_v28, 0.0 }
0x18fb   : > { %v9201_v9 = vpop.eup %9200  ;;  %v4438_v12 = vsel %vm1091_vm0, %v9199_v29, 0.0 }
0x18fc   : > { %v9203_v31 = vpop.eup %9202  ;;  %v4439_v47 = vadd.f32 %v4438_v12, %v4437_v20  ;;  %v4440_v50 = vsel %vm1091_vm0, %v9201_v9, 0.0  ;;  %v4926_v12 = vpop.trf.xlu0 }
0x18fd   : > { %v4442_v10 = vsel %vm1091_vm0, %v9203_v31, 0.0 }
0x18fe   : > { %v4441_v5 = vadd.f32 %v4440_v50, %v4439_v47 }
0x1900   : > { %v4443_v48 = vadd.f32 %v4442_v10, %v4441_v5  ;;  %v4927_v47 = vpop.trf.xlu0 }
0x1902   : > { %v4444_v55 = vrot.slane %v4443_v48, 4 }
0x1904   : > { %v4445_v33 = vadd.f32 %v4444_v55, %v4443_v48 }
0x1906   : > { %v4446_v63 = vrot.slane %v4445_v33, 2 }
0x1908   : > { %v4447_v24 = vadd.f32 %v4446_v63, %v4445_v33  ;;  %v10377_v33 = vld [vmem:[%s11061_s11 + $0x40] sm:$0xff] }
0x190a   : > { %v4448_v59 = vrot.slane %v4447_v24, 1 }
0x190c   : > { %v4449_v22 = vadd.f32 %v4448_v59, %v4447_v24  ;;  %v10383_v24 = vld [vmem:[%s11061_s11 + $0x48] sm:$0xff] }
0x190e   : > { %9204 = vrcp.f32 %v4449_v22  ;;  %v10389_v22 = vld [vmem:[%s11061_s11 + $0x50] sm:$0xff] }
0x1918   : > { %v9205_v16 = vpop.eup %9204 }
0x1919   : > { %v4451_v2 = vmul.f32 %v9205_v16, %v9197_v28  ;;  %v4452_v46 = vmul.f32 %v9205_v16, %v9199_v29  ;;  %v4453_v35 = vmul.f32 %v9205_v16, %v9201_v9  ;;  %v4454_v49 = vmul.f32 %v9205_v16, %v9203_v31 }
0x191b   : > { %v4600_v30 = vmul.f32 %v10334_v56, %v4451_v2  ;;  %v4601_v53 = vmul.f32 %v10340_v3, %v4452_v46  ;;  %v4602_v23 = vmul.f32 %v10346_v62, %v4453_v35  ;;  %v4603_v28 = vmul.f32 %v10352_v25, %v4454_v49 }
0x191c   : > { %v4757_v63 = vmul.f32 %v10377_v33, %v4451_v2  ;;  %v4758_v59 = vmul.f32 %v10383_v24, %v4452_v46  ;;  %v4759_v16 = vmul.f32 %v10389_v22, %v4453_v35 }
0x191d   : > { %4604 = vxpose.xlu1.b32.start [1/4] (short) (narrow) %v4600_v30, 32  ;;  %v10395_v30 = vld [vmem:[%s11061_s11 + $0x58] sm:$0xff] }
0x1921   : > { %4605 = vxpose.xlu1.b32.cont [2/4] (short) (narrow) %v4601_v53, 32  ;;  %v10400_v53 = vld [vmem:[%s11061_s11] sm:$0xff] }
0x1925   : > { %4606 = vxpose.xlu1.b32.cont [3/4] (short) (narrow) %v4602_v23, 32  ;;  %v4760_v23 = vmul.f32 %v10395_v30, %v4454_v49 }
0x1929   : > { %4607 = vxpose.xlu1.b32.end [4/4] (short) (narrow) %v4603_v28, 32  ;;  %v4459_v28 = vmul.f32 %v10400_v53, %v4451_v2  ;;  %v10419_v2 = vld [vmem:[%s11061_s11 + $0x18] sm:$0xff] }
0x199d   : > { %v4620_v29 = vpop.trf.xlu1 }
0x199e   : > { %8445 = vmatprep.mubr.msk.f32.mxu1 %vm1091_vm0, %v4620_v29  ;;  %v10407_v29 = vld [vmem:[%s11061_s11 + $0x8] sm:$0xff] }
0x19a1   : > { %v4621_v20 = vpop.trf.xlu1 }
0x19a2   : > { %8446 = vmatmul.mubr.msk.f32.vlgmr.msra.gmra.mrb[62].mxu1 %vm1091_vm0, %v4621_v20  ;;  %v4460_v20 = vmul.f32 %v10407_v29, %v4452_v46 }
0x19a3   : > { %8466 = vmatpush3.xpose.msk.msra.mxu1 %vm1091_vm0, %v10081_v15 }
0x19a4   : > { %8481 = vmatprep.subr.mxu1 %v11143_v51 }
0x19a5   : > { %v4622_v9 = vpop.trf.xlu1 }
0x19a6   : > { %8448 = vmatprep.mubr.msk.f32.mxu1 %vm1091_vm0, %v4622_v9  ;;  %v10413_v9 = vld [vmem:[%s11061_s11 + $0x10] sm:$0xff] }
0x19a9   : > { %v4623_v31 = vpop.trf.xlu1 }
0x19aa   : > { %8449 = vmatmul.mubr.msk.f32.gmra.mrb[64].mxu1 %vm1091_vm0, %v4623_v31  ;;  %v4462_v31 = vmul.f32 %v10419_v2, %v4454_v49 }
0x19ab   : > { %8467 = vmatprep.mubr.msk.f32.mxu1 %vm1091_vm0, %v4926_v12  ;;  %v4461_v12 = vmul.f32 %v10413_v9, %v4453_v35 }
0x19ae   : > { %8468 = vmatmul.mubr.msk.f32.vlgmr.msra.gmra.mrb[66].mxu1 %vm1091_vm0, %v4927_v47 }
0x19af   : > { %8483 = vmatprep.mubr.msk.f32.mxu1 %vm9360_vm2, %v11143_v51 }
0x1a75   : > { %v10366_v50 = vpop.f32.mrb[62].mxu1 }
0x1a76   : > { %v10368_v15 = vpop.f32.mrb[63].mxu1 }
0x1a7d   : > { %v10370_v5 = vpop.f32.mrb[64].mxu1 }
0x1a7e   : > { %v10372_v10 = vpop.f32.mrb[65].mxu1 }
0x1a81   : > { %v8469_v48 = vpop.f32.mrb[66].mxu1 }
0x1a82   : > { %5032 = vperm.xlu0 %9095, %v8469_v48   ;;  %v5014_v55 = vpop.f32.mrb[67].mxu1 }
0x1a83   : > { %5025 = vperm.xlu1 %9094, %v5014_v55  }
0x1aa0   : > { %4761 = vxpose.xlu0.b32.start [1/4] (short) (narrow) %v4757_v63, 32 }
0x1aa4   : > { %4762 = vxpose.xlu0.b32.cont [2/4] (short) (narrow) %v4758_v59, 32 }
0x1aa8   : > { %4763 = vxpose.xlu0.b32.cont [3/4] (short) (narrow) %v4759_v16, 32 }
0x1aac   : > { %4764 = vxpose.xlu0.b32.end [4/4] (short) (narrow) %v4760_v23, 32  ;;  %4463 = vxpose.xlu1.b32.start [1/4] (short) (narrow) %v4459_v28, 32  ;;  %v11163_v23 = vld [vmem:[#allocation11_spill] sm:$0xff]  ;;  %v11164_v28 = vld [vmem:[#allocation12_spill] sm:$0xff] }
0x1ab0   : > { %4464 = vxpose.xlu1.b32.cont [2/4] (short) (narrow) %v4460_v20, 32  ;;  %v11165_v20 = vpack.c.bf16 %v11163_v23, %v11164_v28 }
0x1ab4   : > { %4465 = vxpose.xlu1.b32.cont [3/4] (short) (narrow) %v4461_v12, 32 }
0x1ab8   : > { %4466 = vxpose.xlu1.b32.end [4/4] (short) (narrow) %v4462_v31, 32 }
0x1b01   : > { %v5033_v47 = vpop.permute.xlu0 %5032 }
0x1b02   : > { %v5026_v48 = vpop.permute.xlu1 %5025  ;;  %v5035_v31 = vmul.f32 %v5033_v47, %v9739_v27 }
0x1b20   : > { %v4777_v55 = vpop.trf.xlu0 }
0x1b24   : > { %v4778_v35 = vpop.trf.xlu0 }
0x1b28   : > { %v4779_v16 = vpop.trf.xlu0 }
0x1b2c   : > { %v4479_v46 = vpop.trf.xlu1  ;;  %v4780_v12 = vpop.trf.xlu0 }
0x1b2d   : > { %8431 = vmatprep.mubr.msk.f32.mxu0 %vm1091_vm0, %v4479_v46  ;;  %v5028_v46 = vmul.f32 %v5026_v48, %v9737_v26 }
0x1b30   : > { %v4480_v63 = vpop.trf.xlu1 }
0x1b31   : > { %8432 = vmatmul.mubr.msk.f32.vlgmr.msra.gmra.mrb[66].mxu0 %vm1091_vm0, %v4480_v63  ;;  %v11166_v63 = vld [vmem:[#allocation13_spill] sm:$0xff] }
0x1b32   : > { %8908 = vmatpush3.bf16.msra.mxu0 %v10217_v39 }
0x1b33   : > { %8910 = vmatprep.subr.bf16.mxu0 %v10262_v6 }
0x1b34   : > { %v4481_v59 = vpop.trf.xlu1 }
0x1b35   : > { %8434 = vmatprep.mubr.msk.f32.mxu0 %vm1091_vm0, %v4481_v59  ;;  %v11167_v59 = vld [vmem:[#allocation14_spill] sm:$0xff] }
0x1b36   : > { %8912 = vmatpush3.bf16.msra.mxu0 %v10262_v6 }
0x1b37   : > { %8913 = vmatprep.subr.bf16.mxu0 %v11148_v14 }
0x1b38   : > { %v4482_v49 = vpop.trf.xlu1 }
0x1b39   : > { %8435 = vmatmul.mubr.msk.f32.gmra.mrb[68].mxu0 %vm1091_vm0, %v4482_v49 }
0x1b3a   : > { %8459 = vmatprep.mubr.msk.f32.mxu0 %vm1091_vm0, %v4777_v55  ;;  %v11168_v55 = vpack.c.bf16 %v11166_v63, %v11167_v59  ;;  %v11169_v59 = vld [vmem:[#allocation18_spill] sm:$0xff] }
0x1b3d   : > { %8460 = vmatmul.mubr.msk.f32.vlgmr.msra.gmra.mrb[70].mxu0 %vm1091_vm0, %v4778_v35  ;;  %v5036_v35 = vadd.f32 %v5035_v31, %v5028_v46 }
0x1b3e   : > { %8915 = vmatpush3.bf16.msra.mxu0 %v11165_v20  ;;  %8462 = vmatprep.mubr.msk.f32.mxu0 %vm1091_vm0, %v4779_v16 }
0x1b3f   : > { %8916 = vmatprep.subr.bf16.mxu0 %v11148_v14 }
0x1b41   : > { %8463 = vmatmul.mubr.msk.f32.gmra.mrb[72].mxu0 %vm1091_vm0, %v4780_v12 }
0x1b42   : > { %8918 = vmatpush3.bf16.msra.mxu0 %v11168_v55  ;;  %8478 = vmatprep.mubr.msk.f32.mxu0 %vm9360_vm2, %v11143_v51 }
0x1b43   : > { %8494 = vmatprep.subr.mxu0 %v11143_v51 }
0x1b45   : > { %8479 = vmatmul.mubr.msk.f32.vlgmr.msra.gmra.mrb[74].mxu0 %vm1091_vm0, %v5036_v35 }
0x1b46   : > { %8495 = vmatpush3.msra.mxu0 %v10167_v40  ;;  %8496 = vmatprep.mubr.msk.f32.mxu0 %vm9360_vm2, %v11143_v51 }
0x1c04   : > { %v8433_v26 = vpop.f32.mrb[66].mxu0 }
0x1c05   : > { %4593 = vst.msk [vmem:[#allocation2 + $0x48] sm:$0xff] %vm718_vm1, %v8433_v26  ;;  %v4573_v27 = vpop.f32.mrb[67].mxu0 }
0x1c06   : > { %4592 = vst.msk [vmem:[#allocation2 + $0x40] sm:$0xff] %vm718_vm1, %v4573_v27 }
0x1c0c   : > { %v8436_v14 = vpop.f32.mrb[68].mxu0 }
0x1c0d   : > { %4595 = vst.msk [vmem:[#allocation2 + $0x58] sm:$0xff] %vm718_vm1, %v8436_v14  ;;  %v4583_v47 = vpop.f32.mrb[69].mxu0 }
0x1c0e   : > { %4594 = vst.msk [vmem:[#allocation2 + $0x50] sm:$0xff] %vm718_vm1, %v4583_v47 }
0x1c10   : > { %v10454_v48 = vpop.f32.mrb[70].mxu0 }
0x1c11   : > { %v10456_v49 = vpop.f32.mrb[71].mxu0 }
0x1c14   : > { %v10458_v40 = vpop.f32.mrb[72].mxu0 }
0x1c15   : > { %v10460_v16 = vpop.f32.mrb[73].mxu0 }
0x1c18   : > { %v5106_v23 = vpop.f32.mrb[74].mxu0 }
0x1c19   : > { %v5107_v28 = vadd.f32 %v10187_v37, %v5106_v23  ;;  %v8480_v20 = vpop.f32.mrb[75].mxu0 }
0x1c1b   : > { %v7570_v12 = vmul.f32 -1.442695, %v5107_v28 }
0x1c1d   : > { %9206 = vpow2.f32 %v7570_v12 }
0x1c27   : > { %v9207_v31 = vpop.eup %9206 }
0x1c28   : > { %v5113_v46 = vadd.f32 1.0, %v9207_v31 }
0x1c2a   : > { %9208 = vrcp.f32 %v5113_v46 }
0x1c34   : > { %v9209_v63 = vpop.eup %9208 }
0x1c35   : > { %8482 = vmatpush3.msra.mxu1 %v9209_v63 }
0x1c36   : > { %8484 = vmatmul.mubr.msk.f32.vlgmr.msra.gmra.mrb[68].mxu1 %vm1277_vm3, %v10193_v4 }
0x1c37   : > { %8488 = vmatprep.mubr.msk.f32.mxu1 %vm1277_vm3, %v11169_v59 }
0x1d09   : > { %v5182_v55 = vpop.f32.mrb[68].mxu1 }
0x1d0a   : > { %v5186_v35 = vsel %vm1277_vm3, %v5182_v55, -inf  ;;  %v8485_v26 = vpop.f32.mrb[69].mxu1 }
0x1d0b   : > { %v5187_v27 = vrot.slane %v5186_v35, 4 }
0x1d0d   : > { %v5188_v37 = vmax.f32 %v5186_v35, %v5187_v27  ;;  %v11171_v35 = vld [vmem:[#allocation20_spill] sm:$0xff]  ;;  %v11172_v27 = vld [vmem:[#allocation19_spill] sm:$0xff] }
0x1d0f   : > { %v5189_v14 = vrot.slane %v5188_v37, 2 }
0x1d11   : > { %v5190_v47 = vmax.f32 %v5188_v37, %v5189_v14 }
0x1d13   : > { %v5191_v23 = vrot.slane %v5190_v47, 1 }
0x1d15   : > { %v5192_v28 = vmax.f32 %v5190_v47, %v5191_v23 }
0x1d17   : > { %v5193_v20 = vsub.f32 %v5182_v55, %v5192_v28  ;;  %v11170_v55 = vld [vmem:[#allocation17_spill] sm:$0xff]  ;;  %v10486_v28 = vpack.c.bf16 %v10227_v43, %v10223_v42 }
0x1d19   : > { %v5194_v12 = vmul.f32 1.442695, %v5193_v20 }
0x1d1b   : > { %9210 = vpow2.f32 %v5194_v12 }
0x1d25   : > { %v9211_v31 = vpop.eup %9210 }
0x1d26   : > { %v5196_v46 = vsel %vm1277_vm3, %v9211_v31, 0.0 }
0x1d27   : > { %v5197_v4 = vrot.slane %v5196_v46, 4 }
0x1d29   : > { %v5198_v63 = vadd.f32 %v5197_v4, %v5196_v46 }
0x1d2b   : > { %v5199_v6 = vrot.slane %v5198_v63, 2 }
0x1d2d   : > { %v5200_v59 = vadd.f32 %v5199_v6, %v5198_v63 }
0x1d2f   : > { %v5201_v39 = vrot.slane %v5200_v59, 1 }
0x1d31   : > { %v5202_v19 = vadd.f32 %v5201_v39, %v5200_v59 }
0x1d33   : > { %9212 = vrcp.f32 %v5202_v19 }
0x1d3d   : > { %v9213_v26 = vpop.eup %9212 }
0x1d3e   : > { %v5204_v60 = vmul.f32 %v9213_v26, %v9211_v31 }
0x1d40   : > { %8486 = vmatprep.subr.mxu1 %v5204_v60  ;;  %8497 = vmatmul.mubr.msk.f32.vlgmr.msra.gmra.mrb[76].mxu0 %vm1277_vm3, %v5204_v60 }
0x1d41   : > { %8487 = vmatpush3.msra.mxu1 %v5204_v60  ;;  %8503 = vmatprep.mubr.msk.f32.mxu0 %vm718_vm1, %v10223_v42 }
0x1d42   : > { %8489 = vmatmul.mubr.msk.f32.vlgmr.msra.gmra.mrb[70].mxu1 %vm1277_vm3, %v11170_v55 }
0x1d43   : > { %8491 = vmatprep.mubr.msk.f32.mxu1 %vm1277_vm3, %v11171_v35 }
0x1d46   : > { %8492 = vmatmul.mubr.msk.f32.gmra.mrb[72].mxu1 %vm1277_vm3, %v11172_v27 }
0x1e13   : > { %v5371_v39 = vpop.f32.mrb[76].mxu0 }
0x1e14   : > { %5377 = vperm.xlu1 %9094, %v5371_v39   ;;  %v8498_v19 = vpop.f32.mrb[77].mxu0 }
0x1e15   : > { %v8490_v6 = vpop.f32.mrb[70].mxu1 }
0x1e16   : > { %v5283_v37 = vpop.f32.mrb[71].mxu1 }
0x1e17   : > { %v8923_v14 = vpack.c.bf16 %v8490_v6, %v5283_v37 }
0x1e19   : > { %v8493_v47 = vpop.f32.mrb[72].mxu1  ;;  %8925 = vmatprep.subr.msk.bf16.mxu1 %vm9780_vm4, %v8923_v14 }
0x1e1a   : > { %v5293_v60 = vpop.f32.mrb[73].mxu1  ;;  %8928 = vmatpush3.bf16.xpose.msk.msra.mxu1 %vm9780_vm4, %v8923_v14 }
0x1e1b   : > { %v8929_v23 = vpack.c.bf16 %v8493_v47, %v5293_v60 }
0x1e1d   : > { %8931 = vmatprep.subr.msk.bf16.mxu1 %vm9780_vm4, %v8929_v23 }
0x1e22   : > { %8934 = vmatpush3.bf16.xpose.msk.msra.mxu1 %vm9780_vm4, %v8929_v23 }
0x1e23   : > { %8952 = vmatprep.subr.bf16.mxu1 %v10486_v28 }
0x1e93   : > { %v5378_v20 = vpop.permute.xlu1 %5377 }
0x1e94   : > { %v5380_v12 = vmul.f32 %v10241_v7, %v5378_v20  ;;  %v5381_v31 = vmul.f32 %v10247_v18, %v5378_v20  ;;  %v10504_v7 = vpack.c.bf16 %v10235_v1, %v10231_v41 }
0x1e96   : > { %v8919_v46 = vpack.c.bf16 %v5381_v31, %v5380_v12 }
0x1e98   : > { %8920 = vmatprep.subr.bf16.mxu0 %v8919_v46 }
0x1e99   : > { %8922 = vmatpush3.bf16.msra.mxu0 %v8919_v46 }
0x1e9c   : > { %8504 = vmatmul.mubr.msk.f32.vlgmr.msra.gmra.mrb[78].mxu0 %vm718_vm1, %v10227_v43 }
0x1e9d   : > { %8506 = vmatprep.mubr.msk.f32.mxu0 %vm718_vm1, %v10231_v41 }
0x1ea0   : > { %8507 = vmatmul.mubr.msk.f32.gmra.mrb[80].mxu0 %vm718_vm1, %v10235_v1 }
0x1ea1   : > { %8531 = vmatprep.mubr.msk.f32.mxu0 %vm1091_vm0, %v10258_v57 }
0x1f6f   : > { %v8505_v44 = vpop.f32.mrb[78].mxu0 }
0x1f70   : > { %v5448_v42 = vpop.f32.mrb[79].mxu0 }
0x1f71   : > { %8517 = vmatprep.mubr.msk.f32.mxu1 %vm1277_vm3, %v5448_v42 }
0x1f72   : > { %8518 = vmatmul.mubr.msk.f32.vlgmr.msra.gmra.mrb[74].mxu1 %vm1277_vm3, %v8505_v44 }
0x1f73   : > { %v8508_v43 = vpop.f32.mrb[80].mxu0  ;;  %8954 = vmatpush3.bf16.msra.mxu1 %v10486_v28 }
0x1f74   : > { %v5458_v18 = vpop.f32.mrb[81].mxu0  ;;  %8956 = vmatprep.subr.bf16.mxu1 %v10504_v7 }
0x1f75   : > { %8520 = vmatprep.mubr.msk.f32.mxu1 %vm1277_vm3, %v5458_v18 }
0x1f76   : > { %8521 = vmatmul.mubr.msk.f32.gmra.mrb[76].mxu1 %vm1277_vm3, %v8508_v43 }
0x1f77   : > { %8958 = vmatpush3.bf16.msra.mxu1 %v10504_v7 }
0x2045   : > { %v8519_v57 = vpop.f32.mrb[74].mxu1 }
0x2046   : > { %v5563_v4 = vadd.f32 %v10276_v38, %v8519_v57  ;;  %v5557_v63 = vpop.f32.mrb[75].mxu1 }
0x2047   : > { %v5558_v41 = vadd.f32 %v10282_v45, %v5557_v63 }
0x2048   : > { %v7590_v1 = vmul.f32 -1.442695, %v5563_v4 }
0x2049   : > { %v7589_v59 = vmul.f32 -1.442695, %v5558_v41  ;;  %v8522_v26 = vpop.f32.mrb[76].mxu1 }
0x204a   : > { %9214 = vpow2.f32 %v7590_v1  ;;  %v5573_v55 = vadd.f32 %v10288_v34, %v8522_v26  ;;  %v5567_v35 = vpop.f32.mrb[77].mxu1 }
0x204b   : > { %9216 = vpow2.f32 %v7589_v59  ;;  %v5568_v27 = vadd.f32 %v10294_v8, %v5567_v35 }
0x204c   : > { %v7592_v39 = vmul.f32 -1.442695, %v5573_v55 }
0x204d   : > { %v7591_v19 = vmul.f32 -1.442695, %v5568_v27 }
0x204e   : > { %9218 = vpow2.f32 %v7592_v39 }
0x204f   : > { %9220 = vpow2.f32 %v7591_v19 }
0x2054   : > { %v9215_v6 = vpop.eup %9214 }
0x2055   : > { %v9217_v37 = vpop.eup %9216  ;;  %v5589_v38 = vadd.f32 1.0, %v9215_v6 }
0x2056   : > { %v5588_v14 = vadd.f32 1.0, %v9217_v37 }
0x2057   : > { %9222 = vrcp.f32 %v5589_v38 }
0x2058   : > { %v9219_v45 = vpop.eup %9218  ;;  %9224 = vrcp.f32 %v5588_v14 }
0x2059   : > { %v9221_v47 = vpop.eup %9220  ;;  %v5591_v60 = vadd.f32 1.0, %v9219_v45 }
0x205a   : > { %v5590_v23 = vadd.f32 1.0, %v9221_v47 }
0x205b   : > { %9226 = vrcp.f32 %v5591_v60 }
0x205c   : > { %9228 = vrcp.f32 %v5590_v23 }
0x2061   : > { %v9223_v34 = vpop.eup %9222 }
0x2062   : > { %v9225_v20 = vpop.eup %9224 }
0x2063   : > { %v8935_v12 = vpack.c.bf16 %v9223_v34, %v9225_v20 }
0x2065   : > { %v9227_v8 = vpop.eup %9226  ;;  %8936 = vmatprep.subr.bf16.mxu0 %v8935_v12 }
0x2066   : > { %v9229_v31 = vpop.eup %9228  ;;  %8938 = vmatpush3.bf16.msra.mxu0 %v8935_v12 }
0x2067   : > { %v8939_v46 = vpack.c.bf16 %v9227_v8, %v9229_v31 }
0x2069   : > { %8940 = vmatprep.subr.bf16.mxu0 %v8939_v46 }
0x206a   : > { %8942 = vmatpush3.bf16.msra.mxu0 %v8939_v46 }
0x206b   : > { %8944 = vmatprep.subr.bf16.mxu0 %v10486_v28 }
0x206d   : > { %8532 = vmatmul.mubr.msk.f32.vlgmr.msra.gmra.mrb[82].mxu0 %vm1091_vm0, %v10301_v21 }
0x206e   : > { %8534 = vmatprep.mubr.msk.f32.mxu0 %vm1091_vm0, %v10308_v17  ;;  %8946 = vmatpush3.bf16.msra.mxu0 %v10486_v28 }
0x206f   : > { %8948 = vmatprep.subr.bf16.mxu0 %v10504_v7 }
0x2071   : > { %8535 = vmatmul.mubr.msk.f32.gmra.mrb[84].mxu0 %vm1091_vm0, %v10317_v11 }
0x2072   : > { %8950 = vmatpush3.bf16.msra.mxu0 %v10504_v7 }
0x2073   : > { %8960 = vmatprep.subr.bf16.mxu0 %v10486_v28 }
0x2140   : > { %v8533_v44 = vpop.f32.mrb[82].mxu0 }
0x2141   : > { %v5686_v42 = vsel %vm1091_vm0, %v8533_v44, -inf  ;;  %v5666_v43 = vpop.f32.mrb[83].mxu0 }
0x2142   : > { %v5685_v21 = vsel %vm1091_vm0, %v5666_v43, -inf }
0x2143   : > { %v5689_v18 = vmax.f32 %v5685_v21, %v5686_v42 }
0x2144   : > { %v8536_v57 = vpop.f32.mrb[84].mxu0 }
0x2145   : > { %v5688_v17 = vsel %vm1091_vm0, %v8536_v57, -inf  ;;  %v5676_v4 = vpop.f32.mrb[85].mxu0 }
0x2146   : > { %v5687_v63 = vsel %vm1091_vm0, %v5676_v4, -inf }
0x2147   : > { %v5690_v41 = vmax.f32 %v5687_v63, %v5688_v17 }
0x2149   : > { %v5691_v1 = vmax.f32 %v5689_v18, %v5690_v41 }
0x214b   : > { %v5692_v11 = vrot.slane %v5691_v1, 4 }
0x214d   : > { %v5693_v59 = vmax.f32 %v5691_v1, %v5692_v11 }
0x214f   : > { %v5694_v26 = vrot.slane %v5693_v59, 2 }
0x2151   : > { %v5695_v55 = vmax.f32 %v5693_v59, %v5694_v26 }
0x2153   : > { %v5696_v35 = vrot.slane %v5695_v55, 1 }
0x2155   : > { %v5697_v27 = vmax.f32 %v5695_v55, %v5696_v35 }
0x2157   : > { %v5698_v39 = vsub.f32 %v5666_v43, %v5697_v27  ;;  %v5699_v19 = vsub.f32 %v8533_v44, %v5697_v27  ;;  %v5700_v6 = vsub.f32 %v5676_v4, %v5697_v27  ;;  %v5701_v37 = vsub.f32 %v8536_v57, %v5697_v27 }
0x2159   : > { %v5702_v38 = vmul.f32 1.442695, %v5698_v39  ;;  %v5704_v14 = vmul.f32 1.442695, %v5699_v19  ;;  %v5706_v45 = vmul.f32 1.442695, %v5700_v6 }
0x215a   : > { %v5708_v47 = vmul.f32 1.442695, %v5701_v37 }
0x215b   : > { %9230 = vpow2.f32 %v5702_v38 }
0x215c   : > { %9232 = vpow2.f32 %v5704_v14 }
0x215d   : > { %9234 = vpow2.f32 %v5706_v45 }
0x215e   : > { %9236 = vpow2.f32 %v5708_v47 }
0x2165   : > { %v9231_v60 = vpop.eup %9230 }
0x2166   : > { %v9233_v23 = vpop.eup %9232  ;;  %v5710_v34 = vsel %vm1091_vm0, %v9231_v60, 0.0 }
0x2167   : > { %v9235_v20 = vpop.eup %9234  ;;  %v5711_v12 = vsel %vm1091_vm0, %v9233_v23, 0.0 }
0x2168   : > { %v9237_v8 = vpop.eup %9236  ;;  %v5712_v31 = vadd.f32 %v5711_v12, %v5710_v34  ;;  %v5713_v46 = vsel %vm1091_vm0, %v9235_v20, 0.0 }
0x2169   : > { %v5715_v42 = vsel %vm1091_vm0, %v9237_v8, 0.0 }
0x216a   : > { %v5714_v44 = vadd.f32 %v5713_v46, %v5712_v31 }
0x216c   : > { %v5716_v43 = vadd.f32 %v5715_v42, %v5714_v44 }
0x216e   : > { %v5717_v21 = vrot.slane %v5716_v43, 4 }
0x2170   : > { %v5718_v18 = vadd.f32 %v5717_v21, %v5716_v43 }
0x2172   : > { %v5719_v57 = vrot.slane %v5718_v18, 2 }
0x2174   : > { %v5720_v17 = vadd.f32 %v5719_v57, %v5718_v18 }
0x2176   : > { %v5721_v4 = vrot.slane %v5720_v17, 1 }
0x2178   : > { %v5722_v63 = vadd.f32 %v5721_v4, %v5720_v17 }
0x217a   : > { %9238 = vrcp.f32 %v5722_v63 }
0x2184   : > { %v9239_v41 = vpop.eup %9238 }
0x2185   : > { %v5726_v1 = vmul.f32 %v9239_v41, %v9235_v20  ;;  %v5724_v11 = vmul.f32 %v9239_v41, %v9231_v60  ;;  %v5725_v59 = vmul.f32 %v9239_v41, %v9233_v23  ;;  %v5727_v26 = vmul.f32 %v9239_v41, %v9237_v8 }
0x2187   : > { %v5873_v55 = vmul.f32 %v10334_v56, %v5724_v11  ;;  %v5732_v35 = vmul.f32 %v5724_v11, %v10400_v53  ;;  %v5874_v27 = vmul.f32 %v10340_v3, %v5725_v59  ;;  %v5733_v39 = vmul.f32 %v5725_v59, %v10407_v29 }
0x2188   : > { %v5875_v19 = vmul.f32 %v10346_v62, %v5726_v1  ;;  %v5734_v6 = vmul.f32 %v5726_v1, %v10413_v9  ;;  %v5876_v37 = vmul.f32 %v10352_v25, %v5727_v26  ;;  %v5735_v56 = vmul.f32 %v5727_v26, %v10419_v2  ;;  %v11173_v9 = vld [vmem:[#allocation23_spill] sm:$0xff] }
0x2189   : > { %5877 = vxpose.xlu1.b32.start [1/4] (short) (narrow) %v5873_v55, 32  ;;  %5736 = vxpose.xlu0.b32.start [1/4] (short) (narrow) %v5732_v35, 32  ;;  %v6030_v53 = vmul.f32 %v10377_v33, %v5724_v11  ;;  %v6031_v3 = vmul.f32 %v10383_v24, %v5725_v59  ;;  %v6032_v29 = vmul.f32 %v10389_v22, %v5726_v1  ;;  %v11174_v25 = vld [vmem:[#allocation27_spill] sm:$0xff]  ;;  %v11175_v33 = vld [vmem:[#allocation29_spill] sm:$0xff]  ;;  %v11176_v24 = vld [vmem:[#allocation24_spill] sm:$0xff] }
0x218a   : > { %v6033_v62 = vmul.f32 %v10395_v30, %v5727_v26  ;;  %v9096_v22 = vld [vmem:[%s11062_s12] sm:$0xff]  }
0x218b   : > { %8579 = vmatprep.subr.bf16.mxu1 %v9096_v22 }
0x218d   : > { %5878 = vxpose.xlu1.b32.cont [2/4] (short) (narrow) %v5874_v27, 32  ;;  %5737 = vxpose.xlu0.b32.cont [2/4] (short) (narrow) %v5733_v39, 32 }
0x2191   : > { %5879 = vxpose.xlu1.b32.cont [3/4] (short) (narrow) %v5875_v19, 32  ;;  %5738 = vxpose.xlu0.b32.cont [3/4] (short) (narrow) %v5734_v6, 32 }
0x2195   : > { %5880 = vxpose.xlu1.b32.end [4/4] (short) (narrow) %v5876_v37, 32  ;;  %5739 = vxpose.xlu0.b32.end [4/4] (short) (narrow) %v5735_v56, 32 }
0x2199   : > { %6034 = vxpose.xlu0.b32.start [1/4] (short) (narrow) %v6030_v53, 32 }
0x219d   : > { %6035 = vxpose.xlu0.b32.cont [2/4] (short) (narrow) %v6031_v3, 32 }
0x21a1   : > { %6036 = vxpose.xlu0.b32.cont [3/4] (short) (narrow) %v6032_v29, 32 }
0x21a5   : > { %6037 = vxpose.xlu0.b32.end [4/4] (short) (narrow) %v6033_v62, 32 }
0x21b3   : > { %2190 = vrot.lane.b32.xlu1 %v11173_v9, %s11100_s26 }
0x21b7   : > { %2349 = vrot.lane.b32.xlu1 %v11174_v25, %s11098_s2 }
0x21bb   : > { %2353 = vrot.lane.b32.xlu1 %v11175_v33, %s11098_s2 }
0x21bf   : > { %3466 = vrot.lane.b32.xlu1 %v10127_v52, %s11100_s26  ;;  %v11177_v52 = vld [vmem:[#allocation26_spill] sm:$0xff] }
0x21c3   : > { %3470 = vrot.lane.b32.xlu1 %v10131_v0, %s11100_s26  ;;  %v11178_v0 = vld [vmem:[#allocation25_spill] sm:$0xff] }
0x21c7   : > { %3623 = vrot.lane.b32.xlu1 %v10176_v13, %s11098_s2  ;;  %v11179_v13 = vld [vmem:[#allocation28_spill] sm:$0xff] }
0x21cb   : > { %3627 = vrot.lane.b32.xlu1 %v10180_v61, %s11098_s2  ;;  %v11180_v61 = vld [vmem:[#allocation30_spill] sm:$0xff] }
0x21ce   : > { %2188 = vrot.lane.b32.xlu0 %v11176_v24, %s11100_s26 }
0x21cf   : > { %4739 = vrot.lane.b32.xlu1 %v10366_v50, %s11100_s26 }
0x21d2   : > { %2192 = vrot.lane.b32.xlu0 %v11177_v52, %s11100_s26  ;;  %v9100_v52 = vld [vmem:[%s11063_s13 + $0x8] sm:$0xff]  }
0x21d3   : > { %4743 = vrot.lane.b32.xlu1 %v10370_v5, %s11100_s26 }
0x21d6   : > { %2194 = vrot.lane.b32.xlu0 %v11178_v0, %s11100_s26  ;;  %v9101_v0 = vld [vmem:[%s11063_s13 + $0x10] sm:$0xff]  }
0x21d7   : > { %4896 = vrot.lane.b32.xlu1 %v10454_v48, %s11098_s2 }
0x21da   : > { %2347 = vrot.lane.b32.xlu0 %v11179_v13, %s11098_s2  ;;  %v9102_v13 = vld [vmem:[%s11063_s13 + $0x18] sm:$0xff]  }
0x21db   : > { %4900 = vrot.lane.b32.xlu1 %v10458_v40, %s11098_s2 }
0x21de   : > { %2351 = vrot.lane.b32.xlu0 %v11180_v61, %s11098_s2 }
0x21e2   : > { %3464 = vrot.lane.b32.xlu0 %v10129_v32, %s11100_s26 }
0x21e6   : > { %3468 = vrot.lane.b32.xlu0 %v10133_v54, %s11100_s26 }
0x21ea   : > { %3621 = vrot.lane.b32.xlu0 %v10178_v58, %s11098_s2  ;;  %v9097_v58 = vld [vmem:[%s11062_s12 + $0x8] sm:$0xff]  }
0x21ee   : > { %3625 = vrot.lane.b32.xlu0 %v10182_v36, %s11098_s2 }
0x21f2   : > { %4737 = vrot.lane.b32.xlu0 %v10368_v15, %s11100_s26  ;;  %v9098_v15 = vld [vmem:[%s11062_s12 + $0x10] sm:$0xff]  }
0x21f6   : > { %4741 = vrot.lane.b32.xlu0 %v10372_v10, %s11100_s26  ;;  %s11182_s26 = smov 32  }
0x21fa   : > { %4894 = vrot.lane.b32.xlu0 %v10456_v49, %s11098_s2 }
0x21fe   : > { %4898 = vrot.lane.b32.xlu0 %v10460_v16, %s11098_s2  ;;  %s675_s2 = sand.u32 1, %s9348_s28  }
0x21ff   : > { %s7378_s0 = sshll.u32 %s675_s2, 2  ;;  %s7302_s4 = scalar_lea.sflag [#allocation4], %s675_s2 }
0x2200   : > { %s677_s8 = scalar_lea.vmem [#allocation3], %s7378_s0 }
0x2201   : > { %s7315_s3 = sshll.u32 %s677_s8, 4  ;;  %s11010_s3 = int_to_ptr.vmem [resolvable:$true] %s7315_s3 }
0x2209   : > { %v5752_v32 = vpop.trf.xlu0  ;;  %v5893_v54 = vpop.trf.xlu1 }
0x220a   : > { %8545 = vmatprep.mubr.msk.f32.mxu0 %vm1091_vm0, %v5752_v32  ;;  %8559 = vmatprep.mubr.msk.f32.mxu1 %vm1091_vm0, %v5893_v54 }
0x220d   : > { %v5753_v36 = vpop.trf.xlu0  ;;  %v5894_v50 = vpop.trf.xlu1 }
0x220e   : > { %8546 = vmatmul.mubr.msk.f32.vlgmr.msra.gmra.mrb[86].mxu0 %vm1091_vm0, %v5753_v36  ;;  %8560 = vmatmul.mubr.msk.f32.vlgmr.msra.gmra.mrb[78].mxu1 %vm1091_vm0, %v5894_v50 }
0x220f   : > { %8962 = vmatpush3.bf16.msra.mxu0 %v10486_v28  ;;  %8580 = vmatpush3.bf16.msra.mxu1 %v9096_v22  ;;  %v9099_v22 = vld [vmem:[%s11063_s13] sm:$0xff]  }
0x2210   : > { %8964 = vmatprep.subr.bf16.mxu0 %v10504_v7  ;;  %8581 = vmatprep.subr.bf16.mxu1 %v9097_v58 }
0x2211   : > { %v5754_v5 = vpop.trf.xlu0  ;;  %v5895_v10 = vpop.trf.xlu1 }
0x2212   : > { %8548 = vmatprep.mubr.msk.f32.mxu0 %vm1091_vm0, %v5754_v5  ;;  %8562 = vmatprep.mubr.msk.f32.mxu1 %vm1091_vm0, %v5895_v10 }
0x2213   : > { %8966 = vmatpush3.bf16.msra.mxu0 %v10504_v7  ;;  %8582 = vmatpush3.bf16.msra.mxu1 %v9097_v58 }
0x2214   : > { %8583 = vmatprep.subr.bf16.mxu1 %v9098_v15  ;;  %8601 = vmatprep.subr.bf16.mxu0 %v9099_v22 }
0x2215   : > { %v5755_v30 = vpop.trf.xlu0  ;;  %v5896_v2 = vpop.trf.xlu1 }
0x2216   : > { %8549 = vmatmul.mubr.msk.f32.gmra.mrb[88].mxu0 %vm1091_vm0, %v5755_v30  ;;  %8563 = vmatmul.mubr.msk.f32.gmra.mrb[80].mxu1 %vm1091_vm0, %v5896_v2 }
0x2217   : > { %8584 = vmatpush3.bf16.msra.mxu1 %v9098_v15 }
0x2219   : > { %v6050_v48 = vpop.trf.xlu0 }
0x221a   : > { %8573 = vmatprep.mubr.msk.f32.mxu0 %vm1091_vm0, %v6050_v48 }
0x221d   : > { %v6051_v49 = vpop.trf.xlu0 }
0x221e   : > { %8574 = vmatmul.mubr.msk.f32.vlgmr.msra.gmra.mrb[90].mxu0 %vm1091_vm0, %v6051_v49  ;;  %v7227_v49 = vld [vmem:[%s11071_s21] sm:$0xf] }
0x221f   : > { %8602 = vmatpush3.bf16.msra.mxu0 %v9099_v22 }
0x2220   : > { %8603 = vmatprep.subr.bf16.mxu0 %v9100_v52 }
0x2221   : > { %v6052_v40 = vpop.trf.xlu0 }
0x2222   : > { %8576 = vmatprep.mubr.msk.f32.mxu0 %vm1091_vm0, %v6052_v40  ;;  %v9103_v40 = vld [vmem:[%s11065_s15] sm:$0xff]  }
0x2223   : > { %8604 = vmatpush3.bf16.msra.mxu0 %v9100_v52  ;;  %v6714_v52 = vld [vmem:[%s11067_s17] sm:$0xff] }
0x2224   : > { %8605 = vmatprep.subr.bf16.mxu0 %v9101_v0 }
0x2225   : > { %v2191_v16 = vpop.permute.xlu1 %2190  ;;  %v6053_v38 = vpop.trf.xlu0 }
0x2226   : > { %2202 = vst.msk [vmem:[#allocation2 + $0x8] sm:$0xff] %vm2200_vm5, %v2191_v16  ;;  %8577 = vmatmul.mubr.msk.f32.gmra.mrb[92].mxu0 %vm1091_vm0, %v6053_v38 }
0x2227   : > { %8606 = vmatpush3.bf16.msra.mxu0 %v9101_v0  ;;  %v6715_v0 = vld [vmem:[%s11067_s17 + $0x8] sm:$0xff] }
0x2228   : > { %8607 = vmatprep.subr.bf16.mxu0 %v9102_v13 }
0x2229   : > { %v2350_v14 = vpop.permute.xlu1 %2349 }
0x222a   : > { %2361 = vst.msk [vmem:[#allocation2 + $0x8] sm:$0xff] %vm2359_vm6, %v2350_v14 }
0x222b   : > { %8608 = vmatpush3.bf16.msra.mxu0 %v9102_v13  ;;  %v6716_v13 = vld [vmem:[%s11067_s17 + $0x10] sm:$0xff] }
0x222c   : > { %8625 = vmatprep.subr.bf16.mxu0 %v9103_v40 }
0x222d   : > { %v2354_v45 = vpop.permute.xlu1 %2353 }
0x2231   : > { %v3467_v47 = vpop.permute.xlu1 %3466  ;;  %v6184_v17 = vld [vmem:[#allocation2 + $0x8] sm:$0xff] }
0x2232   : > { %3477 = vst.msk [vmem:[#allocation2 + $0x28] sm:$0xff] %vm2200_vm5, %v3467_v47 }
0x2235   : > { %v3471_v60 = vpop.permute.xlu1 %3470 }
0x2236   : > { %3479 = vst.msk [vmem:[#allocation2 + $0x38] sm:$0xff] %vm2200_vm5, %v3471_v60 }
0x2239   : > { %v3624_v23 = vpop.permute.xlu1 %3623 }
0x223a   : > { %3634 = vst.msk [vmem:[#allocation2 + $0x28] sm:$0xff] %vm2359_vm6, %v3624_v23 }
0x223d   : > { %v3628_v34 = vpop.permute.xlu1 %3627 }
0x223e   : > { %3636 = vst.msk [vmem:[#allocation2 + $0x38] sm:$0xff] %vm2359_vm6, %v3628_v34 }
0x2240   : > { %v2189_v20 = vpop.permute.xlu0 %2188 }
0x2241   : > { %2201 = vst.msk [vmem:[#allocation2] sm:$0xff] %vm2200_vm5, %v2189_v20  ;;  %v4740_v12 = vpop.permute.xlu1 %4739  ;;  %v6188_v27 = vld [vmem:[#allocation2 + $0x28] sm:$0xff] }
0x2242   : > { %4750 = vst.msk [vmem:[#allocation2 + $0x48] sm:$0xff] %vm2200_vm5, %v4740_v12 }
0x2244   : > { %v2193_v8 = vpop.permute.xlu0 %2192 }
0x2245   : > { %2203 = vst.msk [vmem:[#allocation2 + $0x10] sm:$0xff] %vm2200_vm5, %v2193_v8  ;;  %v4744_v31 = vpop.permute.xlu1 %4743  ;;  %v6190_v37 = vld [vmem:[#allocation2 + $0x38] sm:$0xff] }
0x2246   : > { %4752 = vst.msk [vmem:[#allocation2 + $0x58] sm:$0xff] %vm2200_vm5, %v4744_v31 }
0x2248   : > { %v2195_v46 = vpop.permute.xlu0 %2194 }
0x2249   : > { %2204 = vst.msk [vmem:[#allocation2 + $0x18] sm:$0xff] %vm2200_vm5, %v2195_v46  ;;  %v4897_v44 = vpop.permute.xlu1 %4896 }
0x224a   : > { %2363 = vst.msk [vmem:[#allocation2 + $0x18] sm:$0xff] %vm2359_vm6, %v2354_v45  ;;  %4907 = vst.msk [vmem:[#allocation2 + $0x48] sm:$0xff] %vm2359_vm6, %v4897_v44 }
0x224c   : > { %v2348_v42 = vpop.permute.xlu0 %2347 }
0x224d   : > { %2360 = vst.msk [vmem:[#allocation2] sm:$0xff] %vm2359_vm6, %v2348_v42  ;;  %v4901_v43 = vpop.permute.xlu1 %4900 }
0x224e   : > { %4909 = vst.msk [vmem:[#allocation2 + $0x58] sm:$0xff] %vm2359_vm6, %v4901_v43 }
0x2250   : > { %v2352_v21 = vpop.permute.xlu0 %2351 }
0x2251   : > { %2362 = vst.msk [vmem:[#allocation2 + $0x10] sm:$0xff] %vm2359_vm6, %v2352_v21  ;;  %v6186_v1 = vld [vmem:[#allocation2 + $0x18] sm:$0xff]  ;;  %v6192_v62 = vld [vmem:[#allocation2 + $0x48] sm:$0xff] }
0x2254   : > { %v3465_v18 = vpop.permute.xlu0 %3464  ;;  %v6183_v57 = vld [vmem:[#allocation2] sm:$0xff] }
0x2255   : > { %3476 = vst.msk [vmem:[#allocation2 + $0x20] sm:$0xff] %vm2200_vm5, %v3465_v18  ;;  %v6199_v4 = vpack.c.bf16 %v6184_v17, %v6183_v57  ;;  %v6194_v33 = vld [vmem:[#allocation2 + $0x58] sm:$0xff] }
0x2257   : > { %8585 = vmatprep.mubr.msk.bf16.mxu1 %vm6231_vm7, %v6199_v4 }
0x2258   : > { %v3469_v63 = vpop.permute.xlu0 %3468  ;;  %v6185_v41 = vld [vmem:[#allocation2 + $0x10] sm:$0xff] }
0x2259   : > { %3478 = vst.msk [vmem:[#allocation2 + $0x30] sm:$0xff] %vm2200_vm5, %v3469_v63  ;;  %v6200_v11 = vpack.c.bf16 %v6186_v1, %v6185_v41 }
0x225b   : > { %8586 = vmatmul.mubr.msk.bf16.vlgmr.msra.gmra.mrb[84].mxu1 %vm6231_vm7, %v6200_v11 }
0x225c   : > { %v3622_v59 = vpop.permute.xlu0 %3621 }
0x225d   : > { %3633 = vst.msk [vmem:[#allocation2 + $0x20] sm:$0xff] %vm2359_vm6, %v3622_v59 }
0x2260   : > { %v3626_v26 = vpop.permute.xlu0 %3625 }
0x2261   : > { %3635 = vst.msk [vmem:[#allocation2 + $0x30] sm:$0xff] %vm2359_vm6, %v3626_v26 }
0x2264   : > { %v4738_v55 = vpop.permute.xlu0 %4737  ;;  %v6187_v35 = vld [vmem:[#allocation2 + $0x20] sm:$0xff] }
0x2265   : > { %4749 = vst.msk [vmem:[#allocation2 + $0x40] sm:$0xff] %vm2200_vm5, %v4738_v55  ;;  %v6201_v39 = vpack.c.bf16 %v6188_v27, %v6187_v35 }
0x2267   : > { %8589 = vmatprep.mubr.msk.bf16.mxu1 %vm6231_vm7, %v6201_v39 }
0x2268   : > { %v4742_v19 = vpop.permute.xlu0 %4741  ;;  %v6189_v6 = vld [vmem:[#allocation2 + $0x30] sm:$0xff] }
0x2269   : > { %4751 = vst.msk [vmem:[#allocation2 + $0x50] sm:$0xff] %vm2200_vm5, %v4742_v19  ;;  %v6202_v56 = vpack.c.bf16 %v6190_v37, %v6189_v6 }
0x226b   : > { %8590 = vmatmul.mubr.msk.bf16.gmra.mrb[88].mxu1 %vm6231_vm7, %v6202_v56 }
0x226c   : > { %v4895_v53 = vpop.permute.xlu0 %4894 }
0x226d   : > { %4906 = vst.msk [vmem:[#allocation2 + $0x40] sm:$0xff] %vm2359_vm6, %v4895_v53 }
0x2270   : > { %v4899_v3 = vpop.permute.xlu0 %4898 }
0x2271   : > { %4908 = vst.msk [vmem:[#allocation2 + $0x50] sm:$0xff] %vm2359_vm6, %v4899_v3 }
0x2274   : > { %v6191_v29 = vld [vmem:[#allocation2 + $0x40] sm:$0xff] }
0x2275   : > { %v6203_v9 = vpack.c.bf16 %v6192_v62, %v6191_v29 }
0x2277   : > { %8593 = vmatprep.mubr.msk.bf16.mxu1 %vm6231_vm7, %v6203_v9 }
0x2278   : > { %v6193_v25 = vld [vmem:[#allocation2 + $0x50] sm:$0xff] }
0x2279   : > { %v6204_v24 = vpack.c.bf16 %v6194_v33, %v6193_v25 }
0x227b   : > { %8594 = vmatmul.mubr.msk.bf16.gmra.mrb[92].mxu1 %vm6231_vm7, %v6204_v24 }
0x22e1   : > { %v8547_v61 = vpop.f32.mrb[86].mxu0  ;;  %v8561_v32 = vpop.f32.mrb[78].mxu1 }
0x22e2   : > { %5866 = vst.msk [vmem:[#allocation2 + $0x68] sm:$0xff] %vm718_vm1, %v8547_v61  ;;  %v5846_v54 = vpop.f32.mrb[87].mxu0  ;;  %v5987_v58 = vpop.f32.mrb[79].mxu1  ;;  %6012 = vrot.lane.b32.xlu1 %v8561_v32, %s11181_s1  ;;  %v8967_v61 = vpack.c.bf16 %v6715_v0, %v6714_v52  ;;  %v6717_v32 = vld [vmem:[%s11067_s17 + $0x18] sm:$0xff] }
0x22e3   : > { %5865 = vst.msk [vmem:[#allocation2 + $0x60] sm:$0xff] %vm718_vm1, %v5846_v54  ;;  %6010 = vrot.lane.b32.xlu0 %v5987_v58, %s11181_s1  ;;  %v10708_v54 = vpack.c.bf16 %v6717_v32, %v6716_v13  ;;  %v6718_v58 = vld [vmem:[%s11067_s17 + $0x20] sm:$0xff] }
0x22e4   : > { %8968 = vmatprep.subr.bf16.mxu1 %v8967_v61 }
0x22e5   : > { %8970 = vmatpush3.bf16.msra.mxu1 %v8967_v61 }
0x22e6   : > { %8972 = vmatprep.subr.bf16.mxu1 %v10708_v54 }
0x22e9   : > { %v8550_v36 = vpop.f32.mrb[88].mxu0  ;;  %v8564_v50 = vpop.f32.mrb[80].mxu1  ;;  %8974 = vmatpush3.bf16.msra.mxu1 %v10708_v54 }
0x22ea   : > { %5868 = vst.msk [vmem:[#allocation2 + $0x78] sm:$0xff] %vm718_vm1, %v8550_v36  ;;  %v5856_v15 = vpop.f32.mrb[89].mxu0  ;;  %v5997_v5 = vpop.f32.mrb[81].mxu1  ;;  %6016 = vrot.lane.b32.xlu1 %v8564_v50, %s11181_s1  ;;  %v6719_v36 = vld [vmem:[%s11067_s17 + $0x28] sm:$0xff] }
0x22eb   : > { %5867 = vst.msk [vmem:[#allocation2 + $0x70] sm:$0xff] %vm718_vm1, %v5856_v15  ;;  %6014 = vrot.lane.b32.xlu0 %v5997_v5, %s11181_s1  ;;  %v10717_v50 = vpack.c.bf16 %v6719_v36, %v6718_v58  ;;  %s9294_s1 = scalar_lea.vmem %s11010_s3, 64 }
0x22ec   : > { %p9295_p11 = scmp.ne.s32.totalorder %s11010_s3, %s9294_s1 }
0x22ed   : > { %8976 = vmatprep.subr.bf16.mxu1 %v10717_v50 }
0x22ee   : > { %8978 = vmatpush3.bf16.msra.mxu1 %v10717_v50  ;;  %p9296_p12 = pnand %p9295_p11, %p9518_p5 }
0x22f0   : > { %p9297_p13 = pneg %p9296_p12 }
0x22f1   : > { %v8575_v10 = vpop.f32.mrb[90].mxu0 }
0x22f2   : > { %v6144_v30 = vpop.f32.mrb[91].mxu0  ;;  %6169 = vrot.lane.b32.xlu1 %v8575_v10, %s11182_s26 }
0x22f3   : > { %6167 = vrot.lane.b32.xlu0 %v6144_v30, %s11182_s26 }
0x22f9   : > { %v8578_v2 = vpop.f32.mrb[92].mxu0 }
0x22fa   : > { %v6154_v48 = vpop.f32.mrb[93].mxu0  ;;  %6173 = vrot.lane.b32.xlu1 %v8578_v2, %s11182_s26 }
0x22fb   : > { %6171 = vrot.lane.b32.xlu0 %v6154_v48, %s11182_s26  ;;  %s9364_s26 = smov [#allocation3]  }
0x22fc   : > { %s9298_s0 = sshll.u32 %s9364_s26, 4  ;;  %s9299_s0 = int_to_ptr.vmem [resolvable:$false] %s9298_s0 }
0x22fd   : > { %s9300_s5 = scalar_lea.vmem %s9299_s0, 128  ;;  %p9301_p0 = scmp.lt.s32.totalorder %s11010_s3, %s9299_s0 }
0x22fe   : > { %p9302_p1 = scmp.lt.s32.totalorder %s9300_s5, %s9294_s1 }
0x22ff   : > { %7230 = vperm.xlu0 %9095, %v7227_v49  }
0x2300   : > { %p9303_p2 = por %p9302_p1, %p9301_p0 }
0x2302   : > { %p9304_p3 = pnand %p9303_p2, %p9297_p13 }
0x232e   : > { %v8587_v16 = vpop.f32.mrb[84].mxu1 }
0x232f   : > { %v6290_v38 = vpop.f32.mrb[85].mxu1  ;;  %v6355_v45 = vmax.f32 %v8587_v16, 0.0 }
0x2330   : > { %v8588_v14 = vpop.f32.mrb[86].mxu1  ;;  %v6353_v23 = vmax.f32 %v6290_v38, 0.0 }
0x2331   : > { %v6356_v47 = vmax.f32 %v8588_v14, 0.0  ;;  %v6293_v60 = vpop.f32.mrb[87].mxu1  ;;  %v11183_v14 = vld [vmem:[#allocation21_spill] sm:$0xff] }
0x2332   : > { %v6354_v34 = vmax.f32 %v6293_v60, 0.0  ;;  %v11186_v60 = vld [vmem:[#allocation32_spill] sm:$0xff] }
0x2333   : > { %v6370_v20 = vpack.c.bf16 %v6356_v47, %v6355_v45  ;;  %v11184_v45 = vld [vmem:[#allocation22_spill] sm:$0xff]  ;;  %v11185_v47 = vld [vmem:[#allocation31_spill] sm:$0xff] }
0x2334   : > { %v6369_v12 = vpack.c.bf16 %v6354_v34, %v6353_v23  ;;  %v11187_v23 = vld [vmem:[#allocation16_spill] sm:$0xff]  ;;  %v11188_v34 = vld [vmem:[#allocation15_spill] sm:$0xff] }
0x2336   : > { %8609 = vmatprep.mubr.msk.bf16.mxu0 %vm6416_vm8, %v6369_v12  ;;  %v6721_v12 = vld [vmem:[%s11067_s17 + $0x38] sm:$0xff] }
0x2337   : > { %8610 = vmatmul.mubr.msk.bf16.vlgmr.msra.gmra.mrb[96].mxu0 %vm6416_vm8, %v6370_v20  ;;  %v6720_v20 = vld [vmem:[%s11067_s17 + $0x30] sm:$0xff] }
0x2338   : > { %8626 = vmatpush3.bf16.msra.mxu0 %v9103_v40 }
0x2339   : > { %8723 = vmatprep.subr.bf16.mxu0 %v11143_v51 }
0x233e   : > { %v8591_v8 = vpop.f32.mrb[88].mxu1 }
0x233f   : > { %v6306_v31 = vpop.f32.mrb[89].mxu1  ;;  %v6359_v44 = vmax.f32 %v8591_v8, 0.0  ;;  %v8979_v8 = vpack.c.bf16 %v6721_v12, %v6720_v20 }
0x2340   : > { %v8592_v46 = vpop.f32.mrb[90].mxu1  ;;  %v6357_v21 = vmax.f32 %v6306_v31, 0.0 }
0x2341   : > { %v6360_v42 = vmax.f32 %v8592_v46, 0.0  ;;  %v6309_v43 = vpop.f32.mrb[91].mxu1  ;;  %8980 = vmatprep.subr.bf16.mxu1 %v8979_v8 }
0x2342   : > { %v6358_v18 = vmax.f32 %v6309_v43, 0.0  ;;  %8982 = vmatpush3.bf16.msra.mxu1 %v8979_v8 }
0x2343   : > { %v6372_v57 = vpack.c.bf16 %v6360_v42, %v6359_v44  ;;  %8984 = vmatprep.subr.bf16.mxu1 %v8967_v61 }
0x2344   : > { %v6371_v17 = vpack.c.bf16 %v6358_v18, %v6357_v21 }
0x2346   : > { %8613 = vmatprep.mubr.msk.bf16.mxu0 %vm6416_vm8, %v6371_v17 }
0x2347   : > { %8614 = vmatmul.mubr.msk.bf16.gmra.mrb[100].mxu0 %vm6416_vm8, %v6372_v57 }
0x234e   : > { %v8595_v4 = vpop.f32.mrb[92].mxu1 }
0x234f   : > { %v6322_v63 = vpop.f32.mrb[93].mxu1  ;;  %v6363_v1 = vmax.f32 %v8595_v4, 0.0 }
0x2350   : > { %v8596_v41 = vpop.f32.mrb[94].mxu1  ;;  %v6361_v26 = vmax.f32 %v6322_v63, 0.0 }
0x2351   : > { %v6364_v11 = vmax.f32 %v8596_v41, 0.0  ;;  %v6325_v59 = vpop.f32.mrb[95].mxu1 }
0x2352   : > { %v6362_v55 = vmax.f32 %v6325_v59, 0.0 }
0x2353   : > { %v6374_v35 = vpack.c.bf16 %v6364_v11, %v6363_v1 }
0x2354   : > { %v6373_v27 = vpack.c.bf16 %v6362_v55, %v6361_v26  ;;  %v6013_v39 = vpop.permute.xlu1 %6012 }
0x2355   : > { %6023 = vst.msk [vmem:[#allocation2 + $0x68] sm:$0xff] %vm2200_vm5, %v6013_v39  ;;  %v6011_v19 = vpop.permute.xlu0 %6010 }
0x2356   : > { %8617 = vmatprep.mubr.msk.bf16.mxu0 %vm6416_vm8, %v6373_v27  ;;  %6022 = vst.msk [vmem:[#allocation2 + $0x60] sm:$0xff] %vm2200_vm5, %v6011_v19 }
0x2357   : > { %8618 = vmatmul.mubr.msk.bf16.gmra.mrb[104].mxu0 %vm6416_vm8, %v6374_v35 }
0x235c   : > { %v6017_v6 = vpop.permute.xlu1 %6016 }
0x235d   : > { %6025 = vst.msk [vmem:[#allocation2 + $0x78] sm:$0xff] %vm2200_vm5, %v6017_v6  ;;  %v6015_v37 = vpop.permute.xlu0 %6014 }
0x235e   : > { %6024 = vst.msk [vmem:[#allocation2 + $0x70] sm:$0xff] %vm2200_vm5, %v6015_v37 }
0x2364   : > { %v6170_v56 = vpop.permute.xlu1 %6169 }
0x2365   : > { %6180 = vst.msk [vmem:[#allocation2 + $0x68] sm:$0xff] %vm2359_vm6, %v6170_v56  ;;  %v6168_v53 = vpop.permute.xlu0 %6167 }
0x2366   : > { %6179 = vst.msk [vmem:[#allocation2 + $0x60] sm:$0xff] %vm2359_vm6, %v6168_v53 }
0x236c   : > { %v6174_v3 = vpop.permute.xlu1 %6173  ;;  %v6196_v29 = vld [vmem:[#allocation2 + $0x68] sm:$0xff] }
0x236d   : > { %6182 = vst.msk [vmem:[#allocation2 + $0x78] sm:$0xff] %vm2359_vm6, %v6174_v3  ;;  %v6172_v62 = vpop.permute.xlu0 %6171  ;;  %v6195_v9 = vld [vmem:[#allocation2 + $0x60] sm:$0xff] }
0x236e   : > { %6181 = vst.msk [vmem:[#allocation2 + $0x70] sm:$0xff] %vm2359_vm6, %v6172_v62  ;;  %v6205_v25 = vpack.c.bf16 %v6196_v29, %v6195_v9 }
0x2370   : > { %8597 = vmatprep.mubr.msk.bf16.mxu1 %vm6231_vm7, %v6205_v25 }
0x2374   : > { %v6198_v33 = vld [vmem:[#allocation2 + $0x78] sm:$0xff] }
0x2375   : > { %v6197_v24 = vld [vmem:[#allocation2 + $0x70] sm:$0xff] }
0x2376   : > { %v6206_v22 = vpack.c.bf16 %v6198_v33, %v6197_v24 }
0x2378   : > { %8598 = vmatmul.mubr.msk.bf16.gmra.mrb[96].mxu1 %vm6231_vm7, %v6206_v22 }
0x244b   : > { %v8599_v15 = vpop.f32.mrb[96].mxu1 }
0x244c   : > { %v6338_v5 = vpop.f32.mrb[97].mxu1  ;;  %v6367_v30 = vmax.f32 %v8599_v15, 0.0 }
0x244d   : > { %v8600_v10 = vpop.f32.mrb[98].mxu1  ;;  %v6365_v49 = vmax.f32 %v6338_v5, 0.0 }
0x244e   : > { %v6368_v2 = vmax.f32 %v8600_v10, 0.0  ;;  %v6341_v48 = vpop.f32.mrb[99].mxu1 }
0x244f   : > { %v6366_v40 = vmax.f32 %v6341_v48, 0.0 }
0x2450   : > { %v6376_v16 = vpack.c.bf16 %v6368_v2, %v6367_v30 }
0x2451   : > { %v6375_v38 = vpack.c.bf16 %v6366_v40, %v6365_v49 }
0x2453   : > { %8621 = vmatprep.mubr.msk.bf16.mxu0 %vm6416_vm8, %v6375_v38 }
0x2454   : > { %8622 = vmatmul.mubr.msk.bf16.gmra.mrb[108].mxu0 %vm6416_vm8, %v6376_v16 }
0x2455   : > { %8627 = vmatprep.mubr.msk.bf16.mxu0 %vm718_vm1, %v11183_v14 }
0x245c   : > { %8628 = vmatmul.mubr.msk.bf16.vlgmr.msra.gmra.mrb[96].mxu0 %vm718_vm1, %v11184_v45 }
0x245d   : > { %8631 = vmatprep.mubr.msk.bf16.mxu0 %vm718_vm1, %v11185_v47 }
0x2464   : > { %8632 = vmatmul.mubr.msk.bf16.gmra.mrb[100].mxu0 %vm718_vm1, %v11186_v60 }
0x2465   : > { %8635 = vmatprep.mubr.msk.bf16.mxu0 %vm718_vm1, %v11187_v23 }
0x246c   : > { %8636 = vmatmul.mubr.msk.bf16.gmra.mrb[104].mxu0 %vm718_vm1, %v11188_v34 }
0x246d   : > { %8639 = vmatprep.mubr.msk.bf16.mxu0 %vm718_vm1, %v10486_v28  ;;  %v7628_v28 = vld [vmem:[%s11064_s14] ss:$0 sm:$0xff] }
0x2474   : > { %8640 = vmatmul.mubr.msk.bf16.gmra.mrb[108].mxu0 %vm718_vm1, %v10504_v7  ;;  %v7641_v7 = vld [vmem:[%s11066_s16] ss:$0 sm:$0xff] }
0x2475   : > { %8739 = vmatprep.mubr.msk.bf16.mxu0 %vm9360_vm2, %v11143_v51  ;;  %v10754_v46 = vadd.f32 %v7641_v7, %v7628_v28 }
0x252f   : > { %v8629_v31 = vpop.f32.mrb[96].mxu0 }
0x2530   : > { %v9001_v44 = vadd.f32 %v8629_v31, %v7628_v28  ;;  %v6619_v42 = vpop.f32.mrb[97].mxu0 }
0x2531   : > { %v9003_v43 = vadd.f32 %v7628_v28, %v6619_v42  ;;  %v8630_v21 = vpop.f32.mrb[98].mxu0 }
0x2532   : > { %v6622_v18 = vpop.f32.mrb[99].mxu0  ;;  %v10756_v57 = vadd.f32 %v9001_v44, %v7641_v7  ;;  %v10766_v1 = vadd.f32 %v10754_v46, %v8630_v21 }
0x2533   : > { %v10758_v17 = vadd.f32 %v9003_v43, %v7641_v7  ;;  %v10761_v4 = vadd.f32 %v10754_v46, %v6622_v18 }
0x2534   : > { %v6700_v11 = vmax.f32 %v10756_v57, 0.0  ;;  %v6701_v27 = vmax.f32 %v10766_v1, 0.0 }
0x2535   : > { %v6698_v63 = vmax.f32 %v10758_v17, 0.0  ;;  %v6699_v41 = vmax.f32 %v10761_v4, 0.0 }
0x2537   : > { %v8633_v59 = vpop.f32.mrb[100].mxu0  ;;  %8659 = vmatprep.mubr.msk.f32.mxu1 %vm6416_vm8, %v6698_v63 }
0x2538   : > { %v6635_v26 = vpop.f32.mrb[101].mxu0  ;;  %8660 = vmatmul.mubr.msk.f32.vlgmr.msra.gmra.mrb[82].mxu1 %vm6416_vm8, %v6699_v41  ;;  %v10784_v19 = vadd.f32 %v10754_v46, %v8633_v59 }
0x2539   : > { %v10776_v55 = vadd.f32 %v10754_v46, %v6635_v26  ;;  %v8634_v35 = vpop.f32.mrb[102].mxu0  ;;  %8662 = vmatprep.mubr.msk.f32.mxu1 %vm6416_vm8, %v6700_v11  ;;  %8986 = vmatpush3.bf16.msra.mxu1 %v8967_v61 }
0x253a   : > { %v6638_v39 = vpop.f32.mrb[103].mxu0  ;;  %8988 = vmatprep.subr.bf16.mxu1 %v10708_v54  ;;  %v10797_v53 = vadd.f32 %v10754_v46, %v8634_v35  ;;  %v6704_v3 = vmax.f32 %v10784_v19, 0.0 }
0x253b   : > { %v6702_v6 = vmax.f32 %v10776_v55, 0.0  ;;  %v10788_v37 = vadd.f32 %v10754_v46, %v6638_v39 }
0x253c   : > { %8663 = vmatmul.mubr.msk.f32.gmra.mrb[100].mxu1 %vm6416_vm8, %v6701_v27  ;;  %v6705_v33 = vmax.f32 %v10797_v53, 0.0 }
0x253d   : > { %v6703_v56 = vmax.f32 %v10788_v37, 0.0  ;;  %8665 = vmatprep.mubr.msk.f32.mxu1 %vm6416_vm8, %v6702_v6  ;;  %8990 = vmatpush3.bf16.msra.mxu1 %v10708_v54 }
0x253e   : > { %8992 = vmatprep.subr.bf16.mxu1 %v10717_v50 }
0x253f   : > { %v8637_v29 = vpop.f32.mrb[104].mxu0 }
0x2540   : > { %v6651_v62 = vpop.f32.mrb[105].mxu0  ;;  %8666 = vmatmul.mubr.msk.f32.gmra.mrb[102].mxu1 %vm6416_vm8, %v6703_v56  ;;  %v10811_v22 = vadd.f32 %v10754_v46, %v8637_v29 }
0x2541   : > { %v10803_v9 = vadd.f32 %v10754_v46, %v6651_v62  ;;  %v8638_v25 = vpop.f32.mrb[106].mxu0  ;;  %8668 = vmatprep.mubr.msk.f32.mxu1 %vm6416_vm8, %v6704_v3  ;;  %8994 = vmatpush3.bf16.msra.mxu1 %v10717_v50 }
0x2542   : > { %v6654_v24 = vpop.f32.mrb[107].mxu0  ;;  %8996 = vmatprep.subr.bf16.mxu1 %v8979_v8  ;;  %v9022_v61 = vadd.f32 %v10754_v46, %v8638_v25  ;;  %v6708_v32 = vmax.f32 %v10811_v22, 0.0 }
0x2543   : > { %v6706_v52 = vmax.f32 %v10803_v9, 0.0  ;;  %v9024_v0 = vadd.f32 %v10754_v46, %v6654_v24 }
0x2544   : > { %8669 = vmatmul.mubr.msk.f32.gmra.mrb[104].mxu1 %vm6416_vm8, %v6705_v33  ;;  %v6709_v15 = vmax.f32 %v9022_v61, 0.0 }
0x2545   : > { %v6707_v13 = vmax.f32 %v9024_v0, 0.0  ;;  %8671 = vmatprep.mubr.msk.f32.mxu1 %vm6416_vm8, %v6706_v52  ;;  %8998 = vmatpush3.bf16.msra.mxu1 %v8979_v8 }
0x2547   : > { %v8641_v54 = vpop.f32.mrb[108].mxu0 }
0x2548   : > { %v6667_v58 = vpop.f32.mrb[109].mxu0  ;;  %8672 = vmatmul.mubr.msk.f32.gmra.mrb[106].mxu1 %vm6416_vm8, %v6707_v13  ;;  %v10825_v10 = vadd.f32 %v10754_v46, %v8641_v54 }
0x2549   : > { %v10821_v36 = vadd.f32 %v10754_v46, %v6667_v58  ;;  %v8642_v50 = vpop.f32.mrb[110].mxu0  ;;  %8674 = vmatprep.mubr.msk.f32.mxu1 %vm6416_vm8, %v6708_v32 }
0x254a   : > { %v6670_v5 = vpop.f32.mrb[111].mxu0  ;;  %v9030_v49 = vadd.f32 %v10754_v46, %v8642_v50  ;;  %v6712_v40 = vmax.f32 %v10825_v10, 0.0 }
0x254b   : > { %v6710_v30 = vmax.f32 %v10821_v36, 0.0  ;;  %v9032_v2 = vadd.f32 %v10754_v46, %v6670_v5 }
0x254c   : > { %8675 = vmatmul.mubr.msk.f32.gmra.mrb[108].mxu1 %vm6416_vm8, %v6709_v15  ;;  %v6713_v16 = vmax.f32 %v9030_v49, 0.0 }
0x254d   : > { %v6711_v48 = vmax.f32 %v9032_v2, 0.0  ;;  %8677 = vmatprep.mubr.msk.f32.mxu1 %vm6416_vm8, %v6710_v30 }
0x2550   : > { %8678 = vmatmul.mubr.msk.f32.gmra.mrb[110].mxu1 %vm6416_vm8, %v6711_v48 }
0x2551   : > { %8680 = vmatprep.mubr.msk.f32.mxu1 %vm6416_vm8, %v6712_v40 }
0x2554   : > { %8681 = vmatmul.mubr.msk.f32.gmra.mrb[112].mxu1 %vm6416_vm8, %v6713_v16 }
0x260b   : > { %v8661_v38 = vpop.f32.mrb[82].mxu1 }
0x260c   : > { %v10838_v14 = vsub.f32 %v6699_v41, %v8661_v38  ;;  %v6836_v45 = vpop.f32.mrb[83].mxu1 }
0x260d   : > { %v10842_v47 = vsub.f32 %v6698_v63, %v6836_v45  ;;  %v10929_v45 = vld [vmem:[%s11068_s18] ss:$0 sm:$0xff] }
0x260e   : > { %v6932_v34 = vmul.f32 %v10838_v14, %v10838_v14 }
0x260f   : > { %v6931_v60 = vmul.f32 %v10842_v47, %v10842_v47  ;;  %v8664_v23 = vpop.f32.mrb[100].mxu1 }
0x2610   : > { %v10848_v20 = vsub.f32 %v6701_v27, %v8664_v23  ;;  %v6846_v12 = vpop.f32.mrb[101].mxu1 }
0x2611   : > { %v10852_v8 = vsub.f32 %v6700_v11, %v6846_v12  ;;  %8699 = vmatprep.mubr.msk.f32.mxu1 %vm6416_vm8, %v6931_v60 }
0x2612   : > { %8700 = vmatmul.mubr.msk.f32.vlgmr.msra.gmra.mrb[114].mxu1 %vm6416_vm8, %v6932_v34  ;;  %v6934_v31 = vmul.f32 %v10848_v20, %v10848_v20 }
0x2613   : > { %v6933_v28 = vmul.f32 %v10852_v8, %v10852_v8  ;;  %v8667_v7 = vpop.f32.mrb[102].mxu1 }
0x2614   : > { %v10860_v46 = vsub.f32 %v6703_v56, %v8667_v7  ;;  %v6856_v44 = vpop.f32.mrb[103].mxu1 }
0x2615   : > { %v10864_v42 = vsub.f32 %v6702_v6, %v6856_v44  ;;  %8702 = vmatprep.mubr.msk.f32.mxu1 %vm6416_vm8, %v6933_v28  ;;  %v10936_v28 = vld [vmem:[%s11069_s19] ss:$0 sm:$0xff] }
0x2616   : > { %8703 = vmatmul.mubr.msk.f32.gmra.mrb[116].mxu1 %vm6416_vm8, %v6934_v31  ;;  %v6936_v18 = vmul.f32 %v10860_v46, %v10860_v46 }
0x2617   : > { %v6935_v43 = vmul.f32 %v10864_v42, %v10864_v42  ;;  %v8670_v21 = vpop.f32.mrb[104].mxu1 }
0x2618   : > { %v10872_v57 = vsub.f32 %v6705_v33, %v8670_v21  ;;  %v6866_v17 = vpop.f32.mrb[105].mxu1 }
0x2619   : > { %v10876_v4 = vsub.f32 %v6704_v3, %v6866_v17  ;;  %8705 = vmatprep.mubr.msk.f32.mxu1 %vm6416_vm8, %v6935_v43 }
0x261a   : > { %8706 = vmatmul.mubr.msk.f32.gmra.mrb[118].mxu1 %vm6416_vm8, %v6936_v18  ;;  %v6938_v1 = vmul.f32 %v10872_v57, %v10872_v57 }
0x261b   : > { %v6937_v63 = vmul.f32 %v10876_v4, %v10876_v4  ;;  %v8673_v41 = vpop.f32.mrb[106].mxu1 }
0x261c   : > { %v10884_v11 = vsub.f32 %v6707_v13, %v8673_v41  ;;  %v6876_v59 = vpop.f32.mrb[107].mxu1 }
0x261d   : > { %v10886_v26 = vsub.f32 %v6706_v52, %v6876_v59  ;;  %8708 = vmatprep.mubr.msk.f32.mxu1 %vm6416_vm8, %v6937_v63 }
0x261e   : > { %8709 = vmatmul.mubr.msk.f32.gmra.mrb[120].mxu1 %vm6416_vm8, %v6938_v1  ;;  %v6940_v27 = vmul.f32 %v10884_v11, %v10884_v11 }
0x261f   : > { %v6939_v55 = vmul.f32 %v10886_v26, %v10886_v26  ;;  %v8676_v35 = vpop.f32.mrb[108].mxu1 }
0x2620   : > { %v10894_v39 = vsub.f32 %v6709_v15, %v8676_v35  ;;  %v6886_v19 = vpop.f32.mrb[109].mxu1 }
0x2621   : > { %v10896_v6 = vsub.f32 %v6708_v32, %v6886_v19  ;;  %8711 = vmatprep.mubr.msk.f32.mxu1 %vm6416_vm8, %v6939_v55 }
0x2622   : > { %8712 = vmatmul.mubr.msk.f32.gmra.mrb[122].mxu1 %vm6416_vm8, %v6940_v27  ;;  %v6942_v53 = vmul.f32 %v10894_v39, %v10894_v39 }
0x2623   : > { %v6941_v37 = vmul.f32 %v10896_v6, %v10896_v6  ;;  %v8679_v56 = vpop.f32.mrb[110].mxu1 }
0x2624   : > { %v10904_v3 = vsub.f32 %v6711_v48, %v8679_v56  ;;  %v6896_v29 = vpop.f32.mrb[111].mxu1 }
0x2625   : > { %v10906_v62 = vsub.f32 %v6710_v30, %v6896_v29  ;;  %8714 = vmatprep.mubr.msk.f32.mxu1 %vm6416_vm8, %v6941_v37 }
0x2626   : > { %8715 = vmatmul.mubr.msk.f32.gmra.mrb[124].mxu1 %vm6416_vm8, %v6942_v53  ;;  %v6944_v33 = vmul.f32 %v10904_v3, %v10904_v3 }
0x2627   : > { %v6943_v9 = vmul.f32 %v10906_v62, %v10906_v62  ;;  %v8682_v25 = vpop.f32.mrb[112].mxu1 }
0x2628   : > { %v10914_v24 = vsub.f32 %v6713_v16, %v8682_v25  ;;  %v6906_v22 = vpop.f32.mrb[113].mxu1 }
0x2629   : > { %v10916_v52 = vsub.f32 %v6712_v40, %v6906_v22  ;;  %8717 = vmatprep.mubr.msk.f32.mxu1 %vm6416_vm8, %v6943_v9 }
0x262a   : > { %8718 = vmatmul.mubr.msk.f32.gmra.mrb[126].mxu1 %vm6416_vm8, %v6944_v33  ;;  %v6946_v13 = vmul.f32 %v10914_v24, %v10914_v24 }
0x262b   : > { %v6945_v0 = vmul.f32 %v10916_v52, %v10916_v52 }
0x262d   : > { %8720 = vmatprep.mubr.msk.f32.mxu1 %vm6416_vm8, %v6945_v0 }
0x262e   : > { %8721 = vmatmul.mubr.msk.f32.gmra.mrb[128].mxu1 %vm6416_vm8, %v6946_v13 }
0x26e5   : > { %v8701_v61 = vpop.f32.mrb[114].mxu1 }
0x26e6   : > { %v7067_v32 = vadd.f32 1e-05, %v8701_v61  ;;  %v7061_v54 = vpop.f32.mrb[115].mxu1 }
0x26e7   : > { %v7062_v58 = vadd.f32 1e-05, %v7061_v54 }
0x26e8   : > { %9240 = vrsqrt.f32 %v7067_v32 }
0x26e9   : > { %9242 = vrsqrt.f32 %v7062_v58  ;;  %v8704_v36 = vpop.f32.mrb[116].mxu1 }
0x26ea   : > { %v7077_v50 = vadd.f32 1e-05, %v8704_v36  ;;  %v7071_v15 = vpop.f32.mrb[117].mxu1 }
0x26eb   : > { %v7072_v5 = vadd.f32 1e-05, %v7071_v15 }
0x26ec   : > { %9244 = vrsqrt.f32 %v7077_v50 }
0x26ed   : > { %9246 = vrsqrt.f32 %v7072_v5  ;;  %v8707_v10 = vpop.f32.mrb[118].mxu1 }
0x26ee   : > { %v7087_v30 = vadd.f32 1e-05, %v8707_v10  ;;  %v7081_v2 = vpop.f32.mrb[119].mxu1 }
0x26ef   : > { %v7082_v48 = vadd.f32 1e-05, %v7081_v2 }
0x26f0   : > { %9248 = vrsqrt.f32 %v7087_v30 }
0x26f1   : > { %9250 = vrsqrt.f32 %v7082_v48  ;;  %v8710_v49 = vpop.f32.mrb[120].mxu1 }
0x26f2   : > { %v9241_v40 = vpop.eup %9240  ;;  %v7097_v16 = vadd.f32 1e-05, %v8710_v49  ;;  %v7091_v38 = vpop.f32.mrb[121].mxu1 }
0x26f3   : > { %v9243_v60 = vpop.eup %9242  ;;  %v7092_v23 = vadd.f32 1e-05, %v7091_v38  ;;  %v7157_v34 = vmul.f32 %v9241_v40, %v10838_v14 }
0x26f4   : > { %9252 = vrsqrt.f32 %v7097_v16  ;;  %v7156_v12 = vmul.f32 %v9243_v60, %v10842_v47 }
0x26f5   : > { %9254 = vrsqrt.f32 %v7092_v23  ;;  %v8713_v7 = vpop.f32.mrb[122].mxu1  ;;  %v7180_v31 = vmul.f32 %v10929_v45, %v7157_v34 }
0x26f6   : > { %v9245_v44 = vpop.eup %9244  ;;  %v7107_v43 = vadd.f32 1e-05, %v8713_v7  ;;  %v7101_v21 = vpop.f32.mrb[123].mxu1  ;;  %v7179_v18 = vmul.f32 %v10929_v45, %v7156_v12 }
0x26f7   : > { %v9247_v17 = vpop.eup %9246  ;;  %v7102_v63 = vadd.f32 1e-05, %v7101_v21  ;;  %v7203_v14 = vadd.f32 %v10936_v28, %v7180_v31  ;;  %v7159_v47 = vmul.f32 %v9245_v44, %v10848_v20 }
0x26f8   : > { %9256 = vrsqrt.f32 %v7107_v43  ;;  %v7202_v41 = vadd.f32 %v10936_v28, %v7179_v18  ;;  %v7158_v1 = vmul.f32 %v9247_v17, %v10852_v8 }
0x26f9   : > { %9258 = vrsqrt.f32 %v7102_v63  ;;  %v8716_v59 = vpop.f32.mrb[124].mxu1  ;;  %v7182_v55 = vmul.f32 %v10929_v45, %v7159_v47 }
0x26fa   : > { %v9249_v35 = vpop.eup %9248  ;;  %v7117_v27 = vadd.f32 1e-05, %v8716_v59  ;;  %v7111_v19 = vpop.f32.mrb[125].mxu1  ;;  %v7219_v37 = vpack.c.bf16 %v7203_v14, %v7202_v41  ;;  %v7181_v56 = vmul.f32 %v10929_v45, %v7158_v1 }
0x26fb   : > { %v9251_v53 = vpop.eup %9250  ;;  %v7112_v29 = vadd.f32 1e-05, %v7111_v19  ;;  %v7205_v9 = vadd.f32 %v10936_v28, %v7182_v55  ;;  %v7161_v20 = vmul.f32 %v9249_v35, %v10860_v46 }
0x26fc   : > { %9260 = vrsqrt.f32 %v7117_v27  ;;  %v7237_v25 = vsel %vm6416_vm8, %v7219_v37, 0  ;;  %v7204_v8 = vadd.f32 %v10936_v28, %v7181_v56  ;;  %v7160_v33 = vmul.f32 %v9251_v53, %v10864_v42 }
0x26fd   : > { %9262 = vrsqrt.f32 %v7112_v29  ;;  %v8719_v22 = vpop.f32.mrb[126].mxu1  ;;  %8724 = vmatpush3.bf16.xpose.msra.mxu0 %v7237_v25  ;;  %v7184_v0 = vmul.f32 %v10929_v45, %v7161_v20 }
0x26fe   : > { %v9253_v13 = vpop.eup %9252  ;;  %v7127_v61 = vadd.f32 1e-05, %v8719_v22  ;;  %v7121_v32 = vpop.f32.mrb[127].mxu1  ;;  %8725 = vmatprep.subr.bf16.mxu0 %v11143_v51  ;;  %v7220_v54 = vpack.c.bf16 %v7205_v9, %v7204_v8  ;;  %v7183_v46 = vmul.f32 %v10929_v45, %v7160_v33 }
0x26ff   : > { %v9255_v58 = vpop.eup %9254  ;;  %v7122_v36 = vadd.f32 1e-05, %v7121_v32  ;;  %v7207_v50 = vadd.f32 %v10936_v28, %v7184_v0  ;;  %v7163_v15 = vmul.f32 %v9253_v13, %v10872_v57  ;;  %v7231_v32 = vpop.permute.xlu0 %7230 }
0x2700   : > { %9264 = vrsqrt.f32 %v7127_v61  ;;  %v7206_v42 = vadd.f32 %v10936_v28, %v7183_v46  ;;  %v7162_v5 = vmul.f32 %v9255_v58, %v10876_v4  ;;  %v7240_v34 = vsel %vm6416_vm8, %v7220_v54, 0  ;;  %v7218_v61 = vld [vmem:[%s11070_s20] sm:$0x3] }
0x2701   : > { %9266 = vrsqrt.f32 %v7122_v36  ;;  %v8722_v10 = vpop.f32.mrb[128].mxu1  ;;  %v7186_v30 = vmul.f32 %v10929_v45, %v7163_v15 }
0x2702   : > { %v9257_v2 = vpop.eup %9256  ;;  %v7137_v48 = vadd.f32 1e-05, %v8722_v10  ;;  %v7131_v49 = vpop.f32.mrb[129].mxu1  ;;  %v7221_v40 = vpack.c.bf16 %v7207_v50, %v7206_v42  ;;  %v7185_v16 = vmul.f32 %v10929_v45, %v7162_v5 }
0x2703   : > { %v9259_v38 = vpop.eup %9258  ;;  %v7132_v60 = vadd.f32 1e-05, %v7131_v49  ;;  %v7209_v23 = vadd.f32 %v10936_v28, %v7186_v30  ;;  %v7165_v57 = vmul.f32 %v9257_v2, %v10884_v11 }
0x2704   : > { %9268 = vrsqrt.f32 %v7137_v48  ;;  %v7208_v4 = vadd.f32 %v10936_v28, %v7185_v16  ;;  %v7164_v12 = vmul.f32 %v9259_v38, %v10886_v26  ;;  %v7243_v35 = vsel %vm6416_vm8, %v7221_v40, 0 }
0x2705   : > { %9270 = vrsqrt.f32 %v7132_v60  ;;  %8726 = vmatpush3.bf16.xpose.msra.mxu0 %v7240_v34  ;;  %v7188_v7 = vmul.f32 %v10929_v45, %v7165_v57 }
0x2706   : > { %v9261_v31 = vpop.eup %9260  ;;  %8727 = vmatprep.subr.bf16.mxu0 %v11143_v51  ;;  %v7222_v44 = vpack.c.bf16 %v7209_v23, %v7208_v4  ;;  %v7187_v43 = vmul.f32 %v10929_v45, %v7164_v12 }
0x2707   : > { %v9263_v21 = vpop.eup %9262  ;;  %v7211_v11 = vadd.f32 %v10936_v28, %v7188_v7  ;;  %v7167_v18 = vmul.f32 %v9261_v31, %v10894_v39 }
0x2708   : > { %v7210_v17 = vadd.f32 %v10936_v28, %v7187_v43  ;;  %v7166_v63 = vmul.f32 %v9263_v21, %v10896_v6  ;;  %v7246_v22 = vsel %vm6416_vm8, %v7222_v44, 0 }
0x2709   : > { %v7190_v26 = vmul.f32 %v10929_v45, %v7167_v18 }
0x270a   : > { %v9265_v14 = vpop.eup %9264  ;;  %v7223_v47 = vpack.c.bf16 %v7211_v11, %v7210_v17  ;;  %v7189_v41 = vmul.f32 %v10929_v45, %v7166_v63 }
0x270b   : > { %v9267_v1 = vpop.eup %9266  ;;  %v7213_v59 = vadd.f32 %v10936_v28, %v7190_v26  ;;  %v7169_v55 = vmul.f32 %v9265_v14, %v10904_v3 }
0x270c   : > { %v7212_v27 = vadd.f32 %v10936_v28, %v7189_v41  ;;  %v7168_v39 = vmul.f32 %v9267_v1, %v10906_v62 }
0x270d   : > { %8728 = vmatpush3.bf16.xpose.msra.mxu0 %v7243_v35  ;;  %v7192_v6 = vmul.f32 %v10929_v45, %v7169_v55 }
0x270e   : > { %v9269_v19 = vpop.eup %9268  ;;  %8729 = vmatprep.subr.bf16.mxu0 %v11143_v51  ;;  %v7224_v37 = vpack.c.bf16 %v7213_v59, %v7212_v27  ;;  %v7191_v56 = vmul.f32 %v10929_v45, %v7168_v39 }
0x270f   : > { %v9271_v53 = vpop.eup %9270  ;;  %v7215_v29 = vadd.f32 %v10936_v28, %v7192_v6  ;;  %v7171_v3 = vmul.f32 %v9269_v19, %v10914_v24 }
0x2710   : > { %v7170_v9 = vmul.f32 %v9271_v53, %v10916_v52  ;;  %v7214_v20 = vadd.f32 %v10936_v28, %v7191_v56  ;;  %v7249_v52 = vsel %vm6416_vm8, %v7223_v47, 0  ;;  %v7252_v13 = vsel %vm6416_vm8, %v7224_v37, 0 }
0x2711   : > { %v7194_v62 = vmul.f32 %v10929_v45, %v7171_v3 }
0x2712   : > { %v7225_v25 = vpack.c.bf16 %v7215_v29, %v7214_v20  ;;  %v7193_v8 = vmul.f32 %v10929_v45, %v7170_v9 }
0x2713   : > { %v7217_v33 = vadd.f32 %v10936_v28, %v7194_v62 }
0x2714   : > { %v7216_v0 = vadd.f32 %v10936_v28, %v7193_v8  ;;  %v7255_v45 = vsel %vm6416_vm8, %v7225_v25, 0 }
0x2715   : > { %8730 = vmatpush3.bf16.xpose.msra.mxu0 %v7246_v22 }
0x2716   : > { %8731 = vmatprep.subr.bf16.mxu0 %v11143_v51  ;;  %v7226_v24 = vpack.c.bf16 %v7217_v33, %v7216_v0 }
0x2718   : > { %v7258_v28 = vsel %vm6416_vm8, %v7226_v24, 0 }
0x271d   : > { %8732 = vmatpush3.bf16.xpose.msra.mxu0 %v7249_v52 }
0x271e   : > { %8733 = vmatprep.subr.bf16.mxu0 %v11143_v51 }
0x2725   : > { %8734 = vmatpush3.bf16.xpose.msra.mxu0 %v7252_v13 }
0x2726   : > { %8735 = vmatprep.subr.bf16.mxu0 %v11143_v51 }
0x272d   : > { %8736 = vmatpush3.bf16.xpose.msra.mxu0 %v7255_v45 }
0x272e   : > { %8737 = vmatprep.subr.bf16.mxu0 %v11143_v51 }
0x2735   : > { %8738 = vmatpush3.bf16.xpose.msra.mxu0 %v7258_v28 }
0x273c   : > { %8740 = vmatmul.mubr.msk.bf16.vlgmr.msra.gmra.mrb[112].mxu0 %vm6416_vm8, %v7218_v61 }
0x280f   : > { %v7294_v54 = vpop.f32.mrb[112].mxu0 }
0x2810   : > { %v7295_v46 = vadd.f32 %v7294_v54, %v7231_v32  ;;  %v8741_v58 = vpop.f32.mrb[113].mxu0 }
0x2811   : > { %v7297_v51 = vpop.f32.mrb[114].mxu0 }
0x2812   : > { %7300 = vst [vmem:[%s677_s8] sm:$0xf] %v7295_v46  ;;  %v8742_v36 = vpop.f32.mrb[115].mxu0 }
0x2813   : > { %9307 = shalt.err (!%p9304_p3)
}
0x2814   : > { %s9308_s2 = scalar_lea.hbm %s11008_s9, 64  ;;  %s9312_s7 = scalar_lea.hbm %s11072_s22, 128 }
0x2815   : > { %p9309_p4 = scmp.ne.s32.totalorder %s11008_s9, %s9308_s2  ;;  %p9313_p9 = scmp.lt.u32.totalorder %s11008_s9, %s11072_s22 }
0x2816   : > { %p9314_p10 = scmp.lt.u32.totalorder %s9312_s7, %s9308_s2  ;;  %p9316_p12 = scmp.lt.u32.totalorder %s9308_s2, %s11008_s9 }
0x2817   : > { %p9310_p7 = pnand %p9309_p4, %p9518_p5 }
0x2818   : > { %p9315_p11 = por %p9314_p10, %p9313_p9 }
0x2819   : > { %p9311_p8 = pneg %p9310_p7 }
0x281a   : > { %p9317_p13 = por %p9316_p12, %p9315_p11 }
0x281c   : > { %p9318_p0 = pnand %p9317_p13, %p9311_p8 }
0x281e   : > { %9321 = shalt.err (!%p9318_p0)
}
0x281f   : > { %9049 = dma.vmem_to_hbm [thread:$0]  (%p9518_p5), %s11010_s3, 64, %s11008_s9, %s7302_s4  }
0x2820 PF: > { %s11189_s1 = sld [smem:[#allocation6_spill]]  ;;  %p9055_p1 = scmp.ge.s32.totalorder %s9356_s30, 2 }
0x2822   : > { %p9052_p2 = pnand %p9055_p1, %p9522_p6 }
0x2826   : > { %s7327_s29 = sand.u32 1, %s11189_s1  }
0x2827   : > { %s7328_s8 = scalar_lea.sflag [#allocation4], %s7327_s29 }
0x2828   : > { %9339 = dma.done.wait (!%p9052_p2), %s7328_s8, 64  }
0x2829   : > { %9341 = vsyncadd (!%p9052_p2), %s7328_s8, 4294967232  ;;  %s11191_s30 = sld [smem:[#allocation8_spill]]  ;;  %s11192_s2 = sld [smem:[#allocation7_spill]] }
0x282a   : > { %s11193_s29 = sld [smem:[#allocation9_spill]]  ;;  %s11194_s3 = smov %s9348_s28 }
0x282f   : > { %p32_p3 = scmp.ge.s32.totalorder %s11191_s30, 4   ;;  %s11195_s28 = smov %s11192_s2 }
0x2831   :  { %34 = sbr.rel (!%p32_p3) target bundleno = 14 (0xe), region = 145 }
0x2838   :  { %7333 = vsyncpa [#allocation4], 1 }
0x2839   :  { %7335 = vsyncpa [#allocation4 + $0x1], 1 }

</bundles_post_ra>
